<compile_context>
chip_gen: v7x
topology: tpu7x:2x2x1
jax: 0.10.0
libtpu: 0.0.40
codegen_flags: <defaults>
</compile_context>

<pallas_src>
import functools
import math

import numpy as np
import jax
import jax.numpy as jnp
from jax.experimental import pallas as pl
from jax.experimental.pallas import tpu as pltpu

# ---------------------------------------------------------------------------
# Tiling configuration
# ---------------------------------------------------------------------------
_TM = 512            # flattened output-row tile (multiple of 8)
_TN = 256            # output-channel tile (multiple of 128; MXU-native on v6e/v7x)
_TK = 512            # contraction (taps*Cin) tile (multiple of 128)
_VMEM_LIMIT = 48 * 1024 * 1024   # safe on v7x (64 MiB physical VMEM), plenty on v5e/v6e
_BN_EPS = 1e-5


def _round_up(x, m):
    return ((x + m - 1) // m) * m


def _plan_rows(d, max_tile=_TM):
    """(padded_dim, tile) for a second-minor (sublane) dimension."""
    if d <= max_tile:
        dp = _round_up(d, 8)
        return dp, dp
    dp = _round_up(d, max_tile)
    return dp, max_tile


def _plan_lanes(d, max_tile):
    """(padded_dim, tile) for a minor (lane) dimension; tile is a multiple of 128."""
    dp = _round_up(d, 128)
    if dp <= max_tile:
        return dp, dp
    for t in range(max_tile, 0, -128):
        if dp % t == 0:
            return dp, t
    return dp, 128  # unreachable: 128 always divides dp


def _compiler_params(dim_sem):
    return pltpu.CompilerParams(dimension_semantics=dim_sem,
                                vmem_limit_bytes=_VMEM_LIMIT)


# ---------------------------------------------------------------------------
# Pallas kernels
# ---------------------------------------------------------------------------

def _fused_matmul_kernel(*refs, relu, has_affine, has_res):
    """Tiled matmul with a K-reduction grid axis and fused epilogue:
         out = [relu]( acc * scale + shift [+ residual] )
       acc is kept in an f32 VMEM scratch across the K axis."""
    a_ref, b_ref = refs[0], refs[1]
    i = 2
    scale_ref = shift_ref = res_ref = None
    if has_affine:
        scale_ref, shift_ref = refs[i], refs[i + 1]
        i += 2
    if has_res:
        res_ref = refs[i]
        i += 1
    o_ref, acc_ref = refs[i], refs[i + 1]

    k = pl.program_id(2)

    @pl.when(k == 0)
    def _():
        acc_ref[...] = jnp.zeros_like(acc_ref)

    acc_ref[...] += jnp.dot(a_ref[...], b_ref[...],
                            preferred_element_type=jnp.float32)

    @pl.when(k == pl.num_programs(2) - 1)
    def _():
        out = acc_ref[...]
        if has_affine:
            out = out * scale_ref[...] + shift_ref[...]
        if has_res:
            out = out + res_ref[...].astype(jnp.float32)
        if relu:
            out = jnp.maximum(out, 0.0)
        o_ref[...] = out.astype(o_ref.dtype)


def _maxreduce_kernel(x_ref, o_ref):
    """Max over the leading 'tap' axis of a (T, tm, tc) block (pure VPU work)."""
    o_ref[...] = jnp.max(x_ref[...], axis=0)


# ---------------------------------------------------------------------------
# pallas_call wrappers (padding / im2col / reshapes are plain-JAX glue)
# ---------------------------------------------------------------------------

def _fused_matmul(a, b, scale=None, shift=None, *, residual=None, relu=False,
                  out_dtype=jnp.float32):
    """C[M,N] = epilogue(A[M,K] @ B[K,N]); tiled grid, K innermost reduction."""
    M, K = a.shape
    K2, Nc = b.shape
    assert K == K2
    has_affine = scale is not None

    Mp, tm = _plan_rows(M, _TM)
    Kp, tk = _plan_lanes(K, _TK)
    Np, tn = _plan_lanes(Nc, _TN)

    a = jnp.pad(a, ((0, Mp - M), (0, Kp - K)))
    b = jnp.pad(b, ((0, Kp - K), (0, Np - Nc)))

    args = [a, b]
    in_specs = [
        pl.BlockSpec((tm, tk), lambda i, j, k: (i, k)),
        pl.BlockSpec((tk, tn), lambda i, j, k: (k, j)),
    ]
    if has_affine:
        sc = jnp.pad(scale.astype(jnp.float32).reshape(1, Nc), ((0, 0), (0, Np - Nc)))
        sh = jnp.pad(shift.astype(jnp.float32).reshape(1, Nc), ((0, 0), (0, Np - Nc)))
        args += [sc, sh]
        in_specs += [pl.BlockSpec((1, tn), lambda i, j, k: (0, j)),
                     pl.BlockSpec((1, tn), lambda i, j, k: (0, j))]
    if residual is not None:
        rp = jnp.pad(residual, ((0, Mp - M), (0, Np - Nc)))
        args.append(rp)
        in_specs.append(pl.BlockSpec((tm, tn), lambda i, j, k: (i, j)))

    kern = functools.partial(_fused_matmul_kernel, relu=relu,
                             has_affine=has_affine, has_res=residual is not None)
    out = pl.pallas_call(
        kern,
        out_shape=jax.ShapeDtypeStruct((Mp, Np), out_dtype),
        grid=(Mp // tm, Np // tn, Kp // tk),
        in_specs=in_specs,
        out_specs=pl.BlockSpec((tm, tn), lambda i, j, k: (i, j)),
        scratch_shapes=[pltpu.VMEM((tm, tn), jnp.float32)],
        compiler_params=_compiler_params(("parallel", "parallel", "arbitrary")),
    )(*args)
    return out[:M, :Nc]


def _im2col(xp, KH, KW, stride, dilation, Ho, Wo):
    """(N,Hp,Wp,Cin) padded input -> (N,Ho,Wo,KH*KW*Cin); stride/dilation folded."""
    N, _, _, Cin = xp.shape
    slices = []
    for kh in range(KH):
        for kw in range(KW):
            h0, w0 = kh * dilation, kw * dilation
            slices.append(jax.lax.slice(
                xp, (0, h0, w0, 0),
                (N, h0 + (Ho - 1) * stride + 1, w0 + (Wo - 1) * stride + 1, Cin),
                (1, stride, stride, 1)))
    if len(slices) == 1:
        return slices[0]
    return jnp.concatenate(slices, axis=-1)


def conv_bn_act(x, w, scale, shift, *, stride, padding, dilation, relu,
                residual=None, out_dtype=None):
    """nn.Conv2d(bias=False) + folded BatchNorm + optional residual + optional ReLU."""
    N, H, W, Cin = x.shape
    KH, KW, _, Cout = w.shape
    Ho = (H + 2 * padding - dilation * (KH - 1) - 1) // stride + 1
    Wo = (W + 2 * padding - dilation * (KW - 1) - 1) // stride + 1
    xp = jnp.pad(x, ((0, 0), (padding, padding), (padding, padding), (0, 0))) if padding else x
    a = _im2col(xp, KH, KW, stride, dilation, Ho, Wo).reshape(N * Ho * Wo, KH * KW * Cin)
    b = w.reshape(KH * KW * Cin, Cout)
    res = residual.reshape(N * Ho * Wo, Cout) if residual is not None else None
    out = _fused_matmul(a, b, scale, shift, residual=res, relu=relu,
                        out_dtype=out_dtype or x.dtype)
    return out.reshape(N, Ho, Wo, Cout)


def max_pool2d_ceil(x, kernel=3, stride=2, padding=1):
    """Matches nn.MaxPool2d(kernel, stride, padding, ceil_mode=True)."""
    N, H, W, C = x.shape

    def out_size(sz):
        o = math.ceil((sz + 2 * padding - kernel) / stride) + 1
        if (o - 1) * stride >= sz + padding:   # PyTorch: drop window starting in padding
            o -= 1
        return o

    Ho, Wo = out_size(H), out_size(W)
    extra_h = max(0, (Ho - 1) * stride + kernel - (H + 2 * padding))
    extra_w = max(0, (Wo - 1) * stride + kernel - (W + 2 * padding))
    xp = jnp.pad(x, ((0, 0), (padding, padding + extra_h),
                     (padding, padding + extra_w), (0, 0)),
                 constant_values=-jnp.inf)

    taps = []
    for kh in range(kernel):
        for kw in range(kernel):
            taps.append(jax.lax.slice(
                xp, (0, kh, kw, 0),
                (N, kh + (Ho - 1) * stride + 1, kw + (Wo - 1) * stride + 1, C),
                (1, stride, stride, 1)))
    T = kernel * kernel
    M = N * Ho * Wo
    t = jnp.stack(taps, axis=0).reshape(T, M, C)

    Mp, tm = _plan_rows(M, _TM)
    Cp, tc = _plan_lanes(C, _TN)
    t = jnp.pad(t, ((0, 0), (0, Mp - M), (0, Cp - C)))

    out = pl.pallas_call(
        _maxreduce_kernel,
        out_shape=jax.ShapeDtypeStruct((Mp, Cp), x.dtype),
        grid=(Mp // tm, Cp // tc),
        in_specs=[pl.BlockSpec((T, tm, tc), lambda i, j: (0, i, j))],
        out_specs=pl.BlockSpec((tm, tc), lambda i, j: (i, j)),
        compiler_params=_compiler_params(("parallel", "parallel")),
    )(t)
    return out[:M, :C].reshape(N, Ho, Wo, C)


def _linear_interp_matrix(out_size, in_size):
    """Row weights for F.interpolate(mode='bilinear', align_corners=False)."""
    scale = in_size / out_size
    dst = np.arange(out_size, dtype=np.float64)
    src = np.maximum((dst + 0.5) * scale - 0.5, 0.0)
    i0 = np.minimum(np.floor(src).astype(np.int64), in_size - 1)
    lam = src - i0
    i1 = np.minimum(i0 + 1, in_size - 1)
    A = np.zeros((out_size, in_size), dtype=np.float32)
    A[np.arange(out_size), i0] += (1.0 - lam).astype(np.float32)
    A[np.arange(out_size), i1] += lam.astype(np.float32)
    return A


def bilinear_resize(x, Hout, Wout):
    """F.interpolate(x, (Hout, Wout), mode='bilinear', align_corners=False) on NHWC."""
    N, Hi, Wi, C = x.shape
    xf = x.astype(jnp.float32)
    Ah = jnp.asarray(_linear_interp_matrix(Hout, Hi))
    Aw = jnp.asarray(_linear_interp_matrix(Wout, Wi))
    xt = jnp.transpose(xf, (1, 0, 2, 3)).reshape(Hi, N * Wi * C)
    y = _fused_matmul(Ah, xt, out_dtype=jnp.float32)                         # (Hout, N*Wi*C)
    y = jnp.transpose(y.reshape(Hout, N, Wi, C), (2, 1, 0, 3)).reshape(Wi, N * Hout * C)
    z = _fused_matmul(Aw, y, out_dtype=jnp.float32)                          # (Wout, N*Hout*C)
    return jnp.transpose(z.reshape(Wout, N, Hout, C), (1, 2, 0, 3))          # (N,Hout,Wout,C)


# ---------------------------------------------------------------------------
# Deterministic parameter construction (mirrors DeepLabV2.__init__ shapes)
# ---------------------------------------------------------------------------

def _init_conv_bn(key, kh, kw, cin, cout):
    w = (jax.random.normal(key, (kh, kw, cin, cout), jnp.float32) * 0.01).astype(jnp.bfloat16)
    # eval-mode BN folded: gamma=1, beta=0, running_mean=0, running_var=1
    scale = jnp.full((cout,), 1.0 / np.sqrt(1.0 + _BN_EPS), jnp.float32)
    shift = jnp.zeros((cout,), jnp.float32)
    return {"w": w, "scale": scale, "shift": shift}


def _init_bottleneck(key, in_ch, out_ch, downsample):
    mid = out_ch // 4
    ks = jax.random.split(key, 4)
    p = {
        "reduce": _init_conv_bn(ks[0], 1, 1, in_ch, mid),
        "conv3x3": _init_conv_bn(ks[1], 3, 3, mid, mid),
        "increase": _init_conv_bn(ks[2], 1, 1, mid, out_ch),
    }
    if downsample:
        p["shortcut"] = _init_conv_bn(ks[3], 1, 1, in_ch, out_ch)
    return p


def _init_res_layer(key, n_layers, in_ch, out_ch):
    ks = jax.random.split(key, n_layers)
    return [_init_bottleneck(ks[i], in_ch if i == 0 else out_ch, out_ch, i == 0)
            for i in range(n_layers)]


def _init_aspp(key, in_ch, num_classes, rates):
    ks = jax.random.split(key, len(rates))
    ws = [(jax.random.normal(k, (3, 3, in_ch, num_classes), jnp.float32) * 0.01
           ).astype(jnp.bfloat16) for k in ks]
    bs = [jnp.zeros((num_classes,), jnp.float32) for _ in rates]  # nn.init.constant_(bias,0)
    return {"ws": ws, "bs": bs}   # rates are static config, NOT traced params


def init_deeplab_v2(key, num_classes, num_blocks, atrous_rates):
    channels = [64 * 2 ** p for p in range(6)]
    ks = jax.random.split(key, 6)
    return {
        "stem": _init_conv_bn(ks[0], 7, 7, 3, channels[0]),
        "layer1": _init_res_layer(ks[1], num_blocks[0], channels[0], channels[2]),
        "layer2": _init_res_layer(ks[2], num_blocks[1], channels[2], channels[3]),
        "layer3": _init_res_layer(ks[3], num_blocks[2], channels[3], channels[4]),
        "layer4": _init_res_layer(ks[4], num_blocks[3], channels[4], channels[5]),
        "aspp": _init_aspp(ks[5], channels[5], num_classes, atrous_rates),
    }


# ---------------------------------------------------------------------------
# Forward pass
# ---------------------------------------------------------------------------

def _bottleneck_fwd(x, p, stride, dilation, downsample):
    if downsample:
        sc = conv_bn_act(x, **p["shortcut"], stride=stride, padding=0, dilation=1, relu=False)
    else:
        sc = x
    h = conv_bn_act(x, **p["reduce"], stride=stride, padding=0, dilation=1, relu=True)
    h = conv_bn_act(h, **p["conv3x3"], stride=1, padding=dilation, dilation=dilation, relu=True)
    # increase conv fuses the residual add and the final ReLU inside the matmul epilogue
    h = conv_bn_act(h, **p["increase"], stride=1, padding=0, dilation=1, relu=True, residual=sc)
    return h


def _res_layer_fwd(x, layer_params, stride, dilation):
    for i, p in enumerate(layer_params):
        x = _bottleneck_fwd(x, p, stride if i == 0 else 1, dilation, i == 0)
    return x


def _stem_fwd(x, p):
    x = conv_bn_act(x, **p, stride=2, padding=3, dilation=1, relu=True)
    return max_pool2d_ceil(x, kernel=3, stride=2, padding=1)


def _aspp_fwd(x, p, rates):
    """Sum of parallel dilated 3x3 convs, fused into a single wide-K matmul."""
    N, H, W, Cin = x.shape
    cols, ws = [], []
    for w, r in zip(p["ws"], rates):
        xp = jnp.pad(x, ((0, 0), (r, r), (r, r), (0, 0)))
        cols.append(_im2col(xp, 3, 3, 1, r, H, W).reshape(N * H * W, 9 * Cin))
        ws.append(w.reshape(9 * Cin, -1))
    a = jnp.concatenate(cols, axis=-1)          # (M, len(rates)*9*Cin)
    b = jnp.concatenate(ws, axis=0)             # (len(rates)*9*Cin, num_classes)
    shift = sum(p["bs"])                        # sum of per-branch biases
    scale = jnp.ones_like(shift)
    out = _fused_matmul(a, b, scale, shift, relu=False, out_dtype=jnp.float32)
    return out.reshape(N, H, W, -1)


def deeplab_v2_forward(params, x_nchw, *, atrous_rates):
    """x_nchw: (N, 3, H, W) float32 -> (N, num_classes, H, W) float32."""
    N, C, H, W = x_nchw.shape
    x = jnp.transpose(x_nchw, (0, 2, 3, 1)).astype(jnp.bfloat16)   # NCHW -> NHWC, bf16
    x = _stem_fwd(x, params["stem"])
    x = _res_layer_fwd(x, params["layer1"], stride=1, dilation=1)
    x = _res_layer_fwd(x, params["layer2"], stride=2, dilation=1)
    x = _res_layer_fwd(x, params["layer3"], stride=1, dilation=2)
    x = _res_layer_fwd(x, params["layer4"], stride=1, dilation=4)
    x = _aspp_fwd(x, params["aspp"], atrous_rates)
    x = bilinear_resize(x, H, W)                                   # align_corners=False
    return jnp.transpose(x, (0, 3, 1, 2))                          # NHWC -> NCHW


# ---------------------------------------------------------------------------

if __name__ == "__main__":
    num_classes = 4
    num_blocks = (1, 1, 1, 1)
    atrous_rates = (1, 2)

    key = jax.random.PRNGKey(0)
    pkey, xkey = jax.random.split(key)
    params = init_deeplab_v2(pkey, num_classes, num_blocks, atrous_rates)

    x = jax.random.normal(xkey, (2, 3, 16, 16), jnp.float32)       # NCHW, like PyTorch

    fwd = jax.jit(functools.partial(deeplab_v2_forward, atrous_rates=atrous_rates))
    out = jax.block_until_ready(fwd(params, x))

    assert out.shape == (2, num_classes, 16, 16), out.shape
    assert bool(jnp.all(jnp.isfinite(out)))
    print("KERNEL_OK")
</pallas_src>

<mosaic_0001>
module attributes {stable_mosaic.version = 11 : i64} {
  func.func @_fused_matmul_kernel(%arg0: i32, %arg1: i32, %arg2: i32, %arg3: memref<128x256xbf16, #tpu.memory_space<vmem>>, %arg4: memref<256x128xbf16, #tpu.memory_space<vmem>>, %arg5: memref<1x128xf32, #tpu.memory_space<vmem>>, %arg6: memref<1x128xf32, #tpu.memory_space<vmem>>, %arg7: memref<128x128xbf16, #tpu.memory_space<vmem>>, %arg8: memref<128x128xf32, #tpu.memory_space<vmem>>) attributes {dimension_semantics = [#tpu.dimension_semantics<parallel>, #tpu.dimension_semantics<parallel>, #tpu.dimension_semantics<arbitrary>], iteration_bounds = array<i64: 1, 1, 1>, scalar_prefetch = 0 : i64, scratch_operands = 1 : i64, tpu.core_type = #tpu.core_type<tc>, window_params = [{transform_indices = @transform_0, window_bounds = array<i64: 128, 256>}, {transform_indices = @transform_1, window_bounds = array<i64: 256, 128>}, {transform_indices = @transform_2, window_bounds = array<i64: 1, 128>}, {transform_indices = @transform_3, window_bounds = array<i64: 1, 128>}, {transform_indices = @transform_4, window_bounds = array<i64: 128, 128>}]} {
    %c0_i32 = arith.constant 0 : i32
    %0 = arith.cmpi eq, %arg2, %c0_i32 : i32
    %1 = arith.extui %0 : i1 to i32
    %c0_i32_0 = arith.constant 0 : i32
    %2 = arith.cmpi ne, %1, %c0_i32_0 : i32
    scf.if %2 {
      %cst_10 = arith.constant 0.000000e+00 : f32
      %12 = vector.broadcast %cst_10 : f32 to vector<128x128xf32>
      %c0_11 = arith.constant 0 : index
      %c0_12 = arith.constant 0 : index
      %13 = vector.load %arg8[%c0_11, %c0_12] : memref<128x128xf32, #tpu.memory_space<vmem>>, vector<128x128xf32>
      tpu.vector_store %arg8[%c0_11, %c0_12], %12 {strides = array<i32>} : memref<128x128xf32, #tpu.memory_space<vmem>>, vector<128x128xf32>,
    } else {
    }
    %c0 = arith.constant 0 : index
    %c0_1 = arith.constant 0 : index
    %3 = vector.load %arg8[%c0, %c0_1] : memref<128x128xf32, #tpu.memory_space<vmem>>, vector<128x128xf32>
    %c0_2 = arith.constant 0 : index
    %c0_3 = arith.constant 0 : index
    %4 = vector.load %arg3[%c0_2, %c0_3] : memref<128x256xbf16, #tpu.memory_space<vmem>>, vector<128x256xbf16>
    %c0_4 = arith.constant 0 : index
    %c0_5 = arith.constant 0 : index
    %5 = vector.load %arg4[%c0_4, %c0_5] : memref<256x128xbf16, #tpu.memory_space<vmem>>, vector<256x128xbf16>
    %cst = arith.constant dense<0.000000e+00> : vector<128x128xf32>
    %6 = tpu.matmul %4, %5, %cst {dimension_numbers = #tpu.dot_dimension_numbers<[1], [0], [0], [1], [0, 0, 1, 1], [], []>} : vector<128x256xbf16>, vector<256x128xbf16>, vector<128x128xf32> -> vector<128x128xf32>
    %7 = arith.addf %3, %6 : vector<128x128xf32>
    %c0_6 = arith.constant 0 : index
    %c0_7 = arith.constant 0 : index
    %8 = vector.load %arg8[%c0_6, %c0_7] : memref<128x128xf32, #tpu.memory_space<vmem>>, vector<128x128xf32>
    tpu.vector_store %arg8[%c0_6, %c0_7], %7 {strides = array<i32>} : memref<128x128xf32, #tpu.memory_space<vmem>>, vector<128x128xf32>,
    %c0_i32_8 = arith.constant 0 : i32
    %9 = arith.cmpi eq, %arg2, %c0_i32_8 : i32
    %10 = arith.extui %9 : i1 to i32
    %c0_i32_9 = arith.constant 0 : i32
    %11 = arith.cmpi ne, %10, %c0_i32_9 : i32
    scf.if %11 {
      %c0_10 = arith.constant 0 : index
      %c0_11 = arith.constant 0 : index
      %12 = vector.load %arg8[%c0_10, %c0_11] : memref<128x128xf32, #tpu.memory_space<vmem>>, vector<128x128xf32>
      %c0_12 = arith.constant 0 : index
      %c0_13 = arith.constant 0 : index
      %13 = vector.load %arg5[%c0_12, %c0_13] : memref<1x128xf32, #tpu.memory_space<vmem>>, vector<1x128xf32>
      %14 = vector.broadcast %13 : vector<1x128xf32> to vector<128x128xf32>
      %15 = arith.mulf %12, %14 : vector<128x128xf32>
      %c0_14 = arith.constant 0 : index
      %c0_15 = arith.constant 0 : index
      %16 = vector.load %arg6[%c0_14, %c0_15] : memref<1x128xf32, #tpu.memory_space<vmem>>, vector<1x128xf32>
      %17 = vector.broadcast %16 : vector<1x128xf32> to vector<128x128xf32>
      %18 = arith.addf %15, %17 : vector<128x128xf32>
      %cst_16 = arith.constant 0.000000e+00 : f32
      %19 = vector.broadcast %cst_16 : f32 to vector<128x128xf32>
      %20 = arith.maximumf %18, %19 : vector<128x128xf32>
      %21 = arith.truncf %20 : vector<128x128xf32> to vector<128x128xbf16>
      %c0_17 = arith.constant 0 : index
      %c0_18 = arith.constant 0 : index
      %22 = vector.load %arg7[%c0_17, %c0_18] : memref<128x128xbf16, #tpu.memory_space<vmem>>, vector<128x128xbf16>
      tpu.vector_store %arg7[%c0_17, %c0_18], %21 {strides = array<i32>} : memref<128x128xbf16, #tpu.memory_space<vmem>>, vector<128x128xbf16>,
    } else {
    }
    return
  }
  func.func @transform_0(%arg0: i32, %arg1: i32, %arg2: i32) -> (i32, i32) {
    %c0_i32 = arith.constant 0 : i32
    return %arg0, %arg2 : i32, i32
  }
  func.func @transform_1(%arg0: i32, %arg1: i32, %arg2: i32) -> (i32, i32) {
    %c0_i32 = arith.constant 0 : i32
    return %arg2, %arg1 : i32, i32
  }
  func.func @transform_2(%arg0: i32, %arg1: i32, %arg2: i32) -> (i32, i32) {
    %c0_i32 = arith.constant 0 : i32
    %c0_i32_0 = arith.constant 0 : i32
    return %c0_i32, %arg1 : i32, i32
  }
  func.func @transform_3(%arg0: i32, %arg1: i32, %arg2: i32) -> (i32, i32) {
    %c0_i32 = arith.constant 0 : i32
    %c0_i32_0 = arith.constant 0 : i32
    return %c0_i32, %arg1 : i32, i32
  }
  func.func @transform_4(%arg0: i32, %arg1: i32, %arg2: i32) -> (i32, i32) {
    %c0_i32 = arith.constant 0 : i32
    return %arg0, %arg1 : i32, i32
  }
}

module attributes {stable_mosaic.version = 11 : i64} {
  func.func @_maxreduce_kernel(%arg0: i32, %arg1: i32, %arg2: memref<9x56x128xbf16, #tpu.memory_space<vmem>>, %arg3: memref<56x128xbf16, #tpu.memory_space<vmem>>) attributes {dimension_semantics = [#tpu.dimension_semantics<parallel>, #tpu.dimension_semantics<parallel>], iteration_bounds = array<i64: 1, 1>, scalar_prefetch = 0 : i64, scratch_operands = 0 : i64, tpu.core_type = #tpu.core_type<tc>, window_params = [{transform_indices = @transform_0, window_bounds = array<i64: 9, 56, 128>}, {transform_indices = @transform_1, window_bounds = array<i64: 56, 128>}]} {
    %c0 = arith.constant 0 : index
    %c0_0 = arith.constant 0 : index
    %c0_1 = arith.constant 0 : index
    %0 = vector.load %arg2[%c0, %c0_0, %c0_1] : memref<9x56x128xbf16, #tpu.memory_space<vmem>>, vector<9x56x128xbf16>
    %cst = arith.constant dense<0xFF80> : vector<56x128xbf16>
    %1 = vector.multi_reduction <maximumf>, %0, %cst [0] : vector<9x56x128xbf16> to vector<56x128xbf16>
    %c0_2 = arith.constant 0 : index
    %c0_3 = arith.constant 0 : index
    %2 = vector.load %arg3[%c0_2, %c0_3] : memref<56x128xbf16, #tpu.memory_space<vmem>>, vector<56x128xbf16>
    tpu.vector_store %arg3[%c0_2, %c0_3], %1 {strides = array<i32>} : memref<56x128xbf16, #tpu.memory_space<vmem>>, vector<56x128xbf16>,
    return
  }
  func.func @transform_0(%arg0: i32, %arg1: i32) -> (i32, i32, i32) {
    %c0_i32 = arith.constant 0 : i32
    %c0_i32_0 = arith.constant 0 : i32
    return %c0_i32, %arg0, %arg1 : i32, i32, i32
  }
  func.func @transform_1(%arg0: i32, %arg1: i32) -> (i32, i32) {
    %c0_i32 = arith.constant 0 : i32
    return %arg0, %arg1 : i32, i32
  }
}

module attributes {stable_mosaic.version = 11 : i64} {
  func.func @_fused_matmul_kernel(%arg0: i32, %arg1: i32, %arg2: i32, %arg3: memref<56x128xbf16, #tpu.memory_space<vmem>>, %arg4: memref<128x128xbf16, #tpu.memory_space<vmem>>, %arg5: memref<1x128xf32, #tpu.memory_space<vmem>>, %arg6: memref<1x128xf32, #tpu.memory_space<vmem>>, %arg7: memref<56x128xbf16, #tpu.memory_space<vmem>>, %arg8: memref<56x128xf32, #tpu.memory_space<vmem>>) attributes {dimension_semantics = [#tpu.dimension_semantics<parallel>, #tpu.dimension_semantics<parallel>, #tpu.dimension_semantics<arbitrary>], iteration_bounds = array<i64: 1, 1, 1>, scalar_prefetch = 0 : i64, scratch_operands = 1 : i64, tpu.core_type = #tpu.core_type<tc>, window_params = [{transform_indices = @transform_0, window_bounds = array<i64: 56, 128>}, {transform_indices = @transform_1, window_bounds = array<i64: 128, 128>}, {transform_indices = @transform_2, window_bounds = array<i64: 1, 128>}, {transform_indices = @transform_3, window_bounds = array<i64: 1, 128>}, {transform_indices = @transform_4, window_bounds = array<i64: 56, 128>}]} {
    %c0_i32 = arith.constant 0 : i32
    %0 = arith.cmpi eq, %arg2, %c0_i32 : i32
    %1 = arith.extui %0 : i1 to i32
    %c0_i32_0 = arith.constant 0 : i32
    %2 = arith.cmpi ne, %1, %c0_i32_0 : i32
    scf.if %2 {
      %cst_10 = arith.constant 0.000000e+00 : f32
      %12 = vector.broadcast %cst_10 : f32 to vector<56x128xf32>
      %c0_11 = arith.constant 0 : index
      %c0_12 = arith.constant 0 : index
      %13 = vector.load %arg8[%c0_11, %c0_12] : memref<56x128xf32, #tpu.memory_space<vmem>>, vector<56x128xf32>
      tpu.vector_store %arg8[%c0_11, %c0_12], %12 {strides = array<i32>} : memref<56x128xf32, #tpu.memory_space<vmem>>, vector<56x128xf32>,
    } else {
    }
    %c0 = arith.constant 0 : index
    %c0_1 = arith.constant 0 : index
    %3 = vector.load %arg8[%c0, %c0_1] : memref<56x128xf32, #tpu.memory_space<vmem>>, vector<56x128xf32>
    %c0_2 = arith.constant 0 : index
    %c0_3 = arith.constant 0 : index
    %4 = vector.load %arg3[%c0_2, %c0_3] : memref<56x128xbf16, #tpu.memory_space<vmem>>, vector<56x128xbf16>
    %c0_4 = arith.constant 0 : index
    %c0_5 = arith.constant 0 : index
    %5 = vector.load %arg4[%c0_4, %c0_5] : memref<128x128xbf16, #tpu.memory_space<vmem>>, vector<128x128xbf16>
    %cst = arith.constant dense<0.000000e+00> : vector<56x128xf32>
    %6 = tpu.matmul %4, %5, %cst {dimension_numbers = #tpu.dot_dimension_numbers<[1], [0], [0], [1], [0, 0, 1, 1], [], []>} : vector<56x128xbf16>, vector<128x128xbf16>, vector<56x128xf32> -> vector<56x128xf32>
    %7 = arith.addf %3, %6 : vector<56x128xf32>
    %c0_6 = arith.constant 0 : index
    %c0_7 = arith.constant 0 : index
    %8 = vector.load %arg8[%c0_6, %c0_7] : memref<56x128xf32, #tpu.memory_space<vmem>>, vector<56x128xf32>
    tpu.vector_store %arg8[%c0_6, %c0_7], %7 {strides = array<i32>} : memref<56x128xf32, #tpu.memory_space<vmem>>, vector<56x128xf32>,
    %c0_i32_8 = arith.constant 0 : i32
    %9 = arith.cmpi eq, %arg2, %c0_i32_8 : i32
    %10 = arith.extui %9 : i1 to i32
    %c0_i32_9 = arith.constant 0 : i32
    %11 = arith.cmpi ne, %10, %c0_i32_9 : i32
    scf.if %11 {
      %c0_10 = arith.constant 0 : index
      %c0_11 = arith.constant 0 : index
      %12 = vector.load %arg8[%c0_10, %c0_11] : memref<56x128xf32, #tpu.memory_space<vmem>>, vector<56x128xf32>
      %c0_12 = arith.constant 0 : index
      %c0_13 = arith.constant 0 : index
      %13 = vector.load %arg5[%c0_12, %c0_13] : memref<1x128xf32, #tpu.memory_space<vmem>>, vector<1x128xf32>
      %14 = vector.broadcast %13 : vector<1x128xf32> to vector<56x128xf32>
      %15 = arith.mulf %12, %14 : vector<56x128xf32>
      %c0_14 = arith.constant 0 : index
      %c0_15 = arith.constant 0 : index
      %16 = vector.load %arg6[%c0_14, %c0_15] : memref<1x128xf32, #tpu.memory_space<vmem>>, vector<1x128xf32>
      %17 = vector.broadcast %16 : vector<1x128xf32> to vector<56x128xf32>
      %18 = arith.addf %15, %17 : vector<56x128xf32>
      %cst_16 = arith.constant 0.000000e+00 : f32
      %19 = vector.broadcast %cst_16 : f32 to vector<56x128xf32>
      %20 = arith.maximumf %18, %19 : vector<56x128xf32>
      %21 = arith.truncf %20 : vector<56x128xf32> to vector<56x128xbf16>
      %c0_17 = arith.constant 0 : index
      %c0_18 = arith.constant 0 : index
      %22 = vector.load %arg7[%c0_17, %c0_18] : memref<56x128xbf16, #tpu.memory_space<vmem>>, vector<56x128xbf16>
      tpu.vector_store %arg7[%c0_17, %c0_18], %21 {strides = array<i32>} : memref<56x128xbf16, #tpu.memory_space<vmem>>, vector<56x128xbf16>,
    } else {
    }
    return
  }
  func.func @transform_0(%arg0: i32, %arg1: i32, %arg2: i32) -> (i32, i32) {
    %c0_i32 = arith.constant 0 : i32
    return %arg0, %arg2 : i32, i32
  }
  func.func @transform_1(%arg0: i32, %arg1: i32, %arg2: i32) -> (i32, i32) {
    %c0_i32 = arith.constant 0 : i32
    return %arg2, %arg1 : i32, i32
  }
  func.func @transform_2(%arg0: i32, %arg1: i32, %arg2: i32) -> (i32, i32) {
    %c0_i32 = arith.constant 0 : i32
    %c0_i32_0 = arith.constant 0 : i32
    return %c0_i32, %arg1 : i32, i32
  }
  func.func @transform_3(%arg0: i32, %arg1: i32, %arg2: i32) -> (i32, i32) {
    %c0_i32 = arith.constant 0 : i32
    %c0_i32_0 = arith.constant 0 : i32
    return %c0_i32, %arg1 : i32, i32
  }
  func.func @transform_4(%arg0: i32, %arg1: i32, %arg2: i32) -> (i32, i32) {
    %c0_i32 = arith.constant 0 : i32
    return %arg0, %arg1 : i32, i32
  }
}

module attributes {stable_mosaic.version = 11 : i64} {
  func.func @_fused_matmul_kernel(%arg0: i32, %arg1: i32, %arg2: i32, %arg3: memref<56x128xbf16, #tpu.memory_space<vmem>>, %arg4: memref<128x128xbf16, #tpu.memory_space<vmem>>, %arg5: memref<1x128xf32, #tpu.memory_space<vmem>>, %arg6: memref<1x128xf32, #tpu.memory_space<vmem>>, %arg7: memref<56x128xbf16, #tpu.memory_space<vmem>>, %arg8: memref<56x128xf32, #tpu.memory_space<vmem>>) attributes {dimension_semantics = [#tpu.dimension_semantics<parallel>, #tpu.dimension_semantics<parallel>, #tpu.dimension_semantics<arbitrary>], iteration_bounds = array<i64: 1, 1, 5>, scalar_prefetch = 0 : i64, scratch_operands = 1 : i64, tpu.core_type = #tpu.core_type<tc>, window_params = [{transform_indices = @transform_0, window_bounds = array<i64: 56, 128>}, {transform_indices = @transform_1, window_bounds = array<i64: 128, 128>}, {transform_indices = @transform_2, window_bounds = array<i64: 1, 128>}, {transform_indices = @transform_3, window_bounds = array<i64: 1, 128>}, {transform_indices = @transform_4, window_bounds = array<i64: 56, 128>}]} {
    %c0_i32 = arith.constant 0 : i32
    %0 = arith.cmpi eq, %arg2, %c0_i32 : i32
    %1 = arith.extui %0 : i1 to i32
    %c0_i32_0 = arith.constant 0 : i32
    %2 = arith.cmpi ne, %1, %c0_i32_0 : i32
    scf.if %2 {
      %cst_9 = arith.constant 0.000000e+00 : f32
      %12 = vector.broadcast %cst_9 : f32 to vector<56x128xf32>
      %c0_10 = arith.constant 0 : index
      %c0_11 = arith.constant 0 : index
      %13 = vector.load %arg8[%c0_10, %c0_11] : memref<56x128xf32, #tpu.memory_space<vmem>>, vector<56x128xf32>
      tpu.vector_store %arg8[%c0_10, %c0_11], %12 {strides = array<i32>} : memref<56x128xf32, #tpu.memory_space<vmem>>, vector<56x128xf32>,
    } else {
    }
    %c0 = arith.constant 0 : index
    %c0_1 = arith.constant 0 : index
    %3 = vector.load %arg8[%c0, %c0_1] : memref<56x128xf32, #tpu.memory_space<vmem>>, vector<56x128xf32>
    %c0_2 = arith.constant 0 : index
    %c0_3 = arith.constant 0 : index
    %4 = vector.load %arg3[%c0_2, %c0_3] : memref<56x128xbf16, #tpu.memory_space<vmem>>, vector<56x128xbf16>
    %c0_4 = arith.constant 0 : index
    %c0_5 = arith.constant 0 : index
    %5 = vector.load %arg4[%c0_4, %c0_5] : memref<128x128xbf16, #tpu.memory_space<vmem>>, vector<128x128xbf16>
    %cst = arith.constant dense<0.000000e+00> : vector<56x128xf32>
    %6 = tpu.matmul %4, %5, %cst {dimension_numbers = #tpu.dot_dimension_numbers<[1], [0], [0], [1], [0, 0, 1, 1], [], []>} : vector<56x128xbf16>, vector<128x128xbf16>, vector<56x128xf32> -> vector<56x128xf32>
    %7 = arith.addf %3, %6 : vector<56x128xf32>
    %c0_6 = arith.constant 0 : index
    %c0_7 = arith.constant 0 : index
    %8 = vector.load %arg8[%c0_6, %c0_7] : memref<56x128xf32, #tpu.memory_space<vmem>>, vector<56x128xf32>
    tpu.vector_store %arg8[%c0_6, %c0_7], %7 {strides = array<i32>} : memref<56x128xf32, #tpu.memory_space<vmem>>, vector<56x128xf32>,
    %c4_i32 = arith.constant 4 : i32
    %9 = arith.cmpi eq, %arg2, %c4_i32 : i32
    %10 = arith.extui %9 : i1 to i32
    %c0_i32_8 = arith.constant 0 : i32
    %11 = arith.cmpi ne, %10, %c0_i32_8 : i32
    scf.if %11 {
      %c0_9 = arith.constant 0 : index
      %c0_10 = arith.constant 0 : index
      %12 = vector.load %arg8[%c0_9, %c0_10] : memref<56x128xf32, #tpu.memory_space<vmem>>, vector<56x128xf32>
      %c0_11 = arith.constant 0 : index
      %c0_12 = arith.constant 0 : index
      %13 = vector.load %arg5[%c0_11, %c0_12] : memref<1x128xf32, #tpu.memory_space<vmem>>, vector<1x128xf32>
      %14 = vector.broadcast %13 : vector<1x128xf32> to vector<56x128xf32>
      %15 = arith.mulf %12, %14 : vector<56x128xf32>
      %c0_13 = arith.constant 0 : index
      %c0_14 = arith.constant 0 : index
      %16 = vector.load %arg6[%c0_13, %c0_14] : memref<1x128xf32, #tpu.memory_space<vmem>>, vector<1x128xf32>
      %17 = vector.broadcast %16 : vector<1x128xf32> to vector<56x128xf32>
      %18 = arith.addf %15, %17 : vector<56x128xf32>
      %cst_15 = arith.constant 0.000000e+00 : f32
      %19 = vector.broadcast %cst_15 : f32 to vector<56x128xf32>
      %20 = arith.maximumf %18, %19 : vector<56x128xf32>
      %21 = arith.truncf %20 : vector<56x128xf32> to vector<56x128xbf16>
      %c0_16 = arith.constant 0 : index
      %c0_17 = arith.constant 0 : index
      %22 = vector.load %arg7[%c0_16, %c0_17] : memref<56x128xbf16, #tpu.memory_space<vmem>>, vector<56x128xbf16>
      tpu.vector_store %arg7[%c0_16, %c0_17], %21 {strides = array<i32>} : memref<56x128xbf16, #tpu.memory_space<vmem>>, vector<56x128xbf16>,
    } else {
    }
    return
  }
  func.func @transform_0(%arg0: i32, %arg1: i32, %arg2: i32) -> (i32, i32) {
    %c0_i32 = arith.constant 0 : i32
    return %arg0, %arg2 : i32, i32
  }
  func.func @transform_1(%arg0: i32, %arg1: i32, %arg2: i32) -> (i32, i32) {
    %c0_i32 = arith.constant 0 : i32
    return %arg2, %arg1 : i32, i32
  }
  func.func @transform_2(%arg0: i32, %arg1: i32, %arg2: i32) -> (i32, i32) {
    %c0_i32 = arith.constant 0 : i32
    %c0_i32_0 = arith.constant 0 : i32
    return %c0_i32, %arg1 : i32, i32
  }
  func.func @transform_3(%arg0: i32, %arg1: i32, %arg2: i32) -> (i32, i32) {
    %c0_i32 = arith.constant 0 : i32
    %c0_i32_0 = arith.constant 0 : i32
    return %c0_i32, %arg1 : i32, i32
  }
  func.func @transform_4(%arg0: i32, %arg1: i32, %arg2: i32) -> (i32, i32) {
    %c0_i32 = arith.constant 0 : i32
    return %arg0, %arg1 : i32, i32
  }
}

module attributes {stable_mosaic.version = 11 : i64} {
  func.func @_fused_matmul_kernel(%arg0: i32, %arg1: i32, %arg2: i32, %arg3: memref<56x128xbf16, #tpu.memory_space<vmem>>, %arg4: memref<128x256xbf16, #tpu.memory_space<vmem>>, %arg5: memref<1x256xf32, #tpu.memory_space<vmem>>, %arg6: memref<1x256xf32, #tpu.memory_space<vmem>>, %arg7: memref<56x256xbf16, #tpu.memory_space<vmem>>, %arg8: memref<56x256xf32, #tpu.memory_space<vmem>>) attributes {dimension_semantics = [#tpu.dimension_semantics<parallel>, #tpu.dimension_semantics<parallel>, #tpu.dimension_semantics<arbitrary>], iteration_bounds = array<i64: 1, 1, 1>, scalar_prefetch = 0 : i64, scratch_operands = 1 : i64, tpu.core_type = #tpu.core_type<tc>, window_params = [{transform_indices = @transform_0, window_bounds = array<i64: 56, 128>}, {transform_indices = @transform_1, window_bounds = array<i64: 128, 256>}, {transform_indices = @transform_2, window_bounds = array<i64: 1, 256>}, {transform_indices = @transform_3, window_bounds = array<i64: 1, 256>}, {transform_indices = @transform_4, window_bounds = array<i64: 56, 256>}]} {
    %c0_i32 = arith.constant 0 : i32
    %0 = arith.cmpi eq, %arg2, %c0_i32 : i32
    %1 = arith.extui %0 : i1 to i32
    %c0_i32_0 = arith.constant 0 : i32
    %2 = arith.cmpi ne, %1, %c0_i32_0 : i32
    scf.if %2 {
      %cst_10 = arith.constant 0.000000e+00 : f32
      %12 = vector.broadcast %cst_10 : f32 to vector<56x256xf32>
      %c0_11 = arith.constant 0 : index
      %c0_12 = arith.constant 0 : index
      %13 = vector.load %arg8[%c0_11, %c0_12] : memref<56x256xf32, #tpu.memory_space<vmem>>, vector<56x256xf32>
      tpu.vector_store %arg8[%c0_11, %c0_12], %12 {strides = array<i32>} : memref<56x256xf32, #tpu.memory_space<vmem>>, vector<56x256xf32>,
    } else {
    }
    %c0 = arith.constant 0 : index
    %c0_1 = arith.constant 0 : index
    %3 = vector.load %arg8[%c0, %c0_1] : memref<56x256xf32, #tpu.memory_space<vmem>>, vector<56x256xf32>
    %c0_2 = arith.constant 0 : index
    %c0_3 = arith.constant 0 : index
    %4 = vector.load %arg3[%c0_2, %c0_3] : memref<56x128xbf16, #tpu.memory_space<vmem>>, vector<56x128xbf16>
    %c0_4 = arith.constant 0 : index
    %c0_5 = arith.constant 0 : index
    %5 = vector.load %arg4[%c0_4, %c0_5] : memref<128x256xbf16, #tpu.memory_space<vmem>>, vector<128x256xbf16>
    %cst = arith.constant dense<0.000000e+00> : vector<56x256xf32>
    %6 = tpu.matmul %4, %5, %cst {dimension_numbers = #tpu.dot_dimension_numbers<[1], [0], [0], [1], [0, 0, 1, 1], [], []>} : vector<56x128xbf16>, vector<128x256xbf16>, vector<56x256xf32> -> vector<56x256xf32>
    %7 = arith.addf %3, %6 : vector<56x256xf32>
    %c0_6 = arith.constant 0 : index
    %c0_7 = arith.constant 0 : index
    %8 = vector.load %arg8[%c0_6, %c0_7] : memref<56x256xf32, #tpu.memory_space<vmem>>, vector<56x256xf32>
    tpu.vector_store %arg8[%c0_6, %c0_7], %7 {strides = array<i32>} : memref<56x256xf32, #tpu.memory_space<vmem>>, vector<56x256xf32>,
    %c0_i32_8 = arith.constant 0 : i32
    %9 = arith.cmpi eq, %arg2, %c0_i32_8 : i32
    %10 = arith.extui %9 : i1 to i32
    %c0_i32_9 = arith.constant 0 : i32
    %11 = arith.cmpi ne, %10, %c0_i32_9 : i32
    scf.if %11 {
      %c0_10 = arith.constant 0 : index
      %c0_11 = arith.constant 0 : index
      %12 = vector.load %arg8[%c0_10, %c0_11] : memref<56x256xf32, #tpu.memory_space<vmem>>, vector<56x256xf32>
      %c0_12 = arith.constant 0 : index
      %c0_13 = arith.constant 0 : index
      %13 = vector.load %arg5[%c0_12, %c0_13] : memref<1x256xf32, #tpu.memory_space<vmem>>, vector<1x256xf32>
      %14 = vector.broadcast %13 : vector<1x256xf32> to vector<56x256xf32>
      %15 = arith.mulf %12, %14 : vector<56x256xf32>
      %c0_14 = arith.constant 0 : index
      %c0_15 = arith.constant 0 : index
      %16 = vector.load %arg6[%c0_14, %c0_15] : memref<1x256xf32, #tpu.memory_space<vmem>>, vector<1x256xf32>
      %17 = vector.broadcast %16 : vector<1x256xf32> to vector<56x256xf32>
      %18 = arith.addf %15, %17 : vector<56x256xf32>
      %19 = arith.truncf %18 : vector<56x256xf32> to vector<56x256xbf16>
      %c0_16 = arith.constant 0 : index
      %c0_17 = arith.constant 0 : index
      %20 = vector.load %arg7[%c0_16, %c0_17] : memref<56x256xbf16, #tpu.memory_space<vmem>>, vector<56x256xbf16>
      tpu.vector_store %arg7[%c0_16, %c0_17], %19 {strides = array<i32>} : memref<56x256xbf16, #tpu.memory_space<vmem>>, vector<56x256xbf16>,
    } else {
    }
    return
  }
  func.func @transform_0(%arg0: i32, %arg1: i32, %arg2: i32) -> (i32, i32) {
    %c0_i32 = arith.constant 0 : i32
    return %arg0, %arg2 : i32, i32
  }
  func.func @transform_1(%arg0: i32, %arg1: i32, %arg2: i32) -> (i32, i32) {
    %c0_i32 = arith.constant 0 : i32
    return %arg2, %arg1 : i32, i32
  }
  func.func @transform_2(%arg0: i32, %arg1: i32, %arg2: i32) -> (i32, i32) {
    %c0_i32 = arith.constant 0 : i32
    %c0_i32_0 = arith.constant 0 : i32
    return %c0_i32, %arg1 : i32, i32
  }
  func.func @transform_3(%arg0: i32, %arg1: i32, %arg2: i32) -> (i32, i32) {
    %c0_i32 = arith.constant 0 : i32
    %c0_i32_0 = arith.constant 0 : i32
    return %c0_i32, %arg1 : i32, i32
  }
  func.func @transform_4(%arg0: i32, %arg1: i32, %arg2: i32) -> (i32, i32) {
    %c0_i32 = arith.constant 0 : i32
    return %arg0, %arg1 : i32, i32
  }
}

module attributes {stable_mosaic.version = 11 : i64} {
  func.func @_fused_matmul_kernel(%arg0: i32, %arg1: i32, %arg2: i32, %arg3: memref<56x128xbf16, #tpu.memory_space<vmem>>, %arg4: memref<128x256xbf16, #tpu.memory_space<vmem>>, %arg5: memref<1x256xf32, #tpu.memory_space<vmem>>, %arg6: memref<1x256xf32, #tpu.memory_space<vmem>>, %arg7: memref<56x256xbf16, #tpu.memory_space<vmem>>, %arg8: memref<56x256xbf16, #tpu.memory_space<vmem>>, %arg9: memref<56x256xf32, #tpu.memory_space<vmem>>) attributes {dimension_semantics = [#tpu.dimension_semantics<parallel>, #tpu.dimension_semantics<parallel>, #tpu.dimension_semantics<arbitrary>], iteration_bounds = array<i64: 1, 1, 1>, scalar_prefetch = 0 : i64, scratch_operands = 1 : i64, tpu.core_type = #tpu.core_type<tc>, window_params = [{transform_indices = @transform_0, window_bounds = array<i64: 56, 128>}, {transform_indices = @transform_1, window_bounds = array<i64: 128, 256>}, {transform_indices = @transform_2, window_bounds = array<i64: 1, 256>}, {transform_indices = @transform_3, window_bounds = array<i64: 1, 256>}, {transform_indices = @transform_4, window_bounds = array<i64: 56, 256>}, {transform_indices = @transform_5, window_bounds = array<i64: 56, 256>}]} {
    %c0_i32 = arith.constant 0 : i32
    %0 = arith.cmpi eq, %arg2, %c0_i32 : i32
    %1 = arith.extui %0 : i1 to i32
    %c0_i32_0 = arith.constant 0 : i32
    %2 = arith.cmpi ne, %1, %c0_i32_0 : i32
    scf.if %2 {
      %cst_10 = arith.constant 0.000000e+00 : f32
      %12 = vector.broadcast %cst_10 : f32 to vector<56x256xf32>
      %c0_11 = arith.constant 0 : index
      %c0_12 = arith.constant 0 : index
      %13 = vector.load %arg9[%c0_11, %c0_12] : memref<56x256xf32, #tpu.memory_space<vmem>>, vector<56x256xf32>
      tpu.vector_store %arg9[%c0_11, %c0_12], %12 {strides = array<i32>} : memref<56x256xf32, #tpu.memory_space<vmem>>, vector<56x256xf32>,
    } else {
    }
    %c0 = arith.constant 0 : index
    %c0_1 = arith.constant 0 : index
    %3 = vector.load %arg9[%c0, %c0_1] : memref<56x256xf32, #tpu.memory_space<vmem>>, vector<56x256xf32>
    %c0_2 = arith.constant 0 : index
    %c0_3 = arith.constant 0 : index
    %4 = vector.load %arg3[%c0_2, %c0_3] : memref<56x128xbf16, #tpu.memory_space<vmem>>, vector<56x128xbf16>
    %c0_4 = arith.constant 0 : index
    %c0_5 = arith.constant 0 : index
    %5 = vector.load %arg4[%c0_4, %c0_5] : memref<128x256xbf16, #tpu.memory_space<vmem>>, vector<128x256xbf16>
    %cst = arith.constant dense<0.000000e+00> : vector<56x256xf32>
    %6 = tpu.matmul %4, %5, %cst {dimension_numbers = #tpu.dot_dimension_numbers<[1], [0], [0], [1], [0, 0, 1, 1], [], []>} : vector<56x128xbf16>, vector<128x256xbf16>, vector<56x256xf32> -> vector<56x256xf32>
    %7 = arith.addf %3, %6 : vector<56x256xf32>
    %c0_6 = arith.constant 0 : index
    %c0_7 = arith.constant 0 : index
    %8 = vector.load %arg9[%c0_6, %c0_7] : memref<56x256xf32, #tpu.memory_space<vmem>>, vector<56x256xf32>
    tpu.vector_store %arg9[%c0_6, %c0_7], %7 {strides = array<i32>} : memref<56x256xf32, #tpu.memory_space<vmem>>, vector<56x256xf32>,
    %c0_i32_8 = arith.constant 0 : i32
    %9 = arith.cmpi eq, %arg2, %c0_i32_8 : i32
    %10 = arith.extui %9 : i1 to i32
    %c0_i32_9 = arith.constant 0 : i32
    %11 = arith.cmpi ne, %10, %c0_i32_9 : i32
    scf.if %11 {
      %c0_10 = arith.constant 0 : index
      %c0_11 = arith.constant 0 : index
      %12 = vector.load %arg9[%c0_10, %c0_11] : memref<56x256xf32, #tpu.memory_space<vmem>>, vector<56x256xf32>
      %c0_12 = arith.constant 0 : index
      %c0_13 = arith.constant 0 : index
      %13 = vector.load %arg5[%c0_12, %c0_13] : memref<1x256xf32, #tpu.memory_space<vmem>>, vector<1x256xf32>
      %14 = vector.broadcast %13 : vector<1x256xf32> to vector<56x256xf32>
      %15 = arith.mulf %12, %14 : vector<56x256xf32>
      %c0_14 = arith.constant 0 : index
      %c0_15 = arith.constant 0 : index
      %16 = vector.load %arg6[%c0_14, %c0_15] : memref<1x256xf32, #tpu.memory_space<vmem>>, vector<1x256xf32>
      %17 = vector.broadcast %16 : vector<1x256xf32> to vector<56x256xf32>
      %18 = arith.addf %15, %17 : vector<56x256xf32>
      %c0_16 = arith.constant 0 : index
      %c0_17 = arith.constant 0 : index
      %19 = vector.load %arg7[%c0_16, %c0_17] : memref<56x256xbf16, #tpu.memory_space<vmem>>, vector<56x256xbf16>
      %20 = arith.extf %19 : vector<56x256xbf16> to vector<56x256xf32>
      %21 = arith.addf %18, %20 : vector<56x256xf32>
      %cst_18 = arith.constant 0.000000e+00 : f32
      %22 = vector.broadcast %cst_18 : f32 to vector<56x256xf32>
      %23 = arith.maximumf %21, %22 : vector<56x256xf32>
      %24 = arith.truncf %23 : vector<56x256xf32> to vector<56x256xbf16>
      %c0_19 = arith.constant 0 : index
      %c0_20 = arith.constant 0 : index
      %25 = vector.load %arg8[%c0_19, %c0_20] : memref<56x256xbf16, #tpu.memory_space<vmem>>, vector<56x256xbf16>
      tpu.vector_store %arg8[%c0_19, %c0_20], %24 {strides = array<i32>} : memref<56x256xbf16, #tpu.memory_space<vmem>>, vector<56x256xbf16>,
    } else {
    }
    return
  }
  func.func @transform_0(%arg0: i32, %arg1: i32, %arg2: i32) -> (i32, i32) {
    %c0_i32 = arith.constant 0 : i32
    return %arg0, %arg2 : i32, i32
  }
  func.func @transform_1(%arg0: i32, %arg1: i32, %arg2: i32) -> (i32, i32) {
    %c0_i32 = arith.constant 0 : i32
    return %arg2, %arg1 : i32, i32
  }
  func.func @transform_2(%arg0: i32, %arg1: i32, %arg2: i32) -> (i32, i32) {
    %c0_i32 = arith.constant 0 : i32
    %c0_i32_0 = arith.constant 0 : i32
    return %c0_i32, %arg1 : i32, i32
  }
  func.func @transform_3(%arg0: i32, %arg1: i32, %arg2: i32) -> (i32, i32) {
    %c0_i32 = arith.constant 0 : i32
    %c0_i32_0 = arith.constant 0 : i32
    return %c0_i32, %arg1 : i32, i32
  }
  func.func @transform_4(%arg0: i32, %arg1: i32, %arg2: i32) -> (i32, i32) {
    %c0_i32 = arith.constant 0 : i32
    return %arg0, %arg1 : i32, i32
  }
  func.func @transform_5(%arg0: i32, %arg1: i32, %arg2: i32) -> (i32, i32) {
    %c0_i32 = arith.constant 0 : i32
    return %arg0, %arg1 : i32, i32
  }
}

module attributes {stable_mosaic.version = 11 : i64} {
  func.func @_fused_matmul_kernel(%arg0: i32, %arg1: i32, %arg2: i32, %arg3: memref<24x256xbf16, #tpu.memory_space<vmem>>, %arg4: memref<256x128xbf16, #tpu.memory_space<vmem>>, %arg5: memref<1x128xf32, #tpu.memory_space<vmem>>, %arg6: memref<1x128xf32, #tpu.memory_space<vmem>>, %arg7: memref<24x128xbf16, #tpu.memory_space<vmem>>, %arg8: memref<24x128xf32, #tpu.memory_space<vmem>>) attributes {dimension_semantics = [#tpu.dimension_semantics<parallel>, #tpu.dimension_semantics<parallel>, #tpu.dimension_semantics<arbitrary>], iteration_bounds = array<i64: 1, 1, 1>, scalar_prefetch = 0 : i64, scratch_operands = 1 : i64, tpu.core_type = #tpu.core_type<tc>, window_params = [{transform_indices = @transform_0, window_bounds = array<i64: 24, 256>}, {transform_indices = @transform_1, window_bounds = array<i64: 256, 128>}, {transform_indices = @transform_2, window_bounds = array<i64: 1, 128>}, {transform_indices = @transform_3, window_bounds = array<i64: 1, 128>}, {transform_indices = @transform_4, window_bounds = array<i64: 24, 128>}]} {
    %c0_i32 = arith.constant 0 : i32
    %0 = arith.cmpi eq, %arg2, %c0_i32 : i32
    %1 = arith.extui %0 : i1 to i32
    %c0_i32_0 = arith.constant 0 : i32
    %2 = arith.cmpi ne, %1, %c0_i32_0 : i32
    scf.if %2 {
      %cst_10 = arith.constant 0.000000e+00 : f32
      %12 = vector.broadcast %cst_10 : f32 to vector<24x128xf32>
      %c0_11 = arith.constant 0 : index
      %c0_12 = arith.constant 0 : index
      %13 = vector.load %arg8[%c0_11, %c0_12] : memref<24x128xf32, #tpu.memory_space<vmem>>, vector<24x128xf32>
      tpu.vector_store %arg8[%c0_11, %c0_12], %12 {strides = array<i32>} : memref<24x128xf32, #tpu.memory_space<vmem>>, vector<24x128xf32>,
    } else {
    }
    %c0 = arith.constant 0 : index
    %c0_1 = arith.constant 0 : index
    %3 = vector.load %arg8[%c0, %c0_1] : memref<24x128xf32, #tpu.memory_space<vmem>>, vector<24x128xf32>
    %c0_2 = arith.constant 0 : index
    %c0_3 = arith.constant 0 : index
    %4 = vector.load %arg3[%c0_2, %c0_3] : memref<24x256xbf16, #tpu.memory_space<vmem>>, vector<24x256xbf16>
    %c0_4 = arith.constant 0 : index
    %c0_5 = arith.constant 0 : index
    %5 = vector.load %arg4[%c0_4, %c0_5] : memref<256x128xbf16, #tpu.memory_space<vmem>>, vector<256x128xbf16>
    %cst = arith.constant dense<0.000000e+00> : vector<24x128xf32>
    %6 = tpu.matmul %4, %5, %cst {dimension_numbers = #tpu.dot_dimension_numbers<[1], [0], [0], [1], [0, 0, 1, 1], [], []>} : vector<24x256xbf16>, vector<256x128xbf16>, vector<24x128xf32> -> vector<24x128xf32>
    %7 = arith.addf %3, %6 : vector<24x128xf32>
    %c0_6 = arith.constant 0 : index
    %c0_7 = arith.constant 0 : index
    %8 = vector.load %arg8[%c0_6, %c0_7] : memref<24x128xf32, #tpu.memory_space<vmem>>, vector<24x128xf32>
    tpu.vector_store %arg8[%c0_6, %c0_7], %7 {strides = array<i32>} : memref<24x128xf32, #tpu.memory_space<vmem>>, vector<24x128xf32>,
    %c0_i32_8 = arith.constant 0 : i32
    %9 = arith.cmpi eq, %arg2, %c0_i32_8 : i32
    %10 = arith.extui %9 : i1 to i32
    %c0_i32_9 = arith.constant 0 : i32
    %11 = arith.cmpi ne, %10, %c0_i32_9 : i32
    scf.if %11 {
      %c0_10 = arith.constant 0 : index
      %c0_11 = arith.constant 0 : index
      %12 = vector.load %arg8[%c0_10, %c0_11] : memref<24x128xf32, #tpu.memory_space<vmem>>, vector<24x128xf32>
      %c0_12 = arith.constant 0 : index
      %c0_13 = arith.constant 0 : index
      %13 = vector.load %arg5[%c0_12, %c0_13] : memref<1x128xf32, #tpu.memory_space<vmem>>, vector<1x128xf32>
      %14 = vector.broadcast %13 : vector<1x128xf32> to vector<24x128xf32>
      %15 = arith.mulf %12, %14 : vector<24x128xf32>
      %c0_14 = arith.constant 0 : index
      %c0_15 = arith.constant 0 : index
      %16 = vector.load %arg6[%c0_14, %c0_15] : memref<1x128xf32, #tpu.memory_space<vmem>>, vector<1x128xf32>
      %17 = vector.broadcast %16 : vector<1x128xf32> to vector<24x128xf32>
      %18 = arith.addf %15, %17 : vector<24x128xf32>
      %cst_16 = arith.constant 0.000000e+00 : f32
      %19 = vector.broadcast %cst_16 : f32 to vector<24x128xf32>
      %20 = arith.maximumf %18, %19 : vector<24x128xf32>
      %21 = arith.truncf %20 : vector<24x128xf32> to vector<24x128xbf16>
      %c0_17 = arith.constant 0 : index
      %c0_18 = arith.constant 0 : index
      %22 = vector.load %arg7[%c0_17, %c0_18] : memref<24x128xbf16, #tpu.memory_space<vmem>>, vector<24x128xbf16>
      tpu.vector_store %arg7[%c0_17, %c0_18], %21 {strides = array<i32>} : memref<24x128xbf16, #tpu.memory_space<vmem>>, vector<24x128xbf16>,
    } else {
    }
    return
  }
  func.func @transform_0(%arg0: i32, %arg1: i32, %arg2: i32) -> (i32, i32) {
    %c0_i32 = arith.constant 0 : i32
    return %arg0, %arg2 : i32, i32
  }
  func.func @transform_1(%arg0: i32, %arg1: i32, %arg2: i32) -> (i32, i32) {
    %c0_i32 = arith.constant 0 : i32
    return %arg2, %arg1 : i32, i32
  }
  func.func @transform_2(%arg0: i32, %arg1: i32, %arg2: i32) -> (i32, i32) {
    %c0_i32 = arith.constant 0 : i32
    %c0_i32_0 = arith.constant 0 : i32
    return %c0_i32, %arg1 : i32, i32
  }
  func.func @transform_3(%arg0: i32, %arg1: i32, %arg2: i32) -> (i32, i32) {
    %c0_i32 = arith.constant 0 : i32
    %c0_i32_0 = arith.constant 0 : i32
    return %c0_i32, %arg1 : i32, i32
  }
  func.func @transform_4(%arg0: i32, %arg1: i32, %arg2: i32) -> (i32, i32) {
    %c0_i32 = arith.constant 0 : i32
    return %arg0, %arg1 : i32, i32
  }
}

module attributes {stable_mosaic.version = 11 : i64} {
  func.func @_fused_matmul_kernel(%arg0: i32, %arg1: i32, %arg2: i32, %arg3: memref<24x512xbf16, #tpu.memory_space<vmem>>, %arg4: memref<512x256xbf16, #tpu.memory_space<vmem>>, %arg5: memref<1x256xf32, #tpu.memory_space<vmem>>, %arg6: memref<1x256xf32, #tpu.memory_space<vmem>>, %arg7: memref<24x256xbf16, #tpu.memory_space<vmem>>, %arg8: memref<24x256xf32, #tpu.memory_space<vmem>>) attributes {dimension_semantics = [#tpu.dimension_semantics<parallel>, #tpu.dimension_semantics<parallel>, #tpu.dimension_semantics<arbitrary>], iteration_bounds = array<i64: 1, 1, 1>, scalar_prefetch = 0 : i64, scratch_operands = 1 : i64, tpu.core_type = #tpu.core_type<tc>, window_params = [{transform_indices = @transform_0, window_bounds = array<i64: 24, 512>}, {transform_indices = @transform_1, window_bounds = array<i64: 512, 256>}, {transform_indices = @transform_2, window_bounds = array<i64: 1, 256>}, {transform_indices = @transform_3, window_bounds = array<i64: 1, 256>}, {transform_indices = @transform_4, window_bounds = array<i64: 24, 256>}]} {
    %c0_i32 = arith.constant 0 : i32
    %0 = arith.cmpi eq, %arg2, %c0_i32 : i32
    %1 = arith.extui %0 : i1 to i32
    %c0_i32_0 = arith.constant 0 : i32
    %2 = arith.cmpi ne, %1, %c0_i32_0 : i32
    scf.if %2 {
      %cst_10 = arith.constant 0.000000e+00 : f32
      %12 = vector.broadcast %cst_10 : f32 to vector<24x256xf32>
      %c0_11 = arith.constant 0 : index
      %c0_12 = arith.constant 0 : index
      %13 = vector.load %arg8[%c0_11, %c0_12] : memref<24x256xf32, #tpu.memory_space<vmem>>, vector<24x256xf32>
      tpu.vector_store %arg8[%c0_11, %c0_12], %12 {strides = array<i32>} : memref<24x256xf32, #tpu.memory_space<vmem>>, vector<24x256xf32>,
    } else {
    }
    %c0 = arith.constant 0 : index
    %c0_1 = arith.constant 0 : index
    %3 = vector.load %arg8[%c0, %c0_1] : memref<24x256xf32, #tpu.memory_space<vmem>>, vector<24x256xf32>
    %c0_2 = arith.constant 0 : index
    %c0_3 = arith.constant 0 : index
    %4 = vector.load %arg3[%c0_2, %c0_3] : memref<24x512xbf16, #tpu.memory_space<vmem>>, vector<24x512xbf16>
    %c0_4 = arith.constant 0 : index
    %c0_5 = arith.constant 0 : index
    %5 = vector.load %arg4[%c0_4, %c0_5] : memref<512x256xbf16, #tpu.memory_space<vmem>>, vector<512x256xbf16>
    %cst = arith.constant dense<0.000000e+00> : vector<24x256xf32>
    %6 = tpu.matmul %4, %5, %cst {dimension_numbers = #tpu.dot_dimension_numbers<[1], [0], [0], [1], [0, 0, 1, 1], [], []>} : vector<24x512xbf16>, vector<512x256xbf16>, vector<24x256xf32> -> vector<24x256xf32>
    %7 = arith.addf %3, %6 : vector<24x256xf32>
    %c0_6 = arith.constant 0 : index
    %c0_7 = arith.constant 0 : index
    %8 = vector.load %arg8[%c0_6, %c0_7] : memref<24x256xf32, #tpu.memory_space<vmem>>, vector<24x256xf32>
    tpu.vector_store %arg8[%c0_6, %c0_7], %7 {strides = array<i32>} : memref<24x256xf32, #tpu.memory_space<vmem>>, vector<24x256xf32>,
    %c0_i32_8 = arith.constant 0 : i32
    %9 = arith.cmpi eq, %arg2, %c0_i32_8 : i32
    %10 = arith.extui %9 : i1 to i32
    %c0_i32_9 = arith.constant 0 : i32
    %11 = arith.cmpi ne, %10, %c0_i32_9 : i32
    scf.if %11 {
      %c0_10 = arith.constant 0 : index
      %c0_11 = arith.constant 0 : index
      %12 = vector.load %arg8[%c0_10, %c0_11] : memref<24x256xf32, #tpu.memory_space<vmem>>, vector<24x256xf32>
      %c0_12 = arith.constant 0 : index
      %c0_13 = arith.constant 0 : index
      %13 = vector.load %arg5[%c0_12, %c0_13] : memref<1x256xf32, #tpu.memory_space<vmem>>, vector<1x256xf32>
      %14 = vector.broadcast %13 : vector<1x256xf32> to vector<24x256xf32>
      %15 = arith.mulf %12, %14 : vector<24x256xf32>
      %c0_14 = arith.constant 0 : index
      %c0_15 = arith.constant 0 : index
      %16 = vector.load %arg6[%c0_14, %c0_15] : memref<1x256xf32, #tpu.memory_space<vmem>>, vector<1x256xf32>
      %17 = vector.broadcast %16 : vector<1x256xf32> to vector<24x256xf32>
      %18 = arith.addf %15, %17 : vector<24x256xf32>
      %cst_16 = arith.constant 0.000000e+00 : f32
      %19 = vector.broadcast %cst_16 : f32 to vector<24x256xf32>
      %20 = arith.maximumf %18, %19 : vector<24x256xf32>
      %21 = arith.truncf %20 : vector<24x256xf32> to vector<24x256xbf16>
      %c0_17 = arith.constant 0 : index
      %c0_18 = arith.constant 0 : index
      %22 = vector.load %arg7[%c0_17, %c0_18] : memref<24x256xbf16, #tpu.memory_space<vmem>>, vector<24x256xbf16>
      tpu.vector_store %arg7[%c0_17, %c0_18], %21 {strides = array<i32>} : memref<24x256xbf16, #tpu.memory_space<vmem>>, vector<24x256xbf16>,
    } else {
    }
    return
  }
  func.func @transform_0(%arg0: i32, %arg1: i32, %arg2: i32) -> (i32, i32) {
    %c0_i32 = arith.constant 0 : i32
    return %arg0, %arg2 : i32, i32
  }
  func.func @transform_1(%arg0: i32, %arg1: i32, %arg2: i32) -> (i32, i32) {
    %c0_i32 = arith.constant 0 : i32
    return %arg2, %arg1 : i32, i32
  }
  func.func @transform_2(%arg0: i32, %arg1: i32, %arg2: i32) -> (i32, i32) {
    %c0_i32 = arith.constant 0 : i32
    %c0_i32_0 = arith.constant 0 : i32
    return %c0_i32, %arg1 : i32, i32
  }
  func.func @transform_3(%arg0: i32, %arg1: i32, %arg2: i32) -> (i32, i32) {
    %c0_i32 = arith.constant 0 : i32
    %c0_i32_0 = arith.constant 0 : i32
    return %c0_i32, %arg1 : i32, i32
  }
  func.func @transform_4(%arg0: i32, %arg1: i32, %arg2: i32) -> (i32, i32) {
    %c0_i32 = arith.constant 0 : i32
    return %arg0, %arg1 : i32, i32
  }
}

module attributes {stable_mosaic.version = 11 : i64} {
  func.func @_fused_matmul_kernel(%arg0: i32, %arg1: i32, %arg2: i32, %arg3: memref<24x256xbf16, #tpu.memory_space<vmem>>, %arg4: memref<256x256xbf16, #tpu.memory_space<vmem>>, %arg5: memref<1x256xf32, #tpu.memory_space<vmem>>, %arg6: memref<1x256xf32, #tpu.memory_space<vmem>>, %arg7: memref<24x256xbf16, #tpu.memory_space<vmem>>, %arg8: memref<24x256xf32, #tpu.memory_space<vmem>>) attributes {dimension_semantics = [#tpu.dimension_semantics<parallel>, #tpu.dimension_semantics<parallel>, #tpu.dimension_semantics<arbitrary>], iteration_bounds = array<i64: 1, 2, 1>, scalar_prefetch = 0 : i64, scratch_operands = 1 : i64, tpu.core_type = #tpu.core_type<tc>, window_params = [{transform_indices = @transform_0, window_bounds = array<i64: 24, 256>}, {transform_indices = @transform_1, window_bounds = array<i64: 256, 256>}, {transform_indices = @transform_2, window_bounds = array<i64: 1, 256>}, {transform_indices = @transform_3, window_bounds = array<i64: 1, 256>}, {transform_indices = @transform_4, window_bounds = array<i64: 24, 256>}]} {
    %c0_i32 = arith.constant 0 : i32
    %0 = arith.cmpi eq, %arg2, %c0_i32 : i32
    %1 = arith.extui %0 : i1 to i32
    %c0_i32_0 = arith.constant 0 : i32
    %2 = arith.cmpi ne, %1, %c0_i32_0 : i32
    scf.if %2 {
      %cst_10 = arith.constant 0.000000e+00 : f32
      %12 = vector.broadcast %cst_10 : f32 to vector<24x256xf32>
      %c0_11 = arith.constant 0 : index
      %c0_12 = arith.constant 0 : index
      %13 = vector.load %arg8[%c0_11, %c0_12] : memref<24x256xf32, #tpu.memory_space<vmem>>, vector<24x256xf32>
      tpu.vector_store %arg8[%c0_11, %c0_12], %12 {strides = array<i32>} : memref<24x256xf32, #tpu.memory_space<vmem>>, vector<24x256xf32>,
    } else {
    }
    %c0 = arith.constant 0 : index
    %c0_1 = arith.constant 0 : index
    %3 = vector.load %arg8[%c0, %c0_1] : memref<24x256xf32, #tpu.memory_space<vmem>>, vector<24x256xf32>
    %c0_2 = arith.constant 0 : index
    %c0_3 = arith.constant 0 : index
    %4 = vector.load %arg3[%c0_2, %c0_3] : memref<24x256xbf16, #tpu.memory_space<vmem>>, vector<24x256xbf16>
    %c0_4 = arith.constant 0 : index
    %c0_5 = arith.constant 0 : index
    %5 = vector.load %arg4[%c0_4, %c0_5] : memref<256x256xbf16, #tpu.memory_space<vmem>>, vector<256x256xbf16>
    %cst = arith.constant dense<0.000000e+00> : vector<24x256xf32>
    %6 = tpu.matmul %4, %5, %cst {dimension_numbers = #tpu.dot_dimension_numbers<[1], [0], [0], [1], [0, 0, 1, 1], [], []>} : vector<24x256xbf16>, vector<256x256xbf16>, vector<24x256xf32> -> vector<24x256xf32>
    %7 = arith.addf %3, %6 : vector<24x256xf32>
    %c0_6 = arith.constant 0 : index
    %c0_7 = arith.constant 0 : index
    %8 = vector.load %arg8[%c0_6, %c0_7] : memref<24x256xf32, #tpu.memory_space<vmem>>, vector<24x256xf32>
    tpu.vector_store %arg8[%c0_6, %c0_7], %7 {strides = array<i32>} : memref<24x256xf32, #tpu.memory_space<vmem>>, vector<24x256xf32>,
    %c0_i32_8 = arith.constant 0 : i32
    %9 = arith.cmpi eq, %arg2, %c0_i32_8 : i32
    %10 = arith.extui %9 : i1 to i32
    %c0_i32_9 = arith.constant 0 : i32
    %11 = arith.cmpi ne, %10, %c0_i32_9 : i32
    scf.if %11 {
      %c0_10 = arith.constant 0 : index
      %c0_11 = arith.constant 0 : index
      %12 = vector.load %arg8[%c0_10, %c0_11] : memref<24x256xf32, #tpu.memory_space<vmem>>, vector<24x256xf32>
      %c0_12 = arith.constant 0 : index
      %c0_13 = arith.constant 0 : index
      %13 = vector.load %arg5[%c0_12, %c0_13] : memref<1x256xf32, #tpu.memory_space<vmem>>, vector<1x256xf32>
      %14 = vector.broadcast %13 : vector<1x256xf32> to vector<24x256xf32>
      %15 = arith.mulf %12, %14 : vector<24x256xf32>
      %c0_14 = arith.constant 0 : index
      %c0_15 = arith.constant 0 : index
      %16 = vector.load %arg6[%c0_14, %c0_15] : memref<1x256xf32, #tpu.memory_space<vmem>>, vector<1x256xf32>
      %17 = vector.broadcast %16 : vector<1x256xf32> to vector<24x256xf32>
      %18 = arith.addf %15, %17 : vector<24x256xf32>
      %19 = arith.truncf %18 : vector<24x256xf32> to vector<24x256xbf16>
      %c0_16 = arith.constant 0 : index
      %c0_17 = arith.constant 0 : index
      %20 = vector.load %arg7[%c0_16, %c0_17] : memref<24x256xbf16, #tpu.memory_space<vmem>>, vector<24x256xbf16>
      tpu.vector_store %arg7[%c0_16, %c0_17], %19 {strides = array<i32>} : memref<24x256xbf16, #tpu.memory_space<vmem>>, vector<24x256xbf16>,
    } else {
    }
    return
  }
  func.func @transform_0(%arg0: i32, %arg1: i32, %arg2: i32) -> (i32, i32) {
    %c0_i32 = arith.constant 0 : i32
    return %arg0, %arg2 : i32, i32
  }
  func.func @transform_1(%arg0: i32, %arg1: i32, %arg2: i32) -> (i32, i32) {
    %c0_i32 = arith.constant 0 : i32
    return %arg2, %arg1 : i32, i32
  }
  func.func @transform_2(%arg0: i32, %arg1: i32, %arg2: i32) -> (i32, i32) {
    %c0_i32 = arith.constant 0 : i32
    %c0_i32_0 = arith.constant 0 : i32
    return %c0_i32, %arg1 : i32, i32
  }
  func.func @transform_3(%arg0: i32, %arg1: i32, %arg2: i32) -> (i32, i32) {
    %c0_i32 = arith.constant 0 : i32
    %c0_i32_0 = arith.constant 0 : i32
    return %c0_i32, %arg1 : i32, i32
  }
  func.func @transform_4(%arg0: i32, %arg1: i32, %arg2: i32) -> (i32, i32) {
    %c0_i32 = arith.constant 0 : i32
    return %arg0, %arg1 : i32, i32
  }
}

module attributes {stable_mosaic.version = 11 : i64} {
  func.func @_fused_matmul_kernel(%arg0: i32, %arg1: i32, %arg2: i32, %arg3: memref<24x128xbf16, #tpu.memory_space<vmem>>, %arg4: memref<128x256xbf16, #tpu.memory_space<vmem>>, %arg5: memref<1x256xf32, #tpu.memory_space<vmem>>, %arg6: memref<1x256xf32, #tpu.memory_space<vmem>>, %arg7: memref<24x256xbf16, #tpu.memory_space<vmem>>, %arg8: memref<24x256xbf16, #tpu.memory_space<vmem>>, %arg9: memref<24x256xf32, #tpu.memory_space<vmem>>) attributes {dimension_semantics = [#tpu.dimension_semantics<parallel>, #tpu.dimension_semantics<parallel>, #tpu.dimension_semantics<arbitrary>], iteration_bounds = array<i64: 1, 2, 1>, scalar_prefetch = 0 : i64, scratch_operands = 1 : i64, tpu.core_type = #tpu.core_type<tc>, window_params = [{transform_indices = @transform_0, window_bounds = array<i64: 24, 128>}, {transform_indices = @transform_1, window_bounds = array<i64: 128, 256>}, {transform_indices = @transform_2, window_bounds = array<i64: 1, 256>}, {transform_indices = @transform_3, window_bounds = array<i64: 1, 256>}, {transform_indices = @transform_4, window_bounds = array<i64: 24, 256>}, {transform_indices = @transform_5, window_bounds = array<i64: 24, 256>}]} {
    %c0_i32 = arith.constant 0 : i32
    %0 = arith.cmpi eq, %arg2, %c0_i32 : i32
    %1 = arith.extui %0 : i1 to i32
    %c0_i32_0 = arith.constant 0 : i32
    %2 = arith.cmpi ne, %1, %c0_i32_0 : i32
    scf.if %2 {
      %cst_10 = arith.constant 0.000000e+00 : f32
      %12 = vector.broadcast %cst_10 : f32 to vector<24x256xf32>
      %c0_11 = arith.constant 0 : index
      %c0_12 = arith.constant 0 : index
      %13 = vector.load %arg9[%c0_11, %c0_12] : memref<24x256xf32, #tpu.memory_space<vmem>>, vector<24x256xf32>
      tpu.vector_store %arg9[%c0_11, %c0_12], %12 {strides = array<i32>} : memref<24x256xf32, #tpu.memory_space<vmem>>, vector<24x256xf32>,
    } else {
    }
    %c0 = arith.constant 0 : index
    %c0_1 = arith.constant 0 : index
    %3 = vector.load %arg9[%c0, %c0_1] : memref<24x256xf32, #tpu.memory_space<vmem>>, vector<24x256xf32>
    %c0_2 = arith.constant 0 : index
    %c0_3 = arith.constant 0 : index
    %4 = vector.load %arg3[%c0_2, %c0_3] : memref<24x128xbf16, #tpu.memory_space<vmem>>, vector<24x128xbf16>
    %c0_4 = arith.constant 0 : index
    %c0_5 = arith.constant 0 : index
    %5 = vector.load %arg4[%c0_4, %c0_5] : memref<128x256xbf16, #tpu.memory_space<vmem>>, vector<128x256xbf16>
    %cst = arith.constant dense<0.000000e+00> : vector<24x256xf32>
    %6 = tpu.matmul %4, %5, %cst {dimension_numbers = #tpu.dot_dimension_numbers<[1], [0], [0], [1], [0, 0, 1, 1], [], []>} : vector<24x128xbf16>, vector<128x256xbf16>, vector<24x256xf32> -> vector<24x256xf32>
    %7 = arith.addf %3, %6 : vector<24x256xf32>
    %c0_6 = arith.constant 0 : index
    %c0_7 = arith.constant 0 : index
    %8 = vector.load %arg9[%c0_6, %c0_7] : memref<24x256xf32, #tpu.memory_space<vmem>>, vector<24x256xf32>
    tpu.vector_store %arg9[%c0_6, %c0_7], %7 {strides = array<i32>} : memref<24x256xf32, #tpu.memory_space<vmem>>, vector<24x256xf32>,
    %c0_i32_8 = arith.constant 0 : i32
    %9 = arith.cmpi eq, %arg2, %c0_i32_8 : i32
    %10 = arith.extui %9 : i1 to i32
    %c0_i32_9 = arith.constant 0 : i32
    %11 = arith.cmpi ne, %10, %c0_i32_9 : i32
    scf.if %11 {
      %c0_10 = arith.constant 0 : index
      %c0_11 = arith.constant 0 : index
      %12 = vector.load %arg9[%c0_10, %c0_11] : memref<24x256xf32, #tpu.memory_space<vmem>>, vector<24x256xf32>
      %c0_12 = arith.constant 0 : index
      %c0_13 = arith.constant 0 : index
      %13 = vector.load %arg5[%c0_12, %c0_13] : memref<1x256xf32, #tpu.memory_space<vmem>>, vector<1x256xf32>
      %14 = vector.broadcast %13 : vector<1x256xf32> to vector<24x256xf32>
      %15 = arith.mulf %12, %14 : vector<24x256xf32>
      %c0_14 = arith.constant 0 : index
      %c0_15 = arith.constant 0 : index
      %16 = vector.load %arg6[%c0_14, %c0_15] : memref<1x256xf32, #tpu.memory_space<vmem>>, vector<1x256xf32>
      %17 = vector.broadcast %16 : vector<1x256xf32> to vector<24x256xf32>
      %18 = arith.addf %15, %17 : vector<24x256xf32>
      %c0_16 = arith.constant 0 : index
      %c0_17 = arith.constant 0 : index
      %19 = vector.load %arg7[%c0_16, %c0_17] : memref<24x256xbf16, #tpu.memory_space<vmem>>, vector<24x256xbf16>
      %20 = arith.extf %19 : vector<24x256xbf16> to vector<24x256xf32>
      %21 = arith.addf %18, %20 : vector<24x256xf32>
      %cst_18 = arith.constant 0.000000e+00 : f32
      %22 = vector.broadcast %cst_18 : f32 to vector<24x256xf32>
      %23 = arith.maximumf %21, %22 : vector<24x256xf32>
      %24 = arith.truncf %23 : vector<24x256xf32> to vector<24x256xbf16>
      %c0_19 = arith.constant 0 : index
      %c0_20 = arith.constant 0 : index
      %25 = vector.load %arg8[%c0_19, %c0_20] : memref<24x256xbf16, #tpu.memory_space<vmem>>, vector<24x256xbf16>
      tpu.vector_store %arg8[%c0_19, %c0_20], %24 {strides = array<i32>} : memref<24x256xbf16, #tpu.memory_space<vmem>>, vector<24x256xbf16>,
    } else {
    }
    return
  }
  func.func @transform_0(%arg0: i32, %arg1: i32, %arg2: i32) -> (i32, i32) {
    %c0_i32 = arith.constant 0 : i32
    return %arg0, %arg2 : i32, i32
  }
  func.func @transform_1(%arg0: i32, %arg1: i32, %arg2: i32) -> (i32, i32) {
    %c0_i32 = arith.constant 0 : i32
    return %arg2, %arg1 : i32, i32
  }
  func.func @transform_2(%arg0: i32, %arg1: i32, %arg2: i32) -> (i32, i32) {
    %c0_i32 = arith.constant 0 : i32
    %c0_i32_0 = arith.constant 0 : i32
    return %c0_i32, %arg1 : i32, i32
  }
  func.func @transform_3(%arg0: i32, %arg1: i32, %arg2: i32) -> (i32, i32) {
    %c0_i32 = arith.constant 0 : i32
    %c0_i32_0 = arith.constant 0 : i32
    return %c0_i32, %arg1 : i32, i32
  }
  func.func @transform_4(%arg0: i32, %arg1: i32, %arg2: i32) -> (i32, i32) {
    %c0_i32 = arith.constant 0 : i32
    return %arg0, %arg1 : i32, i32
  }
  func.func @transform_5(%arg0: i32, %arg1: i32, %arg2: i32) -> (i32, i32) {
    %c0_i32 = arith.constant 0 : i32
    return %arg0, %arg1 : i32, i32
  }
}

module attributes {stable_mosaic.version = 11 : i64} {
  func.func @_fused_matmul_kernel(%arg0: i32, %arg1: i32, %arg2: i32, %arg3: memref<24x384xbf16, #tpu.memory_space<vmem>>, %arg4: memref<384x128xbf16, #tpu.memory_space<vmem>>, %arg5: memref<1x128xf32, #tpu.memory_space<vmem>>, %arg6: memref<1x128xf32, #tpu.memory_space<vmem>>, %arg7: memref<24x128xbf16, #tpu.memory_space<vmem>>, %arg8: memref<24x128xf32, #tpu.memory_space<vmem>>) attributes {dimension_semantics = [#tpu.dimension_semantics<parallel>, #tpu.dimension_semantics<parallel>, #tpu.dimension_semantics<arbitrary>], iteration_bounds = array<i64: 1, 1, 3>, scalar_prefetch = 0 : i64, scratch_operands = 1 : i64, tpu.core_type = #tpu.core_type<tc>, window_params = [{transform_indices = @transform_0, window_bounds = array<i64: 24, 384>}, {transform_indices = @transform_1, window_bounds = array<i64: 384, 128>}, {transform_indices = @transform_2, window_bounds = array<i64: 1, 128>}, {transform_indices = @transform_3, window_bounds = array<i64: 1, 128>}, {transform_indices = @transform_4, window_bounds = array<i64: 24, 128>}]} {
    %c0_i32 = arith.constant 0 : i32
    %0 = arith.cmpi eq, %arg2, %c0_i32 : i32
    %1 = arith.extui %0 : i1 to i32
    %c0_i32_0 = arith.constant 0 : i32
    %2 = arith.cmpi ne, %1, %c0_i32_0 : i32
    scf.if %2 {
      %cst_9 = arith.constant 0.000000e+00 : f32
      %12 = vector.broadcast %cst_9 : f32 to vector<24x128xf32>
      %c0_10 = arith.constant 0 : index
      %c0_11 = arith.constant 0 : index
      %13 = vector.load %arg8[%c0_10, %c0_11] : memref<24x128xf32, #tpu.memory_space<vmem>>, vector<24x128xf32>
      tpu.vector_store %arg8[%c0_10, %c0_11], %12 {strides = array<i32>} : memref<24x128xf32, #tpu.memory_space<vmem>>, vector<24x128xf32>,
    } else {
    }
    %c0 = arith.constant 0 : index
    %c0_1 = arith.constant 0 : index
    %3 = vector.load %arg8[%c0, %c0_1] : memref<24x128xf32, #tpu.memory_space<vmem>>, vector<24x128xf32>
    %c0_2 = arith.constant 0 : index
    %c0_3 = arith.constant 0 : index
    %4 = vector.load %arg3[%c0_2, %c0_3] : memref<24x384xbf16, #tpu.memory_space<vmem>>, vector<24x384xbf16>
    %c0_4 = arith.constant 0 : index
    %c0_5 = arith.constant 0 : index
    %5 = vector.load %arg4[%c0_4, %c0_5] : memref<384x128xbf16, #tpu.memory_space<vmem>>, vector<384x128xbf16>
    %cst = arith.constant dense<0.000000e+00> : vector<24x128xf32>
    %6 = tpu.matmul %4, %5, %cst {dimension_numbers = #tpu.dot_dimension_numbers<[1], [0], [0], [1], [0, 0, 1, 1], [], []>} : vector<24x384xbf16>, vector<384x128xbf16>, vector<24x128xf32> -> vector<24x128xf32>
    %7 = arith.addf %3, %6 : vector<24x128xf32>
    %c0_6 = arith.constant 0 : index
    %c0_7 = arith.constant 0 : index
    %8 = vector.load %arg8[%c0_6, %c0_7] : memref<24x128xf32, #tpu.memory_space<vmem>>, vector<24x128xf32>
    tpu.vector_store %arg8[%c0_6, %c0_7], %7 {strides = array<i32>} : memref<24x128xf32, #tpu.memory_space<vmem>>, vector<24x128xf32>,
    %c2_i32 = arith.constant 2 : i32
    %9 = arith.cmpi eq, %arg2, %c2_i32 : i32
    %10 = arith.extui %9 : i1 to i32
    %c0_i32_8 = arith.constant 0 : i32
    %11 = arith.cmpi ne, %10, %c0_i32_8 : i32
    scf.if %11 {
      %c0_9 = arith.constant 0 : index
      %c0_10 = arith.constant 0 : index
      %12 = vector.load %arg8[%c0_9, %c0_10] : memref<24x128xf32, #tpu.memory_space<vmem>>, vector<24x128xf32>
      %c0_11 = arith.constant 0 : index
      %c0_12 = arith.constant 0 : index
      %13 = vector.load %arg5[%c0_11, %c0_12] : memref<1x128xf32, #tpu.memory_space<vmem>>, vector<1x128xf32>
      %14 = vector.broadcast %13 : vector<1x128xf32> to vector<24x128xf32>
      %15 = arith.mulf %12, %14 : vector<24x128xf32>
      %c0_13 = arith.constant 0 : index
      %c0_14 = arith.constant 0 : index
      %16 = vector.load %arg6[%c0_13, %c0_14] : memref<1x128xf32, #tpu.memory_space<vmem>>, vector<1x128xf32>
      %17 = vector.broadcast %16 : vector<1x128xf32> to vector<24x128xf32>
      %18 = arith.addf %15, %17 : vector<24x128xf32>
      %cst_15 = arith.constant 0.000000e+00 : f32
      %19 = vector.broadcast %cst_15 : f32 to vector<24x128xf32>
      %20 = arith.maximumf %18, %19 : vector<24x128xf32>
      %21 = arith.truncf %20 : vector<24x128xf32> to vector<24x128xbf16>
      %c0_16 = arith.constant 0 : index
      %c0_17 = arith.constant 0 : index
      %22 = vector.load %arg7[%c0_16, %c0_17] : memref<24x128xbf16, #tpu.memory_space<vmem>>, vector<24x128xbf16>
      tpu.vector_store %arg7[%c0_16, %c0_17], %21 {strides = array<i32>} : memref<24x128xbf16, #tpu.memory_space<vmem>>, vector<24x128xbf16>,
    } else {
    }
    return
  }
  func.func @transform_0(%arg0: i32, %arg1: i32, %arg2: i32) -> (i32, i32) {
    %c0_i32 = arith.constant 0 : i32
    return %arg0, %arg2 : i32, i32
  }
  func.func @transform_1(%arg0: i32, %arg1: i32, %arg2: i32) -> (i32, i32) {
    %c0_i32 = arith.constant 0 : i32
    return %arg2, %arg1 : i32, i32
  }
  func.func @transform_2(%arg0: i32, %arg1: i32, %arg2: i32) -> (i32, i32) {
    %c0_i32 = arith.constant 0 : i32
    %c0_i32_0 = arith.constant 0 : i32
    return %c0_i32, %arg1 : i32, i32
  }
  func.func @transform_3(%arg0: i32, %arg1: i32, %arg2: i32) -> (i32, i32) {
    %c0_i32 = arith.constant 0 : i32
    %c0_i32_0 = arith.constant 0 : i32
    return %c0_i32, %arg1 : i32, i32
  }
  func.func @transform_4(%arg0: i32, %arg1: i32, %arg2: i32) -> (i32, i32) {
    %c0_i32 = arith.constant 0 : i32
    return %arg0, %arg1 : i32, i32
  }
}

module attributes {stable_mosaic.version = 11 : i64} {
  func.func @_fused_matmul_kernel(%arg0: i32, %arg1: i32, %arg2: i32, %arg3: memref<24x256xbf16, #tpu.memory_space<vmem>>, %arg4: memref<256x256xbf16, #tpu.memory_space<vmem>>, %arg5: memref<1x256xf32, #tpu.memory_space<vmem>>, %arg6: memref<1x256xf32, #tpu.memory_space<vmem>>, %arg7: memref<24x256xbf16, #tpu.memory_space<vmem>>, %arg8: memref<24x256xbf16, #tpu.memory_space<vmem>>, %arg9: memref<24x256xf32, #tpu.memory_space<vmem>>) attributes {dimension_semantics = [#tpu.dimension_semantics<parallel>, #tpu.dimension_semantics<parallel>, #tpu.dimension_semantics<arbitrary>], iteration_bounds = array<i64: 1, 4, 1>, scalar_prefetch = 0 : i64, scratch_operands = 1 : i64, tpu.core_type = #tpu.core_type<tc>, window_params = [{transform_indices = @transform_0, window_bounds = array<i64: 24, 256>}, {transform_indices = @transform_1, window_bounds = array<i64: 256, 256>}, {transform_indices = @transform_2, window_bounds = array<i64: 1, 256>}, {transform_indices = @transform_3, window_bounds = array<i64: 1, 256>}, {transform_indices = @transform_4, window_bounds = array<i64: 24, 256>}, {transform_indices = @transform_5, window_bounds = array<i64: 24, 256>}]} {
    %c0_i32 = arith.constant 0 : i32
    %0 = arith.cmpi eq, %arg2, %c0_i32 : i32
    %1 = arith.extui %0 : i1 to i32
    %c0_i32_0 = arith.constant 0 : i32
    %2 = arith.cmpi ne, %1, %c0_i32_0 : i32
    scf.if %2 {
      %cst_10 = arith.constant 0.000000e+00 : f32
      %12 = vector.broadcast %cst_10 : f32 to vector<24x256xf32>
      %c0_11 = arith.constant 0 : index
      %c0_12 = arith.constant 0 : index
      %13 = vector.load %arg9[%c0_11, %c0_12] : memref<24x256xf32, #tpu.memory_space<vmem>>, vector<24x256xf32>
      tpu.vector_store %arg9[%c0_11, %c0_12], %12 {strides = array<i32>} : memref<24x256xf32, #tpu.memory_space<vmem>>, vector<24x256xf32>,
    } else {
    }
    %c0 = arith.constant 0 : index
    %c0_1 = arith.constant 0 : index
    %3 = vector.load %arg9[%c0, %c0_1] : memref<24x256xf32, #tpu.memory_space<vmem>>, vector<24x256xf32>
    %c0_2 = arith.constant 0 : index
    %c0_3 = arith.constant 0 : index
    %4 = vector.load %arg3[%c0_2, %c0_3] : memref<24x256xbf16, #tpu.memory_space<vmem>>, vector<24x256xbf16>
    %c0_4 = arith.constant 0 : index
    %c0_5 = arith.constant 0 : index
    %5 = vector.load %arg4[%c0_4, %c0_5] : memref<256x256xbf16, #tpu.memory_space<vmem>>, vector<256x256xbf16>
    %cst = arith.constant dense<0.000000e+00> : vector<24x256xf32>
    %6 = tpu.matmul %4, %5, %cst {dimension_numbers = #tpu.dot_dimension_numbers<[1], [0], [0], [1], [0, 0, 1, 1], [], []>} : vector<24x256xbf16>, vector<256x256xbf16>, vector<24x256xf32> -> vector<24x256xf32>
    %7 = arith.addf %3, %6 : vector<24x256xf32>
    %c0_6 = arith.constant 0 : index
    %c0_7 = arith.constant 0 : index
    %8 = vector.load %arg9[%c0_6, %c0_7] : memref<24x256xf32, #tpu.memory_space<vmem>>, vector<24x256xf32>
    tpu.vector_store %arg9[%c0_6, %c0_7], %7 {strides = array<i32>} : memref<24x256xf32, #tpu.memory_space<vmem>>, vector<24x256xf32>,
    %c0_i32_8 = arith.constant 0 : i32
    %9 = arith.cmpi eq, %arg2, %c0_i32_8 : i32
    %10 = arith.extui %9 : i1 to i32
    %c0_i32_9 = arith.constant 0 : i32
    %11 = arith.cmpi ne, %10, %c0_i32_9 : i32
    scf.if %11 {
      %c0_10 = arith.constant 0 : index
      %c0_11 = arith.constant 0 : index
      %12 = vector.load %arg9[%c0_10, %c0_11] : memref<24x256xf32, #tpu.memory_space<vmem>>, vector<24x256xf32>
      %c0_12 = arith.constant 0 : index
      %c0_13 = arith.constant 0 : index
      %13 = vector.load %arg5[%c0_12, %c0_13] : memref<1x256xf32, #tpu.memory_space<vmem>>, vector<1x256xf32>
      %14 = vector.broadcast %13 : vector<1x256xf32> to vector<24x256xf32>
      %15 = arith.mulf %12, %14 : vector<24x256xf32>
      %c0_14 = arith.constant 0 : index
      %c0_15 = arith.constant 0 : index
      %16 = vector.load %arg6[%c0_14, %c0_15] : memref<1x256xf32, #tpu.memory_space<vmem>>, vector<1x256xf32>
      %17 = vector.broadcast %16 : vector<1x256xf32> to vector<24x256xf32>
      %18 = arith.addf %15, %17 : vector<24x256xf32>
      %c0_16 = arith.constant 0 : index
      %c0_17 = arith.constant 0 : index
      %19 = vector.load %arg7[%c0_16, %c0_17] : memref<24x256xbf16, #tpu.memory_space<vmem>>, vector<24x256xbf16>
      %20 = arith.extf %19 : vector<24x256xbf16> to vector<24x256xf32>
      %21 = arith.addf %18, %20 : vector<24x256xf32>
      %cst_18 = arith.constant 0.000000e+00 : f32
      %22 = vector.broadcast %cst_18 : f32 to vector<24x256xf32>
      %23 = arith.maximumf %21, %22 : vector<24x256xf32>
      %24 = arith.truncf %23 : vector<24x256xf32> to vector<24x256xbf16>
      %c0_19 = arith.constant 0 : index
      %c0_20 = arith.constant 0 : index
      %25 = vector.load %arg8[%c0_19, %c0_20] : memref<24x256xbf16, #tpu.memory_space<vmem>>, vector<24x256xbf16>
      tpu.vector_store %arg8[%c0_19, %c0_20], %24 {strides = array<i32>} : memref<24x256xbf16, #tpu.memory_space<vmem>>, vector<24x256xbf16>,
    } else {
    }
    return
  }
  func.func @transform_0(%arg0: i32, %arg1: i32, %arg2: i32) -> (i32, i32) {
    %c0_i32 = arith.constant 0 : i32
    return %arg0, %arg2 : i32, i32
  }
  func.func @transform_1(%arg0: i32, %arg1: i32, %arg2: i32) -> (i32, i32) {
    %c0_i32 = arith.constant 0 : i32
    return %arg2, %arg1 : i32, i32
  }
  func.func @transform_2(%arg0: i32, %arg1: i32, %arg2: i32) -> (i32, i32) {
    %c0_i32 = arith.constant 0 : i32
    %c0_i32_0 = arith.constant 0 : i32
    return %c0_i32, %arg1 : i32, i32
  }
  func.func @transform_3(%arg0: i32, %arg1: i32, %arg2: i32) -> (i32, i32) {
    %c0_i32 = arith.constant 0 : i32
    %c0_i32_0 = arith.constant 0 : i32
    return %c0_i32, %arg1 : i32, i32
  }
  func.func @transform_4(%arg0: i32, %arg1: i32, %arg2: i32) -> (i32, i32) {
    %c0_i32 = arith.constant 0 : i32
    return %arg0, %arg1 : i32, i32
  }
  func.func @transform_5(%arg0: i32, %arg1: i32, %arg2: i32) -> (i32, i32) {
    %c0_i32 = arith.constant 0 : i32
    return %arg0, %arg1 : i32, i32
  }
}

module attributes {stable_mosaic.version = 11 : i64} {
  func.func @_fused_matmul_kernel(%arg0: i32, %arg1: i32, %arg2: i32, %arg3: memref<24x384xbf16, #tpu.memory_space<vmem>>, %arg4: memref<384x256xbf16, #tpu.memory_space<vmem>>, %arg5: memref<1x256xf32, #tpu.memory_space<vmem>>, %arg6: memref<1x256xf32, #tpu.memory_space<vmem>>, %arg7: memref<24x256xbf16, #tpu.memory_space<vmem>>, %arg8: memref<24x256xf32, #tpu.memory_space<vmem>>) attributes {dimension_semantics = [#tpu.dimension_semantics<parallel>, #tpu.dimension_semantics<parallel>, #tpu.dimension_semantics<arbitrary>], iteration_bounds = array<i64: 1, 1, 6>, scalar_prefetch = 0 : i64, scratch_operands = 1 : i64, tpu.core_type = #tpu.core_type<tc>, window_params = [{transform_indices = @transform_0, window_bounds = array<i64: 24, 384>}, {transform_indices = @transform_1, window_bounds = array<i64: 384, 256>}, {transform_indices = @transform_2, window_bounds = array<i64: 1, 256>}, {transform_indices = @transform_3, window_bounds = array<i64: 1, 256>}, {transform_indices = @transform_4, window_bounds = array<i64: 24, 256>}]} {
    %c0_i32 = arith.constant 0 : i32
    %0 = arith.cmpi eq, %arg2, %c0_i32 : i32
    %1 = arith.extui %0 : i1 to i32
    %c0_i32_0 = arith.constant 0 : i32
    %2 = arith.cmpi ne, %1, %c0_i32_0 : i32
    scf.if %2 {
      %cst_9 = arith.constant 0.000000e+00 : f32
      %12 = vector.broadcast %cst_9 : f32 to vector<24x256xf32>
      %c0_10 = arith.constant 0 : index
      %c0_11 = arith.constant 0 : index
      %13 = vector.load %arg8[%c0_10, %c0_11] : memref<24x256xf32, #tpu.memory_space<vmem>>, vector<24x256xf32>
      tpu.vector_store %arg8[%c0_10, %c0_11], %12 {strides = array<i32>} : memref<24x256xf32, #tpu.memory_space<vmem>>, vector<24x256xf32>,
    } else {
    }
    %c0 = arith.constant 0 : index
    %c0_1 = arith.constant 0 : index
    %3 = vector.load %arg8[%c0, %c0_1] : memref<24x256xf32, #tpu.memory_space<vmem>>, vector<24x256xf32>
    %c0_2 = arith.constant 0 : index
    %c0_3 = arith.constant 0 : index
    %4 = vector.load %arg3[%c0_2, %c0_3] : memref<24x384xbf16, #tpu.memory_space<vmem>>, vector<24x384xbf16>
    %c0_4 = arith.constant 0 : index
    %c0_5 = arith.constant 0 : index
    %5 = vector.load %arg4[%c0_4, %c0_5] : memref<384x256xbf16, #tpu.memory_space<vmem>>, vector<384x256xbf16>
    %cst = arith.constant dense<0.000000e+00> : vector<24x256xf32>
    %6 = tpu.matmul %4, %5, %cst {dimension_numbers = #tpu.dot_dimension_numbers<[1], [0], [0], [1], [0, 0, 1, 1], [], []>} : vector<24x384xbf16>, vector<384x256xbf16>, vector<24x256xf32> -> vector<24x256xf32>
    %7 = arith.addf %3, %6 : vector<24x256xf32>
    %c0_6 = arith.constant 0 : index
    %c0_7 = arith.constant 0 : index
    %8 = vector.load %arg8[%c0_6, %c0_7] : memref<24x256xf32, #tpu.memory_space<vmem>>, vector<24x256xf32>
    tpu.vector_store %arg8[%c0_6, %c0_7], %7 {strides = array<i32>} : memref<24x256xf32, #tpu.memory_space<vmem>>, vector<24x256xf32>,
    %c5_i32 = arith.constant 5 : i32
    %9 = arith.cmpi eq, %arg2, %c5_i32 : i32
    %10 = arith.extui %9 : i1 to i32
    %c0_i32_8 = arith.constant 0 : i32
    %11 = arith.cmpi ne, %10, %c0_i32_8 : i32
    scf.if %11 {
      %c0_9 = arith.constant 0 : index
      %c0_10 = arith.constant 0 : index
      %12 = vector.load %arg8[%c0_9, %c0_10] : memref<24x256xf32, #tpu.memory_space<vmem>>, vector<24x256xf32>
      %c0_11 = arith.constant 0 : index
      %c0_12 = arith.constant 0 : index
      %13 = vector.load %arg5[%c0_11, %c0_12] : memref<1x256xf32, #tpu.memory_space<vmem>>, vector<1x256xf32>
      %14 = vector.broadcast %13 : vector<1x256xf32> to vector<24x256xf32>
      %15 = arith.mulf %12, %14 : vector<24x256xf32>
      %c0_13 = arith.constant 0 : index
      %c0_14 = arith.constant 0 : index
      %16 = vector.load %arg6[%c0_13, %c0_14] : memref<1x256xf32, #tpu.memory_space<vmem>>, vector<1x256xf32>
      %17 = vector.broadcast %16 : vector<1x256xf32> to vector<24x256xf32>
      %18 = arith.addf %15, %17 : vector<24x256xf32>
      %cst_15 = arith.constant 0.000000e+00 : f32
      %19 = vector.broadcast %cst_15 : f32 to vector<24x256xf32>
      %20 = arith.maximumf %18, %19 : vector<24x256xf32>
      %21 = arith.truncf %20 : vector<24x256xf32> to vector<24x256xbf16>
      %c0_16 = arith.constant 0 : index
      %c0_17 = arith.constant 0 : index
      %22 = vector.load %arg7[%c0_16, %c0_17] : memref<24x256xbf16, #tpu.memory_space<vmem>>, vector<24x256xbf16>
      tpu.vector_store %arg7[%c0_16, %c0_17], %21 {strides = array<i32>} : memref<24x256xbf16, #tpu.memory_space<vmem>>, vector<24x256xbf16>,
    } else {
    }
    return
  }
  func.func @transform_0(%arg0: i32, %arg1: i32, %arg2: i32) -> (i32, i32) {
    %c0_i32 = arith.constant 0 : i32
    return %arg0, %arg2 : i32, i32
  }
  func.func @transform_1(%arg0: i32, %arg1: i32, %arg2: i32) -> (i32, i32) {
    %c0_i32 = arith.constant 0 : i32
    return %arg2, %arg1 : i32, i32
  }
  func.func @transform_2(%arg0: i32, %arg1: i32, %arg2: i32) -> (i32, i32) {
    %c0_i32 = arith.constant 0 : i32
    %c0_i32_0 = arith.constant 0 : i32
    return %c0_i32, %arg1 : i32, i32
  }
  func.func @transform_3(%arg0: i32, %arg1: i32, %arg2: i32) -> (i32, i32) {
    %c0_i32 = arith.constant 0 : i32
    %c0_i32_0 = arith.constant 0 : i32
    return %c0_i32, %arg1 : i32, i32
  }
  func.func @transform_4(%arg0: i32, %arg1: i32, %arg2: i32) -> (i32, i32) {
    %c0_i32 = arith.constant 0 : i32
    return %arg0, %arg1 : i32, i32
  }
}

module attributes {stable_mosaic.version = 11 : i64} {
  func.func @_fused_matmul_kernel(%arg0: i32, %arg1: i32, %arg2: i32, %arg3: memref<24x512xbf16, #tpu.memory_space<vmem>>, %arg4: memref<512x256xbf16, #tpu.memory_space<vmem>>, %arg5: memref<1x256xf32, #tpu.memory_space<vmem>>, %arg6: memref<1x256xf32, #tpu.memory_space<vmem>>, %arg7: memref<24x256xbf16, #tpu.memory_space<vmem>>, %arg8: memref<24x256xf32, #tpu.memory_space<vmem>>) attributes {dimension_semantics = [#tpu.dimension_semantics<parallel>, #tpu.dimension_semantics<parallel>, #tpu.dimension_semantics<arbitrary>], iteration_bounds = array<i64: 1, 4, 1>, scalar_prefetch = 0 : i64, scratch_operands = 1 : i64, tpu.core_type = #tpu.core_type<tc>, window_params = [{transform_indices = @transform_0, window_bounds = array<i64: 24, 512>}, {transform_indices = @transform_1, window_bounds = array<i64: 512, 256>}, {transform_indices = @transform_2, window_bounds = array<i64: 1, 256>}, {transform_indices = @transform_3, window_bounds = array<i64: 1, 256>}, {transform_indices = @transform_4, window_bounds = array<i64: 24, 256>}]} {
    %c0_i32 = arith.constant 0 : i32
    %0 = arith.cmpi eq, %arg2, %c0_i32 : i32
    %1 = arith.extui %0 : i1 to i32
    %c0_i32_0 = arith.constant 0 : i32
    %2 = arith.cmpi ne, %1, %c0_i32_0 : i32
    scf.if %2 {
      %cst_10 = arith.constant 0.000000e+00 : f32
      %12 = vector.broadcast %cst_10 : f32 to vector<24x256xf32>
      %c0_11 = arith.constant 0 : index
      %c0_12 = arith.constant 0 : index
      %13 = vector.load %arg8[%c0_11, %c0_12] : memref<24x256xf32, #tpu.memory_space<vmem>>, vector<24x256xf32>
      tpu.vector_store %arg8[%c0_11, %c0_12], %12 {strides = array<i32>} : memref<24x256xf32, #tpu.memory_space<vmem>>, vector<24x256xf32>,
    } else {
    }
    %c0 = arith.constant 0 : index
    %c0_1 = arith.constant 0 : index
    %3 = vector.load %arg8[%c0, %c0_1] : memref<24x256xf32, #tpu.memory_space<vmem>>, vector<24x256xf32>
    %c0_2 = arith.constant 0 : index
    %c0_3 = arith.constant 0 : index
    %4 = vector.load %arg3[%c0_2, %c0_3] : memref<24x512xbf16, #tpu.memory_space<vmem>>, vector<24x512xbf16>
    %c0_4 = arith.constant 0 : index
    %c0_5 = arith.constant 0 : index
    %5 = vector.load %arg4[%c0_4, %c0_5] : memref<512x256xbf16, #tpu.memory_space<vmem>>, vector<512x256xbf16>
    %cst = arith.constant dense<0.000000e+00> : vector<24x256xf32>
    %6 = tpu.matmul %4, %5, %cst {dimension_numbers = #tpu.dot_dimension_numbers<[1], [0], [0], [1], [0, 0, 1, 1], [], []>} : vector<24x512xbf16>, vector<512x256xbf16>, vector<24x256xf32> -> vector<24x256xf32>
    %7 = arith.addf %3, %6 : vector<24x256xf32>
    %c0_6 = arith.constant 0 : index
    %c0_7 = arith.constant 0 : index
    %8 = vector.load %arg8[%c0_6, %c0_7] : memref<24x256xf32, #tpu.memory_space<vmem>>, vector<24x256xf32>
    tpu.vector_store %arg8[%c0_6, %c0_7], %7 {strides = array<i32>} : memref<24x256xf32, #tpu.memory_space<vmem>>, vector<24x256xf32>,
    %c0_i32_8 = arith.constant 0 : i32
    %9 = arith.cmpi eq, %arg2, %c0_i32_8 : i32
    %10 = arith.extui %9 : i1 to i32
    %c0_i32_9 = arith.constant 0 : i32
    %11 = arith.cmpi ne, %10, %c0_i32_9 : i32
    scf.if %11 {
      %c0_10 = arith.constant 0 : index
      %c0_11 = arith.constant 0 : index
      %12 = vector.load %arg8[%c0_10, %c0_11] : memref<24x256xf32, #tpu.memory_space<vmem>>, vector<24x256xf32>
      %c0_12 = arith.constant 0 : index
      %c0_13 = arith.constant 0 : index
      %13 = vector.load %arg5[%c0_12, %c0_13] : memref<1x256xf32, #tpu.memory_space<vmem>>, vector<1x256xf32>
      %14 = vector.broadcast %13 : vector<1x256xf32> to vector<24x256xf32>
      %15 = arith.mulf %12, %14 : vector<24x256xf32>
      %c0_14 = arith.constant 0 : index
      %c0_15 = arith.constant 0 : index
      %16 = vector.load %arg6[%c0_14, %c0_15] : memref<1x256xf32, #tpu.memory_space<vmem>>, vector<1x256xf32>
      %17 = vector.broadcast %16 : vector<1x256xf32> to vector<24x256xf32>
      %18 = arith.addf %15, %17 : vector<24x256xf32>
      %19 = arith.truncf %18 : vector<24x256xf32> to vector<24x256xbf16>
      %c0_16 = arith.constant 0 : index
      %c0_17 = arith.constant 0 : index
      %20 = vector.load %arg7[%c0_16, %c0_17] : memref<24x256xbf16, #tpu.memory_space<vmem>>, vector<24x256xbf16>
      tpu.vector_store %arg7[%c0_16, %c0_17], %19 {strides = array<i32>} : memref<24x256xbf16, #tpu.memory_space<vmem>>, vector<24x256xbf16>,
    } else {
    }
    return
  }
  func.func @transform_0(%arg0: i32, %arg1: i32, %arg2: i32) -> (i32, i32) {
    %c0_i32 = arith.constant 0 : i32
    return %arg0, %arg2 : i32, i32
  }
  func.func @transform_1(%arg0: i32, %arg1: i32, %arg2: i32) -> (i32, i32) {
    %c0_i32 = arith.constant 0 : i32
    return %arg2, %arg1 : i32, i32
  }
  func.func @transform_2(%arg0: i32, %arg1: i32, %arg2: i32) -> (i32, i32) {
    %c0_i32 = arith.constant 0 : i32
    %c0_i32_0 = arith.constant 0 : i32
    return %c0_i32, %arg1 : i32, i32
  }
  func.func @transform_3(%arg0: i32, %arg1: i32, %arg2: i32) -> (i32, i32) {
    %c0_i32 = arith.constant 0 : i32
    %c0_i32_0 = arith.constant 0 : i32
    return %c0_i32, %arg1 : i32, i32
  }
  func.func @transform_4(%arg0: i32, %arg1: i32, %arg2: i32) -> (i32, i32) {
    %c0_i32 = arith.constant 0 : i32
    return %arg0, %arg1 : i32, i32
  }
}

module attributes {stable_mosaic.version = 11 : i64} {
  func.func @_fused_matmul_kernel(%arg0: i32, %arg1: i32, %arg2: i32, %arg3: memref<24x512xbf16, #tpu.memory_space<vmem>>, %arg4: memref<512x256xbf16, #tpu.memory_space<vmem>>, %arg5: memref<1x256xf32, #tpu.memory_space<vmem>>, %arg6: memref<1x256xf32, #tpu.memory_space<vmem>>, %arg7: memref<24x256xbf16, #tpu.memory_space<vmem>>, %arg8: memref<24x256xf32, #tpu.memory_space<vmem>>) attributes {dimension_semantics = [#tpu.dimension_semantics<parallel>, #tpu.dimension_semantics<parallel>, #tpu.dimension_semantics<arbitrary>], iteration_bounds = array<i64: 1, 2, 2>, scalar_prefetch = 0 : i64, scratch_operands = 1 : i64, tpu.core_type = #tpu.core_type<tc>, window_params = [{transform_indices = @transform_0, window_bounds = array<i64: 24, 512>}, {transform_indices = @transform_1, window_bounds = array<i64: 512, 256>}, {transform_indices = @transform_2, window_bounds = array<i64: 1, 256>}, {transform_indices = @transform_3, window_bounds = array<i64: 1, 256>}, {transform_indices = @transform_4, window_bounds = array<i64: 24, 256>}]} {
    %c0_i32 = arith.constant 0 : i32
    %0 = arith.cmpi eq, %arg2, %c0_i32 : i32
    %1 = arith.extui %0 : i1 to i32
    %c0_i32_0 = arith.constant 0 : i32
    %2 = arith.cmpi ne, %1, %c0_i32_0 : i32
    scf.if %2 {
      %cst_9 = arith.constant 0.000000e+00 : f32
      %12 = vector.broadcast %cst_9 : f32 to vector<24x256xf32>
      %c0_10 = arith.constant 0 : index
      %c0_11 = arith.constant 0 : index
      %13 = vector.load %arg8[%c0_10, %c0_11] : memref<24x256xf32, #tpu.memory_space<vmem>>, vector<24x256xf32>
      tpu.vector_store %arg8[%c0_10, %c0_11], %12 {strides = array<i32>} : memref<24x256xf32, #tpu.memory_space<vmem>>, vector<24x256xf32>,
    } else {
    }
    %c0 = arith.constant 0 : index
    %c0_1 = arith.constant 0 : index
    %3 = vector.load %arg8[%c0, %c0_1] : memref<24x256xf32, #tpu.memory_space<vmem>>, vector<24x256xf32>
    %c0_2 = arith.constant 0 : index
    %c0_3 = arith.constant 0 : index
    %4 = vector.load %arg3[%c0_2, %c0_3] : memref<24x512xbf16, #tpu.memory_space<vmem>>, vector<24x512xbf16>
    %c0_4 = arith.constant 0 : index
    %c0_5 = arith.constant 0 : index
    %5 = vector.load %arg4[%c0_4, %c0_5] : memref<512x256xbf16, #tpu.memory_space<vmem>>, vector<512x256xbf16>
    %cst = arith.constant dense<0.000000e+00> : vector<24x256xf32>
    %6 = tpu.matmul %4, %5, %cst {dimension_numbers = #tpu.dot_dimension_numbers<[1], [0], [0], [1], [0, 0, 1, 1], [], []>} : vector<24x512xbf16>, vector<512x256xbf16>, vector<24x256xf32> -> vector<24x256xf32>
    %7 = arith.addf %3, %6 : vector<24x256xf32>
    %c0_6 = arith.constant 0 : index
    %c0_7 = arith.constant 0 : index
    %8 = vector.load %arg8[%c0_6, %c0_7] : memref<24x256xf32, #tpu.memory_space<vmem>>, vector<24x256xf32>
    tpu.vector_store %arg8[%c0_6, %c0_7], %7 {strides = array<i32>} : memref<24x256xf32, #tpu.memory_space<vmem>>, vector<24x256xf32>,
    %c1_i32 = arith.constant 1 : i32
    %9 = arith.cmpi eq, %arg2, %c1_i32 : i32
    %10 = arith.extui %9 : i1 to i32
    %c0_i32_8 = arith.constant 0 : i32
    %11 = arith.cmpi ne, %10, %c0_i32_8 : i32
    scf.if %11 {
      %c0_9 = arith.constant 0 : index
      %c0_10 = arith.constant 0 : index
      %12 = vector.load %arg8[%c0_9, %c0_10] : memref<24x256xf32, #tpu.memory_space<vmem>>, vector<24x256xf32>
      %c0_11 = arith.constant 0 : index
      %c0_12 = arith.constant 0 : index
      %13 = vector.load %arg5[%c0_11, %c0_12] : memref<1x256xf32, #tpu.memory_space<vmem>>, vector<1x256xf32>
      %14 = vector.broadcast %13 : vector<1x256xf32> to vector<24x256xf32>
      %15 = arith.mulf %12, %14 : vector<24x256xf32>
      %c0_13 = arith.constant 0 : index
      %c0_14 = arith.constant 0 : index
      %16 = vector.load %arg6[%c0_13, %c0_14] : memref<1x256xf32, #tpu.memory_space<vmem>>, vector<1x256xf32>
      %17 = vector.broadcast %16 : vector<1x256xf32> to vector<24x256xf32>
      %18 = arith.addf %15, %17 : vector<24x256xf32>
      %cst_15 = arith.constant 0.000000e+00 : f32
      %19 = vector.broadcast %cst_15 : f32 to vector<24x256xf32>
      %20 = arith.maximumf %18, %19 : vector<24x256xf32>
      %21 = arith.truncf %20 : vector<24x256xf32> to vector<24x256xbf16>
      %c0_16 = arith.constant 0 : index
      %c0_17 = arith.constant 0 : index
      %22 = vector.load %arg7[%c0_16, %c0_17] : memref<24x256xbf16, #tpu.memory_space<vmem>>, vector<24x256xbf16>
      tpu.vector_store %arg7[%c0_16, %c0_17], %21 {strides = array<i32>} : memref<24x256xbf16, #tpu.memory_space<vmem>>, vector<24x256xbf16>,
    } else {
    }
    return
  }
  func.func @transform_0(%arg0: i32, %arg1: i32, %arg2: i32) -> (i32, i32) {
    %c0_i32 = arith.constant 0 : i32
    return %arg0, %arg2 : i32, i32
  }
  func.func @transform_1(%arg0: i32, %arg1: i32, %arg2: i32) -> (i32, i32) {
    %c0_i32 = arith.constant 0 : i32
    return %arg2, %arg1 : i32, i32
  }
  func.func @transform_2(%arg0: i32, %arg1: i32, %arg2: i32) -> (i32, i32) {
    %c0_i32 = arith.constant 0 : i32
    %c0_i32_0 = arith.constant 0 : i32
    return %c0_i32, %arg1 : i32, i32
  }
  func.func @transform_3(%arg0: i32, %arg1: i32, %arg2: i32) -> (i32, i32) {
    %c0_i32 = arith.constant 0 : i32
    %c0_i32_0 = arith.constant 0 : i32
    return %c0_i32, %arg1 : i32, i32
  }
  func.func @transform_4(%arg0: i32, %arg1: i32, %arg2: i32) -> (i32, i32) {
    %c0_i32 = arith.constant 0 : i32
    return %arg0, %arg1 : i32, i32
  }
}

module attributes {stable_mosaic.version = 11 : i64} {
  func.func @_fused_matmul_kernel(%arg0: i32, %arg1: i32, %arg2: i32, %arg3: memref<24x512xbf16, #tpu.memory_space<vmem>>, %arg4: memref<512x256xbf16, #tpu.memory_space<vmem>>, %arg5: memref<1x256xf32, #tpu.memory_space<vmem>>, %arg6: memref<1x256xf32, #tpu.memory_space<vmem>>, %arg7: memref<24x256xbf16, #tpu.memory_space<vmem>>, %arg8: memref<24x256xf32, #tpu.memory_space<vmem>>) attributes {dimension_semantics = [#tpu.dimension_semantics<parallel>, #tpu.dimension_semantics<parallel>, #tpu.dimension_semantics<arbitrary>], iteration_bounds = array<i64: 1, 2, 9>, scalar_prefetch = 0 : i64, scratch_operands = 1 : i64, tpu.core_type = #tpu.core_type<tc>, window_params = [{transform_indices = @transform_0, window_bounds = array<i64: 24, 512>}, {transform_indices = @transform_1, window_bounds = array<i64: 512, 256>}, {transform_indices = @transform_2, window_bounds = array<i64: 1, 256>}, {transform_indices = @transform_3, window_bounds = array<i64: 1, 256>}, {transform_indices = @transform_4, window_bounds = array<i64: 24, 256>}]} {
    %c0_i32 = arith.constant 0 : i32
    %0 = arith.cmpi eq, %arg2, %c0_i32 : i32
    %1 = arith.extui %0 : i1 to i32
    %c0_i32_0 = arith.constant 0 : i32
    %2 = arith.cmpi ne, %1, %c0_i32_0 : i32
    scf.if %2 {
      %cst_9 = arith.constant 0.000000e+00 : f32
      %12 = vector.broadcast %cst_9 : f32 to vector<24x256xf32>
      %c0_10 = arith.constant 0 : index
      %c0_11 = arith.constant 0 : index
      %13 = vector.load %arg8[%c0_10, %c0_11] : memref<24x256xf32, #tpu.memory_space<vmem>>, vector<24x256xf32>
      tpu.vector_store %arg8[%c0_10, %c0_11], %12 {strides = array<i32>} : memref<24x256xf32, #tpu.memory_space<vmem>>, vector<24x256xf32>,
    } else {
    }
    %c0 = arith.constant 0 : index
    %c0_1 = arith.constant 0 : index
    %3 = vector.load %arg8[%c0, %c0_1] : memref<24x256xf32, #tpu.memory_space<vmem>>, vector<24x256xf32>
    %c0_2 = arith.constant 0 : index
    %c0_3 = arith.constant 0 : index
    %4 = vector.load %arg3[%c0_2, %c0_3] : memref<24x512xbf16, #tpu.memory_space<vmem>>, vector<24x512xbf16>
    %c0_4 = arith.constant 0 : index
    %c0_5 = arith.constant 0 : index
    %5 = vector.load %arg4[%c0_4, %c0_5] : memref<512x256xbf16, #tpu.memory_space<vmem>>, vector<512x256xbf16>
    %cst = arith.constant dense<0.000000e+00> : vector<24x256xf32>
    %6 = tpu.matmul %4, %5, %cst {dimension_numbers = #tpu.dot_dimension_numbers<[1], [0], [0], [1], [0, 0, 1, 1], [], []>} : vector<24x512xbf16>, vector<512x256xbf16>, vector<24x256xf32> -> vector<24x256xf32>
    %7 = arith.addf %3, %6 : vector<24x256xf32>
    %c0_6 = arith.constant 0 : index
    %c0_7 = arith.constant 0 : index
    %8 = vector.load %arg8[%c0_6, %c0_7] : memref<24x256xf32, #tpu.memory_space<vmem>>, vector<24x256xf32>
    tpu.vector_store %arg8[%c0_6, %c0_7], %7 {strides = array<i32>} : memref<24x256xf32, #tpu.memory_space<vmem>>, vector<24x256xf32>,
    %c8_i32 = arith.constant 8 : i32
    %9 = arith.cmpi eq, %arg2, %c8_i32 : i32
    %10 = arith.extui %9 : i1 to i32
    %c0_i32_8 = arith.constant 0 : i32
    %11 = arith.cmpi ne, %10, %c0_i32_8 : i32
    scf.if %11 {
      %c0_9 = arith.constant 0 : index
      %c0_10 = arith.constant 0 : index
      %12 = vector.load %arg8[%c0_9, %c0_10] : memref<24x256xf32, #tpu.memory_space<vmem>>, vector<24x256xf32>
      %c0_11 = arith.constant 0 : index
      %c0_12 = arith.constant 0 : index
      %13 = vector.load %arg5[%c0_11, %c0_12] : memref<1x256xf32, #tpu.memory_space<vmem>>, vector<1x256xf32>
      %14 = vector.broadcast %13 : vector<1x256xf32> to vector<24x256xf32>
      %15 = arith.mulf %12, %14 : vector<24x256xf32>
      %c0_13 = arith.constant 0 : index
      %c0_14 = arith.constant 0 : index
      %16 = vector.load %arg6[%c0_13, %c0_14] : memref<1x256xf32, #tpu.memory_space<vmem>>, vector<1x256xf32>
      %17 = vector.broadcast %16 : vector<1x256xf32> to vector<24x256xf32>
      %18 = arith.addf %15, %17 : vector<24x256xf32>
      %cst_15 = arith.constant 0.000000e+00 : f32
      %19 = vector.broadcast %cst_15 : f32 to vector<24x256xf32>
      %20 = arith.maximumf %18, %19 : vector<24x256xf32>
      %21 = arith.truncf %20 : vector<24x256xf32> to vector<24x256xbf16>
      %c0_16 = arith.constant 0 : index
      %c0_17 = arith.constant 0 : index
      %22 = vector.load %arg7[%c0_16, %c0_17] : memref<24x256xbf16, #tpu.memory_space<vmem>>, vector<24x256xbf16>
      tpu.vector_store %arg7[%c0_16, %c0_17], %21 {strides = array<i32>} : memref<24x256xbf16, #tpu.memory_space<vmem>>, vector<24x256xbf16>,
    } else {
    }
    return
  }
  func.func @transform_0(%arg0: i32, %arg1: i32, %arg2: i32) -> (i32, i32) {
    %c0_i32 = arith.constant 0 : i32
    return %arg0, %arg2 : i32, i32
  }
  func.func @transform_1(%arg0: i32, %arg1: i32, %arg2: i32) -> (i32, i32) {
    %c0_i32 = arith.constant 0 : i32
    return %arg2, %arg1 : i32, i32
  }
  func.func @transform_2(%arg0: i32, %arg1: i32, %arg2: i32) -> (i32, i32) {
    %c0_i32 = arith.constant 0 : i32
    %c0_i32_0 = arith.constant 0 : i32
    return %c0_i32, %arg1 : i32, i32
  }
  func.func @transform_3(%arg0: i32, %arg1: i32, %arg2: i32) -> (i32, i32) {
    %c0_i32 = arith.constant 0 : i32
    %c0_i32_0 = arith.constant 0 : i32
    return %c0_i32, %arg1 : i32, i32
  }
  func.func @transform_4(%arg0: i32, %arg1: i32, %arg2: i32) -> (i32, i32) {
    %c0_i32 = arith.constant 0 : i32
    return %arg0, %arg1 : i32, i32
  }
}

module attributes {stable_mosaic.version = 11 : i64} {
  func.func @_fused_matmul_kernel(%arg0: i32, %arg1: i32, %arg2: i32, %arg3: memref<24x512xbf16, #tpu.memory_space<vmem>>, %arg4: memref<512x256xbf16, #tpu.memory_space<vmem>>, %arg5: memref<1x256xf32, #tpu.memory_space<vmem>>, %arg6: memref<1x256xf32, #tpu.memory_space<vmem>>, %arg7: memref<24x256xbf16, #tpu.memory_space<vmem>>, %arg8: memref<24x256xbf16, #tpu.memory_space<vmem>>, %arg9: memref<24x256xf32, #tpu.memory_space<vmem>>) attributes {dimension_semantics = [#tpu.dimension_semantics<parallel>, #tpu.dimension_semantics<parallel>, #tpu.dimension_semantics<arbitrary>], iteration_bounds = array<i64: 1, 8, 1>, scalar_prefetch = 0 : i64, scratch_operands = 1 : i64, tpu.core_type = #tpu.core_type<tc>, window_params = [{transform_indices = @transform_0, window_bounds = array<i64: 24, 512>}, {transform_indices = @transform_1, window_bounds = array<i64: 512, 256>}, {transform_indices = @transform_2, window_bounds = array<i64: 1, 256>}, {transform_indices = @transform_3, window_bounds = array<i64: 1, 256>}, {transform_indices = @transform_4, window_bounds = array<i64: 24, 256>}, {transform_indices = @transform_5, window_bounds = array<i64: 24, 256>}]} {
    %c0_i32 = arith.constant 0 : i32
    %0 = arith.cmpi eq, %arg2, %c0_i32 : i32
    %1 = arith.extui %0 : i1 to i32
    %c0_i32_0 = arith.constant 0 : i32
    %2 = arith.cmpi ne, %1, %c0_i32_0 : i32
    scf.if %2 {
      %cst_10 = arith.constant 0.000000e+00 : f32
      %12 = vector.broadcast %cst_10 : f32 to vector<24x256xf32>
      %c0_11 = arith.constant 0 : index
      %c0_12 = arith.constant 0 : index
      %13 = vector.load %arg9[%c0_11, %c0_12] : memref<24x256xf32, #tpu.memory_space<vmem>>, vector<24x256xf32>
      tpu.vector_store %arg9[%c0_11, %c0_12], %12 {strides = array<i32>} : memref<24x256xf32, #tpu.memory_space<vmem>>, vector<24x256xf32>,
    } else {
    }
    %c0 = arith.constant 0 : index
    %c0_1 = arith.constant 0 : index
    %3 = vector.load %arg9[%c0, %c0_1] : memref<24x256xf32, #tpu.memory_space<vmem>>, vector<24x256xf32>
    %c0_2 = arith.constant 0 : index
    %c0_3 = arith.constant 0 : index
    %4 = vector.load %arg3[%c0_2, %c0_3] : memref<24x512xbf16, #tpu.memory_space<vmem>>, vector<24x512xbf16>
    %c0_4 = arith.constant 0 : index
    %c0_5 = arith.constant 0 : index
    %5 = vector.load %arg4[%c0_4, %c0_5] : memref<512x256xbf16, #tpu.memory_space<vmem>>, vector<512x256xbf16>
    %cst = arith.constant dense<0.000000e+00> : vector<24x256xf32>
    %6 = tpu.matmul %4, %5, %cst {dimension_numbers = #tpu.dot_dimension_numbers<[1], [0], [0], [1], [0, 0, 1, 1], [], []>} : vector<24x512xbf16>, vector<512x256xbf16>, vector<24x256xf32> -> vector<24x256xf32>
    %7 = arith.addf %3, %6 : vector<24x256xf32>
    %c0_6 = arith.constant 0 : index
    %c0_7 = arith.constant 0 : index
    %8 = vector.load %arg9[%c0_6, %c0_7] : memref<24x256xf32, #tpu.memory_space<vmem>>, vector<24x256xf32>
    tpu.vector_store %arg9[%c0_6, %c0_7], %7 {strides = array<i32>} : memref<24x256xf32, #tpu.memory_space<vmem>>, vector<24x256xf32>,
    %c0_i32_8 = arith.constant 0 : i32
    %9 = arith.cmpi eq, %arg2, %c0_i32_8 : i32
    %10 = arith.extui %9 : i1 to i32
    %c0_i32_9 = arith.constant 0 : i32
    %11 = arith.cmpi ne, %10, %c0_i32_9 : i32
    scf.if %11 {
      %c0_10 = arith.constant 0 : index
      %c0_11 = arith.constant 0 : index
      %12 = vector.load %arg9[%c0_10, %c0_11] : memref<24x256xf32, #tpu.memory_space<vmem>>, vector<24x256xf32>
      %c0_12 = arith.constant 0 : index
      %c0_13 = arith.constant 0 : index
      %13 = vector.load %arg5[%c0_12, %c0_13] : memref<1x256xf32, #tpu.memory_space<vmem>>, vector<1x256xf32>
      %14 = vector.broadcast %13 : vector<1x256xf32> to vector<24x256xf32>
      %15 = arith.mulf %12, %14 : vector<24x256xf32>
      %c0_14 = arith.constant 0 : index
      %c0_15 = arith.constant 0 : index
      %16 = vector.load %arg6[%c0_14, %c0_15] : memref<1x256xf32, #tpu.memory_space<vmem>>, vector<1x256xf32>
      %17 = vector.broadcast %16 : vector<1x256xf32> to vector<24x256xf32>
      %18 = arith.addf %15, %17 : vector<24x256xf32>
      %c0_16 = arith.constant 0 : index
      %c0_17 = arith.constant 0 : index
      %19 = vector.load %arg7[%c0_16, %c0_17] : memref<24x256xbf16, #tpu.memory_space<vmem>>, vector<24x256xbf16>
      %20 = arith.extf %19 : vector<24x256xbf16> to vector<24x256xf32>
      %21 = arith.addf %18, %20 : vector<24x256xf32>
      %cst_18 = arith.constant 0.000000e+00 : f32
      %22 = vector.broadcast %cst_18 : f32 to vector<24x256xf32>
      %23 = arith.maximumf %21, %22 : vector<24x256xf32>
      %24 = arith.truncf %23 : vector<24x256xf32> to vector<24x256xbf16>
      %c0_19 = arith.constant 0 : index
      %c0_20 = arith.constant 0 : index
      %25 = vector.load %arg8[%c0_19, %c0_20] : memref<24x256xbf16, #tpu.memory_space<vmem>>, vector<24x256xbf16>
      tpu.vector_store %arg8[%c0_19, %c0_20], %24 {strides = array<i32>} : memref<24x256xbf16, #tpu.memory_space<vmem>>, vector<24x256xbf16>,
    } else {
    }
    return
  }
  func.func @transform_0(%arg0: i32, %arg1: i32, %arg2: i32) -> (i32, i32) {
    %c0_i32 = arith.constant 0 : i32
    return %arg0, %arg2 : i32, i32
  }
  func.func @transform_1(%arg0: i32, %arg1: i32, %arg2: i32) -> (i32, i32) {
    %c0_i32 = arith.constant 0 : i32
    return %arg2, %arg1 : i32, i32
  }
  func.func @transform_2(%arg0: i32, %arg1: i32, %arg2: i32) -> (i32, i32) {
    %c0_i32 = arith.constant 0 : i32
    %c0_i32_0 = arith.constant 0 : i32
    return %c0_i32, %arg1 : i32, i32
  }
  func.func @transform_3(%arg0: i32, %arg1: i32, %arg2: i32) -> (i32, i32) {
    %c0_i32 = arith.constant 0 : i32
    %c0_i32_0 = arith.constant 0 : i32
    return %c0_i32, %arg1 : i32, i32
  }
  func.func @transform_4(%arg0: i32, %arg1: i32, %arg2: i32) -> (i32, i32) {
    %c0_i32 = arith.constant 0 : i32
    return %arg0, %arg1 : i32, i32
  }
  func.func @transform_5(%arg0: i32, %arg1: i32, %arg2: i32) -> (i32, i32) {
    %c0_i32 = arith.constant 0 : i32
    return %arg0, %arg1 : i32, i32
  }
}

module attributes {stable_mosaic.version = 11 : i64} {
  func.func @_fused_matmul_kernel(%arg0: i32, %arg1: i32, %arg2: i32, %arg3: memref<24x512xbf16, #tpu.memory_space<vmem>>, %arg4: memref<512x256xbf16, #tpu.memory_space<vmem>>, %arg5: memref<1x256xf32, #tpu.memory_space<vmem>>, %arg6: memref<1x256xf32, #tpu.memory_space<vmem>>, %arg7: memref<24x256xbf16, #tpu.memory_space<vmem>>, %arg8: memref<24x256xf32, #tpu.memory_space<vmem>>) attributes {dimension_semantics = [#tpu.dimension_semantics<parallel>, #tpu.dimension_semantics<parallel>, #tpu.dimension_semantics<arbitrary>], iteration_bounds = array<i64: 1, 8, 2>, scalar_prefetch = 0 : i64, scratch_operands = 1 : i64, tpu.core_type = #tpu.core_type<tc>, window_params = [{transform_indices = @transform_0, window_bounds = array<i64: 24, 512>}, {transform_indices = @transform_1, window_bounds = array<i64: 512, 256>}, {transform_indices = @transform_2, window_bounds = array<i64: 1, 256>}, {transform_indices = @transform_3, window_bounds = array<i64: 1, 256>}, {transform_indices = @transform_4, window_bounds = array<i64: 24, 256>}]} {
    %c0_i32 = arith.constant 0 : i32
    %0 = arith.cmpi eq, %arg2, %c0_i32 : i32
    %1 = arith.extui %0 : i1 to i32
    %c0_i32_0 = arith.constant 0 : i32
    %2 = arith.cmpi ne, %1, %c0_i32_0 : i32
    scf.if %2 {
      %cst_9 = arith.constant 0.000000e+00 : f32
      %12 = vector.broadcast %cst_9 : f32 to vector<24x256xf32>
      %c0_10 = arith.constant 0 : index
      %c0_11 = arith.constant 0 : index
      %13 = vector.load %arg8[%c0_10, %c0_11] : memref<24x256xf32, #tpu.memory_space<vmem>>, vector<24x256xf32>
      tpu.vector_store %arg8[%c0_10, %c0_11], %12 {strides = array<i32>} : memref<24x256xf32, #tpu.memory_space<vmem>>, vector<24x256xf32>,
    } else {
    }
    %c0 = arith.constant 0 : index
    %c0_1 = arith.constant 0 : index
    %3 = vector.load %arg8[%c0, %c0_1] : memref<24x256xf32, #tpu.memory_space<vmem>>, vector<24x256xf32>
    %c0_2 = arith.constant 0 : index
    %c0_3 = arith.constant 0 : index
    %4 = vector.load %arg3[%c0_2, %c0_3] : memref<24x512xbf16, #tpu.memory_space<vmem>>, vector<24x512xbf16>
    %c0_4 = arith.constant 0 : index
    %c0_5 = arith.constant 0 : index
    %5 = vector.load %arg4[%c0_4, %c0_5] : memref<512x256xbf16, #tpu.memory_space<vmem>>, vector<512x256xbf16>
    %cst = arith.constant dense<0.000000e+00> : vector<24x256xf32>
    %6 = tpu.matmul %4, %5, %cst {dimension_numbers = #tpu.dot_dimension_numbers<[1], [0], [0], [1], [0, 0, 1, 1], [], []>} : vector<24x512xbf16>, vector<512x256xbf16>, vector<24x256xf32> -> vector<24x256xf32>
    %7 = arith.addf %3, %6 : vector<24x256xf32>
    %c0_6 = arith.constant 0 : index
    %c0_7 = arith.constant 0 : index
    %8 = vector.load %arg8[%c0_6, %c0_7] : memref<24x256xf32, #tpu.memory_space<vmem>>, vector<24x256xf32>
    tpu.vector_store %arg8[%c0_6, %c0_7], %7 {strides = array<i32>} : memref<24x256xf32, #tpu.memory_space<vmem>>, vector<24x256xf32>,
    %c1_i32 = arith.constant 1 : i32
    %9 = arith.cmpi eq, %arg2, %c1_i32 : i32
    %10 = arith.extui %9 : i1 to i32
    %c0_i32_8 = arith.constant 0 : i32
    %11 = arith.cmpi ne, %10, %c0_i32_8 : i32
    scf.if %11 {
      %c0_9 = arith.constant 0 : index
      %c0_10 = arith.constant 0 : index
      %12 = vector.load %arg8[%c0_9, %c0_10] : memref<24x256xf32, #tpu.memory_space<vmem>>, vector<24x256xf32>
      %c0_11 = arith.constant 0 : index
      %c0_12 = arith.constant 0 : index
      %13 = vector.load %arg5[%c0_11, %c0_12] : memref<1x256xf32, #tpu.memory_space<vmem>>, vector<1x256xf32>
      %14 = vector.broadcast %13 : vector<1x256xf32> to vector<24x256xf32>
      %15 = arith.mulf %12, %14 : vector<24x256xf32>
      %c0_13 = arith.constant 0 : index
      %c0_14 = arith.constant 0 : index
      %16 = vector.load %arg6[%c0_13, %c0_14] : memref<1x256xf32, #tpu.memory_space<vmem>>, vector<1x256xf32>
      %17 = vector.broadcast %16 : vector<1x256xf32> to vector<24x256xf32>
      %18 = arith.addf %15, %17 : vector<24x256xf32>
      %19 = arith.truncf %18 : vector<24x256xf32> to vector<24x256xbf16>
      %c0_15 = arith.constant 0 : index
      %c0_16 = arith.constant 0 : index
      %20 = vector.load %arg7[%c0_15, %c0_16] : memref<24x256xbf16, #tpu.memory_space<vmem>>, vector<24x256xbf16>
      tpu.vector_store %arg7[%c0_15, %c0_16], %19 {strides = array<i32>} : memref<24x256xbf16, #tpu.memory_space<vmem>>, vector<24x256xbf16>,
    } else {
    }
    return
  }
  func.func @transform_0(%arg0: i32, %arg1: i32, %arg2: i32) -> (i32, i32) {
    %c0_i32 = arith.constant 0 : i32
    return %arg0, %arg2 : i32, i32
  }
  func.func @transform_1(%arg0: i32, %arg1: i32, %arg2: i32) -> (i32, i32) {
    %c0_i32 = arith.constant 0 : i32
    return %arg2, %arg1 : i32, i32
  }
  func.func @transform_2(%arg0: i32, %arg1: i32, %arg2: i32) -> (i32, i32) {
    %c0_i32 = arith.constant 0 : i32
    %c0_i32_0 = arith.constant 0 : i32
    return %c0_i32, %arg1 : i32, i32
  }
  func.func @transform_3(%arg0: i32, %arg1: i32, %arg2: i32) -> (i32, i32) {
    %c0_i32 = arith.constant 0 : i32
    %c0_i32_0 = arith.constant 0 : i32
    return %c0_i32, %arg1 : i32, i32
  }
  func.func @transform_4(%arg0: i32, %arg1: i32, %arg2: i32) -> (i32, i32) {
    %c0_i32 = arith.constant 0 : i32
    return %arg0, %arg1 : i32, i32
  }
}

module attributes {stable_mosaic.version = 11 : i64} {
  func.func @_fused_matmul_kernel(%arg0: i32, %arg1: i32, %arg2: i32, %arg3: memref<24x512xbf16, #tpu.memory_space<vmem>>, %arg4: memref<512x128xbf16, #tpu.memory_space<vmem>>, %arg5: memref<1x128xf32, #tpu.memory_space<vmem>>, %arg6: memref<1x128xf32, #tpu.memory_space<vmem>>, %arg7: memref<24x128xf32, #tpu.memory_space<vmem>>, %arg8: memref<24x128xf32, #tpu.memory_space<vmem>>) attributes {dimension_semantics = [#tpu.dimension_semantics<parallel>, #tpu.dimension_semantics<parallel>, #tpu.dimension_semantics<arbitrary>], iteration_bounds = array<i64: 1, 1, 72>, scalar_prefetch = 0 : i64, scratch_operands = 1 : i64, tpu.core_type = #tpu.core_type<tc>, window_params = [{transform_indices = @transform_0, window_bounds = array<i64: 24, 512>}, {transform_indices = @transform_1, window_bounds = array<i64: 512, 128>}, {transform_indices = @transform_2, window_bounds = array<i64: 1, 128>}, {transform_indices = @transform_3, window_bounds = array<i64: 1, 128>}, {transform_indices = @transform_4, window_bounds = array<i64: 24, 128>}]} {
    %c0_i32 = arith.constant 0 : i32
    %0 = arith.cmpi eq, %arg2, %c0_i32 : i32
    %1 = arith.extui %0 : i1 to i32
    %c0_i32_0 = arith.constant 0 : i32
    %2 = arith.cmpi ne, %1, %c0_i32_0 : i32
    scf.if %2 {
      %cst_9 = arith.constant 0.000000e+00 : f32
      %12 = vector.broadcast %cst_9 : f32 to vector<24x128xf32>
      %c0_10 = arith.constant 0 : index
      %c0_11 = arith.constant 0 : index
      %13 = vector.load %arg8[%c0_10, %c0_11] : memref<24x128xf32, #tpu.memory_space<vmem>>, vector<24x128xf32>
      tpu.vector_store %arg8[%c0_10, %c0_11], %12 {strides = array<i32>} : memref<24x128xf32, #tpu.memory_space<vmem>>, vector<24x128xf32>,
    } else {
    }
    %c0 = arith.constant 0 : index
    %c0_1 = arith.constant 0 : index
    %3 = vector.load %arg8[%c0, %c0_1] : memref<24x128xf32, #tpu.memory_space<vmem>>, vector<24x128xf32>
    %c0_2 = arith.constant 0 : index
    %c0_3 = arith.constant 0 : index
    %4 = vector.load %arg3[%c0_2, %c0_3] : memref<24x512xbf16, #tpu.memory_space<vmem>>, vector<24x512xbf16>
    %c0_4 = arith.constant 0 : index
    %c0_5 = arith.constant 0 : index
    %5 = vector.load %arg4[%c0_4, %c0_5] : memref<512x128xbf16, #tpu.memory_space<vmem>>, vector<512x128xbf16>
    %cst = arith.constant dense<0.000000e+00> : vector<24x128xf32>
    %6 = tpu.matmul %4, %5, %cst {dimension_numbers = #tpu.dot_dimension_numbers<[1], [0], [0], [1], [0, 0, 1, 1], [], []>} : vector<24x512xbf16>, vector<512x128xbf16>, vector<24x128xf32> -> vector<24x128xf32>
    %7 = arith.addf %3, %6 : vector<24x128xf32>
    %c0_6 = arith.constant 0 : index
    %c0_7 = arith.constant 0 : index
    %8 = vector.load %arg8[%c0_6, %c0_7] : memref<24x128xf32, #tpu.memory_space<vmem>>, vector<24x128xf32>
    tpu.vector_store %arg8[%c0_6, %c0_7], %7 {strides = array<i32>} : memref<24x128xf32, #tpu.memory_space<vmem>>, vector<24x128xf32>,
    %c71_i32 = arith.constant 71 : i32
    %9 = arith.cmpi eq, %arg2, %c71_i32 : i32
    %10 = arith.extui %9 : i1 to i32
    %c0_i32_8 = arith.constant 0 : i32
    %11 = arith.cmpi ne, %10, %c0_i32_8 : i32
    scf.if %11 {
      %c0_9 = arith.constant 0 : index
      %c0_10 = arith.constant 0 : index
      %12 = vector.load %arg8[%c0_9, %c0_10] : memref<24x128xf32, #tpu.memory_space<vmem>>, vector<24x128xf32>
      %c0_11 = arith.constant 0 : index
      %c0_12 = arith.constant 0 : index
      %13 = vector.load %arg5[%c0_11, %c0_12] : memref<1x128xf32, #tpu.memory_space<vmem>>, vector<1x128xf32>
      %14 = vector.broadcast %13 : vector<1x128xf32> to vector<24x128xf32>
      %15 = arith.mulf %12, %14 : vector<24x128xf32>
      %c0_13 = arith.constant 0 : index
      %c0_14 = arith.constant 0 : index
      %16 = vector.load %arg6[%c0_13, %c0_14] : memref<1x128xf32, #tpu.memory_space<vmem>>, vector<1x128xf32>
      %17 = vector.broadcast %16 : vector<1x128xf32> to vector<24x128xf32>
      %18 = arith.addf %15, %17 : vector<24x128xf32>
      %c0_15 = arith.constant 0 : index
      %c0_16 = arith.constant 0 : index
      %19 = vector.load %arg7[%c0_15, %c0_16] : memref<24x128xf32, #tpu.memory_space<vmem>>, vector<24x128xf32>
      tpu.vector_store %arg7[%c0_15, %c0_16], %18 {strides = array<i32>} : memref<24x128xf32, #tpu.memory_space<vmem>>, vector<24x128xf32>,
    } else {
    }
    return
  }
  func.func @transform_0(%arg0: i32, %arg1: i32, %arg2: i32) -> (i32, i32) {
    %c0_i32 = arith.constant 0 : i32
    return %arg0, %arg2 : i32, i32
  }
  func.func @transform_1(%arg0: i32, %arg1: i32, %arg2: i32) -> (i32, i32) {
    %c0_i32 = arith.constant 0 : i32
    return %arg2, %arg1 : i32, i32
  }
  func.func @transform_2(%arg0: i32, %arg1: i32, %arg2: i32) -> (i32, i32) {
    %c0_i32 = arith.constant 0 : i32
    %c0_i32_0 = arith.constant 0 : i32
    return %c0_i32, %arg1 : i32, i32
  }
  func.func @transform_3(%arg0: i32, %arg1: i32, %arg2: i32) -> (i32, i32) {
    %c0_i32 = arith.constant 0 : i32
    %c0_i32_0 = arith.constant 0 : i32
    return %c0_i32, %arg1 : i32, i32
  }
  func.func @transform_4(%arg0: i32, %arg1: i32, %arg2: i32) -> (i32, i32) {
    %c0_i32 = arith.constant 0 : i32
    return %arg0, %arg1 : i32, i32
  }
}

module attributes {stable_mosaic.version = 11 : i64} {
  func.func @_fused_matmul_kernel(%arg0: i32, %arg1: i32, %arg2: i32, %arg3: memref<16x128xf32, #tpu.memory_space<vmem>>, %arg4: memref<128x128xf32, #tpu.memory_space<vmem>>, %arg5: memref<16x128xf32, #tpu.memory_space<vmem>>, %arg6: memref<16x128xf32, #tpu.memory_space<vmem>>) attributes {dimension_semantics = [#tpu.dimension_semantics<parallel>, #tpu.dimension_semantics<parallel>, #tpu.dimension_semantics<arbitrary>], iteration_bounds = array<i64: 1, 1, 1>, scalar_prefetch = 0 : i64, scratch_operands = 1 : i64, tpu.core_type = #tpu.core_type<tc>, window_params = [{transform_indices = @transform_0, window_bounds = array<i64: 16, 128>}, {transform_indices = @transform_1, window_bounds = array<i64: 128, 128>}, {transform_indices = @transform_2, window_bounds = array<i64: 16, 128>}]} {
    %c0_i32 = arith.constant 0 : i32
    %0 = arith.cmpi eq, %arg2, %c0_i32 : i32
    %1 = arith.extui %0 : i1 to i32
    %c0_i32_0 = arith.constant 0 : i32
    %2 = arith.cmpi ne, %1, %c0_i32_0 : i32
    scf.if %2 {
      %cst_10 = arith.constant 0.000000e+00 : f32
      %12 = vector.broadcast %cst_10 : f32 to vector<16x128xf32>
      %c0_11 = arith.constant 0 : index
      %c0_12 = arith.constant 0 : index
      %13 = vector.load %arg6[%c0_11, %c0_12] : memref<16x128xf32, #tpu.memory_space<vmem>>, vector<16x128xf32>
      tpu.vector_store %arg6[%c0_11, %c0_12], %12 {strides = array<i32>} : memref<16x128xf32, #tpu.memory_space<vmem>>, vector<16x128xf32>,
    } else {
    }
    %c0 = arith.constant 0 : index
    %c0_1 = arith.constant 0 : index
    %3 = vector.load %arg6[%c0, %c0_1] : memref<16x128xf32, #tpu.memory_space<vmem>>, vector<16x128xf32>
    %c0_2 = arith.constant 0 : index
    %c0_3 = arith.constant 0 : index
    %4 = vector.load %arg3[%c0_2, %c0_3] : memref<16x128xf32, #tpu.memory_space<vmem>>, vector<16x128xf32>
    %c0_4 = arith.constant 0 : index
    %c0_5 = arith.constant 0 : index
    %5 = vector.load %arg4[%c0_4, %c0_5] : memref<128x128xf32, #tpu.memory_space<vmem>>, vector<128x128xf32>
    %cst = arith.constant dense<0.000000e+00> : vector<16x128xf32>
    %6 = tpu.matmul %4, %5, %cst {dimension_numbers = #tpu.dot_dimension_numbers<[1], [0], [0], [1], [0, 0, 1, 1], [], []>} : vector<16x128xf32>, vector<128x128xf32>, vector<16x128xf32> -> vector<16x128xf32>
    %7 = arith.addf %3, %6 : vector<16x128xf32>
    %c0_6 = arith.constant 0 : index
    %c0_7 = arith.constant 0 : index
    %8 = vector.load %arg6[%c0_6, %c0_7] : memref<16x128xf32, #tpu.memory_space<vmem>>, vector<16x128xf32>
    tpu.vector_store %arg6[%c0_6, %c0_7], %7 {strides = array<i32>} : memref<16x128xf32, #tpu.memory_space<vmem>>, vector<16x128xf32>,
    %c0_i32_8 = arith.constant 0 : i32
    %9 = arith.cmpi eq, %arg2, %c0_i32_8 : i32
    %10 = arith.extui %9 : i1 to i32
    %c0_i32_9 = arith.constant 0 : i32
    %11 = arith.cmpi ne, %10, %c0_i32_9 : i32
    scf.if %11 {
      %c0_10 = arith.constant 0 : index
      %c0_11 = arith.constant 0 : index
      %12 = vector.load %arg6[%c0_10, %c0_11] : memref<16x128xf32, #tpu.memory_space<vmem>>, vector<16x128xf32>
      %c0_12 = arith.constant 0 : index
      %c0_13 = arith.constant 0 : index
      %13 = vector.load %arg5[%c0_12, %c0_13] : memref<16x128xf32, #tpu.memory_space<vmem>>, vector<16x128xf32>
      tpu.vector_store %arg5[%c0_12, %c0_13], %12 {strides = array<i32>} : memref<16x128xf32, #tpu.memory_space<vmem>>, vector<16x128xf32>,
    } else {
    }
    return
  }
  func.func @transform_0(%arg0: i32, %arg1: i32, %arg2: i32) -> (i32, i32) {
    %c0_i32 = arith.constant 0 : i32
    return %arg0, %arg2 : i32, i32
  }
  func.func @transform_1(%arg0: i32, %arg1: i32, %arg2: i32) -> (i32, i32) {
    %c0_i32 = arith.constant 0 : i32
    return %arg2, %arg1 : i32, i32
  }
  func.func @transform_2(%arg0: i32, %arg1: i32, %arg2: i32) -> (i32, i32) {
    %c0_i32 = arith.constant 0 : i32
    return %arg0, %arg1 : i32, i32
  }
}

</mosaic_0001>

<bundles_post_ra>
// kernel: deeplab_v2_forward.22
= control target key start
LH: loop header
LB: loop body
LE: loop exit
PB: predicated region body
PF: predicated region fallthrough
CT: control target
= control target key end

     0   :  { %vm72_vm0 = vcmask 1043456   ;;  %s624_s0 = inlined_call_operand.vmem [shape: bf16[9,56,128], index: 0, kind: input, shape index: {}]   ;;  %s625_s1 = inlined_call_operand.vmem [shape: bf16[56,128], index: 1, kind: output, shape index: {}]  }
   0x1   :  { %v9_v0 = vld [vmem:[%s624_s0] sm:$0xf]  ;;  %v16_v1 = vld [vmem:[%s624_s0 + $0x1c] sm:$0xf]  ;;  %v23_v2 = vld [vmem:[%s624_s0 + $0x38] sm:$0xf] }
   0x2   :  { %v10_v3 = vld [vmem:[%s624_s0 + $0x4] sm:$0xf]  ;;  %v17_v4 = vld [vmem:[%s624_s0 + $0x20] sm:$0xf]  ;;  %v24_v5 = vld [vmem:[%s624_s0 + $0x3c] sm:$0xf] }
   0x3   :  { %v30_v6 = vld [vmem:[%s624_s0 + $0x54] sm:$0xf]  ;;  %v75_v7 = vsel %vm72_vm0, %v9_v0, 4286644096  ;;  %v78_v8 = vsel %vm72_vm0, %v16_v1, 4286644096 }
   0x4   :  { %v82_v9 = vsel %vm72_vm0, %v23_v2, 4286644096  ;;  %v37_v10 = vld [vmem:[%s624_s0 + $0x70] sm:$0xf]  ;;  %v80_v11 = vmax.bf16 %v78_v8, %v75_v7  ;;  %v31_v12 = vld [vmem:[%s624_s0 + $0x58] sm:$0xf] }
   0x5   :  { %v44_v13 = vld [vmem:[%s624_s0 + $0x8c] sm:$0xf]  ;;  %v86_v14 = vsel %vm72_vm0, %v30_v6, 4286644096  ;;  %v110_v16 = vsel %vm72_vm0, %v10_v3, 4286644096 }
   0x6   :  { %v84_v15 = vmax.bf16 %v82_v9, %v80_v11  ;;  %v113_v17 = vsel %vm72_vm0, %v17_v4, 4286644096  ;;  %v117_v18 = vsel %vm72_vm0, %v24_v5, 4286644096  ;;  %v38_v19 = vld [vmem:[%s624_s0 + $0x74] sm:$0xf] }
   0x7   :  { %v90_v20 = vsel %vm72_vm0, %v37_v10, 4286644096  ;;  %v115_v21 = vmax.bf16 %v113_v17, %v110_v16  ;;  %v45_v22 = vld [vmem:[%s624_s0 + $0x90] sm:$0xf]  ;;  %v51_v23 = vld [vmem:[%s624_s0 + $0xa8] sm:$0xf] }
   0x8   :  { %v88_v24 = vmax.bf16 %v86_v14, %v84_v15  ;;  %v121_v25 = vsel %vm72_vm0, %v31_v12, 4286644096  ;;  %v52_v26 = vld [vmem:[%s624_s0 + $0xac] sm:$0xf]  ;;  %v94_v27 = vsel %vm72_vm0, %v44_v13, 4286644096 }
   0x9   :  { %v119_v28 = vmax.bf16 %v117_v18, %v115_v21  ;;  %v58_v29 = vld [vmem:[%s624_s0 + $0xc4] sm:$0xf]  ;;  %v65_v30 = vld [vmem:[%s624_s0 + $0xe0] sm:$0xf]  ;;  %v125_v32 = vsel %vm72_vm0, %v38_v19, 4286644096 }
   0xa   :  { %v92_v31 = vmax.bf16 %v90_v20, %v88_v24  ;;  %v59_v33 = vld [vmem:[%s624_s0 + $0xc8] sm:$0xf]  ;;  %v98_v34 = vsel %vm72_vm0, %v51_v23, 4286644096  ;;  %v129_v36 = vsel %vm72_vm0, %v45_v22, 4286644096 }
   0xb   :  { %v123_v35 = vmax.bf16 %v121_v25, %v119_v28  ;;  %v66_v37 = vld [vmem:[%s624_s0 + $0xe4] sm:$0xf]  ;;  %v11_v39 = vld [vmem:[%s624_s0 + $0x8] sm:$0xf]  ;;  %v25_v41 = vld [vmem:[%s624_s0 + $0x40] sm:$0xf] }
   0xc   :  { %v96_v38 = vmax.bf16 %v94_v27, %v92_v31  ;;  %v18_v40 = vld [vmem:[%s624_s0 + $0x24] sm:$0xf]  ;;  %v102_v42 = vsel %vm72_vm0, %v58_v29, 4286644096  ;;  %v106_v43 = vsel %vm72_vm0, %v65_v30, 4286644096 }
   0xd   :  { %v127_v44 = vmax.bf16 %v125_v32, %v123_v35  ;;  %v133_v45 = vsel %vm72_vm0, %v52_v26, 4286644096  ;;  %v12_v47 = vld [vmem:[%s624_s0 + $0xc] sm:$0xf]  ;;  %v32_v48 = vld [vmem:[%s624_s0 + $0x5c] sm:$0xf] }
   0xe   :  { %v100_v46 = vmax.bf16 %v98_v34, %v96_v38  ;;  %v39_v49 = vld [vmem:[%s624_s0 + $0x78] sm:$0xf]  ;;  %v145_v51 = vsel %vm72_vm0, %v11_v39, 4286644096  ;;  %v148_v52 = vsel %vm72_vm0, %v18_v40, 4286644096 }
   0xf   :  { %v131_v50 = vmax.bf16 %v129_v36, %v127_v44  ;;  %v152_v53 = vsel %vm72_vm0, %v25_v41, 4286644096  ;;  %v137_v55 = vsel %vm72_vm0, %v59_v33, 4286644096  ;;  %v19_v56 = vld [vmem:[%s624_s0 + $0x28] sm:$0xf]  ;;  %v150_v58 = vmax.bf16 %v148_v52, %v145_v51 }
  0x10   :  { %v104_v54 = vmax.bf16 %v102_v42, %v100_v46  ;;  %v26_v57 = vld [vmem:[%s624_s0 + $0x44] sm:$0xf]  ;;  %v141_v60 = vsel %vm72_vm0, %v66_v37, 4286644096  ;;  %v33_v61 = vld [vmem:[%s624_s0 + $0x60] sm:$0xf] }
  0x11   :  { %v135_v59 = vmax.bf16 %v133_v45, %v131_v50  ;;  %v156_v62 = vsel %vm72_vm0, %v32_v48, 4286644096  ;;  %v46_v63 = vld [vmem:[%s624_s0 + $0x94] sm:$0xf]  ;;  %v154_v0 = vmax.bf16 %v152_v53, %v150_v58  ;;  %v160_v1 = vsel %vm72_vm0, %v39_v49, 4286644096 }
  0x12   :  { %v180_v2 = vsel %vm72_vm0, %v12_v47, 4286644096  ;;  %v108_v3 = vmax.bf16 %v106_v43, %v104_v54  ;;  %v183_v5 = vsel %vm72_vm0, %v19_v56, 4286644096  ;;  %v187_v6 = vsel %vm72_vm0, %v26_v57, 4286644096 }
  0x13   :  { %v139_v4 = vmax.bf16 %v137_v55, %v135_v59  ;;  %v40_v7 = vld [vmem:[%s624_s0 + $0x7c] sm:$0xf]  ;;  %v53_v8 = vld [vmem:[%s624_s0 + $0xb0] sm:$0xf]  ;;  %v158_v9 = vmax.bf16 %v156_v62, %v154_v0  ;;  %v185_v10 = vmax.bf16 %v183_v5, %v180_v2  ;;  %v47_v12 = vld [vmem:[%s624_s0 + $0x98] sm:$0xf] }
  0x14   :  { %v164_v13 = vsel %vm72_vm0, %v46_v63, 4286644096  ;;  %v191_v14 = vsel %vm72_vm0, %v33_v61, 4286644096  ;;  %v54_v15 = vld [vmem:[%s624_s0 + $0xb4] sm:$0xf] }
  0x15   :  { %v143_v11 = vmax.bf16 %v141_v60, %v139_v4  ;;  %v60_v16 = vld [vmem:[%s624_s0 + $0xcc] sm:$0xf]  ;;  %v67_v17 = vld [vmem:[%s624_s0 + $0xe8] sm:$0xf]  ;;  %v162_v18 = vmax.bf16 %v160_v1, %v158_v9  ;;  %v189_v19 = vmax.bf16 %v187_v6, %v185_v10  ;;  %v61_v21 = vld [vmem:[%s624_s0 + $0xd0] sm:$0xf] }
  0x16   :  { %v168_v22 = vsel %vm72_vm0, %v53_v8, 4286644096  ;;  %v195_v23 = vsel %vm72_vm0, %v40_v7, 4286644096  ;;  %v68_v24 = vld [vmem:[%s624_s0 + $0xec] sm:$0xf] }
  0x17   :  { %v345_v20 = vcombine.low %v108_v3, %v143_v11  ;;  %v166_v25 = vmax.bf16 %v164_v13, %v162_v18  ;;  %v193_v26 = vmax.bf16 %v191_v14, %v189_v19  ;;  %v13_v27 = vld [vmem:[%s624_s0 + $0x10] sm:$0xf]  ;;  %v20_v28 = vld [vmem:[%s624_s0 + $0x2c] sm:$0xf]  ;;  %v27_v29 = vld [vmem:[%s624_s0 + $0x48] sm:$0xf] }
  0x18   :  { %v172_v30 = vsel %vm72_vm0, %v60_v16, 4286644096  ;;  %v176_v31 = vsel %vm72_vm0, %v67_v17, 4286644096  ;;  %v199_v32 = vsel %vm72_vm0, %v47_v12, 4286644096 }
  0x19   :  { %334 = vst [vmem:[%s625_s1] sm:$0xff] %v345_v20   ;;  %v170_v33 = vmax.bf16 %v168_v22, %v166_v25  ;;  %v197_v34 = vmax.bf16 %v195_v23, %v193_v26  ;;  %v203_v35 = vsel %vm72_vm0, %v54_v15, 4286644096  ;;  %v14_v36 = vld [vmem:[%s624_s0 + $0x14] sm:$0xf]  ;;  %v34_v37 = vld [vmem:[%s624_s0 + $0x64] sm:$0xf] }
  0x1a   :  { %v215_v38 = vsel %vm72_vm0, %v13_v27, 4286644096  ;;  %v218_v39 = vsel %vm72_vm0, %v20_v28, 4286644096  ;;  %v222_v40 = vsel %vm72_vm0, %v27_v29, 4286644096 }
  0x1b   :  { %v174_v41 = vmax.bf16 %v172_v30, %v170_v33  ;;  %v201_v42 = vmax.bf16 %v199_v32, %v197_v34  ;;  %v207_v43 = vsel %vm72_vm0, %v61_v21, 4286644096  ;;  %v21_v44 = vld [vmem:[%s624_s0 + $0x30] sm:$0xf]  ;;  %v41_v45 = vld [vmem:[%s624_s0 + $0x80] sm:$0xf]  ;;  %v220_v46 = vmax.bf16 %v218_v39, %v215_v38 }
  0x1c   :  { %v211_v47 = vsel %vm72_vm0, %v68_v24, 4286644096  ;;  %v28_v48 = vld [vmem:[%s624_s0 + $0x4c] sm:$0xf]  ;;  %v226_v49 = vsel %vm72_vm0, %v34_v37, 4286644096 }
  0x1d   :  { %v205_v50 = vmax.bf16 %v203_v35, %v201_v42  ;;  %v35_v51 = vld [vmem:[%s624_s0 + $0x68] sm:$0xf]  ;;  %v42_v52 = vld [vmem:[%s624_s0 + $0x84] sm:$0xf]  ;;  %v48_v53 = vld [vmem:[%s624_s0 + $0x9c] sm:$0xf]  ;;  %v224_v54 = vmax.bf16 %v222_v40, %v220_v46  ;;  %v178_v55 = vmax.bf16 %v176_v31, %v174_v41 }
  0x1e   :  { %v230_v56 = vsel %vm72_vm0, %v41_v45, 4286644096  ;;  %v250_v57 = vsel %vm72_vm0, %v14_v36, 4286644096  ;;  %v253_v58 = vsel %vm72_vm0, %v21_v44, 4286644096 }
  0x1f   :  { %v209_v59 = vmax.bf16 %v207_v43, %v205_v50  ;;  %v55_v60 = vld [vmem:[%s624_s0 + $0xb8] sm:$0xf]  ;;  %v62_v61 = vld [vmem:[%s624_s0 + $0xd4] sm:$0xf]  ;;  %v228_v62 = vmax.bf16 %v226_v49, %v224_v54  ;;  %v255_v63 = vmax.bf16 %v253_v58, %v250_v57  ;;  %v257_v0 = vsel %vm72_vm0, %v28_v48, 4286644096 }
  0x20   :  { %v234_v1 = vsel %vm72_vm0, %v48_v53, 4286644096  ;;  %v261_v2 = vsel %vm72_vm0, %v35_v51, 4286644096  ;;  %v15_v3 = vld [vmem:[%s624_s0 + $0x18] sm:$0xf] }
  0x21   :  { %v213_v4 = vmax.bf16 %v211_v47, %v209_v59  ;;  %v49_v5 = vld [vmem:[%s624_s0 + $0xa0] sm:$0xf]  ;;  %v232_v6 = vmax.bf16 %v230_v56, %v228_v62  ;;  %v259_v7 = vmax.bf16 %v257_v0, %v255_v63  ;;  %v22_v8 = vld [vmem:[%s624_s0 + $0x34] sm:$0xf]  ;;  %v29_v9 = vld [vmem:[%s624_s0 + $0x50] sm:$0xf] }
  0x22   :  { %v238_v10 = vsel %vm72_vm0, %v55_v60, 4286644096  ;;  %v242_v11 = vsel %vm72_vm0, %v62_v61, 4286644096  ;;  %v265_v12 = vsel %vm72_vm0, %v42_v52, 4286644096 }
  0x23   :  { %v346_v13 = vcombine.low %v178_v55, %v213_v4  ;;  %v56_v14 = vld [vmem:[%s624_s0 + $0xbc] sm:$0xf]  ;;  %v236_v15 = vmax.bf16 %v234_v1, %v232_v6  ;;  %v263_v16 = vmax.bf16 %v261_v2, %v259_v7  ;;  %v36_v17 = vld [vmem:[%s624_s0 + $0x6c] sm:$0xf]  ;;  %v285_v18 = vsel %vm72_vm0, %v15_v3, 4286644096 }
  0x24   :  { %v269_v19 = vsel %vm72_vm0, %v49_v5, 4286644096  ;;  %v288_v20 = vsel %vm72_vm0, %v22_v8, 4286644096  ;;  %v292_v21 = vsel %vm72_vm0, %v29_v9, 4286644096 }
  0x25   :  { %347 = vst [vmem:[%s625_s1 + $0x8] sm:$0xff] %v346_v13   ;;  %v63_v22 = vld [vmem:[%s624_s0 + $0xd8] sm:$0xf]  ;;  %v69_v23 = vld [vmem:[%s624_s0 + $0xf0] sm:$0xf]  ;;  %v240_v24 = vmax.bf16 %v238_v10, %v236_v15  ;;  %v267_v25 = vmax.bf16 %v265_v12, %v263_v16  ;;  %v290_v27 = vmax.bf16 %v288_v20, %v285_v18 }
  0x26   :  { %v43_v26 = vld [vmem:[%s624_s0 + $0x88] sm:$0xf]  ;;  %v273_v28 = vsel %vm72_vm0, %v56_v14, 4286644096  ;;  %v296_v29 = vsel %vm72_vm0, %v36_v17, 4286644096 }
  0x27   :  { %v70_v30 = vld [vmem:[%s624_s0 + $0xf4] sm:$0xf]  ;;  %v244_v31 = vmax.bf16 %v242_v11, %v240_v24  ;;  %v271_v32 = vmax.bf16 %v269_v19, %v267_v25  ;;  %v50_v33 = vld [vmem:[%s624_s0 + $0xa4] sm:$0xf]  ;;  %v294_v34 = vmax.bf16 %v292_v21, %v290_v27  ;;  %v246_v35 = vsel %vm72_vm0, %v69_v23, 4286644096 }
  0x28   :  { %v277_v36 = vsel %vm72_vm0, %v63_v22, 4286644096  ;;  %v300_v37 = vsel %vm72_vm0, %v43_v26, 4286644096  ;;  %v57_v39 = vld [vmem:[%s624_s0 + $0xc0] sm:$0xf] }
  0x29   :  { %v275_v38 = vmax.bf16 %v273_v28, %v271_v32  ;;  %v298_v40 = vmax.bf16 %v296_v29, %v294_v34  ;;  %v281_v41 = vsel %vm72_vm0, %v70_v30, 4286644096  ;;  %v304_v42 = vsel %vm72_vm0, %v50_v33, 4286644096  ;;  %v64_v45 = vld [vmem:[%s624_s0 + $0xdc] sm:$0xf] }
  0x2a   :  { %v248_v43 = vmax.bf16 %v246_v35, %v244_v31  ;;  %v308_v47 = vsel %vm72_vm0, %v57_v39, 4286644096  ;;  %v71_v49 = vld [vmem:[%s624_s0 + $0xf8] sm:$0xf]  ;;  %v312_v51 = vsel %vm72_vm0, %v64_v45, 4286644096 }
  0x2b   :  { %v279_v44 = vmax.bf16 %v277_v36, %v275_v38  ;;  %v302_v46 = vmax.bf16 %v300_v37, %v298_v40  ;;  %v316_v54 = vsel %vm72_vm0, %v71_v49, 4286644096 }
  0x2d   :  { %v283_v48 = vmax.bf16 %v281_v41, %v279_v44  ;;  %v306_v50 = vmax.bf16 %v304_v42, %v302_v46 }
  0x2f   :  { %v348_v52 = vcombine.low %v248_v43, %v283_v48  ;;  %v310_v53 = vmax.bf16 %v308_v47, %v306_v50 }
  0x31   :  { %349 = vst [vmem:[%s625_s1 + $0x10] sm:$0xff] %v348_v52   ;;  %v314_v55 = vmax.bf16 %v312_v51, %v310_v53 }
  0x33   :  { %v318_v56 = vmax.bf16 %v316_v54, %v314_v55 }
  0x35   :  { %325 = vst [vmem:[%s625_s1 + $0x18] sm:$0xf] %v318_v56 }

// kernel: deeplab_v2_forward.24
= control target key start
LH: loop header
LB: loop body
LE: loop exit
PB: predicated region body
PF: predicated region fallthrough
CT: control target
= control target key end

     0   :  { %s480_s1 = inlined_call_operand.vmem [shape: bf16[128,128], index: 1, kind: input, shape index: {}]   ;;  %s481_s0 = inlined_call_operand.vmem [shape: bf16[56,128], index: 0, kind: input, shape index: {}]   ;;  %s482_s2 = inlined_call_operand.vmem [shape: f32[1,128], index: 2, kind: input, shape index: {}]   ;;  %s483_s3 = inlined_call_operand.vmem [shape: f32[1,128], index: 3, kind: input, shape index: {}]   ;;  %s484_s4 = inlined_call_operand.vmem [shape: bf16[56,128], index: 4, kind: output, shape index: {}]  }
   0x1   :  { %v389_v0 = vld [vmem:[%s480_s1] sm:$0xff]   ;;  %v390_v1 = vld [vmem:[%s480_s1 + $0x8] sm:$0xff]   ;;  %v391_v2 = vld [vmem:[%s480_s1 + $0x10] sm:$0xff]  }
   0x2   :  { %349 = vmatprep.subr.bf16.mxu0 %v389_v0  ;;  %373 = vmatprep.subr.bf16.mxu1 %v389_v0  ;;  %v392_v3 = vld [vmem:[%s480_s1 + $0x18] sm:$0xff]   ;;  %v397_v4 = vld [vmem:[%s481_s0] sm:$0xff]   ;;  %v398_v5 = vld [vmem:[%s481_s0 + $0x10] sm:$0xff]  }
   0x3   :  { %350 = vmatpush3.bf16.msra.mxu0 %v389_v0  ;;  %381 = vmatpush3.bf16.msra.mxu1 %v389_v0  ;;  %v393_v6 = vld [vmem:[%s480_s1 + $0x20] sm:$0xff]   ;;  %v394_v7 = vld [vmem:[%s480_s1 + $0x28] sm:$0xff]   ;;  %v395_v8 = vld [vmem:[%s480_s1 + $0x30] sm:$0xff]  }
   0x4   :  { %351 = vmatprep.subr.bf16.mxu0 %v390_v1  ;;  %374 = vmatprep.subr.bf16.mxu1 %v390_v1  ;;  %v396_v9 = vld [vmem:[%s480_s1 + $0x38] sm:$0xff]   ;;  %v399_v10 = vld [vmem:[%s481_s0 + $0x8] sm:$0xff]   ;;  %v304_v12 = vld [vmem:[%s482_s2] ss:$0 sm:$0xff] }
   0x5   :  { %365 = vmatprep.mubr.bf16.mxu0 %v397_v4  ;;  %369 = vmatprep.mubr.bf16.mxu1 %v398_v5  ;;  %v400_v11 = vld [vmem:[%s481_s0 + $0x18] ss:$0 sps:$4 sm:$0xff]   ;;  %v305_v14 = vld [vmem:[%s483_s3] ss:$0 sm:$0xff] }
   0x7   :  { %352 = vmatpush3.bf16.msra.mxu0 %v390_v1  ;;  %382 = vmatpush3.bf16.msra.mxu1 %v390_v1 }
   0x8   :  { %353 = vmatprep.subr.bf16.mxu0 %v391_v2  ;;  %375 = vmatprep.subr.bf16.mxu1 %v391_v2 }
   0xb   :  { %354 = vmatpush3.bf16.msra.mxu0 %v391_v2  ;;  %383 = vmatpush3.bf16.msra.mxu1 %v391_v2 }
   0xc   :  { %355 = vmatprep.subr.bf16.mxu0 %v392_v3  ;;  %376 = vmatprep.subr.bf16.mxu1 %v392_v3 }
   0xf   :  { %356 = vmatpush3.bf16.msra.mxu0 %v392_v3  ;;  %384 = vmatpush3.bf16.msra.mxu1 %v392_v3 }
  0x10   :  { %357 = vmatprep.subr.bf16.mxu0 %v393_v6  ;;  %377 = vmatprep.subr.bf16.mxu1 %v393_v6 }
  0x13   :  { %358 = vmatpush3.bf16.msra.mxu0 %v393_v6  ;;  %385 = vmatpush3.bf16.msra.mxu1 %v393_v6 }
  0x14   :  { %359 = vmatprep.subr.bf16.mxu0 %v394_v7  ;;  %378 = vmatprep.subr.bf16.mxu1 %v394_v7 }
  0x17   :  { %360 = vmatpush3.bf16.msra.mxu0 %v394_v7  ;;  %386 = vmatpush3.bf16.msra.mxu1 %v394_v7 }
  0x18   :  { %361 = vmatprep.subr.bf16.mxu0 %v395_v8  ;;  %379 = vmatprep.subr.bf16.mxu1 %v395_v8 }
  0x1b   :  { %362 = vmatpush3.bf16.msra.mxu0 %v395_v8  ;;  %387 = vmatpush3.bf16.msra.mxu1 %v395_v8 }
  0x1c   :  { %363 = vmatprep.subr.bf16.mxu0 %v396_v9  ;;  %380 = vmatprep.subr.bf16.mxu1 %v396_v9 }
  0x1f   :  { %364 = vmatpush3.bf16.msra.mxu0 %v396_v9  ;;  %388 = vmatpush3.bf16.msra.mxu1 %v396_v9 }
  0x22   :  { %366 = vmatmul.mubr.bf16.vlgmr.msra.gmra.mrb[0].mxu0 %v399_v10  ;;  %370 = vmatmul.mubr.bf16.vlgmr.msra.gmra.mrb[0].mxu1 %v400_v11 }
  0xf5   :  { %v367_v13 = vpop.f32.mrb[0].mxu0  ;;  %v371_v15 = vpop.f32.mrb[0].mxu1 }
  0xf6   :  { %v226_v16 = vmul.f32 %v367_v13, %v304_v12  ;;  %v230_v17 = vmul.f32 %v371_v15, %v304_v12  ;;  %v163_v18 = vpop.f32.mrb[1].mxu0  ;;  %v179_v19 = vpop.f32.mrb[1].mxu1 }
  0xf7   :  { %v224_v20 = vmul.f32 %v304_v12, %v163_v18  ;;  %v228_v21 = vmul.f32 %v304_v12, %v179_v19  ;;  %v368_v22 = vpop.f32.mrb[2].mxu0  ;;  %v372_v23 = vpop.f32.mrb[2].mxu1 }
  0xf8   :  { %v240_v24 = vadd.f32 %v305_v14, %v226_v16  ;;  %v244_v25 = vadd.f32 %v305_v14, %v230_v17  ;;  %v227_v26 = vmul.f32 %v368_v22, %v304_v12  ;;  %v166_v27 = vpop.f32.mrb[3].mxu0  ;;  %v182_v28 = vpop.f32.mrb[3].mxu1 }
  0xf9   :  { %v238_v29 = vadd.f32 %v305_v14, %v224_v20  ;;  %v242_v30 = vadd.f32 %v305_v14, %v228_v21  ;;  %v225_v31 = vmul.f32 %v304_v12, %v166_v27  ;;  %v229_v32 = vmul.f32 %v304_v12, %v182_v28 }
  0xfa   :  { %v251_v33 = vmax.f32 %v244_v25, 0.0  ;;  %v241_v34 = vadd.f32 %v305_v14, %v227_v26  ;;  %v247_v37 = vmax.f32 %v240_v24, 0.0 }
  0xfb   :  { %v239_v35 = vadd.f32 %v305_v14, %v225_v31  ;;  %v243_v36 = vadd.f32 %v305_v14, %v229_v32  ;;  %v245_v40 = vmax.f32 %v238_v29, 0.0  ;;  %v249_v41 = vmax.f32 %v242_v30, 0.0 }
  0xfc   :  { %v319_v38 = vpack.c.bf16 %v251_v33, %v251_v33  ;;  %v248_v39 = vmax.f32 %v241_v34, 0.0 }
  0xfd   :  { %v246_v42 = vmax.f32 %v239_v35, 0.0  ;;  %v250_v43 = vmax.f32 %v243_v36, 0.0 }
  0xfe   :  { %287 = vst [vmem:[%s484_s4 + $0x18] sm:$0xf] %v319_v38  ;;  %v328_v44 = vpack.c.bf16 %v248_v39, %v247_v37 }
  0xff   :  { %v323_v45 = vpack.c.bf16 %v246_v42, %v245_v40  ;;  %v333_v46 = vpack.c.bf16 %v250_v43, %v249_v41 }
 0x100   :  { %335 = vst [vmem:[%s484_s4 + $0x8] sm:$0xff] %v328_v44  }
 0x101   :  { %324 = vst [vmem:[%s484_s4] sm:$0xff] %v323_v45   ;;  %336 = vst [vmem:[%s484_s4 + $0x10] sm:$0xff] %v333_v46  }

// kernel: deeplab_v2_forward.21
= control target key start
LH: loop header
LB: loop body
LE: loop exit
PB: predicated region body
PF: predicated region fallthrough
CT: control target
= control target key end

     0   :  { %s992_s1 = inlined_call_operand.vmem [shape: bf16[256,128], index: 1, kind: input, shape index: {}]   ;;  %s993_s0 = inlined_call_operand.vmem [shape: bf16[128,256], index: 0, kind: input, shape index: {}]   ;;  %s994_s2 = inlined_call_operand.vmem [shape: f32[1,128], index: 2, kind: input, shape index: {}]   ;;  %s995_s3 = inlined_call_operand.vmem [shape: f32[1,128], index: 3, kind: input, shape index: {}]   ;;  %s996_s4 = inlined_call_operand.vmem [shape: bf16[128,128], index: 4, kind: output, shape index: {}]  }
   0x1   :  { %v765_v0 = vld [vmem:[%s992_s1 + $0x40] sm:$0xff]   ;;  %v767_v2 = vld [vmem:[%s992_s1 + $0x48] sm:$0xff]   ;;  %v769_v4 = vld [vmem:[%s992_s1 + $0x50] sm:$0xff]  }
   0x2   :  { %v766_v1 = vld [vmem:[%s992_s1] sm:$0xff]   ;;  %685 = vmatprep.subr.bf16.mxu0 %v765_v0  ;;  %749 = vmatprep.subr.bf16.mxu1 %v765_v0  ;;  %v768_v3 = vld [vmem:[%s992_s1 + $0x8] sm:$0xff]   ;;  %v770_v5 = vld [vmem:[%s992_s1 + $0x10] sm:$0xff]  }
   0x3   :  { %686 = vmatpush3.bf16.msra.mxu0 %v766_v1  ;;  %757 = vmatpush3.bf16.msra.mxu1 %v766_v1  ;;  %v771_v6 = vld [vmem:[%s992_s1 + $0x58] sm:$0xff]   ;;  %v773_v8 = vld [vmem:[%s992_s1 + $0x60] sm:$0xff]   ;;  %v775_v10 = vld [vmem:[%s992_s1 + $0x68] sm:$0xff]  }
   0x4   :  { %687 = vmatprep.subr.bf16.mxu0 %v767_v2  ;;  %750 = vmatprep.subr.bf16.mxu1 %v767_v2  ;;  %v772_v7 = vld [vmem:[%s992_s1 + $0x18] sm:$0xff]   ;;  %v774_v9 = vld [vmem:[%s992_s1 + $0x20] sm:$0xff]   ;;  %v776_v13 = vld [vmem:[%s992_s1 + $0x28] sm:$0xff]  }
   0x5   :  { %v783_v11 = vld [vmem:[%s993_s0 + $0x4] ss:$8 sps:$4 sm:$0xff]   ;;  %v777_v14 = vld [vmem:[%s992_s1 + $0x70] sm:$0xff]   ;;  %v779_v16 = vld [vmem:[%s992_s1 + $0x78] sm:$0xff]  }
   0x6   :  { %v786_v12 = vld [vmem:[%s993_s0 + $0x44] ss:$8 sps:$4 sm:$0xff]   ;;  %310 = vmatprep.mubr.bf16.mxu0 %v783_v11  ;;  %v778_v15 = vld [vmem:[%s992_s1 + $0x30] sm:$0xff]   ;;  %v780_v17 = vld [vmem:[%s992_s1 + $0x38] sm:$0xff]  }
   0x7   :  { %688 = vmatpush3.bf16.msra.mxu0 %v768_v3  ;;  %758 = vmatpush3.bf16.msra.mxu1 %v768_v3  ;;  %v781_v18 = vld [vmem:[%s993_s0] ss:$8 sps:$4 sm:$0xff]   ;;  %v787_v20 = vld [vmem:[%s993_s0 + $0x14] ss:$8 sps:$4 sm:$0xff]   ;;  %v791_v22 = vld [vmem:[%s993_s0 + $0x10] ss:$8 sps:$4 sm:$0xff]  }
   0x8   :  { %689 = vmatprep.subr.bf16.mxu0 %v769_v4  ;;  %751 = vmatprep.subr.bf16.mxu1 %v769_v4  ;;  %v784_v19 = vld [vmem:[%s993_s0 + $0x40] ss:$8 sps:$4 sm:$0xff]   ;;  %v789_v21 = vld [vmem:[%s993_s0 + $0x54] ss:$8 sps:$4 sm:$0xff]   ;;  %v792_v23 = vld [vmem:[%s993_s0 + $0x50] ss:$8 sps:$4 sm:$0xff]  }
   0x9   :  { %342 = vmatprep.mubr.bf16.mxu1 %v786_v12  ;;  %v793_v24 = vld [vmem:[%s993_s0 + $0x24] ss:$8 sps:$4 sm:$0xff]   ;;  %v797_v26 = vld [vmem:[%s993_s0 + $0x20] ss:$8 sps:$4 sm:$0xff]   ;;  %v799_v28 = vld [vmem:[%s993_s0 + $0x34] ss:$8 sps:$4 sm:$0xff]  }
   0xa   :  { %v795_v25 = vld [vmem:[%s993_s0 + $0x64] ss:$8 sps:$4 sm:$0xff]   ;;  %v798_v27 = vld [vmem:[%s993_s0 + $0x60] ss:$8 sps:$4 sm:$0xff]   ;;  %v801_v29 = vld [vmem:[%s993_s0 + $0x74] ss:$8 sps:$4 sm:$0xff]  }
   0xb   :  { %690 = vmatpush3.bf16.msra.mxu0 %v770_v5  ;;  %759 = vmatpush3.bf16.msra.mxu1 %v770_v5  ;;  %v803_v30 = vld [vmem:[%s993_s0 + $0x30] ss:$8 sps:$4 sm:$0xff]   ;;  %v929_v35 = vld [vmem:[%s994_s2] ss:$0 sm:$0xff] }
   0xc   :  { %691 = vmatprep.subr.bf16.mxu0 %v771_v6  ;;  %752 = vmatprep.subr.bf16.mxu1 %v771_v6  ;;  %v804_v31 = vld [vmem:[%s993_s0 + $0x70] ss:$8 sps:$4 sm:$0xff]   ;;  %v934_v41 = vld [vmem:[%s995_s3] ss:$0 sm:$0xff] }
   0xf   :  { %692 = vmatpush3.bf16.msra.mxu0 %v772_v7  ;;  %760 = vmatpush3.bf16.msra.mxu1 %v772_v7 }
  0x10   :  { %693 = vmatprep.subr.bf16.mxu0 %v773_v8  ;;  %753 = vmatprep.subr.bf16.mxu1 %v773_v8 }
  0x13   :  { %694 = vmatpush3.bf16.msra.mxu0 %v774_v9  ;;  %761 = vmatpush3.bf16.msra.mxu1 %v774_v9 }
  0x14   :  { %695 = vmatprep.subr.bf16.mxu0 %v775_v10  ;;  %754 = vmatprep.subr.bf16.mxu1 %v775_v10 }
  0x17   :  { %696 = vmatpush3.bf16.msra.mxu0 %v776_v13  ;;  %762 = vmatpush3.bf16.msra.mxu1 %v776_v13 }
  0x18   :  { %697 = vmatprep.subr.bf16.mxu0 %v777_v14  ;;  %755 = vmatprep.subr.bf16.mxu1 %v777_v14 }
  0x1b   :  { %698 = vmatpush3.bf16.msra.mxu0 %v778_v15  ;;  %763 = vmatpush3.bf16.msra.mxu1 %v778_v15 }
  0x1c   :  { %699 = vmatprep.subr.bf16.mxu0 %v779_v16  ;;  %756 = vmatprep.subr.bf16.mxu1 %v779_v16 }
  0x1f   :  { %700 = vmatpush3.bf16.msra.mxu0 %v780_v17  ;;  %764 = vmatpush3.bf16.msra.mxu1 %v780_v17 }
  0x22   :  { %311 = vmatmul.mubr.bf16.vlgmr.msra.gmra.mrb[0].mxu0 %v781_v18  ;;  %343 = vmatmul.mubr.bf16.vlgmr.msra.gmra.mrb[0].mxu1 %v784_v19 }
  0x23   :  { %318 = vmatprep.mubr.bf16.mxu0 %v787_v20  ;;  %350 = vmatprep.mubr.bf16.mxu1 %v789_v21 }
  0x2a   :  { %319 = vmatmul.mubr.bf16.gmra.mrb[4].mxu0 %v791_v22  ;;  %351 = vmatmul.mubr.bf16.gmra.mrb[4].mxu1 %v792_v23 }
  0x2b   :  { %326 = vmatprep.mubr.bf16.mxu0 %v793_v24  ;;  %358 = vmatprep.mubr.bf16.mxu1 %v795_v25 }
  0x32   :  { %327 = vmatmul.mubr.bf16.gmra.mrb[8].mxu0 %v797_v26  ;;  %359 = vmatmul.mubr.bf16.gmra.mrb[8].mxu1 %v798_v27 }
  0x33   :  { %334 = vmatprep.mubr.bf16.mxu0 %v799_v28  ;;  %366 = vmatprep.mubr.bf16.mxu1 %v801_v29 }
  0x3a   :  { %335 = vmatmul.mubr.bf16.gmra.mrb[12].mxu0 %v803_v30  ;;  %367 = vmatmul.mubr.bf16.gmra.mrb[12].mxu1 %v804_v31 }
  0xf5   :  { %v701_v32 = vpop.f32.mrb[0].mxu0  ;;  %v725_v33 = vpop.f32.mrb[0].mxu1 }
  0xf6   :  { %v702_v34 = vpop.f32.mrb[1].mxu0  ;;  %v726_v36 = vpop.f32.mrb[1].mxu1 }
  0xf7   :  { %v703_v37 = vadd.f32 %v702_v34, %v701_v32  ;;  %v727_v38 = vadd.f32 %v726_v36, %v725_v33  ;;  %v704_v39 = vpop.f32.mrb[2].mxu0  ;;  %v728_v40 = vpop.f32.mrb[2].mxu1 }
  0xf8   :  { %v705_v42 = vpop.f32.mrb[3].mxu0  ;;  %v729_v43 = vpop.f32.mrb[3].mxu1 }
  0xf9   :  { %v433_v44 = vmul.f32 %v703_v37, %v929_v35  ;;  %v441_v45 = vmul.f32 %v727_v38, %v929_v35  ;;  %v706_v46 = vadd.f32 %v705_v42, %v704_v39  ;;  %v730_v47 = vadd.f32 %v729_v43, %v728_v40 }
  0xfb   :  { %v456_v48 = vadd.f32 %v934_v41, %v433_v44  ;;  %v464_v49 = vadd.f32 %v934_v41, %v441_v45  ;;  %v434_v50 = vmul.f32 %v706_v46, %v929_v35  ;;  %v442_v51 = vmul.f32 %v730_v47, %v929_v35 }
  0xfd   :  { %v457_v52 = vadd.f32 %v934_v41, %v434_v50  ;;  %v465_v53 = vadd.f32 %v934_v41, %v442_v51  ;;  %v707_v54 = vpop.f32.mrb[4].mxu0  ;;  %v731_v55 = vpop.f32.mrb[4].mxu1  ;;  %v472_v56 = vmax.f32 %v456_v48, 0.0  ;;  %v480_v57 = vmax.f32 %v464_v49, 0.0 }
  0xfe   :  { %v708_v58 = vpop.f32.mrb[5].mxu0  ;;  %v732_v59 = vpop.f32.mrb[5].mxu1 }
  0xff   :  { %v473_v60 = vmax.f32 %v457_v52, 0.0  ;;  %v481_v61 = vmax.f32 %v465_v53, 0.0  ;;  %v709_v62 = vadd.f32 %v708_v58, %v707_v54  ;;  %v733_v63 = vadd.f32 %v732_v59, %v731_v55  ;;  %v710_v0 = vpop.f32.mrb[6].mxu0  ;;  %v734_v1 = vpop.f32.mrb[6].mxu1 }
 0x100   :  { %v711_v2 = vpop.f32.mrb[7].mxu0  ;;  %v735_v3 = vpop.f32.mrb[7].mxu1 }
 0x101   :  { %v641_v4 = vpack.c.bf16 %v473_v60, %v472_v56  ;;  %v661_v5 = vpack.c.bf16 %v481_v61, %v480_v57  ;;  %v435_v6 = vmul.f32 %v709_v62, %v929_v35  ;;  %v443_v7 = vmul.f32 %v733_v63, %v929_v35 }
 0x102   :  { %v712_v8 = vadd.f32 %v711_v2, %v710_v0  ;;  %v736_v9 = vadd.f32 %v735_v3, %v734_v1 }
 0x103   :  { %642 = vst [vmem:[%s996_s4] sm:$0xff] %v641_v4   ;;  %681 = vst [vmem:[%s996_s4 + $0x20] sm:$0xff] %v661_v5   ;;  %v458_v10 = vadd.f32 %v934_v41, %v435_v6  ;;  %v466_v11 = vadd.f32 %v934_v41, %v443_v7 }
 0x104   :  { %v436_v12 = vmul.f32 %v712_v8, %v929_v35  ;;  %v444_v13 = vmul.f32 %v736_v9, %v929_v35 }
 0x105   :  { %v713_v14 = vpop.f32.mrb[8].mxu0  ;;  %v737_v15 = vpop.f32.mrb[8].mxu1  ;;  %v474_v24 = vmax.f32 %v458_v10, 0.0  ;;  %v482_v25 = vmax.f32 %v466_v11, 0.0 }
 0x106   :  { %v459_v16 = vadd.f32 %v934_v41, %v436_v12  ;;  %v467_v17 = vadd.f32 %v934_v41, %v444_v13  ;;  %v714_v18 = vpop.f32.mrb[9].mxu0  ;;  %v738_v19 = vpop.f32.mrb[9].mxu1 }
 0x107   :  { %v715_v20 = vadd.f32 %v714_v18, %v713_v14  ;;  %v739_v21 = vadd.f32 %v738_v19, %v737_v15  ;;  %v716_v22 = vpop.f32.mrb[10].mxu0  ;;  %v740_v23 = vpop.f32.mrb[10].mxu1 }
 0x108   :  { %v475_v26 = vmax.f32 %v459_v16, 0.0  ;;  %v483_v27 = vmax.f32 %v467_v17, 0.0  ;;  %v717_v28 = vpop.f32.mrb[11].mxu0  ;;  %v741_v29 = vpop.f32.mrb[11].mxu1 }
 0x109   :  { %v437_v30 = vmul.f32 %v715_v20, %v929_v35  ;;  %v445_v31 = vmul.f32 %v739_v21, %v929_v35  ;;  %v718_v32 = vadd.f32 %v717_v28, %v716_v22  ;;  %v742_v33 = vadd.f32 %v741_v29, %v740_v23 }
 0x10a   :  { %v646_v34 = vpack.c.bf16 %v475_v26, %v474_v24  ;;  %v666_v36 = vpack.c.bf16 %v483_v27, %v482_v25 }
 0x10b   :  { %v460_v37 = vadd.f32 %v934_v41, %v437_v30  ;;  %v468_v38 = vadd.f32 %v934_v41, %v445_v31  ;;  %v438_v39 = vmul.f32 %v718_v32, %v929_v35  ;;  %v446_v40 = vmul.f32 %v742_v33, %v929_v35 }
 0x10c   :  { %678 = vst [vmem:[%s996_s4 + $0x8] sm:$0xff] %v646_v34   ;;  %682 = vst [vmem:[%s996_s4 + $0x28] sm:$0xff] %v666_v36  }
 0x10d   :  { %v461_v42 = vadd.f32 %v934_v41, %v438_v39  ;;  %v469_v43 = vadd.f32 %v934_v41, %v446_v40  ;;  %v719_v44 = vpop.f32.mrb[12].mxu0  ;;  %v743_v45 = vpop.f32.mrb[12].mxu1  ;;  %v476_v46 = vmax.f32 %v460_v37, 0.0  ;;  %v484_v47 = vmax.f32 %v468_v38, 0.0 }
 0x10e   :  { %v720_v48 = vpop.f32.mrb[13].mxu0  ;;  %v744_v49 = vpop.f32.mrb[13].mxu1 }
 0x10f   :  { %v477_v50 = vmax.f32 %v461_v42, 0.0  ;;  %v485_v51 = vmax.f32 %v469_v43, 0.0  ;;  %v721_v52 = vadd.f32 %v720_v48, %v719_v44  ;;  %v745_v53 = vadd.f32 %v744_v49, %v743_v45  ;;  %v722_v54 = vpop.f32.mrb[14].mxu0  ;;  %v746_v55 = vpop.f32.mrb[14].mxu1 }
 0x110   :  { %v723_v56 = vpop.f32.mrb[15].mxu0  ;;  %v747_v57 = vpop.f32.mrb[15].mxu1 }
 0x111   :  { %v651_v58 = vpack.c.bf16 %v477_v50, %v476_v46  ;;  %v671_v59 = vpack.c.bf16 %v485_v51, %v484_v47  ;;  %v439_v60 = vmul.f32 %v721_v52, %v929_v35  ;;  %v447_v61 = vmul.f32 %v745_v53, %v929_v35 }
 0x112   :  { %v724_v62 = vadd.f32 %v723_v56, %v722_v54  ;;  %v748_v63 = vadd.f32 %v747_v57, %v746_v55 }
 0x113   :  { %679 = vst [vmem:[%s996_s4 + $0x10] sm:$0xff] %v651_v58   ;;  %683 = vst [vmem:[%s996_s4 + $0x30] sm:$0xff] %v671_v59   ;;  %v462_v0 = vadd.f32 %v934_v41, %v439_v60  ;;  %v470_v1 = vadd.f32 %v934_v41, %v447_v61 }
 0x114   :  { %v440_v2 = vmul.f32 %v724_v62, %v929_v35  ;;  %v448_v3 = vmul.f32 %v748_v63, %v929_v35 }
 0x115   :  { %v478_v6 = vmax.f32 %v462_v0, 0.0  ;;  %v486_v7 = vmax.f32 %v470_v1, 0.0 }
 0x116   :  { %v463_v4 = vadd.f32 %v934_v41, %v440_v2  ;;  %v471_v5 = vadd.f32 %v934_v41, %v448_v3 }
 0x118   :  { %v479_v8 = vmax.f32 %v463_v4, 0.0  ;;  %v487_v9 = vmax.f32 %v471_v5, 0.0 }
 0x11a   :  { %v656_v10 = vpack.c.bf16 %v479_v8, %v478_v6  ;;  %v676_v11 = vpack.c.bf16 %v487_v9, %v486_v7 }
 0x11c   :  { %680 = vst [vmem:[%s996_s4 + $0x18] sm:$0xff] %v656_v10   ;;  %684 = vst [vmem:[%s996_s4 + $0x38] sm:$0xff] %v676_v11  }

// kernel: deeplab_v2_forward.25
= control target key start
LH: loop header
LB: loop body
LE: loop exit
PB: predicated region body
PF: predicated region fallthrough
CT: control target
= control target key end

     0   :  { %s985_s15 = smov 0   ;;  %s987_s16 = smov 0   ;;  %s1086_s0 = inlined_call_operand.vmem [shape: bf16[56,640], index: 0, kind: input, shape index: {}]   ;;  %s1087_s1 = inlined_call_operand.vmem [shape: bf16[640,128], index: 1, kind: input, shape index: {}]   ;;  %s1088_s2 = inlined_call_operand.vmem [shape: f32[1,128], index: 2, kind: input, shape index: {}]   ;;  %s1089_s3 = inlined_call_operand.vmem [shape: f32[1,128], index: 3, kind: input, shape index: {}]   ;;  %s1090_s4 = inlined_call_operand.vmem [shape: bf16[56,128], index: 4, kind: output, shape index: {}]  }
   0x1   :  { %s989_s17 = smov 0   ;;  %s991_s18 = smov 0  }
   0x2   :  { %s993_s19 = smov 0  }
   0x3 LB: > { %s26_s20 = sadd.s32 1, %s953_s18  ;;  %p49_p1 = scmp.ne.s32.totalorder %s945_s16, %s941_s15  ;;  %s957_s19 = sphi %s993_s19, %s14_s19   ;;  %s953_s18 = sphi %s991_s18, %s1094_s18   ;;  %s949_s17 = sphi %s989_s17, %s1093_s17   ;;  %s945_s16 = sphi %s987_s16, %s1092_s16   ;;  %s941_s15 = sphi %s985_s15, %s1091_s15  }
   0x4   : > { %p27_p0 = scmp.ge.s32.totalorder %s26_s20, 5  ;;  %p50_p2 = scmp.eq.s32.totalorder %s957_s19, 0 }
   0x5   : > { %s42_s22 = sadd.s32 1, %s945_s16  ;;  %p756_p5 = scmp.ge.s32.totalorder %s957_s19, 5 }
   0x6   : > { %s1096_s20 = smov (%p27_p0, %s26_s20), 0  ;;  %p51_p3 = por %p50_p2, %p49_p1 }
   0x7   : > { %s38_s21 = ssub.s32 %s953_s18, %s1096_s20  ;;  %195 = sbr.rel (%p756_p5) target bundleno = 23 (0x17), region = 24 }
   0x8   : > { %p40_p4 = scmp.eq.s32.totalorder %s38_s21, 0 }
   0xa   : > { %s1020_s23 = scalar_select %p40_p4, %s945_s16, %s42_s22  }
   0xe   : > { %198 = sbr.rel (!%p51_p3) target bundleno = 23 (0x17), region = 28  ;;  %s200_s24 = sand.u32 (%p51_p3), 1, %s945_s16  }
   0xf   : > { %s757_s25 = sshll.u32 (%p51_p3), %s953_s18, 2  ;;  %s864_s26 = smul.u32 (%p51_p3), 28, %s200_s24 }
  0x10   : > { %s207_s29 = scalar_lea.vmem (%p51_p3), %s1086_s0, %s757_s25 }
  0x11   : > { %v223_v0 = vld [vmem:[%s207_s29] sm:$0xf] (%p51_p3)  ;;  %v225_v1 = vld [vmem:[%s207_s29 + $0x14] sm:$0xf] (%p51_p3)  ;;  %v227_v2 = vld [vmem:[%s207_s29 + $0x28] sm:$0xf] (%p51_p3) }
  0x12   : > { %v229_v3 = vld [vmem:[%s207_s29 + $0x3c] sm:$0xf] (%p51_p3)  ;;  %v231_v4 = vld [vmem:[%s207_s29 + $0x50] sm:$0xf] (%p51_p3)  ;;  %s202_s30 = scalar_lea.vmem (%p51_p3), [#allocation3], %s864_s26 }
  0x13   : > { %224 = vst [vmem:[%s202_s30] sm:$0xf] (%p51_p3), %v223_v0  ;;  %226 = vst [vmem:[%s202_s30 + $0x4] sm:$0xf] (%p51_p3), %v225_v1  ;;  %v233_v5 = vld [vmem:[%s207_s29 + $0x64] sm:$0xf] (%p51_p3) }
  0x14   : > { %228 = vst [vmem:[%s202_s30 + $0x8] sm:$0xf] (%p51_p3), %v227_v2  ;;  %230 = vst [vmem:[%s202_s30 + $0xc] sm:$0xf] (%p51_p3), %v229_v3  ;;  %v235_v6 = vld [vmem:[%s207_s29 + $0x78] sm:$0xf] (%p51_p3) }
  0x15   : > { %232 = vst [vmem:[%s202_s30 + $0x10] sm:$0xf] %v231_v4  ;;  %234 = vst [vmem:[%s202_s30 + $0x14] sm:$0xf] %v233_v5 }
  0x16   : > { %236 = vst [vmem:[%s202_s30 + $0x18] sm:$0xf] %v235_v6 }
  0x17 PF: > { %p758_p6 = scmp.ge.s32.totalorder %s957_s19, 1  ;;  %p284_p7 = scmp.lt.s32.totalorder %s957_s19, 6 }
  0x19   : > { %p285_p8 = pnand %p758_p6, %p284_p7 }
  0x1a   : > { %s291_s5 = sand.u32 (!%p285_p8), 1, %s941_s15   ;;  %s759_s6 = sshll.u32 (!%p285_p8), %s949_s17, 4 }
  0x1b   : > { %288 = sbr.rel (%p285_p8) target bundleno = 309 (0x135), region = 73  ;;  %p335_p9 = scmp.lt.s32.totalorder (!%p285_p8), %s759_s6, 79 }
  0x1c   : > { %s865_s7 = smul.u32 (!%p285_p8), 28, %s291_s5  ;;  %p761_p10 = scmp.ne.s32.totalorder (!%p285_p8), %s949_s17, 0 }
  0x1e   : > { %s1037_s12 = scalar_lea.vmem (!%p285_p8), [#allocation3], %s865_s7 }
  0x22   : > { %s1098_s6 = smov (!%p335_p9, %s759_s6), 79  ;;  %362 = sbr.rel (%p761_p10) target bundleno = 41 (0x29), region = 81 }
  0x23   : > { %s760_s8 = sshll.u32 %s1098_s6, 2  ;;  %v959_v7 = vmov (!%p761_p10), 0.0  }
  0x24   : > { %s1035_s11 = scalar_lea.vmem %s1087_s1, %s760_s8  ;;  %363 = vst [vmem:[#allocation2] sm:$0xff] (!%p761_p10), %v959_v7  ;;  %364 = vst [vmem:[#allocation2 + $0x8] sm:$0xff] (!%p761_p10), %v959_v7 }
  0x25   : > { %365 = vst [vmem:[#allocation2 + $0x10] sm:$0xff] (!%p761_p10), %v959_v7  ;;  %366 = vst [vmem:[#allocation2 + $0x18] sm:$0xff] (!%p761_p10), %v959_v7 }
  0x26   : > { %367 = vst [vmem:[#allocation2 + $0x20] sm:$0xff] (!%p761_p10), %v959_v7  ;;  %368 = vst [vmem:[#allocation2 + $0x28] sm:$0xff] (!%p761_p10), %v959_v7 }
  0x27   : > { %369 = vst [vmem:[#allocation2 + $0x30] sm:$0xff] (!%p761_p10), %v959_v7 }
  0x29 PF: > { %v907_v8 = vld [vmem:[%s1035_s11] sm:$0xff]   ;;  %v908_v9 = vld [vmem:[%s1035_s11 + $0x8] sm:$0xff]   ;;  %v909_v10 = vld [vmem:[%s1035_s11 + $0x10] sm:$0xff]   ;;  %p774_p11 = scmp.ne.s32.totalorder %s949_s17, 4 }
  0x2a   : > { %824 = vmatprep.subr.bf16.mxu0 %v907_v8  ;;  %848 = vmatprep.subr.bf16.mxu1 %v907_v8  ;;  %v910_v11 = vld [vmem:[%s1035_s11 + $0x18] sm:$0xff]   ;;  %v916_v13 = vld [vmem:[%s1037_s12 + $0x10] sm:$0xff]   ;;  %v913_v16 = vld [vmem:[%s1035_s11 + $0x30] sm:$0xff]  }
  0x2b   : > { %825 = vmatpush3.bf16.msra.mxu0 %v907_v8  ;;  %856 = vmatpush3.bf16.msra.mxu1 %v907_v8  ;;  %v915_v12 = vld [vmem:[%s1037_s12] sm:$0xff]   ;;  %v911_v14 = vld [vmem:[%s1035_s11 + $0x20] sm:$0xff]   ;;  %v912_v15 = vld [vmem:[%s1035_s11 + $0x28] sm:$0xff]  }
  0x2c   : > { %826 = vmatprep.subr.bf16.mxu0 %v908_v9  ;;  %849 = vmatprep.subr.bf16.mxu1 %v908_v9  ;;  %v914_v17 = vld [vmem:[%s1035_s11 + $0x38] sm:$0xff]   ;;  %v918_v19 = vld [vmem:[%s1037_s12 + $0x18] ss:$0 sps:$4 sm:$0xff]   ;;  %v370_v22 = vld [vmem:[#allocation2] sm:$0xff] }
  0x2d   : > { %840 = vmatprep.mubr.bf16.mxu0 %v915_v12  ;;  %844 = vmatprep.mubr.bf16.mxu1 %v916_v13  ;;  %v917_v18 = vld [vmem:[%s1037_s12 + $0x8] sm:$0xff]   ;;  %v372_v20 = vld [vmem:[#allocation2 + $0x10] sm:$0xff]  ;;  %v371_v31 = vld [vmem:[#allocation2 + $0x8] sm:$0xff] }
  0x2e   : > { %v376_v21 = vld [vmem:[#allocation2 + $0x30] sm:$0xff]  ;;  %v374_v23 = vld [vmem:[#allocation2 + $0x20] sm:$0xff]  ;;  %v373_v26 = vld [vmem:[#allocation2 + $0x18] sm:$0xff] }
  0x2f   : > { %827 = vmatpush3.bf16.msra.mxu0 %v908_v9  ;;  %857 = vmatpush3.bf16.msra.mxu1 %v908_v9  ;;  %v375_v32 = vld [vmem:[#allocation2 + $0x28] sm:$0xff]  ;;  %v775_v44 = vld [vmem:[%s1088_s2] ss:$0 sm:$0xff] (!%p774_p11) }
  0x30   : > { %828 = vmatprep.subr.bf16.mxu0 %v909_v10  ;;  %850 = vmatprep.subr.bf16.mxu1 %v909_v10  ;;  %v776_v47 = vld [vmem:[%s1089_s3] ss:$0 sm:$0xff] (!%p774_p11) }
  0x33   : > { %829 = vmatpush3.bf16.msra.mxu0 %v909_v10  ;;  %858 = vmatpush3.bf16.msra.mxu1 %v909_v10 }
  0x34   : > { %830 = vmatprep.subr.bf16.mxu0 %v910_v11  ;;  %851 = vmatprep.subr.bf16.mxu1 %v910_v11 }
  0x37   : > { %831 = vmatpush3.bf16.msra.mxu0 %v910_v11  ;;  %859 = vmatpush3.bf16.msra.mxu1 %v910_v11 }
  0x38   : > { %832 = vmatprep.subr.bf16.mxu0 %v911_v14  ;;  %852 = vmatprep.subr.bf16.mxu1 %v911_v14 }
  0x3b   : > { %833 = vmatpush3.bf16.msra.mxu0 %v911_v14  ;;  %860 = vmatpush3.bf16.msra.mxu1 %v911_v14 }
  0x3c   : > { %834 = vmatprep.subr.bf16.mxu0 %v912_v15  ;;  %853 = vmatprep.subr.bf16.mxu1 %v912_v15 }
  0x3f   : > { %835 = vmatpush3.bf16.msra.mxu0 %v912_v15  ;;  %861 = vmatpush3.bf16.msra.mxu1 %v912_v15 }
  0x40   : > { %836 = vmatprep.subr.bf16.mxu0 %v913_v16  ;;  %854 = vmatprep.subr.bf16.mxu1 %v913_v16 }
  0x43   : > { %837 = vmatpush3.bf16.msra.mxu0 %v913_v16  ;;  %862 = vmatpush3.bf16.msra.mxu1 %v913_v16 }
  0x44   : > { %838 = vmatprep.subr.bf16.mxu0 %v914_v17  ;;  %855 = vmatprep.subr.bf16.mxu1 %v914_v17 }
  0x47   : > { %839 = vmatpush3.bf16.msra.mxu0 %v914_v17  ;;  %863 = vmatpush3.bf16.msra.mxu1 %v914_v17 }
  0x4a   : > { %841 = vmatmul.mubr.bf16.vlgmr.msra.gmra.mrb[0].mxu0 %v917_v18  ;;  %845 = vmatmul.mubr.bf16.vlgmr.msra.gmra.mrb[0].mxu1 %v918_v19 }
 0x11d   : > { %v842_v24 = vpop.f32.mrb[0].mxu0  ;;  %v846_v25 = vpop.f32.mrb[0].mxu1  ;;  %551 = sbr.rel (%p774_p11) target bundleno = 309 (0x135), region = 85 }
 0x11e   : > { %v536_v27 = vadd.f32 %v842_v24, %v372_v20  ;;  %v540_v28 = vadd.f32 %v846_v25, %v376_v21  ;;  %v504_v29 = vpop.f32.mrb[1].mxu0  ;;  %v520_v30 = vpop.f32.mrb[1].mxu1 }
 0x11f   : > { %v534_v33 = vadd.f32 %v504_v29, %v370_v22  ;;  %v538_v34 = vadd.f32 %v520_v30, %v374_v23  ;;  %v843_v35 = vpop.f32.mrb[2].mxu0  ;;  %v847_v36 = vpop.f32.mrb[2].mxu1 }
 0x120   : > { %543 = vst [vmem:[#allocation2 + $0x10] sm:$0xff] %v536_v27  ;;  %547 = vst [vmem:[#allocation2 + $0x30] sm:$0xff] %v540_v28  ;;  %v537_v37 = vadd.f32 %v843_v35, %v373_v26  ;;  %v507_v38 = vpop.f32.mrb[3].mxu0  ;;  %v523_v39 = vpop.f32.mrb[3].mxu1 }
 0x121   : > { %541 = vst [vmem:[#allocation2] sm:$0xff] %v534_v33  ;;  %545 = vst [vmem:[#allocation2 + $0x20] sm:$0xff] %v538_v34  ;;  %v535_v40 = vadd.f32 %v507_v38, %v371_v31  ;;  %v539_v41 = vadd.f32 %v523_v39, %v375_v32 }
 0x122   : > { %544 = vst [vmem:[#allocation2 + $0x18] sm:$0xff] %v537_v37 }
 0x123   : > { %542 = vst [vmem:[#allocation2 + $0x8] sm:$0xff] %v535_v40  ;;  %546 = vst [vmem:[#allocation2 + $0x28] sm:$0xff] %v539_v41 }
 0x127   : > { %v554_v48 = vld [vmem:[#allocation2 + $0x10] sm:$0xff] }
 0x128   : > { %v552_v42 = vld [vmem:[#allocation2] sm:$0xff]  ;;  %v568_v50 = vmul.f32 %v775_v44, %v554_v48  ;;  %v558_v54 = vld [vmem:[#allocation2 + $0x30] sm:$0xff] }
 0x129   : > { %v566_v45 = vmul.f32 %v775_v44, %v552_v42  ;;  %v555_v49 = vld [vmem:[#allocation2 + $0x18] sm:$0xff]  ;;  %v556_v52 = vld [vmem:[#allocation2 + $0x20] sm:$0xff]  ;;  %v572_v61 = vmul.f32 %v775_v44, %v558_v54 }
 0x12a   : > { %v553_v43 = vld [vmem:[#allocation2 + $0x8] sm:$0xff]  ;;  %v569_v51 = vmul.f32 %v775_v44, %v555_v49  ;;  %v570_v57 = vmul.f32 %v775_v44, %v556_v52  ;;  %v582_v59 = vadd.f32 %v776_v47, %v568_v50 }
 0x12b   : > { %v567_v46 = vmul.f32 %v775_v44, %v553_v43  ;;  %v557_v53 = vld [vmem:[#allocation2 + $0x28] sm:$0xff]  ;;  %v580_v55 = vadd.f32 %v776_v47, %v566_v45  ;;  %v586_v4 = vadd.f32 %v776_v47, %v572_v61 }
 0x12c   : > { %v571_v58 = vmul.f32 %v775_v44, %v557_v53  ;;  %v583_v60 = vadd.f32 %v776_v47, %v569_v51  ;;  %v584_v0 = vadd.f32 %v776_v47, %v570_v57  ;;  %v589_v2 = vmax.f32 %v582_v59, 0.0 }
 0x12d   : > { %v581_v56 = vadd.f32 %v776_v47, %v567_v46  ;;  %v587_v62 = vmax.f32 %v580_v55, 0.0  ;;  %v593_v9 = vmax.f32 %v586_v4, 0.0 }
 0x12e   : > { %v585_v1 = vadd.f32 %v776_v47, %v571_v58  ;;  %v590_v3 = vmax.f32 %v583_v60, 0.0  ;;  %v591_v6 = vmax.f32 %v584_v0, 0.0 }
 0x12f   : > { %v588_v63 = vmax.f32 %v581_v56, 0.0  ;;  %v794_v11 = vpack.c.bf16 %v593_v9, %v593_v9 }
 0x130   : > { %v592_v7 = vmax.f32 %v585_v1, 0.0  ;;  %v803_v8 = vpack.c.bf16 %v590_v3, %v589_v2 }
 0x131   : > { %v798_v5 = vpack.c.bf16 %v588_v63, %v587_v62  ;;  %629 = vst [vmem:[%s1090_s4 + $0x18] sm:$0xf] %v794_v11 }
 0x132   : > { %v808_v10 = vpack.c.bf16 %v592_v7, %v591_v6  ;;  %810 = vst [vmem:[%s1090_s4 + $0x8] sm:$0xff] %v803_v8  }
 0x133   : > { %799 = vst [vmem:[%s1090_s4] sm:$0xff] %v798_v5  }
 0x134   : > { %811 = vst [vmem:[%s1090_s4 + $0x10] sm:$0xff] %v808_v10  }
 0x135 PF: > { %s14_s19 = sadd.s32 1, %s957_s19   ;;  %s1091_s15 = smov %s945_s16 }
 0x136   : > { %p11_p12 = scmp.ge.s32.totalorder %s14_s19, 7   ;;  %s1092_s16 = smov %s1020_s23 }
 0x137   : > { %s1093_s17 = smov %s953_s18  ;;  %s1094_s18 = smov %s1096_s20 }
 0x138   :  { %13 = sbr.rel (!%p11_p12) target bundleno = 3 (0x3), region = 129 }

// kernel: deeplab_v2_forward.23
= control target key start
LH: loop header
LB: loop body
LE: loop exit
PB: predicated region body
PF: predicated region fallthrough
CT: control target
= control target key end

     0   :  { %v477_v1 = vmov 0   ;;  %v293_v21 = vlaneseq  ;;  %s590_s1 = inlined_call_operand.vmem [shape: bf16[128,256], index: 1, kind: input, shape index: {}]   ;;  %s591_s0 = inlined_call_operand.vmem [shape: bf16[56,128], index: 0, kind: input, shape index: {}]   ;;  %s592_s2 = inlined_call_operand.vmem [shape: f32[1,256], index: 2, kind: input, shape index: {}]   ;;  %s593_s3 = inlined_call_operand.vmem [shape: f32[1,256], index: 3, kind: input, shape index: {}]   ;;  %s594_s4 = inlined_call_operand.vmem [shape: bf16[56,256], index: 4, kind: output, shape index: {}]  }
   0x1   :  { %v449_v0 = vld [vmem:[%s590_s1 + $0x4] ss:$8 sps:$4 sm:$0xff]   ;;  %207 = vmatprep.mubr.bf16.mxu0 %v477_v1  ;;  %227 = vmatprep.mubr.bf16.mxu1 %v477_v1  ;;  %v451_v2 = vld [vmem:[%s590_s1] ss:$8 sps:$4 sm:$0xff]   ;;  %v452_v3 = vld [vmem:[%s590_s1 + $0x14] ss:$8 sps:$4 sm:$0xff]  }
   0x2   :  { %175 = vmatprep.subr.bf16.mxu0 %v449_v0  ;;  %432 = vmatprep.subr.bf16.mxu1 %v449_v0  ;;  %v454_v4 = vld [vmem:[%s590_s1 + $0x10] ss:$8 sps:$4 sm:$0xff]   ;;  %v455_v5 = vld [vmem:[%s590_s1 + $0x24] ss:$8 sps:$4 sm:$0xff]   ;;  %v457_v6 = vld [vmem:[%s590_s1 + $0x20] ss:$8 sps:$4 sm:$0xff]  }
   0x3   :  { %176 = vmatpush1.bf16.msra.mxu0 %v451_v2  ;;  %440 = vmatpush1.bf16.msra.mxu1 %v451_v2  ;;  %v458_v7 = vld [vmem:[%s590_s1 + $0x34] ss:$8 sps:$4 sm:$0xff]   ;;  %v460_v8 = vld [vmem:[%s590_s1 + $0x30] ss:$8 sps:$4 sm:$0xff]   ;;  %v461_v9 = vld [vmem:[%s590_s1 + $0x44] ss:$8 sps:$4 sm:$0xff]  }
   0x4   :  { %177 = vmatprep.subr.bf16.mxu0 %v452_v3  ;;  %433 = vmatprep.subr.bf16.mxu1 %v452_v3  ;;  %v463_v10 = vld [vmem:[%s590_s1 + $0x40] ss:$8 sps:$4 sm:$0xff]   ;;  %v464_v11 = vld [vmem:[%s590_s1 + $0x54] ss:$8 sps:$4 sm:$0xff]   ;;  %v466_v12 = vld [vmem:[%s590_s1 + $0x50] ss:$8 sps:$4 sm:$0xff]  }
   0x5   :  { %v467_v13 = vld [vmem:[%s590_s1 + $0x64] ss:$8 sps:$4 sm:$0xff]   ;;  %v469_v14 = vld [vmem:[%s590_s1 + $0x60] ss:$8 sps:$4 sm:$0xff]   ;;  %v470_v15 = vld [vmem:[%s590_s1 + $0x74] ss:$8 sps:$4 sm:$0xff]  }
   0x6   :  { %v472_v16 = vld [vmem:[%s590_s1 + $0x70] ss:$8 sps:$4 sm:$0xff]   ;;  %v473_v17 = vld [vmem:[%s591_s0] sm:$0xff]   ;;  %v475_v19 = vld [vmem:[%s591_s0 + $0x8] sm:$0xff]   ;;  %v294_v22 = vshrl.u32 %v293_v21, 7 }
   0x7   :  { %178 = vmatpush1.bf16.msra.mxu0 %v454_v4  ;;  %441 = vmatpush1.bf16.msra.mxu1 %v454_v4  ;;  %v474_v18 = vld [vmem:[%s591_s0 + $0x10] sm:$0xff]   ;;  %v476_v20 = vld [vmem:[%s591_s0 + $0x18] ss:$0 sps:$4 sm:$0xff]   ;;  %v291_v24 = vld [vmem:[%s592_s2] sm:$0x3] }
   0x8   :  { %179 = vmatprep.subr.bf16.mxu0 %v455_v5  ;;  %434 = vmatprep.subr.bf16.mxu1 %v455_v5  ;;  %v295_v23 = vsub.s32 0, %v294_v22  ;;  %v299_v25 = vsub.s32 1, %v294_v22  ;;  %v317_v26 = vld [vmem:[%s593_s3] sm:$0x3] }
   0xa   :  { %v296_v27 = vrot.slane %v291_v24, %v295_v23  ;;  %v300_v28 = vrot.slane %v291_v24, %v299_v25  ;;  %v322_v29 = vrot.slane %v317_v26, %v295_v23  ;;  %v326_v32 = vrot.slane %v317_v26, %v299_v25 }
   0xb   :  { %180 = vmatpush1.bf16.msra.mxu0 %v457_v6  ;;  %442 = vmatpush1.bf16.msra.mxu1 %v457_v6 }
   0xc   :  { %181 = vmatprep.subr.bf16.mxu0 %v458_v7  ;;  %435 = vmatprep.subr.bf16.mxu1 %v458_v7 }
   0xf   :  { %182 = vmatpush1.bf16.msra.mxu0 %v460_v8  ;;  %443 = vmatpush1.bf16.msra.mxu1 %v460_v8 }
  0x10   :  { %183 = vmatprep.subr.bf16.mxu0 %v461_v9  ;;  %436 = vmatprep.subr.bf16.mxu1 %v461_v9 }
  0x13   :  { %184 = vmatpush1.bf16.msra.mxu0 %v463_v10  ;;  %444 = vmatpush1.bf16.msra.mxu1 %v463_v10 }
  0x14   :  { %185 = vmatprep.subr.bf16.mxu0 %v464_v11  ;;  %437 = vmatprep.subr.bf16.mxu1 %v464_v11 }
  0x17   :  { %186 = vmatpush1.bf16.msra.mxu0 %v466_v12  ;;  %445 = vmatpush1.bf16.msra.mxu1 %v466_v12 }
  0x18   :  { %187 = vmatprep.subr.bf16.mxu0 %v467_v13  ;;  %438 = vmatprep.subr.bf16.mxu1 %v467_v13 }
  0x1b   :  { %188 = vmatpush1.bf16.msra.mxu0 %v469_v14  ;;  %446 = vmatpush1.bf16.msra.mxu1 %v469_v14 }
  0x1c   :  { %189 = vmatprep.subr.bf16.mxu0 %v470_v15  ;;  %439 = vmatprep.subr.bf16.mxu1 %v470_v15 }
  0x1f   :  { %190 = vmatpush1.bf16.msra.mxu0 %v472_v16  ;;  %447 = vmatpush1.bf16.msra.mxu1 %v472_v16 }
  0x22   :  { %208 = vmatmul.mubr.bf16.vlgmr.msra.gmra.mrb[0].mxu0 %v473_v17  ;;  %228 = vmatmul.mubr.bf16.vlgmr.msra.gmra.mrb[0].mxu1 %v474_v18 }
  0x23   :  { %217 = vmatprep.mubr.bf16.mxu0 %v477_v1  ;;  %237 = vmatprep.mubr.bf16.mxu1 %v477_v1 }
  0x2a   :  { %218 = vmatmul.mubr.bf16.gmra.mrb[4].mxu0 %v475_v19  ;;  %238 = vmatmul.mubr.bf16.gmra.mrb[4].mxu1 %v476_v20 }
  0xf5   :  { %v209_v30 = vpop.f32.mrb[0].mxu0  ;;  %v229_v31 = vpop.f32.mrb[0].mxu1 }
  0xf6   :  { %v303_v33 = vmul.f32 %v296_v27, %v209_v30  ;;  %v311_v34 = vmul.f32 %v296_v27, %v229_v31  ;;  %v211_v35 = vpop.f32.mrb[1].mxu0  ;;  %v231_v36 = vpop.f32.mrb[1].mxu1 }
  0xf7   :  { %v304_v37 = vmul.f32 %v300_v28, %v211_v35  ;;  %v312_v38 = vmul.f32 %v300_v28, %v231_v36  ;;  %v213_v39 = vpop.f32.mrb[2].mxu0  ;;  %v233_v40 = vpop.f32.mrb[2].mxu1 }
  0xf8   :  { %v329_v41 = vadd.f32 %v322_v29, %v303_v33  ;;  %v337_v42 = vadd.f32 %v322_v29, %v311_v34  ;;  %v305_v43 = vmul.f32 %v296_v27, %v213_v39  ;;  %v313_v44 = vmul.f32 %v296_v27, %v233_v40  ;;  %v215_v45 = vpop.f32.mrb[3].mxu0  ;;  %v235_v46 = vpop.f32.mrb[3].mxu1 }
  0xf9   :  { %v330_v47 = vadd.f32 %v326_v32, %v304_v37  ;;  %v338_v48 = vadd.f32 %v326_v32, %v312_v38  ;;  %v306_v49 = vmul.f32 %v300_v28, %v215_v45  ;;  %v314_v50 = vmul.f32 %v300_v28, %v235_v46 }
  0xfa   :  { %v331_v51 = vadd.f32 %v322_v29, %v305_v43  ;;  %v339_v52 = vadd.f32 %v322_v29, %v313_v44 }
  0xfb   :  { %v425_v53 = vpack.c.bf16 %v330_v47, %v329_v41  ;;  %v429_v54 = vpack.c.bf16 %v338_v48, %v337_v42  ;;  %v332_v55 = vadd.f32 %v326_v32, %v306_v49  ;;  %v340_v56 = vadd.f32 %v326_v32, %v314_v50 }
  0xfd   :  { %387 = vst [vmem:[%s594_s4] sm:$0xff] %v425_v53  ;;  %391 = vst [vmem:[%s594_s4 + $0x20] sm:$0xff] %v429_v54  ;;  %v426_v57 = vpack.c.bf16 %v332_v55, %v331_v51  ;;  %v430_v58 = vpack.c.bf16 %v340_v56, %v339_v52  ;;  %v219_v59 = vpop.f32.mrb[4].mxu0  ;;  %v239_v60 = vpop.f32.mrb[4].mxu1 }
  0xfe   :  { %v307_v61 = vmul.f32 %v296_v27, %v219_v59  ;;  %v315_v62 = vmul.f32 %v296_v27, %v239_v60  ;;  %v221_v63 = vpop.f32.mrb[5].mxu0  ;;  %v241_v0 = vpop.f32.mrb[5].mxu1 }
  0xff   :  { %388 = vst [vmem:[%s594_s4 + $0x8] sm:$0xff] %v426_v57  ;;  %392 = vst [vmem:[%s594_s4 + $0x28] sm:$0xff] %v430_v58  ;;  %v308_v1 = vmul.f32 %v300_v28, %v221_v63  ;;  %v316_v2 = vmul.f32 %v300_v28, %v241_v0  ;;  %v223_v3 = vpop.f32.mrb[6].mxu0  ;;  %v243_v4 = vpop.f32.mrb[6].mxu1 }
 0x100   :  { %v333_v5 = vadd.f32 %v322_v29, %v307_v61  ;;  %v341_v6 = vadd.f32 %v322_v29, %v315_v62  ;;  %v309_v7 = vmul.f32 %v296_v27, %v223_v3  ;;  %v225_v8 = vpop.f32.mrb[7].mxu0  ;;  %v244_v9 = vpop.f32.mrb[7].mxu1 }
 0x101   :  { %v334_v10 = vadd.f32 %v326_v32, %v308_v1  ;;  %v342_v11 = vadd.f32 %v326_v32, %v316_v2  ;;  %v310_v12 = vmul.f32 %v300_v28, %v225_v8 }
 0x102   :  { %v335_v13 = vadd.f32 %v322_v29, %v309_v7 }
 0x103   :  { %v427_v14 = vpack.c.bf16 %v334_v10, %v333_v5  ;;  %v431_v15 = vpack.c.bf16 %v342_v11, %v341_v6  ;;  %v336_v16 = vadd.f32 %v326_v32, %v310_v12 }
 0x105   :  { %389 = vst [vmem:[%s594_s4 + $0x10] sm:$0xff] %v427_v14  ;;  %393 = vst [vmem:[%s594_s4 + $0x30] sm:$0xff] %v431_v15  ;;  %v428_v17 = vpack.c.bf16 %v336_v16, %v335_v13 }
 0x107   :  { %390 = vst [vmem:[%s594_s4 + $0x18] sm:$0xff] %v428_v17 }

// kernel: deeplab_v2_forward.26
= control target key start
LH: loop header
LB: loop body
LE: loop exit
PB: predicated region body
PF: predicated region fallthrough
CT: control target
= control target key end

     0   :  { %v529_v1 = vmov 0   ;;  %v296_v21 = vlaneseq  ;;  %s728_s1 = inlined_call_operand.vmem [shape: bf16[128,256], index: 1, kind: input, shape index: {}]   ;;  %s729_s0 = inlined_call_operand.vmem [shape: bf16[56,128], index: 0, kind: input, shape index: {}]   ;;  %s730_s2 = inlined_call_operand.vmem [shape: f32[1,256], index: 2, kind: input, shape index: {}]   ;;  %s731_s3 = inlined_call_operand.vmem [shape: f32[1,256], index: 3, kind: input, shape index: {}]   ;;  %s732_s4 = inlined_call_operand.vmem [shape: bf16[56,256], index: 4, kind: input, shape index: {}]   ;;  %s733_s5 = inlined_call_operand.vmem [shape: bf16[56,256], index: 5, kind: output, shape index: {}]  }
   0x1   :  { %v501_v0 = vld [vmem:[%s728_s1 + $0x4] ss:$8 sps:$4 sm:$0xff]   ;;  %210 = vmatprep.mubr.bf16.mxu0 %v529_v1  ;;  %230 = vmatprep.mubr.bf16.mxu1 %v529_v1  ;;  %v503_v2 = vld [vmem:[%s728_s1] ss:$8 sps:$4 sm:$0xff]   ;;  %v504_v3 = vld [vmem:[%s728_s1 + $0x14] ss:$8 sps:$4 sm:$0xff]  }
   0x2   :  { %178 = vmatprep.subr.bf16.mxu0 %v501_v0  ;;  %484 = vmatprep.subr.bf16.mxu1 %v501_v0  ;;  %v506_v4 = vld [vmem:[%s728_s1 + $0x10] ss:$8 sps:$4 sm:$0xff]   ;;  %v507_v5 = vld [vmem:[%s728_s1 + $0x24] ss:$8 sps:$4 sm:$0xff]   ;;  %v509_v6 = vld [vmem:[%s728_s1 + $0x20] ss:$8 sps:$4 sm:$0xff]  }
   0x3   :  { %179 = vmatpush1.bf16.msra.mxu0 %v503_v2  ;;  %492 = vmatpush1.bf16.msra.mxu1 %v503_v2  ;;  %v510_v7 = vld [vmem:[%s728_s1 + $0x34] ss:$8 sps:$4 sm:$0xff]   ;;  %v512_v8 = vld [vmem:[%s728_s1 + $0x30] ss:$8 sps:$4 sm:$0xff]   ;;  %v513_v9 = vld [vmem:[%s728_s1 + $0x44] ss:$8 sps:$4 sm:$0xff]  }
   0x4   :  { %180 = vmatprep.subr.bf16.mxu0 %v504_v3  ;;  %485 = vmatprep.subr.bf16.mxu1 %v504_v3  ;;  %v515_v10 = vld [vmem:[%s728_s1 + $0x40] ss:$8 sps:$4 sm:$0xff]   ;;  %v516_v11 = vld [vmem:[%s728_s1 + $0x54] ss:$8 sps:$4 sm:$0xff]   ;;  %v518_v12 = vld [vmem:[%s728_s1 + $0x50] ss:$8 sps:$4 sm:$0xff]  }
   0x5   :  { %v519_v13 = vld [vmem:[%s728_s1 + $0x64] ss:$8 sps:$4 sm:$0xff]   ;;  %v521_v14 = vld [vmem:[%s728_s1 + $0x60] ss:$8 sps:$4 sm:$0xff]   ;;  %v522_v15 = vld [vmem:[%s728_s1 + $0x74] ss:$8 sps:$4 sm:$0xff]  }
   0x6   :  { %v524_v16 = vld [vmem:[%s728_s1 + $0x70] ss:$8 sps:$4 sm:$0xff]   ;;  %v525_v17 = vld [vmem:[%s729_s0] sm:$0xff]   ;;  %v527_v19 = vld [vmem:[%s729_s0 + $0x8] sm:$0xff]   ;;  %v297_v22 = vshrl.u32 %v296_v21, 7 }
   0x7   :  { %181 = vmatpush1.bf16.msra.mxu0 %v506_v4  ;;  %493 = vmatpush1.bf16.msra.mxu1 %v506_v4  ;;  %v526_v18 = vld [vmem:[%s729_s0 + $0x10] sm:$0xff]   ;;  %v528_v20 = vld [vmem:[%s729_s0 + $0x18] ss:$0 sps:$4 sm:$0xff]   ;;  %v294_v25 = vld [vmem:[%s730_s2] sm:$0x3] }
   0x8   :  { %182 = vmatprep.subr.bf16.mxu0 %v507_v5  ;;  %486 = vmatprep.subr.bf16.mxu1 %v507_v5  ;;  %v298_v23 = vsub.s32 0, %v297_v22  ;;  %v302_v24 = vsub.s32 1, %v297_v22  ;;  %v320_v26 = vld [vmem:[%s731_s3] sm:$0x3]  ;;  %v347_v29 = vld [vmem:[%s732_s4 + $0x8] sm:$0xff]  ;;  %v645_v33 = vld [vmem:[%s732_s4 + $0x10] sm:$0xff] }
   0x9   :  { %v346_v27 = vld [vmem:[%s732_s4] sm:$0xff]  ;;  %v351_v30 = vld [vmem:[%s732_s4 + $0x28] sm:$0xff]  ;;  %v650_v34 = vld [vmem:[%s732_s4 + $0x30] sm:$0xff]  ;;  %v355_v41 = vunpack.c.l.bf16 %v347_v29  ;;  %v356_v46 = vunpack.c.h.bf16 %v347_v29  ;;  %v357_v48 = vunpack.c.l.bf16 %v645_v33  ;;  %v358_v54 = vunpack.c.h.bf16 %v645_v33 }
   0xa   :  { %v350_v28 = vld [vmem:[%s732_s4 + $0x20] sm:$0xff]  ;;  %v638_v31 = vrot.slane %v294_v25, %v298_v23  ;;  %v640_v32 = vrot.slane %v294_v25, %v302_v24  ;;  %v652_v35 = vrot.slane %v320_v26, %v298_v23  ;;  %v353_v36 = vunpack.c.l.bf16 %v346_v27  ;;  %v659_v43 = vld [vmem:[%s732_s4 + $0x18] sm:$0xff] }
   0xb   :  { %183 = vmatpush1.bf16.msra.mxu0 %v509_v6  ;;  %494 = vmatpush1.bf16.msra.mxu1 %v509_v6  ;;  %v654_v37 = vrot.slane %v320_v26, %v302_v24  ;;  %v354_v38 = vunpack.c.h.bf16 %v346_v27  ;;  %v361_v39 = vunpack.c.l.bf16 %v350_v28  ;;  %v362_v40 = vunpack.c.h.bf16 %v350_v28 }
   0xc   :  { %184 = vmatprep.subr.bf16.mxu0 %v510_v7  ;;  %487 = vmatprep.subr.bf16.mxu1 %v510_v7  ;;  %v363_v42 = vunpack.c.l.bf16 %v351_v30  ;;  %v364_v47 = vunpack.c.h.bf16 %v351_v30  ;;  %v365_v49 = vunpack.c.l.bf16 %v650_v34  ;;  %v366_v55 = vunpack.c.h.bf16 %v650_v34 }
   0xd   :  { %v359_v60 = vunpack.c.l.bf16 %v659_v43  ;;  %v360_v61 = vunpack.c.h.bf16 %v659_v43 }
   0xf   :  { %185 = vmatpush1.bf16.msra.mxu0 %v512_v8  ;;  %495 = vmatpush1.bf16.msra.mxu1 %v512_v8 }
  0x10   :  { %186 = vmatprep.subr.bf16.mxu0 %v513_v9  ;;  %488 = vmatprep.subr.bf16.mxu1 %v513_v9 }
  0x13   :  { %187 = vmatpush1.bf16.msra.mxu0 %v515_v10  ;;  %496 = vmatpush1.bf16.msra.mxu1 %v515_v10 }
  0x14   :  { %188 = vmatprep.subr.bf16.mxu0 %v516_v11  ;;  %489 = vmatprep.subr.bf16.mxu1 %v516_v11 }
  0x17   :  { %189 = vmatpush1.bf16.msra.mxu0 %v518_v12  ;;  %497 = vmatpush1.bf16.msra.mxu1 %v518_v12 }
  0x18   :  { %190 = vmatprep.subr.bf16.mxu0 %v519_v13  ;;  %490 = vmatprep.subr.bf16.mxu1 %v519_v13 }
  0x1b   :  { %191 = vmatpush1.bf16.msra.mxu0 %v521_v14  ;;  %498 = vmatpush1.bf16.msra.mxu1 %v521_v14 }
  0x1c   :  { %192 = vmatprep.subr.bf16.mxu0 %v522_v15  ;;  %491 = vmatprep.subr.bf16.mxu1 %v522_v15 }
  0x1f   :  { %193 = vmatpush1.bf16.msra.mxu0 %v524_v16  ;;  %499 = vmatpush1.bf16.msra.mxu1 %v524_v16 }
  0x22   :  { %211 = vmatmul.mubr.bf16.vlgmr.msra.gmra.mrb[0].mxu0 %v525_v17  ;;  %231 = vmatmul.mubr.bf16.vlgmr.msra.gmra.mrb[0].mxu1 %v526_v18 }
  0x23   :  { %220 = vmatprep.mubr.bf16.mxu0 %v529_v1  ;;  %240 = vmatprep.mubr.bf16.mxu1 %v529_v1 }
  0x2a   :  { %221 = vmatmul.mubr.bf16.gmra.mrb[4].mxu0 %v527_v19  ;;  %241 = vmatmul.mubr.bf16.gmra.mrb[4].mxu1 %v528_v20 }
  0xf5   :  { %v212_v44 = vpop.f32.mrb[0].mxu0  ;;  %v232_v45 = vpop.f32.mrb[0].mxu1 }
  0xf6   :  { %v306_v50 = vmul.f32 %v638_v31, %v212_v44  ;;  %v314_v51 = vmul.f32 %v638_v31, %v232_v45  ;;  %v214_v52 = vpop.f32.mrb[1].mxu0  ;;  %v234_v53 = vpop.f32.mrb[1].mxu1 }
  0xf7   :  { %v307_v56 = vmul.f32 %v640_v32, %v214_v52  ;;  %v315_v57 = vmul.f32 %v640_v32, %v234_v53  ;;  %v216_v58 = vpop.f32.mrb[2].mxu0  ;;  %v236_v59 = vpop.f32.mrb[2].mxu1 }
  0xf8   :  { %v332_v62 = vadd.f32 %v652_v35, %v306_v50  ;;  %v340_v63 = vadd.f32 %v652_v35, %v314_v51  ;;  %v308_v0 = vmul.f32 %v638_v31, %v216_v58  ;;  %v316_v1 = vmul.f32 %v638_v31, %v236_v59  ;;  %v218_v2 = vpop.f32.mrb[3].mxu0  ;;  %v238_v3 = vpop.f32.mrb[3].mxu1 }
  0xf9   :  { %v333_v4 = vadd.f32 %v654_v37, %v307_v56  ;;  %v341_v5 = vadd.f32 %v654_v37, %v315_v57  ;;  %v309_v6 = vmul.f32 %v640_v32, %v218_v2  ;;  %v317_v7 = vmul.f32 %v640_v32, %v238_v3 }
  0xfa   :  { %v367_v8 = vadd.f32 %v353_v36, %v332_v62  ;;  %v375_v9 = vadd.f32 %v361_v39, %v340_v63  ;;  %v334_v10 = vadd.f32 %v652_v35, %v308_v0  ;;  %v342_v11 = vadd.f32 %v652_v35, %v316_v1 }
  0xfb   :  { %v368_v12 = vadd.f32 %v354_v38, %v333_v4  ;;  %v376_v13 = vadd.f32 %v362_v40, %v341_v5  ;;  %v335_v14 = vadd.f32 %v654_v37, %v309_v6  ;;  %v343_v15 = vadd.f32 %v654_v37, %v317_v7 }
  0xfc   :  { %v381_v16 = vmax.f32 %v367_v8, 0.0  ;;  %v389_v17 = vmax.f32 %v375_v9, 0.0  ;;  %v369_v18 = vadd.f32 %v355_v41, %v334_v10  ;;  %v377_v19 = vadd.f32 %v363_v42, %v342_v11 }
  0xfd   :  { %v382_v20 = vmax.f32 %v368_v12, 0.0  ;;  %v390_v21 = vmax.f32 %v376_v13, 0.0  ;;  %v370_v22 = vadd.f32 %v356_v46, %v335_v14  ;;  %v378_v23 = vadd.f32 %v364_v47, %v343_v15  ;;  %v222_v24 = vpop.f32.mrb[4].mxu0  ;;  %v242_v25 = vpop.f32.mrb[4].mxu1 }
  0xfe   :  { %v383_v26 = vmax.f32 %v369_v18, 0.0  ;;  %v391_v27 = vmax.f32 %v377_v19, 0.0  ;;  %v310_v28 = vmul.f32 %v638_v31, %v222_v24  ;;  %v318_v29 = vmul.f32 %v638_v31, %v242_v25  ;;  %v224_v30 = vpop.f32.mrb[5].mxu0  ;;  %v244_v36 = vpop.f32.mrb[5].mxu1 }
  0xff   :  { %v477_v38 = vpack.c.bf16 %v382_v20, %v381_v16  ;;  %v481_v39 = vpack.c.bf16 %v390_v21, %v389_v17  ;;  %v384_v40 = vmax.f32 %v370_v22, 0.0  ;;  %v392_v44 = vmax.f32 %v378_v23, 0.0  ;;  %v226_v41 = vpop.f32.mrb[6].mxu0  ;;  %v246_v42 = vpop.f32.mrb[6].mxu1 }
 0x100   :  { %v336_v45 = vadd.f32 %v652_v35, %v310_v28  ;;  %v344_v46 = vadd.f32 %v652_v35, %v318_v29  ;;  %v311_v47 = vmul.f32 %v640_v32, %v224_v30  ;;  %v319_v50 = vmul.f32 %v640_v32, %v244_v36  ;;  %v228_v51 = vpop.f32.mrb[7].mxu0  ;;  %v247_v52 = vpop.f32.mrb[7].mxu1 }
 0x101   :  { %439 = vst [vmem:[%s733_s5] sm:$0xff] %v477_v38  ;;  %443 = vst [vmem:[%s733_s5 + $0x20] sm:$0xff] %v481_v39  ;;  %v478_v53 = vpack.c.bf16 %v384_v40, %v383_v26  ;;  %v482_v56 = vpack.c.bf16 %v392_v44, %v391_v27  ;;  %v312_v57 = vmul.f32 %v638_v31, %v226_v41 }
 0x102   :  { %v313_v58 = vmul.f32 %v640_v32, %v228_v51  ;;  %v371_v59 = vadd.f32 %v357_v48, %v336_v45  ;;  %v379_v62 = vadd.f32 %v365_v49, %v344_v46  ;;  %v337_v63 = vadd.f32 %v654_v37, %v311_v47 }
 0x103   :  { %v345_v0 = vadd.f32 %v654_v37, %v319_v50  ;;  %440 = vst [vmem:[%s733_s5 + $0x8] sm:$0xff] %v478_v53  ;;  %444 = vst [vmem:[%s733_s5 + $0x28] sm:$0xff] %v482_v56  ;;  %v338_v31 = vadd.f32 %v652_v35, %v312_v57 }
 0x104   :  { %v339_v32 = vadd.f32 %v654_v37, %v313_v58  ;;  %v385_v48 = vmax.f32 %v371_v59, 0.0  ;;  %v393_v1 = vmax.f32 %v379_v62, 0.0  ;;  %v372_v49 = vadd.f32 %v358_v54, %v337_v63 }
 0x105   :  { %v380_v2 = vadd.f32 %v366_v55, %v345_v0  ;;  %v373_v3 = vadd.f32 %v359_v60, %v338_v31 }
 0x106   :  { %v374_v4 = vadd.f32 %v360_v61, %v339_v32  ;;  %v386_v5 = vmax.f32 %v372_v49, 0.0 }
 0x107   :  { %v394_v6 = vmax.f32 %v380_v2, 0.0  ;;  %v387_v7 = vmax.f32 %v373_v3, 0.0 }
 0x108   :  { %v388_v35 = vmax.f32 %v374_v4, 0.0  ;;  %v479_v8 = vpack.c.bf16 %v386_v5, %v385_v48 }
 0x109   :  { %v483_v37 = vpack.c.bf16 %v394_v6, %v393_v1 }
 0x10a   :  { %v480_v9 = vpack.c.bf16 %v388_v35, %v387_v7  ;;  %441 = vst [vmem:[%s733_s5 + $0x10] sm:$0xff] %v479_v8 }
 0x10b   :  { %445 = vst [vmem:[%s733_s5 + $0x30] sm:$0xff] %v483_v37 }
 0x10c   :  { %442 = vst [vmem:[%s733_s5 + $0x18] sm:$0xff] %v480_v9 }

// kernel: deeplab_v2_forward.28
= control target key start
LH: loop header
LB: loop body
LE: loop exit
PB: predicated region body
PF: predicated region fallthrough
CT: control target
= control target key end

     0   :  { %s471_s1 = inlined_call_operand.vmem [shape: bf16[256,128], index: 1, kind: input, shape index: {}]   ;;  %s472_s0 = inlined_call_operand.vmem [shape: bf16[24,256], index: 0, kind: input, shape index: {}]   ;;  %s473_s2 = inlined_call_operand.vmem [shape: f32[1,128], index: 2, kind: input, shape index: {}]   ;;  %s474_s3 = inlined_call_operand.vmem [shape: f32[1,128], index: 3, kind: input, shape index: {}]   ;;  %s475_s4 = inlined_call_operand.vmem [shape: bf16[24,128], index: 4, kind: output, shape index: {}]  }
   0x1   :  { %v356_v0 = vld [vmem:[%s471_s1 + $0x40] sm:$0xff]   ;;  %v358_v2 = vld [vmem:[%s471_s1 + $0x48] sm:$0xff]   ;;  %v360_v4 = vld [vmem:[%s471_s1 + $0x50] sm:$0xff]  }
   0x2   :  { %v357_v1 = vld [vmem:[%s471_s1] sm:$0xff]   ;;  %312 = vmatprep.subr.bf16.mxu0 %v356_v0  ;;  %340 = vmatprep.subr.bf16.mxu1 %v356_v0  ;;  %v359_v3 = vld [vmem:[%s471_s1 + $0x8] sm:$0xff]   ;;  %v361_v5 = vld [vmem:[%s471_s1 + $0x10] sm:$0xff]  }
   0x3   :  { %313 = vmatpush3.bf16.msra.mxu0 %v357_v1  ;;  %348 = vmatpush3.bf16.msra.mxu1 %v357_v1  ;;  %v362_v6 = vld [vmem:[%s471_s1 + $0x58] sm:$0xff]   ;;  %v364_v8 = vld [vmem:[%s471_s1 + $0x60] sm:$0xff]   ;;  %v366_v10 = vld [vmem:[%s471_s1 + $0x68] sm:$0xff]  }
   0x4   :  { %314 = vmatprep.subr.bf16.mxu0 %v358_v2  ;;  %341 = vmatprep.subr.bf16.mxu1 %v358_v2  ;;  %v363_v7 = vld [vmem:[%s471_s1 + $0x18] sm:$0xff]   ;;  %v365_v9 = vld [vmem:[%s471_s1 + $0x20] sm:$0xff]   ;;  %v30_v12 = vld [vmem:[%s472_s0 + $0x10] sm:$0xff] }
   0x5   :  { %v374_v11 = vld [vmem:[%s472_s0 + $0x4] ss:$8 sps:$4 sm:$0xff]   ;;  %v282_v13 = vcombine.high %v30_v12, %v30_v12  ;;  %v368_v15 = vld [vmem:[%s471_s1 + $0x70] sm:$0xff]   ;;  %v370_v17 = vld [vmem:[%s471_s1 + $0x78] sm:$0xff]   ;;  %v281_v20 = vcombine.low %v30_v12, %v30_v12 }
   0x6   :  { %v367_v14 = vld [vmem:[%s471_s1 + $0x28] sm:$0xff]   ;;  %208 = vmatprep.mubr.bf16.mxu0 %v374_v11  ;;  %v369_v16 = vld [vmem:[%s471_s1 + $0x30] sm:$0xff]   ;;  %v371_v18 = vld [vmem:[%s471_s1 + $0x38] sm:$0xff]  }
   0x7   :  { %315 = vmatpush3.bf16.msra.mxu0 %v359_v3  ;;  %349 = vmatpush3.bf16.msra.mxu1 %v359_v3  ;;  %v372_v19 = vld [vmem:[%s472_s0] ss:$8 sps:$4 sm:$0xff]  }
   0x8   :  { %316 = vmatprep.subr.bf16.mxu0 %v360_v4  ;;  %342 = vmatprep.subr.bf16.mxu1 %v360_v4  ;;  %v299_v24 = vld [vmem:[%s473_s2] ss:$0 sm:$0xff] }
   0x9   :  { %216 = vmatprep.mubr.bf16.mxu1 %v282_v13  ;;  %v300_v30 = vld [vmem:[%s474_s3] ss:$0 sm:$0xff] }
   0xb   :  { %317 = vmatpush3.bf16.msra.mxu0 %v361_v5  ;;  %350 = vmatpush3.bf16.msra.mxu1 %v361_v5 }
   0xc   :  { %318 = vmatprep.subr.bf16.mxu0 %v362_v6  ;;  %343 = vmatprep.subr.bf16.mxu1 %v362_v6 }
   0xf   :  { %319 = vmatpush3.bf16.msra.mxu0 %v363_v7  ;;  %351 = vmatpush3.bf16.msra.mxu1 %v363_v7 }
  0x10   :  { %320 = vmatprep.subr.bf16.mxu0 %v364_v8  ;;  %344 = vmatprep.subr.bf16.mxu1 %v364_v8 }
  0x13   :  { %321 = vmatpush3.bf16.msra.mxu0 %v365_v9  ;;  %352 = vmatpush3.bf16.msra.mxu1 %v365_v9 }
  0x14   :  { %322 = vmatprep.subr.bf16.mxu0 %v366_v10  ;;  %345 = vmatprep.subr.bf16.mxu1 %v366_v10 }
  0x17   :  { %323 = vmatpush3.bf16.msra.mxu0 %v367_v14  ;;  %353 = vmatpush3.bf16.msra.mxu1 %v367_v14 }
  0x18   :  { %324 = vmatprep.subr.bf16.mxu0 %v368_v15  ;;  %346 = vmatprep.subr.bf16.mxu1 %v368_v15 }
  0x1b   :  { %325 = vmatpush3.bf16.msra.mxu0 %v369_v16  ;;  %354 = vmatpush3.bf16.msra.mxu1 %v369_v16 }
  0x1c   :  { %326 = vmatprep.subr.bf16.mxu0 %v370_v17  ;;  %347 = vmatprep.subr.bf16.mxu1 %v370_v17 }
  0x1f   :  { %327 = vmatpush3.bf16.msra.mxu0 %v371_v18  ;;  %355 = vmatpush3.bf16.msra.mxu1 %v371_v18 }
  0x22   :  { %209 = vmatmul.mubr.bf16.vlgmr.msra.gmra.mrb[0].mxu0 %v372_v19  ;;  %217 = vmatmul.mubr.bf16.vlgmr.msra.gmra.mrb[0].mxu1 %v281_v20 }
  0xf5   :  { %v328_v21 = vpop.f32.mrb[0].mxu0  ;;  %v334_v22 = vpop.f32.mrb[0].mxu1 }
  0xf6   :  { %v329_v23 = vpop.f32.mrb[1].mxu0  ;;  %v335_v25 = vpop.f32.mrb[1].mxu1 }
  0xf7   :  { %v330_v26 = vadd.f32 %v329_v23, %v328_v21  ;;  %v336_v27 = vadd.f32 %v335_v25, %v334_v22  ;;  %v331_v28 = vpop.f32.mrb[2].mxu0  ;;  %v337_v29 = vpop.f32.mrb[2].mxu1 }
  0xf8   :  { %v332_v31 = vpop.f32.mrb[3].mxu0  ;;  %v338_v32 = vpop.f32.mrb[3].mxu1 }
  0xf9   :  { %v243_v33 = vmul.f32 %v330_v26, %v299_v24  ;;  %v245_v34 = vmul.f32 %v336_v27, %v299_v24  ;;  %v333_v35 = vadd.f32 %v332_v31, %v331_v28 }
  0xfb   :  { %v253_v36 = vadd.f32 %v300_v30, %v243_v33  ;;  %v255_v37 = vadd.f32 %v300_v30, %v245_v34  ;;  %v244_v38 = vmul.f32 %v333_v35, %v299_v24 }
  0xfd   :  { %v258_v39 = vmax.f32 %v255_v37, 0.0  ;;  %v254_v40 = vadd.f32 %v300_v30, %v244_v38  ;;  %v256_v41 = vmax.f32 %v253_v36, 0.0 }
  0xff   :  { %v306_v42 = vpack.c.bf16 %v258_v39, %v258_v39  ;;  %v257_v43 = vmax.f32 %v254_v40, 0.0 }
 0x101   :  { %274 = vst [vmem:[%s475_s4 + $0x8] sm:$0xf] %v306_v42  ;;  %v310_v44 = vpack.c.bf16 %v257_v43, %v256_v41 }
 0x103   :  { %311 = vst [vmem:[%s475_s4] sm:$0xff] %v310_v44  }

// kernel: deeplab_v2_forward.32
= control target key start
LH: loop header
LB: loop body
LE: loop exit
PB: predicated region body
PF: predicated region fallthrough
CT: control target
= control target key end

     0   :  { %s1089_s1 = inlined_call_operand.vmem [shape: bf16[512,256], index: 1, kind: input, shape index: {}]   ;;  %s1090_s0 = inlined_call_operand.vmem [shape: bf16[24,512], index: 0, kind: input, shape index: {}]   ;;  %s1091_s2 = inlined_call_operand.vmem [shape: f32[1,256], index: 2, kind: input, shape index: {}]   ;;  %s1092_s3 = inlined_call_operand.vmem [shape: f32[1,256], index: 3, kind: input, shape index: {}]   ;;  %s1093_s4 = inlined_call_operand.vmem [shape: bf16[24,256], index: 4, kind: output, shape index: {}]  }
   0x1   :  { %v733_v0 = vld [vmem:[%s1089_s1 + $0x4] ss:$8 sps:$4 sm:$0xff]   ;;  %v737_v2 = vld [vmem:[%s1089_s1] ss:$8 sps:$4 sm:$0xff]   ;;  %v739_v4 = vld [vmem:[%s1089_s1 + $0x14] ss:$8 sps:$4 sm:$0xff]  }
   0x2   :  { %v735_v1 = vld [vmem:[%s1089_s1 + $0x104] ss:$8 sps:$4 sm:$0xff]   ;;  %457 = vmatprep.subr.bf16.mxu1 %v733_v0  ;;  %v738_v3 = vld [vmem:[%s1089_s1 + $0x100] ss:$8 sps:$4 sm:$0xff]   ;;  %v741_v5 = vld [vmem:[%s1089_s1 + $0x114] ss:$8 sps:$4 sm:$0xff]  }
   0x3   :  { %508 = vmatprep.subr.bf16.mxu0 %v735_v1  ;;  %458 = vmatpush1.bf16.msra.mxu1 %v737_v2  ;;  %v743_v6 = vld [vmem:[%s1089_s1 + $0x10] ss:$8 sps:$4 sm:$0xff]   ;;  %v745_v8 = vld [vmem:[%s1089_s1 + $0x24] ss:$8 sps:$4 sm:$0xff]   ;;  %v749_v10 = vld [vmem:[%s1089_s1 + $0x20] ss:$8 sps:$4 sm:$0xff]  }
   0x4   :  { %509 = vmatpush1.bf16.msra.mxu0 %v738_v3  ;;  %459 = vmatprep.subr.bf16.mxu1 %v739_v4  ;;  %v744_v7 = vld [vmem:[%s1089_s1 + $0x110] ss:$8 sps:$4 sm:$0xff]   ;;  %v747_v9 = vld [vmem:[%s1089_s1 + $0x124] ss:$8 sps:$4 sm:$0xff]   ;;  %v750_v11 = vld [vmem:[%s1089_s1 + $0x120] ss:$8 sps:$4 sm:$0xff]  }
   0x5   :  { %510 = vmatprep.subr.bf16.mxu0 %v741_v5  ;;  %v751_v12 = vld [vmem:[%s1089_s1 + $0x34] ss:$8 sps:$4 sm:$0xff]   ;;  %v755_v14 = vld [vmem:[%s1089_s1 + $0x30] ss:$8 sps:$4 sm:$0xff]   ;;  %v757_v16 = vld [vmem:[%s1089_s1 + $0x44] ss:$8 sps:$4 sm:$0xff]  }
   0x6   :  { %v753_v13 = vld [vmem:[%s1089_s1 + $0x134] ss:$8 sps:$4 sm:$0xff]   ;;  %v756_v15 = vld [vmem:[%s1089_s1 + $0x130] ss:$8 sps:$4 sm:$0xff]   ;;  %v759_v17 = vld [vmem:[%s1089_s1 + $0x144] ss:$8 sps:$4 sm:$0xff]  }
   0x7   :  { %460 = vmatpush1.bf16.msra.mxu1 %v743_v6  ;;  %v761_v18 = vld [vmem:[%s1089_s1 + $0x40] ss:$8 sps:$4 sm:$0xff]   ;;  %v763_v20 = vld [vmem:[%s1089_s1 + $0x54] ss:$8 sps:$4 sm:$0xff]   ;;  %v767_v22 = vld [vmem:[%s1089_s1 + $0x50] ss:$8 sps:$4 sm:$0xff]  }
   0x8   :  { %511 = vmatpush1.bf16.msra.mxu0 %v744_v7  ;;  %461 = vmatprep.subr.bf16.mxu1 %v745_v8  ;;  %v762_v19 = vld [vmem:[%s1089_s1 + $0x140] ss:$8 sps:$4 sm:$0xff]   ;;  %v765_v21 = vld [vmem:[%s1089_s1 + $0x154] ss:$8 sps:$4 sm:$0xff]   ;;  %v768_v23 = vld [vmem:[%s1089_s1 + $0x150] ss:$8 sps:$4 sm:$0xff]  }
   0x9   :  { %512 = vmatprep.subr.bf16.mxu0 %v747_v9  ;;  %v769_v24 = vld [vmem:[%s1089_s1 + $0x64] ss:$8 sps:$4 sm:$0xff]   ;;  %v773_v26 = vld [vmem:[%s1089_s1 + $0x60] ss:$8 sps:$4 sm:$0xff]   ;;  %v775_v28 = vld [vmem:[%s1089_s1 + $0x74] ss:$8 sps:$4 sm:$0xff]  }
   0xa   :  { %v771_v25 = vld [vmem:[%s1089_s1 + $0x164] ss:$8 sps:$4 sm:$0xff]   ;;  %v774_v27 = vld [vmem:[%s1089_s1 + $0x160] ss:$8 sps:$4 sm:$0xff]   ;;  %v777_v29 = vld [vmem:[%s1089_s1 + $0x174] ss:$8 sps:$4 sm:$0xff]  }
   0xb   :  { %462 = vmatpush1.bf16.msra.mxu1 %v749_v10  ;;  %v779_v30 = vld [vmem:[%s1089_s1 + $0x70] ss:$8 sps:$4 sm:$0xff]   ;;  %v781_v32 = vld [vmem:[%s1089_s1 + $0x84] ss:$8 sps:$4 sm:$0xff]   ;;  %v785_v34 = vld [vmem:[%s1089_s1 + $0x80] ss:$8 sps:$4 sm:$0xff]   ;;  %v582_v10 = vlaneseq }
   0xc   :  { %513 = vmatpush1.bf16.msra.mxu0 %v750_v11  ;;  %463 = vmatprep.subr.bf16.mxu1 %v751_v12  ;;  %v780_v31 = vld [vmem:[%s1089_s1 + $0x170] ss:$8 sps:$4 sm:$0xff]   ;;  %v783_v33 = vld [vmem:[%s1089_s1 + $0x184] ss:$8 sps:$4 sm:$0xff]   ;;  %v786_v35 = vld [vmem:[%s1089_s1 + $0x180] ss:$8 sps:$4 sm:$0xff]  }
   0xd   :  { %514 = vmatprep.subr.bf16.mxu0 %v753_v13  ;;  %v787_v36 = vld [vmem:[%s1089_s1 + $0x94] ss:$8 sps:$4 sm:$0xff]   ;;  %v791_v38 = vld [vmem:[%s1089_s1 + $0x90] ss:$8 sps:$4 sm:$0xff]   ;;  %v793_v40 = vld [vmem:[%s1089_s1 + $0xa4] ss:$8 sps:$4 sm:$0xff]  }
   0xe   :  { %v789_v37 = vld [vmem:[%s1089_s1 + $0x194] ss:$8 sps:$4 sm:$0xff]   ;;  %v792_v39 = vld [vmem:[%s1089_s1 + $0x190] ss:$8 sps:$4 sm:$0xff]   ;;  %v795_v41 = vld [vmem:[%s1089_s1 + $0x1a4] ss:$8 sps:$4 sm:$0xff]  }
   0xf   :  { %464 = vmatpush1.bf16.msra.mxu1 %v755_v14  ;;  %v797_v42 = vld [vmem:[%s1089_s1 + $0xa0] ss:$8 sps:$4 sm:$0xff]   ;;  %v799_v44 = vld [vmem:[%s1089_s1 + $0xb4] ss:$8 sps:$4 sm:$0xff]   ;;  %v803_v46 = vld [vmem:[%s1089_s1 + $0xb0] ss:$8 sps:$4 sm:$0xff]  }
  0x10   :  { %515 = vmatpush1.bf16.msra.mxu0 %v756_v15  ;;  %465 = vmatprep.subr.bf16.mxu1 %v757_v16  ;;  %v798_v43 = vld [vmem:[%s1089_s1 + $0x1a0] ss:$8 sps:$4 sm:$0xff]   ;;  %v801_v45 = vld [vmem:[%s1089_s1 + $0x1b4] ss:$8 sps:$4 sm:$0xff]   ;;  %v804_v48 = vld [vmem:[%s1089_s1 + $0x1b0] ss:$8 sps:$4 sm:$0xff]  }
  0x11   :  { %516 = vmatprep.subr.bf16.mxu0 %v759_v17  ;;  %v831_v47 = vld [vmem:[%s1090_s0 + $0x4] ss:$16 sps:$4 sm:$0xff]   ;;  %v834_v51 = vld [vmem:[%s1090_s0 + $0xc] ss:$16 sps:$4 sm:$0xff]   ;;  %v809_v52 = vld [vmem:[%s1089_s1 + $0xc0] ss:$8 sps:$4 sm:$0xff]  }
  0x12   :  { %v805_v49 = vld [vmem:[%s1089_s1 + $0xc4] ss:$8 sps:$4 sm:$0xff]   ;;  %489 = vmatprep.mubr.bf16.mxu1 %v831_v47  ;;  %540 = vmatprep.mubr.bf16.mxu0 %v834_v51  ;;  %v810_v53 = vld [vmem:[%s1089_s1 + $0x1c0] ss:$8 sps:$4 sm:$0xff]   ;;  %v811_v54 = vld [vmem:[%s1089_s1 + $0xd4] ss:$8 sps:$4 sm:$0xff]  }
  0x13   :  { %466 = vmatpush1.bf16.msra.mxu1 %v761_v18  ;;  %v807_v50 = vld [vmem:[%s1089_s1 + $0x1c4] ss:$8 sps:$4 sm:$0xff]   ;;  %v813_v55 = vld [vmem:[%s1089_s1 + $0x1d4] ss:$8 sps:$4 sm:$0xff]   ;;  %v815_v56 = vld [vmem:[%s1089_s1 + $0xd0] ss:$8 sps:$4 sm:$0xff]  }
  0x14   :  { %517 = vmatpush1.bf16.msra.mxu0 %v762_v19  ;;  %467 = vmatprep.subr.bf16.mxu1 %v763_v20  ;;  %v816_v57 = vld [vmem:[%s1089_s1 + $0x1d0] ss:$8 sps:$4 sm:$0xff]   ;;  %v817_v58 = vld [vmem:[%s1089_s1 + $0xe4] ss:$8 sps:$4 sm:$0xff]   ;;  %v821_v60 = vld [vmem:[%s1089_s1 + $0xe0] ss:$8 sps:$4 sm:$0xff]  }
  0x15   :  { %518 = vmatprep.subr.bf16.mxu0 %v765_v21  ;;  %v819_v59 = vld [vmem:[%s1089_s1 + $0x1e4] ss:$8 sps:$4 sm:$0xff]   ;;  %v822_v61 = vld [vmem:[%s1089_s1 + $0x1e0] ss:$8 sps:$4 sm:$0xff]   ;;  %v823_v62 = vld [vmem:[%s1089_s1 + $0xf4] ss:$8 sps:$4 sm:$0xff]  }
  0x16   :  { %v825_v63 = vld [vmem:[%s1089_s1 + $0x1f4] ss:$8 sps:$4 sm:$0xff]   ;;  %v827_v0 = vld [vmem:[%s1089_s1 + $0xf0] ss:$8 sps:$4 sm:$0xff]   ;;  %v37_v2 = vld [vmem:[%s1090_s0 + $0x20] sm:$0xff]  ;;  %v583_v11 = vshrl.u32 %v582_v10, 7 }
  0x17   :  { %468 = vmatpush1.bf16.msra.mxu1 %v767_v22  ;;  %v828_v1 = vld [vmem:[%s1089_s1 + $0x1f0] ss:$8 sps:$4 sm:$0xff]   ;;  %v38_v3 = vld [vmem:[%s1090_s0 + $0x28] sm:$0xff]  ;;  %v654_v6 = vcombine.high %v37_v2, %v37_v2  ;;  %v653_v8 = vcombine.low %v37_v2, %v37_v2  ;;  %v580_v13 = vld [vmem:[%s1091_s2] sm:$0x3] }
  0x18   :  { %519 = vmatpush1.bf16.msra.mxu0 %v768_v23  ;;  %469 = vmatprep.subr.bf16.mxu1 %v769_v24  ;;  %v829_v4 = vld [vmem:[%s1090_s0] ss:$16 sps:$4 sm:$0xff]   ;;  %v832_v5 = vld [vmem:[%s1090_s0 + $0x8] ss:$16 sps:$4 sm:$0xff]   ;;  %v656_v7 = vcombine.high %v38_v3, %v38_v3  ;;  %v655_v9 = vcombine.low %v38_v3, %v38_v3  ;;  %v584_v12 = vsub.s32 0, %v583_v11  ;;  %v588_v14 = vsub.s32 1, %v583_v11 }
  0x19   :  { %520 = vmatprep.subr.bf16.mxu0 %v771_v25  ;;  %v598_v15 = vld [vmem:[%s1092_s3] sm:$0x3] }
  0x1a   :  { %v585_v16 = vrot.slane %v580_v13, %v584_v12  ;;  %v589_v19 = vrot.slane %v580_v13, %v588_v14  ;;  %v603_v21 = vrot.slane %v598_v15, %v584_v12  ;;  %v607_v25 = vrot.slane %v598_v15, %v588_v14 }
  0x1b   :  { %470 = vmatpush1.bf16.msra.mxu1 %v773_v26 }
  0x1c   :  { %521 = vmatpush1.bf16.msra.mxu0 %v774_v27  ;;  %471 = vmatprep.subr.bf16.mxu1 %v775_v28 }
  0x1d   :  { %522 = vmatprep.subr.bf16.mxu0 %v777_v29 }
  0x1f   :  { %472 = vmatpush1.bf16.msra.mxu1 %v779_v30 }
  0x20   :  { %523 = vmatpush1.bf16.msra.mxu0 %v780_v31  ;;  %473 = vmatprep.subr.bf16.mxu1 %v781_v32 }
  0x21   :  { %524 = vmatprep.subr.bf16.mxu0 %v783_v33 }
  0x23   :  { %474 = vmatpush1.bf16.msra.mxu1 %v785_v34 }
  0x24   :  { %525 = vmatpush1.bf16.msra.mxu0 %v786_v35  ;;  %475 = vmatprep.subr.bf16.mxu1 %v787_v36 }
  0x25   :  { %526 = vmatprep.subr.bf16.mxu0 %v789_v37 }
  0x27   :  { %476 = vmatpush1.bf16.msra.mxu1 %v791_v38 }
  0x28   :  { %527 = vmatpush1.bf16.msra.mxu0 %v792_v39  ;;  %477 = vmatprep.subr.bf16.mxu1 %v793_v40 }
  0x29   :  { %528 = vmatprep.subr.bf16.mxu0 %v795_v41 }
  0x2b   :  { %478 = vmatpush1.bf16.msra.mxu1 %v797_v42 }
  0x2c   :  { %529 = vmatpush1.bf16.msra.mxu0 %v798_v43  ;;  %479 = vmatprep.subr.bf16.mxu1 %v799_v44 }
  0x2d   :  { %530 = vmatprep.subr.bf16.mxu0 %v801_v45 }
  0x2f   :  { %480 = vmatpush1.bf16.msra.mxu1 %v803_v46 }
  0x30   :  { %531 = vmatpush1.bf16.msra.mxu0 %v804_v48  ;;  %481 = vmatprep.subr.bf16.mxu1 %v805_v49 }
  0x31   :  { %532 = vmatprep.subr.bf16.mxu0 %v807_v50 }
  0x33   :  { %482 = vmatpush1.bf16.msra.mxu1 %v809_v52 }
  0x34   :  { %533 = vmatpush1.bf16.msra.mxu0 %v810_v53  ;;  %483 = vmatprep.subr.bf16.mxu1 %v811_v54 }
  0x35   :  { %534 = vmatprep.subr.bf16.mxu0 %v813_v55 }
  0x37   :  { %484 = vmatpush1.bf16.msra.mxu1 %v815_v56 }
  0x38   :  { %535 = vmatpush1.bf16.msra.mxu0 %v816_v57  ;;  %485 = vmatprep.subr.bf16.mxu1 %v817_v58 }
  0x39   :  { %536 = vmatprep.subr.bf16.mxu0 %v819_v59 }
  0x3b   :  { %486 = vmatpush1.bf16.msra.mxu1 %v821_v60 }
  0x3c   :  { %537 = vmatpush1.bf16.msra.mxu0 %v822_v61  ;;  %487 = vmatprep.subr.bf16.mxu1 %v823_v62 }
  0x3d   :  { %538 = vmatprep.subr.bf16.mxu0 %v825_v63 }
  0x3f   :  { %488 = vmatpush1.bf16.msra.mxu1 %v827_v0 }
  0x40   :  { %539 = vmatpush1.bf16.msra.mxu0 %v828_v1 }
  0x42   :  { %490 = vmatmul.mubr.bf16.vlgmr.msra.gmra.mrb[0].mxu1 %v829_v4 }
  0x43   :  { %541 = vmatmul.mubr.bf16.vlgmr.msra.gmra.mrb[0].mxu0 %v832_v5  ;;  %499 = vmatprep.mubr.bf16.mxu1 %v654_v6 }
  0x44   :  { %550 = vmatprep.mubr.bf16.mxu0 %v656_v7 }
  0x4a   :  { %500 = vmatmul.mubr.bf16.gmra.mrb[4].mxu1 %v653_v8 }
  0x4b   :  { %551 = vmatmul.mubr.bf16.gmra.mrb[4].mxu0 %v655_v9 }
 0x115   :  { %v491_v17 = vpop.f32.mrb[0].mxu1 }
 0x116   :  { %v542_v18 = vpop.f32.mrb[0].mxu0  ;;  %v493_v22 = vpop.f32.mrb[1].mxu1 }
 0x117   :  { %v543_v20 = vadd.f32 %v542_v18, %v491_v17  ;;  %v544_v23 = vpop.f32.mrb[1].mxu0  ;;  %v495_v26 = vpop.f32.mrb[2].mxu1 }
 0x118   :  { %v545_v24 = vadd.f32 %v544_v23, %v493_v22  ;;  %v546_v27 = vpop.f32.mrb[2].mxu0  ;;  %v497_v30 = vpop.f32.mrb[3].mxu1 }
 0x119   :  { %v592_v28 = vmul.f32 %v585_v16, %v543_v20  ;;  %v547_v29 = vadd.f32 %v546_v27, %v495_v26  ;;  %v548_v31 = vpop.f32.mrb[3].mxu0 }
 0x11a   :  { %v593_v32 = vmul.f32 %v589_v19, %v545_v24  ;;  %v549_v33 = vadd.f32 %v548_v31, %v497_v30 }
 0x11b   :  { %v610_v34 = vadd.f32 %v603_v21, %v592_v28  ;;  %v594_v35 = vmul.f32 %v585_v16, %v547_v29 }
 0x11c   :  { %v611_v36 = vadd.f32 %v607_v25, %v593_v32  ;;  %v595_v37 = vmul.f32 %v589_v19, %v549_v33 }
 0x11d   :  { %v616_v38 = vmax.f32 %v610_v34, 0.0  ;;  %v612_v39 = vadd.f32 %v603_v21, %v594_v35  ;;  %v501_v42 = vpop.f32.mrb[4].mxu1 }
 0x11e   :  { %v617_v40 = vmax.f32 %v611_v36, 0.0  ;;  %v613_v41 = vadd.f32 %v607_v25, %v595_v37  ;;  %v552_v43 = vpop.f32.mrb[4].mxu0  ;;  %v503_v46 = vpop.f32.mrb[5].mxu1 }
 0x11f   :  { %v618_v44 = vmax.f32 %v612_v39, 0.0  ;;  %v553_v45 = vadd.f32 %v552_v43, %v501_v42  ;;  %v554_v47 = vpop.f32.mrb[5].mxu0  ;;  %v505_v51 = vpop.f32.mrb[6].mxu1 }
 0x120   :  { %v724_v48 = vpack.c.bf16 %v617_v40, %v616_v38  ;;  %v619_v49 = vmax.f32 %v613_v41, 0.0  ;;  %v555_v50 = vadd.f32 %v554_v47, %v503_v46  ;;  %v556_v52 = vpop.f32.mrb[6].mxu0  ;;  %v506_v54 = vpop.f32.mrb[7].mxu1 }
 0x121   :  { %v596_v53 = vmul.f32 %v585_v16, %v553_v45  ;;  %v557_v55 = vpop.f32.mrb[7].mxu0 }
 0x122   :  { %642 = vst [vmem:[%s1093_s4] sm:$0xff] %v724_v48  ;;  %v725_v56 = vpack.c.bf16 %v619_v49, %v618_v44  ;;  %v597_v57 = vmul.f32 %v589_v19, %v555_v50 }
 0x123   :  { %v614_v58 = vadd.f32 %v603_v21, %v596_v53 }
 0x124   :  { %643 = vst [vmem:[%s1093_s4 + $0x8] sm:$0xff] %v725_v56  ;;  %v615_v59 = vadd.f32 %v607_v25, %v597_v57 }
 0x125   :  { %v620_v60 = vmax.f32 %v614_v58, 0.0 }
 0x126   :  { %v621_v61 = vmax.f32 %v615_v59, 0.0 }
 0x128   :  { %v726_v62 = vpack.c.bf16 %v621_v61, %v620_v60 }
 0x12a   :  { %644 = vst [vmem:[%s1093_s4 + $0x10] sm:$0xff] %v726_v62 }

// kernel: deeplab_v2_forward.30
= control target key start
LH: loop header
LB: loop body
LE: loop exit
PB: predicated region body
PF: predicated region fallthrough
CT: control target
= control target key end

     0   :  { %s1148_s18 = smov 0   ;;  %s1150_s19 = smov 0   ;;  %s1290_s0 = inlined_call_operand.vmem [shape: bf16[24,128], index: 0, kind: input, shape index: {}]   ;;  %s1291_s1 = inlined_call_operand.vmem [shape: bf16[128,512], index: 1, kind: input, shape index: {}]   ;;  %s1292_s2 = inlined_call_operand.vmem [shape: f32[1,512], index: 2, kind: input, shape index: {}]   ;;  %s1293_s3 = inlined_call_operand.vmem [shape: f32[1,512], index: 3, kind: input, shape index: {}]   ;;  %s1294_s4 = inlined_call_operand.vmem [shape: bf16[24,512], index: 4, kind: input, shape index: {}]   ;;  %s1295_s5 = inlined_call_operand.vmem [shape: bf16[24,512], index: 5, kind: output, shape index: {}]  }
   0x1   :  { %s1152_s20 = smov 0   ;;  %s1154_s21 = smov 0  }
   0x2   :  { %s1156_s22 = smov 0  }
   0x3 LB: > { %s30_s23 = sadd.s32 1, %s1111_s21  ;;  %s947_s24 = sadd.s32 4294967295, %s1115_s22   ;;  %s1115_s22 = sphi %s1156_s22, %s15_s22   ;;  %s1111_s21 = sphi %s1154_s21, %s1301_s21   ;;  %s1107_s20 = sphi %s1152_s20, %s1300_s20   ;;  %s1103_s19 = sphi %s1150_s19, %s1299_s19   ;;  %s1099_s18 = sphi %s1148_s18, %s1298_s18  }
   0x4   : > { %p32_p0 = scmp.ge.s32.totalorder %s30_s23, 2  ;;  %p78_p1 = scmp.ne.s32.totalorder %s1103_s19, %s1099_s18 }
   0x5   : > { %p79_p2 = scmp.eq.s32.totalorder %s1115_s22, 0  ;;  %p190_p4 = scmp.eq.s32.totalorder %s947_s24, 1 }
   0x6   : > { %s1303_s23 = smov (%p32_p0, %s30_s23), 0  ;;  %s71_s27 = sadd.s32 1, %s1103_s19 }
   0x7   : > { %p1180_p3 = por %p79_p2, %p78_p1  ;;  %s67_s26 = ssub.s32 %s1111_s21, %s1303_s23 }
   0x8   : > { %p69_p5 = scmp.eq.s32.totalorder %s67_s26, 0  ;;  %p1187_p6 = por %p190_p4, %p78_p1 }
   0x9   : > { %p951_p7 = scmp.ge.s32.totalorder %s1115_s22, 2 }
   0xa   : > { %s1192_s29 = scalar_select %p69_p5, %s1103_s19, %s71_s27  }
   0xb   : > { %224 = sbr.rel (%p951_p7) target bundleno = 37 (0x25), region = 20 }
  0x12   : > { %227 = sbr.rel (!%p1180_p3) target bundleno = 30 (0x1e), region = 24  ;;  %s229_s30 = sand.u32 (%p1180_p3), 1, %s1103_s19  }
  0x13   : > { %s986_s6 = sshll.u32 (%p1180_p3), %s1111_s21, 3  ;;  %s952_s7 = sshll.u32 (%p1180_p3), %s229_s30, 7 }
  0x14   : > { %s1202_s10 = scalar_lea.vmem (%p1180_p3), %s1291_s1, %s986_s6  ;;  %s231_s11 = scalar_lea.vmem (%p1180_p3), [#allocation3], %s952_s7 }
  0x15   : > { %v295_v0 = vld [vmem:[%s1202_s10] sm:$0xff] (%p1180_p3)  ;;  %v297_v1 = vld [vmem:[%s1202_s10 + $0x10] sm:$0xff] (%p1180_p3) }
  0x16   : > { %v299_v2 = vld [vmem:[%s1202_s10 + $0x20] sm:$0xff] (%p1180_p3)  ;;  %296 = vst [vmem:[%s231_s11] sm:$0xff] (%p1180_p3), %v295_v0  ;;  %298 = vst [vmem:[%s231_s11 + $0x8] sm:$0xff] (%p1180_p3), %v297_v1  ;;  %v301_v3 = vld [vmem:[%s1202_s10 + $0x30] sm:$0xff] (%p1180_p3) }
  0x17   : > { %300 = vst [vmem:[%s231_s11 + $0x10] sm:$0xff] (%p1180_p3), %v299_v2  ;;  %v303_v4 = vld [vmem:[%s1202_s10 + $0x40] sm:$0xff] (%p1180_p3)  ;;  %v305_v5 = vld [vmem:[%s1202_s10 + $0x50] sm:$0xff] (%p1180_p3)  ;;  %302 = vst [vmem:[%s231_s11 + $0x18] sm:$0xff] (%p1180_p3), %v301_v3 }
  0x18   : > { %304 = vst [vmem:[%s231_s11 + $0x20] sm:$0xff] (%p1180_p3), %v303_v4  ;;  %306 = vst [vmem:[%s231_s11 + $0x28] sm:$0xff] (%p1180_p3), %v305_v5  ;;  %v307_v6 = vld [vmem:[%s1202_s10 + $0x60] sm:$0xff] (%p1180_p3)  ;;  %v309_v7 = vld [vmem:[%s1202_s10 + $0x70] sm:$0xff] (%p1180_p3) }
  0x19   : > { %v311_v8 = vld [vmem:[%s1202_s10 + $0x80] sm:$0xff]  ;;  %308 = vst [vmem:[%s231_s11 + $0x30] sm:$0xff] %v307_v6  ;;  %310 = vst [vmem:[%s231_s11 + $0x38] sm:$0xff] %v309_v7  ;;  %v313_v9 = vld [vmem:[%s1202_s10 + $0x90] sm:$0xff] }
  0x1a   : > { %312 = vst [vmem:[%s231_s11 + $0x40] sm:$0xff] %v311_v8  ;;  %v315_v10 = vld [vmem:[%s1202_s10 + $0xa0] sm:$0xff]  ;;  %v317_v11 = vld [vmem:[%s1202_s10 + $0xb0] sm:$0xff]  ;;  %314 = vst [vmem:[%s231_s11 + $0x48] sm:$0xff] %v313_v9 }
  0x1b   : > { %316 = vst [vmem:[%s231_s11 + $0x50] sm:$0xff] %v315_v10  ;;  %318 = vst [vmem:[%s231_s11 + $0x58] sm:$0xff] %v317_v11  ;;  %v319_v12 = vld [vmem:[%s1202_s10 + $0xc0] sm:$0xff]  ;;  %v321_v13 = vld [vmem:[%s1202_s10 + $0xd0] sm:$0xff] }
  0x1c   : > { %v323_v14 = vld [vmem:[%s1202_s10 + $0xe0] sm:$0xff]  ;;  %320 = vst [vmem:[%s231_s11 + $0x60] sm:$0xff] %v319_v12  ;;  %322 = vst [vmem:[%s231_s11 + $0x68] sm:$0xff] %v321_v13  ;;  %v325_v15 = vld [vmem:[%s1202_s10 + $0xf0] sm:$0xff] }
  0x1d   : > { %324 = vst [vmem:[%s231_s11 + $0x70] sm:$0xff] %v323_v14  ;;  %326 = vst [vmem:[%s231_s11 + $0x78] sm:$0xff] %v325_v15 }
  0x1e PF: > { %348 = sbr.rel (!%p1180_p3) target bundleno = 37 (0x25), region = 70  ;;  %s350_s12 = sand.u32 (%p1180_p3), 1, %s1103_s19  }
  0x1f   : > { %s987_s13 = sshll.u32 (%p1180_p3), %s1111_s21, 3  ;;  %s1008_s14 = smul.u32 (%p1180_p3), 24, %s350_s12 }
  0x20   : > { %s358_s17 = scalar_lea.vmem (%p1180_p3), %s1294_s4, %s987_s13 }
  0x21   : > { %v390_v16 = vld [vmem:[%s358_s17] sm:$0xff] (%p1180_p3)  ;;  %v392_v17 = vld [vmem:[%s358_s17 + $0x10] sm:$0xff] (%p1180_p3)  ;;  %s352_s24 = scalar_lea.vmem (%p1180_p3), [#allocation4], %s1008_s14 }
  0x22   : > { %v394_v18 = vld [vmem:[%s358_s17 + $0x20] sm:$0xff] (%p1180_p3)  ;;  %391 = vst [vmem:[%s352_s24] sm:$0xff] (%p1180_p3), %v390_v16  ;;  %393 = vst [vmem:[%s352_s24 + $0x8] sm:$0xff] (%p1180_p3), %v392_v17 }
  0x23   : > { %395 = vst [vmem:[%s352_s24 + $0x10] sm:$0xff] (%p1180_p3), %v394_v18 }
  0x25 PF: > { %p957_p8 = scmp.ge.s32.totalorder %s1115_s22, 1  ;;  %p400_p9 = scmp.lt.s32.totalorder %s1115_s22, 3 }
  0x27   : > { %p401_p10 = pnand %p957_p8, %p400_p9 }
  0x28   : > { %s407_s25 = sand.u32 (!%p401_p10), 1, %s1099_s18   ;;  %v1117_v19 = vmov (!%p401_p10), 0   ;;  %v1075_v36 = vld [vmem:[%s1290_s0] sm:$0xff] (!%p401_p10)   ;;  %v1076_v37 = vld [vmem:[%s1290_s0 + $0x8] ss:$0 sps:$4 sm:$0xff] (!%p401_p10)   ;;  %s959_s9 = sshll.u32 (!%p401_p10), %s1107_s20, 1  ;;  %v685_v38 = vlaneseq (!%p401_p10) }
  0x29   : > { %404 = sbr.rel (%p401_p10) target bundleno = 310 (0x136), region = 108  ;;  %s958_s26 = sshll.u32 (!%p401_p10), %s407_s25, 7  ;;  %643 = vmatprep.mubr.bf16.mxu0 (!%p401_p10), %v1117_v19  ;;  %653 = vmatprep.mubr.bf16.mxu1 (!%p401_p10), %v1117_v19 }
  0x2a   : > { %s1232_s27 = scalar_lea.vmem (!%p401_p10), [#allocation3], %s958_s26  ;;  %p472_p11 = scmp.lt.s32.totalorder (!%p401_p10), %s959_s9, 3  ;;  %v686_v39 = vshrl.u32 (!%p401_p10), %v685_v38, 7 }
  0x2b   : > { %v1051_v20 = vld [vmem:[%s1232_s27 + $0x4] ss:$8 sps:$4 sm:$0xff] (!%p401_p10)   ;;  %v1053_v21 = vld [vmem:[%s1232_s27] ss:$8 sps:$4 sm:$0xff] (!%p401_p10)   ;;  %v1054_v22 = vld [vmem:[%s1232_s27 + $0x14] ss:$8 sps:$4 sm:$0xff] (!%p401_p10)  }
  0x2c   : > { %611 = vmatprep.subr.bf16.mxu0 (!%p401_p10), %v1051_v20  ;;  %992 = vmatprep.subr.bf16.mxu1 (!%p401_p10), %v1051_v20  ;;  %v1056_v23 = vld [vmem:[%s1232_s27 + $0x10] ss:$8 sps:$4 sm:$0xff] (!%p401_p10)   ;;  %v1057_v24 = vld [vmem:[%s1232_s27 + $0x24] ss:$8 sps:$4 sm:$0xff] (!%p401_p10)   ;;  %v1059_v25 = vld [vmem:[%s1232_s27 + $0x20] ss:$8 sps:$4 sm:$0xff] (!%p401_p10)  }
  0x2d   : > { %612 = vmatpush1.bf16.msra.mxu0 (!%p401_p10), %v1053_v21  ;;  %1000 = vmatpush1.bf16.msra.mxu1 (!%p401_p10), %v1053_v21  ;;  %v1060_v26 = vld [vmem:[%s1232_s27 + $0x34] ss:$8 sps:$4 sm:$0xff] (!%p401_p10)   ;;  %v1062_v27 = vld [vmem:[%s1232_s27 + $0x30] ss:$8 sps:$4 sm:$0xff] (!%p401_p10)   ;;  %v1063_v28 = vld [vmem:[%s1232_s27 + $0x44] ss:$8 sps:$4 sm:$0xff] (!%p401_p10)  }
  0x2e   : > { %613 = vmatprep.subr.bf16.mxu0 (!%p401_p10), %v1054_v22  ;;  %993 = vmatprep.subr.bf16.mxu1 (!%p401_p10), %v1054_v22  ;;  %v1065_v29 = vld [vmem:[%s1232_s27 + $0x40] ss:$8 sps:$4 sm:$0xff] (!%p401_p10)   ;;  %v1066_v30 = vld [vmem:[%s1232_s27 + $0x54] ss:$8 sps:$4 sm:$0xff] (!%p401_p10)   ;;  %v1068_v31 = vld [vmem:[%s1232_s27 + $0x50] ss:$8 sps:$4 sm:$0xff] (!%p401_p10)  }
  0x2f   : > { %v1069_v32 = vld [vmem:[%s1232_s27 + $0x64] ss:$8 sps:$4 sm:$0xff] (!%p401_p10)   ;;  %v1071_v33 = vld [vmem:[%s1232_s27 + $0x60] ss:$8 sps:$4 sm:$0xff] (!%p401_p10)   ;;  %v1072_v34 = vld [vmem:[%s1232_s27 + $0x74] ss:$8 sps:$4 sm:$0xff] (!%p401_p10)  }
  0x30   : > { %v1074_v35 = vld [vmem:[%s1232_s27 + $0x70] ss:$8 sps:$4 sm:$0xff]   ;;  %s1305_s9 = smov (!%p472_p11, %s959_s9), 3  ;;  %s1259_s10 = smul.u32 24, %s407_s25  ;;  %v687_v40 = vsub.s32 0, %v686_v39  ;;  %v691_v42 = vsub.s32 1, %v686_v39 }
  0x31   : > { %614 = vmatpush1.bf16.msra.mxu0 %v1056_v23  ;;  %1001 = vmatpush1.bf16.msra.mxu1 %v1056_v23  ;;  %s474_s13 = scalar_lea.vmem %s1292_s2, %s1305_s9  ;;  %s479_s16 = scalar_lea.vmem %s1293_s3, %s1305_s9 }
  0x32   : > { %615 = vmatprep.subr.bf16.mxu0 %v1057_v24  ;;  %994 = vmatprep.subr.bf16.mxu1 %v1057_v24  ;;  %v683_v41 = vld [vmem:[%s474_s13] sm:$0x3]  ;;  %s416_s17 = scalar_lea.vmem [#allocation4], %s1259_s10  ;;  %s459_s18 = scalar_lea.vmem [#allocation5], %s1259_s10 }
  0x33   : > { %v701_v43 = vld [vmem:[%s479_s16] sm:$0x3]  ;;  %v688_v44 = vrot.slane %v683_v41, %v687_v40  ;;  %v721_v46 = vld [vmem:[%s416_s17 + $0x10] sm:$0xff]  ;;  %v692_v47 = vrot.slane %v683_v41, %v691_v42  ;;  %s991_s24 = sshll.u32 (%p1187_p6), %s1107_s20, 3 }
  0x34   : > { %v719_v45 = vld [vmem:[%s416_s17] sm:$0xff]  ;;  %v706_v48 = vrot.slane %v701_v43, %v687_v40  ;;  %v710_v51 = vrot.slane %v701_v43, %v691_v42  ;;  %v720_v52 = vld [vmem:[%s416_s17 + $0x8] sm:$0xff]  ;;  %v726_v56 = vunpack.c.l.bf16 %v721_v46  ;;  %v727_v62 = vunpack.c.h.bf16 %v721_v46  ;;  %s775_s27 = scalar_lea.vmem (%p1187_p6), %s1295_s5, %s991_s24 }
  0x35   : > { %616 = vmatpush1.bf16.msra.mxu0 %v1059_v25  ;;  %1002 = vmatpush1.bf16.msra.mxu1 %v1059_v25  ;;  %v722_v54 = vunpack.c.l.bf16 %v719_v45  ;;  %v723_v60 = vunpack.c.h.bf16 %v719_v45  ;;  %v724_v4 = vunpack.c.l.bf16 %v720_v52  ;;  %v725_v10 = vunpack.c.h.bf16 %v720_v52 }
  0x36   : > { %617 = vmatprep.subr.bf16.mxu0 %v1060_v26  ;;  %995 = vmatprep.subr.bf16.mxu1 %v1060_v26 }
  0x39   : > { %618 = vmatpush1.bf16.msra.mxu0 %v1062_v27  ;;  %1003 = vmatpush1.bf16.msra.mxu1 %v1062_v27 }
  0x3a   : > { %619 = vmatprep.subr.bf16.mxu0 %v1063_v28  ;;  %996 = vmatprep.subr.bf16.mxu1 %v1063_v28 }
  0x3d   : > { %620 = vmatpush1.bf16.msra.mxu0 %v1065_v29  ;;  %1004 = vmatpush1.bf16.msra.mxu1 %v1065_v29 }
  0x3e   : > { %621 = vmatprep.subr.bf16.mxu0 %v1066_v30  ;;  %997 = vmatprep.subr.bf16.mxu1 %v1066_v30 }
  0x41   : > { %622 = vmatpush1.bf16.msra.mxu0 %v1068_v31  ;;  %1005 = vmatpush1.bf16.msra.mxu1 %v1068_v31 }
  0x42   : > { %623 = vmatprep.subr.bf16.mxu0 %v1069_v32  ;;  %998 = vmatprep.subr.bf16.mxu1 %v1069_v32 }
  0x45   : > { %624 = vmatpush1.bf16.msra.mxu0 %v1071_v33  ;;  %1006 = vmatpush1.bf16.msra.mxu1 %v1071_v33 }
  0x46   : > { %625 = vmatprep.subr.bf16.mxu0 %v1072_v34  ;;  %999 = vmatprep.subr.bf16.mxu1 %v1072_v34 }
  0x49   : > { %626 = vmatpush1.bf16.msra.mxu0 %v1074_v35  ;;  %1007 = vmatpush1.bf16.msra.mxu1 %v1074_v35 }
  0x4c   : > { %644 = vmatmul.mubr.bf16.vlgmr.msra.gmra.mrb[0].mxu0 %v1075_v36  ;;  %654 = vmatmul.mubr.bf16.vlgmr.msra.gmra.mrb[0].mxu1 %v1076_v37 }
 0x11f   : > { %v645_v49 = vpop.f32.mrb[0].mxu0  ;;  %v655_v50 = vpop.f32.mrb[0].mxu1 }
 0x120   : > { %v695_v53 = vmul.f32 %v688_v44, %v645_v49  ;;  %v699_v55 = vmul.f32 %v688_v44, %v655_v50  ;;  %v647_v57 = vpop.f32.mrb[1].mxu0  ;;  %v657_v58 = vpop.f32.mrb[1].mxu1 }
 0x121   : > { %v696_v59 = vmul.f32 %v692_v47, %v647_v57  ;;  %v700_v61 = vmul.f32 %v692_v47, %v657_v58  ;;  %v649_v63 = vpop.f32.mrb[2].mxu0  ;;  %v659_v0 = vpop.f32.mrb[2].mxu1 }
 0x122   : > { %v713_v1 = vadd.f32 %v706_v48, %v695_v53  ;;  %v717_v2 = vadd.f32 %v706_v48, %v699_v55  ;;  %v697_v3 = vmul.f32 %v688_v44, %v649_v63  ;;  %v651_v5 = vpop.f32.mrb[3].mxu0  ;;  %v660_v6 = vpop.f32.mrb[3].mxu1 }
 0x123   : > { %v714_v7 = vadd.f32 %v710_v51, %v696_v59  ;;  %v718_v8 = vadd.f32 %v710_v51, %v700_v61  ;;  %v698_v9 = vmul.f32 %v692_v47, %v651_v5 }
 0x124   : > { %v728_v11 = vadd.f32 %v722_v54, %v713_v1  ;;  %v732_v12 = vadd.f32 %v726_v56, %v717_v2  ;;  %v715_v13 = vadd.f32 %v706_v48, %v697_v3 }
 0x125   : > { %v729_v14 = vadd.f32 %v723_v60, %v714_v7  ;;  %v733_v15 = vadd.f32 %v727_v62, %v718_v8  ;;  %v716_v16 = vadd.f32 %v710_v51, %v698_v9 }
 0x126   : > { %v734_v17 = vmax.f32 %v728_v11, 0.0  ;;  %v738_v18 = vmax.f32 %v732_v12, 0.0  ;;  %v730_v19 = vadd.f32 %v724_v4, %v715_v13 }
 0x127   : > { %v735_v20 = vmax.f32 %v729_v14, 0.0  ;;  %v739_v21 = vmax.f32 %v733_v15, 0.0  ;;  %v731_v22 = vadd.f32 %v725_v10, %v716_v16  ;;  %769 = sbr.rel (!%p1187_p6) target bundleno = 310 (0x136), region = 128 }
 0x128   : > { %v736_v23 = vmax.f32 %v730_v19, 0.0 }
 0x129   : > { %v988_v24 = vpack.c.bf16 %v735_v20, %v734_v17  ;;  %v990_v25 = vpack.c.bf16 %v739_v21, %v738_v18  ;;  %v737_v26 = vmax.f32 %v731_v22, 0.0 }
 0x12b   : > { %760 = vst [vmem:[%s459_s18] sm:$0xff] %v988_v24  ;;  %762 = vst [vmem:[%s459_s18 + $0x10] sm:$0xff] %v990_v25  ;;  %v989_v27 = vpack.c.bf16 %v737_v26, %v736_v23 }
 0x12d   : > { %761 = vst [vmem:[%s459_s18 + $0x8] sm:$0xff] %v989_v27 }
 0x132   : > { %v807_v28 = vld [vmem:[%s459_s18] sm:$0xff]  ;;  %v811_v30 = vld [vmem:[%s459_s18 + $0x10] sm:$0xff] }
 0x133   : > { %808 = vst [vmem:[%s775_s27] sm:$0xff] %v807_v28  ;;  %812 = vst [vmem:[%s775_s27 + $0x20] sm:$0xff] %v811_v30 }
 0x134   : > { %v809_v29 = vld [vmem:[%s459_s18 + $0x8] sm:$0xff] }
 0x135   : > { %810 = vst [vmem:[%s775_s27 + $0x10] sm:$0xff] %v809_v29 }
 0x136 PF: > { %s15_s22 = sadd.s32 1, %s1115_s22   ;;  %s1298_s18 = smov %s1103_s19 }
 0x137   : > { %p12_p12 = scmp.ge.s32.totalorder %s15_s22, 4   ;;  %s1299_s19 = smov %s1192_s29 }
 0x138   : > { %s1300_s20 = smov %s1111_s21  ;;  %s1301_s21 = smov %s1303_s23 }
 0x139   :  { %14 = sbr.rel (!%p12_p12) target bundleno = 3 (0x3), region = 214 }

// kernel: deeplab_v2_forward.27
= control target key start
LH: loop header
LB: loop body
LE: loop exit
PB: predicated region body
PF: predicated region fallthrough
CT: control target
= control target key end

     0   :  { %s1236_s15 = smov 0   ;;  %s1238_s16 = smov 0   ;;  %s1436_s0 = inlined_call_operand.vmem [shape: bf16[24,256], index: 0, kind: input, shape index: {}]   ;;  %s1437_s1 = inlined_call_operand.vmem [shape: bf16[256,512], index: 1, kind: input, shape index: {}]   ;;  %s1438_s2 = inlined_call_operand.vmem [shape: f32[1,512], index: 2, kind: input, shape index: {}]   ;;  %s1439_s3 = inlined_call_operand.vmem [shape: f32[1,512], index: 3, kind: input, shape index: {}]   ;;  %s1440_s4 = inlined_call_operand.vmem [shape: bf16[24,512], index: 4, kind: output, shape index: {}]  }
   0x1   :  { %s1240_s17 = smov 0   ;;  %s1242_s18 = smov 0  }
   0x2   :  { %s1244_s19 = smov 0  }
   0x3 LB: > { %s29_s20 = sadd.s32 1, %s1205_s18  ;;  %s985_s21 = sadd.s32 4294967295, %s1209_s19   ;;  %s1209_s19 = sphi %s1244_s19, %s14_s19   ;;  %s1205_s18 = sphi %s1242_s18, %s1445_s18   ;;  %s1201_s17 = sphi %s1240_s17, %s1444_s17   ;;  %s1197_s16 = sphi %s1238_s16, %s1443_s16   ;;  %s1193_s15 = sphi %s1236_s15, %s1442_s15  }
   0x4   : > { %p31_p0 = scmp.ge.s32.totalorder %s29_s20, 2  ;;  %p77_p1 = scmp.ne.s32.totalorder %s1197_s16, %s1193_s15 }
   0x5   : > { %p78_p2 = scmp.eq.s32.totalorder %s1209_s19, 0  ;;  %p161_p4 = scmp.eq.s32.totalorder %s985_s21, 1 }
   0x6   : > { %s1447_s20 = smov (%p31_p0, %s29_s20), 0  ;;  %s70_s23 = sadd.s32 1, %s1197_s16 }
   0x7   : > { %p79_p3 = por %p78_p2, %p77_p1  ;;  %s66_s22 = ssub.s32 %s1205_s18, %s1447_s20 }
   0x8   : > { %p68_p5 = scmp.eq.s32.totalorder %s66_s22, 0  ;;  %p1271_p6 = por %p161_p4, %p77_p1 }
   0x9   : > { %p989_p7 = scmp.ge.s32.totalorder %s1209_s19, 2 }
   0xa   : > { %s1276_s25 = scalar_select %p68_p5, %s1197_s16, %s70_s23  }
   0xb   : > { %198 = sbr.rel (%p989_p7) target bundleno = 38 (0x26), region = 20 }
  0x12   : > { %201 = sbr.rel (!%p79_p3) target bundleno = 38 (0x26), region = 24  ;;  %s203_s26 = sand.u32 (%p79_p3), 1, %s1197_s16  }
  0x13   : > { %s1040_s27 = sshll.u32 (%p79_p3), %s1205_s18, 3  ;;  %s990_s28 = sshll.u32 (%p79_p3), %s203_s26, 8 }
  0x14   : > { %s1284_s5 = scalar_lea.vmem (%p79_p3), %s1437_s1, %s1040_s27  ;;  %s1289_s6 = scalar_lea.vmem (%p79_p3), [#allocation3], %s990_s28 }
  0x15   : > { %v301_v0 = vld [vmem:[%s1284_s5] sm:$0xff] (%p79_p3)  ;;  %v303_v1 = vld [vmem:[%s1284_s5 + $0x10] sm:$0xff] (%p79_p3) }
  0x16   : > { %v305_v2 = vld [vmem:[%s1284_s5 + $0x20] sm:$0xff] (%p79_p3)  ;;  %302 = vst [vmem:[%s1289_s6] sm:$0xff] (%p79_p3), %v301_v0  ;;  %304 = vst [vmem:[%s1289_s6 + $0x8] sm:$0xff] (%p79_p3), %v303_v1  ;;  %v307_v3 = vld [vmem:[%s1284_s5 + $0x30] sm:$0xff] (%p79_p3) }
  0x17   : > { %306 = vst [vmem:[%s1289_s6 + $0x10] sm:$0xff] (%p79_p3), %v305_v2  ;;  %v309_v4 = vld [vmem:[%s1284_s5 + $0x40] sm:$0xff] (%p79_p3)  ;;  %v311_v5 = vld [vmem:[%s1284_s5 + $0x50] sm:$0xff] (%p79_p3)  ;;  %308 = vst [vmem:[%s1289_s6 + $0x18] sm:$0xff] (%p79_p3), %v307_v3 }
  0x18   : > { %310 = vst [vmem:[%s1289_s6 + $0x20] sm:$0xff] (%p79_p3), %v309_v4  ;;  %312 = vst [vmem:[%s1289_s6 + $0x28] sm:$0xff] (%p79_p3), %v311_v5  ;;  %v313_v6 = vld [vmem:[%s1284_s5 + $0x60] sm:$0xff] (%p79_p3)  ;;  %v315_v7 = vld [vmem:[%s1284_s5 + $0x70] sm:$0xff] (%p79_p3) }
  0x19   : > { %v317_v8 = vld [vmem:[%s1284_s5 + $0x80] sm:$0xff]  ;;  %314 = vst [vmem:[%s1289_s6 + $0x30] sm:$0xff] %v313_v6  ;;  %316 = vst [vmem:[%s1289_s6 + $0x38] sm:$0xff] %v315_v7  ;;  %v319_v9 = vld [vmem:[%s1284_s5 + $0x90] sm:$0xff] }
  0x1a   : > { %318 = vst [vmem:[%s1289_s6 + $0x40] sm:$0xff] %v317_v8  ;;  %v321_v10 = vld [vmem:[%s1284_s5 + $0xa0] sm:$0xff]  ;;  %v323_v11 = vld [vmem:[%s1284_s5 + $0xb0] sm:$0xff]  ;;  %320 = vst [vmem:[%s1289_s6 + $0x48] sm:$0xff] %v319_v9 }
  0x1b   : > { %322 = vst [vmem:[%s1289_s6 + $0x50] sm:$0xff] %v321_v10  ;;  %324 = vst [vmem:[%s1289_s6 + $0x58] sm:$0xff] %v323_v11  ;;  %v325_v12 = vld [vmem:[%s1284_s5 + $0xc0] sm:$0xff]  ;;  %v327_v13 = vld [vmem:[%s1284_s5 + $0xd0] sm:$0xff] }
  0x1c   : > { %v329_v14 = vld [vmem:[%s1284_s5 + $0xe0] sm:$0xff]  ;;  %326 = vst [vmem:[%s1289_s6 + $0x60] sm:$0xff] %v325_v12  ;;  %328 = vst [vmem:[%s1289_s6 + $0x68] sm:$0xff] %v327_v13  ;;  %v331_v15 = vld [vmem:[%s1284_s5 + $0xf0] sm:$0xff] }
  0x1d   : > { %330 = vst [vmem:[%s1289_s6 + $0x70] sm:$0xff] %v329_v14  ;;  %v333_v16 = vld [vmem:[%s1284_s5 + $0x100] sm:$0xff]  ;;  %v335_v17 = vld [vmem:[%s1284_s5 + $0x110] sm:$0xff]  ;;  %332 = vst [vmem:[%s1289_s6 + $0x78] sm:$0xff] %v331_v15 }
  0x1e   : > { %334 = vst [vmem:[%s1289_s6 + $0x80] sm:$0xff] %v333_v16  ;;  %336 = vst [vmem:[%s1289_s6 + $0x88] sm:$0xff] %v335_v17  ;;  %v337_v18 = vld [vmem:[%s1284_s5 + $0x120] sm:$0xff]  ;;  %v339_v19 = vld [vmem:[%s1284_s5 + $0x130] sm:$0xff] }
  0x1f   : > { %v341_v20 = vld [vmem:[%s1284_s5 + $0x140] sm:$0xff]  ;;  %338 = vst [vmem:[%s1289_s6 + $0x90] sm:$0xff] %v337_v18  ;;  %340 = vst [vmem:[%s1289_s6 + $0x98] sm:$0xff] %v339_v19  ;;  %v343_v21 = vld [vmem:[%s1284_s5 + $0x150] sm:$0xff] }
  0x20   : > { %342 = vst [vmem:[%s1289_s6 + $0xa0] sm:$0xff] %v341_v20  ;;  %v345_v22 = vld [vmem:[%s1284_s5 + $0x160] sm:$0xff]  ;;  %v347_v23 = vld [vmem:[%s1284_s5 + $0x170] sm:$0xff]  ;;  %344 = vst [vmem:[%s1289_s6 + $0xa8] sm:$0xff] %v343_v21 }
  0x21   : > { %346 = vst [vmem:[%s1289_s6 + $0xb0] sm:$0xff] %v345_v22  ;;  %348 = vst [vmem:[%s1289_s6 + $0xb8] sm:$0xff] %v347_v23  ;;  %v349_v24 = vld [vmem:[%s1284_s5 + $0x180] sm:$0xff]  ;;  %v351_v25 = vld [vmem:[%s1284_s5 + $0x190] sm:$0xff] }
  0x22   : > { %v353_v26 = vld [vmem:[%s1284_s5 + $0x1a0] sm:$0xff]  ;;  %350 = vst [vmem:[%s1289_s6 + $0xc0] sm:$0xff] %v349_v24  ;;  %352 = vst [vmem:[%s1289_s6 + $0xc8] sm:$0xff] %v351_v25  ;;  %v355_v27 = vld [vmem:[%s1284_s5 + $0x1b0] sm:$0xff] }
  0x23   : > { %354 = vst [vmem:[%s1289_s6 + $0xd0] sm:$0xff] %v353_v26  ;;  %v357_v28 = vld [vmem:[%s1284_s5 + $0x1c0] sm:$0xff]  ;;  %v359_v29 = vld [vmem:[%s1284_s5 + $0x1d0] sm:$0xff]  ;;  %356 = vst [vmem:[%s1289_s6 + $0xd8] sm:$0xff] %v355_v27 }
  0x24   : > { %358 = vst [vmem:[%s1289_s6 + $0xe0] sm:$0xff] %v357_v28  ;;  %360 = vst [vmem:[%s1289_s6 + $0xe8] sm:$0xff] %v359_v29  ;;  %v361_v30 = vld [vmem:[%s1284_s5 + $0x1e0] sm:$0xff]  ;;  %v363_v31 = vld [vmem:[%s1284_s5 + $0x1f0] sm:$0xff] }
  0x25   : > { %362 = vst [vmem:[%s1289_s6 + $0xf0] sm:$0xff] %v361_v30  ;;  %364 = vst [vmem:[%s1289_s6 + $0xf8] sm:$0xff] %v363_v31 }
  0x26 PF: > { %p993_p8 = scmp.ge.s32.totalorder %s1209_s19, 1  ;;  %p385_p9 = scmp.lt.s32.totalorder %s1209_s19, 3 }
  0x28   : > { %p386_p10 = pnand %p993_p8, %p385_p9 }
  0x29   : > { %s392_s7 = sand.u32 (!%p386_p10), 1, %s1193_s15   ;;  %v1168_v32 = vld [vmem:[%s1436_s0 + $0x4] ss:$8 sps:$4 sm:$0xff] (!%p386_p10)   ;;  %v1363_v33 = vld [vmem:[%s1436_s0 + $0x10] sm:$0xff] (!%p386_p10)  ;;  %v1166_v3 = vld [vmem:[%s1436_s0] ss:$8 sps:$4 sm:$0xff] (!%p386_p10)   ;;  %v762_v5 = vlaneseq (!%p386_p10) }
  0x2a   : > { %389 = sbr.rel (%p386_p10) target bundleno = 339 (0x153), region = 70  ;;  %s994_s8 = sshll.u32 (!%p386_p10), %s392_s7, 8  ;;  %v1000_v34 = vcombine.high (!%p386_p10), %v1363_v33, %v1363_v33  ;;  %720 = vmatprep.mubr.bf16.mxu0 (!%p386_p10), %v1168_v32  ;;  %v999_v4 = vcombine.low (!%p386_p10), %v1363_v33, %v1363_v33 }
  0x2b   : > { %s1367_s13 = scalar_lea.vmem (!%p386_p10), [#allocation3], %s994_s8  ;;  %s995_s22 = sshll.u32 (!%p386_p10), %s1201_s17, 1  ;;  %v763_v6 = vshrl.u32 (!%p386_p10), %v762_v5, 7 }
  0x2c   : > { %v1118_v35 = vld [vmem:[%s1367_s13 + $0x4] ss:$8 sps:$4 sm:$0xff] (!%p386_p10)   ;;  %v1120_v36 = vld [vmem:[%s1367_s13] ss:$8 sps:$4 sm:$0xff] (!%p386_p10)   ;;  %730 = vmatprep.mubr.bf16.mxu1 (!%p386_p10), %v1000_v34  ;;  %v1121_v37 = vld [vmem:[%s1367_s13 + $0x14] ss:$8 sps:$4 sm:$0xff] (!%p386_p10)  }
  0x2d   : > { %688 = vmatprep.subr.bf16.mxu0 (!%p386_p10), %v1118_v35  ;;  %1045 = vmatprep.subr.bf16.mxu1 (!%p386_p10), %v1118_v35  ;;  %v1123_v38 = vld [vmem:[%s1367_s13 + $0x10] ss:$8 sps:$4 sm:$0xff] (!%p386_p10)   ;;  %v1124_v39 = vld [vmem:[%s1367_s13 + $0x24] ss:$8 sps:$4 sm:$0xff] (!%p386_p10)   ;;  %v1126_v40 = vld [vmem:[%s1367_s13 + $0x20] ss:$8 sps:$4 sm:$0xff] (!%p386_p10)  }
  0x2e   : > { %689 = vmatpush1.bf16.msra.mxu0 (!%p386_p10), %v1120_v36  ;;  %1061 = vmatpush1.bf16.msra.mxu1 (!%p386_p10), %v1120_v36  ;;  %v1127_v41 = vld [vmem:[%s1367_s13 + $0x34] ss:$8 sps:$4 sm:$0xff] (!%p386_p10)   ;;  %v1129_v42 = vld [vmem:[%s1367_s13 + $0x30] ss:$8 sps:$4 sm:$0xff] (!%p386_p10)   ;;  %v1130_v43 = vld [vmem:[%s1367_s13 + $0x44] ss:$8 sps:$4 sm:$0xff] (!%p386_p10)  }
  0x2f   : > { %690 = vmatprep.subr.bf16.mxu0 (!%p386_p10), %v1121_v37  ;;  %1046 = vmatprep.subr.bf16.mxu1 (!%p386_p10), %v1121_v37  ;;  %v1132_v44 = vld [vmem:[%s1367_s13 + $0x40] ss:$8 sps:$4 sm:$0xff] (!%p386_p10)   ;;  %v1133_v45 = vld [vmem:[%s1367_s13 + $0x54] ss:$8 sps:$4 sm:$0xff] (!%p386_p10)   ;;  %v1135_v46 = vld [vmem:[%s1367_s13 + $0x50] ss:$8 sps:$4 sm:$0xff] (!%p386_p10)  }
  0x30   : > { %v1136_v47 = vld [vmem:[%s1367_s13 + $0x64] ss:$8 sps:$4 sm:$0xff] (!%p386_p10)   ;;  %v1138_v48 = vld [vmem:[%s1367_s13 + $0x60] ss:$8 sps:$4 sm:$0xff] (!%p386_p10)   ;;  %v1139_v49 = vld [vmem:[%s1367_s13 + $0x74] ss:$8 sps:$4 sm:$0xff] (!%p386_p10)  }
  0x31   : > { %v1141_v50 = vld [vmem:[%s1367_s13 + $0x70] ss:$8 sps:$4 sm:$0xff]   ;;  %v1142_v51 = vld [vmem:[%s1367_s13 + $0x84] ss:$8 sps:$4 sm:$0xff]   ;;  %v1144_v52 = vld [vmem:[%s1367_s13 + $0x80] ss:$8 sps:$4 sm:$0xff]  }
  0x32   : > { %691 = vmatpush1.bf16.msra.mxu0 %v1123_v38  ;;  %1062 = vmatpush1.bf16.msra.mxu1 %v1123_v38  ;;  %v1145_v53 = vld [vmem:[%s1367_s13 + $0x94] ss:$8 sps:$4 sm:$0xff]   ;;  %v1147_v54 = vld [vmem:[%s1367_s13 + $0x90] ss:$8 sps:$4 sm:$0xff]   ;;  %v1148_v55 = vld [vmem:[%s1367_s13 + $0xa4] ss:$8 sps:$4 sm:$0xff]  }
  0x33   : > { %692 = vmatprep.subr.bf16.mxu0 %v1124_v39  ;;  %1047 = vmatprep.subr.bf16.mxu1 %v1124_v39  ;;  %v1150_v56 = vld [vmem:[%s1367_s13 + $0xa0] ss:$8 sps:$4 sm:$0xff]   ;;  %v1151_v57 = vld [vmem:[%s1367_s13 + $0xb4] ss:$8 sps:$4 sm:$0xff]   ;;  %v1153_v58 = vld [vmem:[%s1367_s13 + $0xb0] ss:$8 sps:$4 sm:$0xff]  }
  0x34   : > { %v1154_v59 = vld [vmem:[%s1367_s13 + $0xc4] ss:$8 sps:$4 sm:$0xff]   ;;  %v1156_v60 = vld [vmem:[%s1367_s13 + $0xc0] ss:$8 sps:$4 sm:$0xff]   ;;  %v1157_v61 = vld [vmem:[%s1367_s13 + $0xd4] ss:$8 sps:$4 sm:$0xff]  }
  0x35   : > { %v1159_v62 = vld [vmem:[%s1367_s13 + $0xd0] ss:$8 sps:$4 sm:$0xff]   ;;  %v1160_v63 = vld [vmem:[%s1367_s13 + $0xe4] ss:$8 sps:$4 sm:$0xff]   ;;  %v1162_v0 = vld [vmem:[%s1367_s13 + $0xe0] ss:$8 sps:$4 sm:$0xff]  }
  0x36   : > { %693 = vmatpush1.bf16.msra.mxu0 %v1126_v40  ;;  %1063 = vmatpush1.bf16.msra.mxu1 %v1126_v40  ;;  %v1163_v1 = vld [vmem:[%s1367_s13 + $0xf4] ss:$8 sps:$4 sm:$0xff]   ;;  %v1165_v2 = vld [vmem:[%s1367_s13 + $0xf0] ss:$8 sps:$4 sm:$0xff]   ;;  %p449_p11 = scmp.lt.s32.totalorder %s995_s22, 3  ;;  %v764_v7 = vsub.s32 0, %v763_v6 }
  0x37   : > { %694 = vmatprep.subr.bf16.mxu0 %v1127_v41  ;;  %1048 = vmatprep.subr.bf16.mxu1 %v1127_v41  ;;  %v768_v9 = vsub.s32 1, %v763_v6  ;;  %s1077_s5 = smul.u32 24, %s392_s7  ;;  %s1044_s6 = sshll.u32 (%p1271_p6), %s1201_s17, 3 }
  0x38   : > { %s1449_s22 = smov (!%p449_p11, %s995_s22), 3  ;;  %s831_s9 = scalar_lea.vmem (%p1271_p6), %s1440_s4, %s1044_s6 }
  0x39   : > { %s451_s27 = scalar_lea.vmem %s1438_s2, %s1449_s22  ;;  %s456_s30 = scalar_lea.vmem %s1439_s3, %s1449_s22 }
  0x3a   : > { %695 = vmatpush1.bf16.msra.mxu0 %v1129_v42  ;;  %1064 = vmatpush1.bf16.msra.mxu1 %v1129_v42  ;;  %v760_v8 = vld [vmem:[%s451_s27] sm:$0x3]  ;;  %s433_s15 = scalar_lea.vmem [#allocation4], %s1077_s5 }
  0x3b   : > { %696 = vmatprep.subr.bf16.mxu0 %v1130_v43  ;;  %1049 = vmatprep.subr.bf16.mxu1 %v1130_v43  ;;  %v778_v10 = vld [vmem:[%s456_s30] sm:$0x3]  ;;  %v765_v11 = vrot.slane %v760_v8, %v764_v7  ;;  %v769_v12 = vrot.slane %v760_v8, %v768_v9 }
  0x3c   : > { %v783_v13 = vrot.slane %v778_v10, %v764_v7  ;;  %v787_v16 = vrot.slane %v778_v10, %v768_v9 }
  0x3e   : > { %697 = vmatpush1.bf16.msra.mxu0 %v1132_v44  ;;  %1065 = vmatpush1.bf16.msra.mxu1 %v1132_v44 }
  0x3f   : > { %698 = vmatprep.subr.bf16.mxu0 %v1133_v45  ;;  %1050 = vmatprep.subr.bf16.mxu1 %v1133_v45 }
  0x42   : > { %699 = vmatpush1.bf16.msra.mxu0 %v1135_v46  ;;  %1066 = vmatpush1.bf16.msra.mxu1 %v1135_v46 }
  0x43   : > { %700 = vmatprep.subr.bf16.mxu0 %v1136_v47  ;;  %1051 = vmatprep.subr.bf16.mxu1 %v1136_v47 }
  0x46   : > { %701 = vmatpush1.bf16.msra.mxu0 %v1138_v48  ;;  %1067 = vmatpush1.bf16.msra.mxu1 %v1138_v48 }
  0x47   : > { %702 = vmatprep.subr.bf16.mxu0 %v1139_v49  ;;  %1052 = vmatprep.subr.bf16.mxu1 %v1139_v49 }
  0x4a   : > { %703 = vmatpush1.bf16.msra.mxu0 %v1141_v50  ;;  %1068 = vmatpush1.bf16.msra.mxu1 %v1141_v50 }
  0x4b   : > { %704 = vmatprep.subr.bf16.mxu0 %v1142_v51  ;;  %1053 = vmatprep.subr.bf16.mxu1 %v1142_v51 }
  0x4e   : > { %705 = vmatpush1.bf16.msra.mxu0 %v1144_v52  ;;  %1069 = vmatpush1.bf16.msra.mxu1 %v1144_v52 }
  0x4f   : > { %706 = vmatprep.subr.bf16.mxu0 %v1145_v53  ;;  %1054 = vmatprep.subr.bf16.mxu1 %v1145_v53 }
  0x52   : > { %707 = vmatpush1.bf16.msra.mxu0 %v1147_v54  ;;  %1070 = vmatpush1.bf16.msra.mxu1 %v1147_v54 }
  0x53   : > { %708 = vmatprep.subr.bf16.mxu0 %v1148_v55  ;;  %1055 = vmatprep.subr.bf16.mxu1 %v1148_v55 }
  0x56   : > { %709 = vmatpush1.bf16.msra.mxu0 %v1150_v56  ;;  %1071 = vmatpush1.bf16.msra.mxu1 %v1150_v56 }
  0x57   : > { %710 = vmatprep.subr.bf16.mxu0 %v1151_v57  ;;  %1056 = vmatprep.subr.bf16.mxu1 %v1151_v57 }
  0x5a   : > { %711 = vmatpush1.bf16.msra.mxu0 %v1153_v58  ;;  %1072 = vmatpush1.bf16.msra.mxu1 %v1153_v58 }
  0x5b   : > { %712 = vmatprep.subr.bf16.mxu0 %v1154_v59  ;;  %1057 = vmatprep.subr.bf16.mxu1 %v1154_v59 }
  0x5e   : > { %713 = vmatpush1.bf16.msra.mxu0 %v1156_v60  ;;  %1073 = vmatpush1.bf16.msra.mxu1 %v1156_v60 }
  0x5f   : > { %714 = vmatprep.subr.bf16.mxu0 %v1157_v61  ;;  %1058 = vmatprep.subr.bf16.mxu1 %v1157_v61 }
  0x62   : > { %715 = vmatpush1.bf16.msra.mxu0 %v1159_v62  ;;  %1074 = vmatpush1.bf16.msra.mxu1 %v1159_v62 }
  0x63   : > { %716 = vmatprep.subr.bf16.mxu0 %v1160_v63  ;;  %1059 = vmatprep.subr.bf16.mxu1 %v1160_v63 }
  0x66   : > { %717 = vmatpush1.bf16.msra.mxu0 %v1162_v0  ;;  %1075 = vmatpush1.bf16.msra.mxu1 %v1162_v0 }
  0x67   : > { %718 = vmatprep.subr.bf16.mxu0 %v1163_v1  ;;  %1060 = vmatprep.subr.bf16.mxu1 %v1163_v1 }
  0x6a   : > { %719 = vmatpush1.bf16.msra.mxu0 %v1165_v2  ;;  %1076 = vmatpush1.bf16.msra.mxu1 %v1165_v2 }
  0x6d   : > { %721 = vmatmul.mubr.bf16.vlgmr.msra.gmra.mrb[0].mxu0 %v1166_v3  ;;  %731 = vmatmul.mubr.bf16.vlgmr.msra.gmra.mrb[0].mxu1 %v999_v4 }
 0x140   : > { %v722_v14 = vpop.f32.mrb[0].mxu0  ;;  %v732_v15 = vpop.f32.mrb[0].mxu1 }
 0x141   : > { %v772_v17 = vmul.f32 %v765_v11, %v722_v14  ;;  %v776_v18 = vmul.f32 %v765_v11, %v732_v15  ;;  %v724_v19 = vpop.f32.mrb[1].mxu0  ;;  %v734_v20 = vpop.f32.mrb[1].mxu1 }
 0x142   : > { %v773_v21 = vmul.f32 %v769_v12, %v724_v19  ;;  %v777_v22 = vmul.f32 %v769_v12, %v734_v20  ;;  %v726_v23 = vpop.f32.mrb[2].mxu0  ;;  %v736_v24 = vpop.f32.mrb[2].mxu1 }
 0x143   : > { %v790_v25 = vadd.f32 %v783_v13, %v772_v17  ;;  %v794_v26 = vadd.f32 %v783_v13, %v776_v18  ;;  %v774_v27 = vmul.f32 %v765_v11, %v726_v23  ;;  %v728_v28 = vpop.f32.mrb[3].mxu0  ;;  %v737_v29 = vpop.f32.mrb[3].mxu1 }
 0x144   : > { %v791_v30 = vadd.f32 %v787_v16, %v773_v21  ;;  %v795_v31 = vadd.f32 %v787_v16, %v777_v22  ;;  %v775_v32 = vmul.f32 %v769_v12, %v728_v28  ;;  %825 = sbr.rel (!%p1271_p6) target bundleno = 339 (0x153), region = 86 }
 0x145   : > { %v792_v33 = vadd.f32 %v783_v13, %v774_v27 }
 0x146   : > { %v1041_v34 = vpack.c.bf16 %v791_v30, %v790_v25  ;;  %v1043_v35 = vpack.c.bf16 %v795_v31, %v794_v26  ;;  %v793_v36 = vadd.f32 %v787_v16, %v775_v32 }
 0x148   : > { %816 = vst [vmem:[%s433_s15] sm:$0xff] %v1041_v34  ;;  %818 = vst [vmem:[%s433_s15 + $0x10] sm:$0xff] %v1043_v35  ;;  %v1042_v37 = vpack.c.bf16 %v793_v36, %v792_v33 }
 0x14a   : > { %817 = vst [vmem:[%s433_s15 + $0x8] sm:$0xff] %v1042_v37 }
 0x14f   : > { %v863_v38 = vld [vmem:[%s433_s15] sm:$0xff]  ;;  %v867_v40 = vld [vmem:[%s433_s15 + $0x10] sm:$0xff] }
 0x150   : > { %864 = vst [vmem:[%s831_s9] sm:$0xff] %v863_v38  ;;  %868 = vst [vmem:[%s831_s9 + $0x20] sm:$0xff] %v867_v40 }
 0x151   : > { %v865_v39 = vld [vmem:[%s433_s15 + $0x8] sm:$0xff] }
 0x152   : > { %866 = vst [vmem:[%s831_s9 + $0x10] sm:$0xff] %v865_v39 }
 0x153 PF: > { %s14_s19 = sadd.s32 1, %s1209_s19   ;;  %s1442_s15 = smov %s1197_s16 }
 0x154   : > { %p11_p12 = scmp.ge.s32.totalorder %s14_s19, 4   ;;  %s1443_s16 = smov %s1276_s25 }
 0x155   : > { %s1444_s17 = smov %s1205_s18  ;;  %s1445_s18 = smov %s1447_s20 }
 0x156   :  { %13 = sbr.rel (!%p11_p12) target bundleno = 3 (0x3), region = 164 }

// kernel: deeplab_v2_forward.29
= control target key start
LH: loop header
LB: loop body
LE: loop exit
PB: predicated region body
PF: predicated region fallthrough
CT: control target
= control target key end

     0   :  { %s1106_s15 = smov 0   ;;  %s1108_s16 = smov 0   ;;  %s1218_s0 = inlined_call_operand.vmem [shape: bf16[24,1152], index: 0, kind: input, shape index: {}]   ;;  %s1219_s1 = inlined_call_operand.vmem [shape: bf16[1152,128], index: 1, kind: input, shape index: {}]   ;;  %s1220_s2 = inlined_call_operand.vmem [shape: f32[1,128], index: 2, kind: input, shape index: {}]   ;;  %s1221_s3 = inlined_call_operand.vmem [shape: f32[1,128], index: 3, kind: input, shape index: {}]   ;;  %s1222_s4 = inlined_call_operand.vmem [shape: bf16[24,128], index: 4, kind: output, shape index: {}]  }
   0x1   :  { %s1110_s17 = smov 0   ;;  %s1112_s18 = smov 0  }
   0x2   :  { %s1114_s19 = smov 0  }
   0x3 LB: > { %s26_s20 = sadd.s32 1, %s1074_s18  ;;  %p49_p1 = scmp.ne.s32.totalorder %s1066_s16, %s1062_s15  ;;  %s1078_s19 = sphi %s1114_s19, %s14_s19   ;;  %s1074_s18 = sphi %s1112_s18, %s1226_s18   ;;  %s1070_s17 = sphi %s1110_s17, %s1225_s17   ;;  %s1066_s16 = sphi %s1108_s16, %s1224_s16   ;;  %s1062_s15 = sphi %s1106_s15, %s1223_s15  }
   0x4   : > { %p27_p0 = scmp.ge.s32.totalorder %s26_s20, 3  ;;  %p50_p2 = scmp.eq.s32.totalorder %s1078_s19, 0 }
   0x5   : > { %s42_s22 = sadd.s32 1, %s1066_s16  ;;  %p848_p5 = scmp.ge.s32.totalorder %s1078_s19, 3 }
   0x6   : > { %s1228_s20 = smov (%p27_p0, %s26_s20), 0  ;;  %p51_p3 = por %p50_p2, %p49_p1 }
   0x7   : > { %s38_s21 = ssub.s32 %s1074_s18, %s1228_s20  ;;  %195 = sbr.rel (%p848_p5) target bundleno = 22 (0x16), region = 24 }
   0x8   : > { %p40_p4 = scmp.eq.s32.totalorder %s38_s21, 0 }
   0xa   : > { %s1141_s23 = scalar_select %p40_p4, %s1066_s16, %s42_s22  }
   0xe   : > { %198 = sbr.rel (!%p51_p3) target bundleno = 22 (0x16), region = 28  ;;  %s200_s24 = sand.u32 (%p51_p3), 1, %s1066_s16  }
   0xf   : > { %s899_s25 = smul.u32 (%p51_p3), 12, %s1074_s18 }
  0x10   : > { %s966_s26 = smul.u32 (%p51_p3), 36, %s200_s24 }
  0x11   : > { %s208_s29 = scalar_lea.vmem (%p51_p3), %s1218_s0, %s899_s25 }
  0x12   : > { %v223_v0 = vld [vmem:[%s208_s29] sm:$0xff] (%p51_p3)  ;;  %v227_v2 = vld [vmem:[%s208_s29 + $0x48] sm:$0xff] (%p51_p3)  ;;  %s202_s30 = scalar_lea.vmem (%p51_p3), [#allocation3], %s966_s26  ;;  %v854_v5 = vld [vmem:[%s208_s29 + $0x50] sm:$0xf] (%p51_p3) }
  0x13   : > { %v225_v1 = vld [vmem:[%s208_s29 + $0x24] sm:$0xff] (%p51_p3)  ;;  %224 = vst [vmem:[%s202_s30] sm:$0xff] (%p51_p3), %v223_v0  ;;  %228 = vst [vmem:[%s202_s30 + $0x18] sm:$0xff] (%p51_p3), %v227_v2  ;;  %v852_v4 = vld [vmem:[%s208_s29 + $0x2c] sm:$0xf] (%p51_p3) }
  0x14   : > { %226 = vst [vmem:[%s202_s30 + $0xc] sm:$0xff] (%p51_p3), %v225_v1  ;;  %v850_v3 = vld [vmem:[%s208_s29 + $0x8] sm:$0xf] (%p51_p3)  ;;  %853 = vst [vmem:[%s202_s30 + $0x14] sm:$0xf] (%p51_p3), %v852_v4 }
  0x15   : > { %851 = vst [vmem:[%s202_s30 + $0x8] sm:$0xf] %v850_v3  ;;  %855 = vst [vmem:[%s202_s30 + $0x20] sm:$0xf] %v854_v5 }
  0x16 PF: > { %p856_p6 = scmp.ge.s32.totalorder %s1078_s19, 1  ;;  %p258_p7 = scmp.lt.s32.totalorder %s1078_s19, 4 }
  0x18   : > { %p259_p8 = pnand %p856_p6, %p258_p7 }
  0x19   : > { %s265_s5 = sand.u32 (!%p259_p8), 1, %s1062_s15   ;;  %s309_s6 = smul.u32 (!%p259_p8), 48, %s1070_s17 }
  0x1a   : > { %262 = sbr.rel (%p259_p8) target bundleno = 317 (0x13d), region = 58  ;;  %p858_p10 = scmp.ne.s32.totalorder (!%p259_p8), %s1070_s17, 0 }
  0x1b   : > { %s967_s7 = smul.u32 (!%p259_p8), 36, %s265_s5  ;;  %p310_p9 = scmp.lt.s32.totalorder (!%p259_p8), %s309_s6, 143 }
  0x1d   : > { %s1158_s12 = scalar_lea.vmem (!%p259_p8), [#allocation3], %s967_s7 }
  0x21   : > { %s1230_s6 = smov (!%p310_p9, %s309_s6), 143  ;;  %337 = sbr.rel (%p858_p10) target bundleno = 40 (0x28), region = 66 }
  0x22   : > { %s857_s8 = sshll.u32 %s1230_s6, 2  ;;  %v1080_v6 = vmov (!%p858_p10), 0.0  }
  0x23   : > { %s1156_s11 = scalar_lea.vmem %s1219_s1, %s857_s8  ;;  %338 = vst [vmem:[#allocation2] sm:$0xff] (!%p858_p10), %v1080_v6  ;;  %339 = vst [vmem:[#allocation2 + $0x8] sm:$0xff] (!%p858_p10), %v1080_v6 }
  0x24   : > { %340 = vst [vmem:[#allocation2 + $0x10] sm:$0xff] (!%p858_p10), %v1080_v6 }
  0x28 PF: > { %v1009_v7 = vld [vmem:[%s1156_s11 + $0x40] sm:$0xff]   ;;  %v1012_v10 = vld [vmem:[%s1156_s11 + $0x48] sm:$0xff]   ;;  %v1015_v13 = vld [vmem:[%s1156_s11 + $0x50] sm:$0xff]   ;;  %p889_p11 = scmp.ne.s32.totalorder %s1070_s17, 2 }
  0x29   : > { %v1010_v8 = vld [vmem:[%s1156_s11] sm:$0xff]   ;;  %908 = vmatprep.subr.bf16.mxu0 %v1009_v7  ;;  %v1013_v11 = vld [vmem:[%s1156_s11 + $0x8] sm:$0xff]   ;;  %v1016_v14 = vld [vmem:[%s1156_s11 + $0x10] sm:$0xff]  }
  0x2a   : > { %v1011_v9 = vld [vmem:[%s1156_s11 + $0x80] sm:$0xff]   ;;  %909 = vmatpush3.bf16.msra.mxu0 %v1010_v8  ;;  %v1014_v12 = vld [vmem:[%s1156_s11 + $0x88] sm:$0xff]   ;;  %v1017_v15 = vld [vmem:[%s1156_s11 + $0x90] sm:$0xff]  }
  0x2b   : > { %946 = vmatprep.subr.bf16.mxu1 %v1011_v9  ;;  %910 = vmatprep.subr.bf16.mxu0 %v1012_v10  ;;  %v1018_v16 = vld [vmem:[%s1156_s11 + $0x58] sm:$0xff]   ;;  %v1021_v19 = vld [vmem:[%s1156_s11 + $0x60] sm:$0xff]   ;;  %v1024_v22 = vld [vmem:[%s1156_s11 + $0x68] sm:$0xff]  }
  0x2c   : > { %947 = vmatpush3.bf16.msra.mxu1 %v1011_v9  ;;  %v1019_v17 = vld [vmem:[%s1156_s11 + $0x18] sm:$0xff]   ;;  %v1023_v20 = vld [vmem:[%s1156_s11 + $0xa0] sm:$0xff]   ;;  %v1026_v23 = vld [vmem:[%s1156_s11 + $0xa8] sm:$0xff]  }
  0x2d   : > { %948 = vmatprep.subr.bf16.mxu1 %v1014_v12  ;;  %v1020_v18 = vld [vmem:[%s1156_s11 + $0x98] sm:$0xff]   ;;  %v1022_v21 = vld [vmem:[%s1156_s11 + $0x20] sm:$0xff]   ;;  %v1025_v24 = vld [vmem:[%s1156_s11 + $0x28] sm:$0xff]  }
  0x2e   : > { %911 = vmatpush3.bf16.msra.mxu0 %v1013_v11  ;;  %v1027_v25 = vld [vmem:[%s1156_s11 + $0x70] sm:$0xff]   ;;  %v1030_v28 = vld [vmem:[%s1156_s11 + $0x78] sm:$0xff]   ;;  %v341_v44 = vld [vmem:[#allocation2] sm:$0xff] }
  0x2f   : > { %912 = vmatprep.subr.bf16.mxu0 %v1015_v13  ;;  %v1029_v26 = vld [vmem:[%s1156_s11 + $0xb0] sm:$0xff]   ;;  %v1035_v29 = vld [vmem:[%s1158_s12 + $0x4] ss:$12 sps:$4 sm:$0xff]   ;;  %v1033_v34 = vld [vmem:[%s1158_s12] ss:$12 sps:$4 sm:$0xff]  }
  0x30   : > { %949 = vmatpush3.bf16.msra.mxu1 %v1014_v12  ;;  %v1028_v27 = vld [vmem:[%s1156_s11 + $0x30] sm:$0xff]   ;;  %v1032_v30 = vld [vmem:[%s1156_s11 + $0xb8] sm:$0xff]   ;;  %601 = vmatprep.mubr.bf16.mxu0 %v1035_v29  ;;  %v342_v49 = vld [vmem:[#allocation2 + $0x8] sm:$0xff] }
  0x31   : > { %950 = vmatprep.subr.bf16.mxu1 %v1017_v15  ;;  %v1036_v31 = vld [vmem:[%s1158_s12 + $0x8] ss:$12 sps:$4 sm:$0xff]   ;;  %v1031_v32 = vld [vmem:[%s1156_s11 + $0x38] sm:$0xff]  }
  0x32   : > { %913 = vmatpush3.bf16.msra.mxu0 %v1016_v14  ;;  %962 = vmatprep.mubr.bf16.mxu1 %v1036_v31  ;;  %v348_v33 = vld [vmem:[%s1158_s12 + $0x18] sm:$0xff]  ;;  %v1037_v36 = vld [vmem:[%s1158_s12 + $0x20] ss:$0 sps:$4 sm:$0xff]   ;;  %v890_v0 = vld [vmem:[%s1220_s2] ss:$0 sm:$0xff] (!%p889_p11) }
  0x33   : > { %914 = vmatprep.subr.bf16.mxu0 %v1018_v16  ;;  %v863_v35 = vcombine.high %v348_v33, %v348_v33  ;;  %v862_v37 = vcombine.low %v348_v33, %v348_v33  ;;  %v343_v58 = vld [vmem:[#allocation2 + $0x10] sm:$0xff]  ;;  %v891_v3 = vld [vmem:[%s1221_s3] ss:$0 sm:$0xff] (!%p889_p11) }
  0x34   : > { %951 = vmatpush3.bf16.msra.mxu1 %v1017_v15 }
  0x35   : > { %952 = vmatprep.subr.bf16.mxu1 %v1020_v18 }
  0x36   : > { %915 = vmatpush3.bf16.msra.mxu0 %v1019_v17 }
  0x37   : > { %916 = vmatprep.subr.bf16.mxu0 %v1021_v19 }
  0x38   : > { %953 = vmatpush3.bf16.msra.mxu1 %v1020_v18 }
  0x39   : > { %954 = vmatprep.subr.bf16.mxu1 %v1023_v20 }
  0x3a   : > { %917 = vmatpush3.bf16.msra.mxu0 %v1022_v21 }
  0x3b   : > { %918 = vmatprep.subr.bf16.mxu0 %v1024_v22 }
  0x3c   : > { %955 = vmatpush3.bf16.msra.mxu1 %v1023_v20 }
  0x3d   : > { %956 = vmatprep.subr.bf16.mxu1 %v1026_v23 }
  0x3e   : > { %919 = vmatpush3.bf16.msra.mxu0 %v1025_v24 }
  0x3f   : > { %920 = vmatprep.subr.bf16.mxu0 %v1027_v25 }
  0x40   : > { %957 = vmatpush3.bf16.msra.mxu1 %v1026_v23 }
  0x41   : > { %958 = vmatprep.subr.bf16.mxu1 %v1029_v26 }
  0x42   : > { %921 = vmatpush3.bf16.msra.mxu0 %v1028_v27 }
  0x43   : > { %922 = vmatprep.subr.bf16.mxu0 %v1030_v28 }
  0x44   : > { %959 = vmatpush3.bf16.msra.mxu1 %v1029_v26 }
  0x45   : > { %960 = vmatprep.subr.bf16.mxu1 %v1032_v30 }
  0x46   : > { %923 = vmatpush3.bf16.msra.mxu0 %v1031_v32 }
  0x48   : > { %961 = vmatpush3.bf16.msra.mxu1 %v1032_v30 }
  0x49   : > { %602 = vmatmul.mubr.bf16.vlgmr.msra.gmra.mrb[0].mxu0 %v1033_v34 }
  0x4a   : > { %609 = vmatprep.mubr.bf16.mxu0 %v863_v35 }
  0x4b   : > { %963 = vmatmul.mubr.bf16.vlgmr.msra.gmra.mrb[0].mxu1 %v1037_v36 }
  0x51   : > { %610 = vmatmul.mubr.bf16.gmra.mrb[4].mxu0 %v862_v37 }
 0x11c   : > { %v924_v38 = vpop.f32.mrb[0].mxu0 }
 0x11d   : > { %v925_v39 = vpop.f32.mrb[1].mxu0 }
 0x11e   : > { %v926_v40 = vadd.f32 %v925_v39, %v924_v38  ;;  %v927_v41 = vpop.f32.mrb[2].mxu0  ;;  %v964_v42 = vpop.f32.mrb[0].mxu1 }
 0x11f   : > { %v928_v43 = vpop.f32.mrb[3].mxu0  ;;  %v651_v45 = vpop.f32.mrb[1].mxu1 }
 0x120   : > { %v929_v46 = vadd.f32 %v928_v43, %v927_v41  ;;  %v652_v47 = vadd.f32 %v926_v40, %v651_v45  ;;  %v965_v48 = vpop.f32.mrb[2].mxu1 }
 0x121   : > { %v654_v50 = vpop.f32.mrb[3].mxu1 }
 0x122   : > { %v665_v51 = vadd.f32 %v652_v47, %v341_v44  ;;  %v655_v52 = vadd.f32 %v929_v46, %v654_v50 }
 0x124   : > { %668 = vst [vmem:[#allocation2] sm:$0xff] %v665_v51  ;;  %v666_v53 = vadd.f32 %v655_v52, %v342_v49  ;;  %v930_v54 = vpop.f32.mrb[4].mxu0 }
 0x125   : > { %v931_v55 = vpop.f32.mrb[5].mxu0 }
 0x126   : > { %669 = vst [vmem:[#allocation2 + $0x8] sm:$0xff] %v666_v53  ;;  %v932_v56 = vadd.f32 %v931_v55, %v930_v54  ;;  %v933_v57 = vpop.f32.mrb[6].mxu0  ;;  %674 = sbr.rel (%p889_p11) target bundleno = 317 (0x13d), region = 70 }
 0x127   : > { %v934_v59 = vpop.f32.mrb[7].mxu0 }
 0x128   : > { %v660_v60 = vadd.f32 %v964_v42, %v932_v56 }
 0x12a   : > { %v667_v61 = vadd.f32 %v660_v60, %v343_v58 }
 0x12b   : > { %v675_v62 = vld [vmem:[#allocation2] sm:$0xff] (!%p889_p11) }
 0x12c   : > { %670 = vst [vmem:[#allocation2 + $0x10] sm:$0xff] %v667_v61  ;;  %v685_v1 = vmul.f32 (!%p889_p11), %v890_v0, %v675_v62 }
 0x12d   : > { %v676_v63 = vld [vmem:[#allocation2 + $0x8] sm:$0xff] }
 0x12e   : > { %v686_v2 = vmul.f32 %v890_v0, %v676_v63  ;;  %v695_v6 = vadd.f32 %v891_v3, %v685_v1 }
 0x130   : > { %v696_v7 = vadd.f32 %v891_v3, %v686_v2  ;;  %v698_v9 = vmax.f32 %v695_v6, 0.0 }
 0x132   : > { %v699_v10 = vmax.f32 %v696_v7, 0.0 }
 0x133   : > { %v677_v4 = vld [vmem:[#allocation2 + $0x10] sm:$0xff] }
 0x134   : > { %v687_v5 = vmul.f32 %v890_v0, %v677_v4  ;;  %v906_v12 = vpack.c.bf16 %v699_v10, %v698_v9 }
 0x136   : > { %v697_v8 = vadd.f32 %v891_v3, %v687_v5  ;;  %907 = vst [vmem:[%s1222_s4] sm:$0xff] %v906_v12  }
 0x138   : > { %v700_v11 = vmax.f32 %v697_v8, 0.0 }
 0x13a   : > { %v902_v13 = vpack.c.bf16 %v700_v11, %v700_v11 }
 0x13c   : > { %716 = vst [vmem:[%s1222_s4 + $0x8] sm:$0xf] %v902_v13 }
 0x13d PF: > { %s14_s19 = sadd.s32 1, %s1078_s19   ;;  %s1223_s15 = smov %s1066_s16 }
 0x13e   : > { %p11_p12 = scmp.ge.s32.totalorder %s14_s19, 5   ;;  %s1224_s16 = smov %s1141_s23 }
 0x13f   : > { %s1225_s17 = smov %s1074_s18  ;;  %s1226_s18 = smov %s1228_s20 }
 0x140   :  { %13 = sbr.rel (!%p11_p12) target bundleno = 3 (0x3), region = 120 }

// kernel: deeplab_v2_forward.34
= control target key start
LH: loop header
LB: loop body
LE: loop exit
PB: predicated region body
PF: predicated region fallthrough
CT: control target
= control target key end

     0   :  { %s1384_s18 = smov 0   ;;  %s1386_s19 = smov 0   ;;  %s1601_s0 = inlined_call_operand.vmem [shape: bf16[24,256], index: 0, kind: input, shape index: {}]   ;;  %s1602_s1 = inlined_call_operand.vmem [shape: bf16[256,1024], index: 1, kind: input, shape index: {}]   ;;  %s1603_s2 = inlined_call_operand.vmem [shape: f32[1,1024], index: 2, kind: input, shape index: {}]   ;;  %s1604_s3 = inlined_call_operand.vmem [shape: f32[1,1024], index: 3, kind: input, shape index: {}]   ;;  %s1605_s4 = inlined_call_operand.vmem [shape: bf16[24,1024], index: 4, kind: input, shape index: {}]   ;;  %s1606_s5 = inlined_call_operand.vmem [shape: bf16[24,1024], index: 5, kind: output, shape index: {}]  }
   0x1   :  { %s1388_s20 = smov 0   ;;  %s1390_s21 = smov 0  }
   0x2   :  { %s1392_s22 = smov 0  }
   0x3 LB: > { %s30_s23 = sadd.s32 1, %s1348_s21  ;;  %s1124_s24 = sadd.s32 4294967295, %s1352_s22   ;;  %s1352_s22 = sphi %s1392_s22, %s15_s22   ;;  %s1348_s21 = sphi %s1390_s21, %s1612_s21   ;;  %s1344_s20 = sphi %s1388_s20, %s1611_s20   ;;  %s1340_s19 = sphi %s1386_s19, %s1610_s19   ;;  %s1336_s18 = sphi %s1384_s18, %s1609_s18  }
   0x4   : > { %p32_p0 = scmp.ge.s32.totalorder %s30_s23, 4  ;;  %p78_p1 = scmp.ne.s32.totalorder %s1340_s19, %s1336_s18 }
   0x5   : > { %p79_p2 = scmp.eq.s32.totalorder %s1352_s22, 0  ;;  %p190_p4 = scmp.eq.s32.totalorder %s1124_s24, 3 }
   0x6   : > { %s1614_s23 = smov (%p32_p0, %s30_s23), 0  ;;  %s71_s27 = sadd.s32 1, %s1340_s19 }
   0x7   : > { %p1416_p3 = por %p79_p2, %p78_p1  ;;  %s67_s26 = ssub.s32 %s1348_s21, %s1614_s23 }
   0x8   : > { %p69_p5 = scmp.eq.s32.totalorder %s67_s26, 0  ;;  %p1423_p6 = por %p190_p4, %p78_p1 }
   0x9   : > { %p1128_p7 = scmp.ge.s32.totalorder %s1352_s22, 4 }
   0xa   : > { %s1428_s29 = scalar_select %p69_p5, %s1340_s19, %s71_s27  }
   0xb   : > { %227 = sbr.rel (%p1128_p7) target bundleno = 61 (0x3d), region = 20 }
  0x12   : > { %230 = sbr.rel (!%p1416_p3) target bundleno = 54 (0x36), region = 24  ;;  %s232_s30 = sand.u32 (%p1416_p3), 1, %s1340_s19  }
  0x13   : > { %s1181_s6 = sshll.u32 (%p1416_p3), %s1348_s21, 3  ;;  %s1129_s7 = sshll.u32 (%p1416_p3), %s232_s30, 8 }
  0x14   : > { %s1438_s10 = scalar_lea.vmem (%p1416_p3), %s1602_s1, %s1181_s6  ;;  %s1443_s11 = scalar_lea.vmem (%p1416_p3), [#allocation3], %s1129_s7 }
  0x15   : > { %v330_v0 = vld [vmem:[%s1438_s10] sm:$0xff] (%p1416_p3) }
  0x16   : > { %v332_v1 = vld [vmem:[%s1438_s10 + $0x20] sm:$0xff] (%p1416_p3)  ;;  %331 = vst [vmem:[%s1443_s11] sm:$0xff] (%p1416_p3), %v330_v0 }
  0x17   : > { %v334_v2 = vld [vmem:[%s1438_s10 + $0x40] sm:$0xff] (%p1416_p3)  ;;  %333 = vst [vmem:[%s1443_s11 + $0x8] sm:$0xff] (%p1416_p3), %v332_v1 }
  0x18   : > { %335 = vst [vmem:[%s1443_s11 + $0x10] sm:$0xff] (%p1416_p3), %v334_v2  ;;  %v336_v3 = vld [vmem:[%s1438_s10 + $0x60] sm:$0xff] (%p1416_p3) }
  0x19   : > { %v338_v4 = vld [vmem:[%s1438_s10 + $0x80] sm:$0xff]  ;;  %337 = vst [vmem:[%s1443_s11 + $0x18] sm:$0xff] %v336_v3 }
  0x1a   : > { %v340_v5 = vld [vmem:[%s1438_s10 + $0xa0] sm:$0xff]  ;;  %339 = vst [vmem:[%s1443_s11 + $0x20] sm:$0xff] %v338_v4 }
  0x1b   : > { %341 = vst [vmem:[%s1443_s11 + $0x28] sm:$0xff] %v340_v5  ;;  %v342_v6 = vld [vmem:[%s1438_s10 + $0xc0] sm:$0xff] }
  0x1c   : > { %v344_v7 = vld [vmem:[%s1438_s10 + $0xe0] sm:$0xff]  ;;  %343 = vst [vmem:[%s1443_s11 + $0x30] sm:$0xff] %v342_v6 }
  0x1d   : > { %v346_v8 = vld [vmem:[%s1438_s10 + $0x100] sm:$0xff]  ;;  %345 = vst [vmem:[%s1443_s11 + $0x38] sm:$0xff] %v344_v7 }
  0x1e   : > { %347 = vst [vmem:[%s1443_s11 + $0x40] sm:$0xff] %v346_v8  ;;  %v348_v9 = vld [vmem:[%s1438_s10 + $0x120] sm:$0xff] }
  0x1f   : > { %v350_v10 = vld [vmem:[%s1438_s10 + $0x140] sm:$0xff]  ;;  %349 = vst [vmem:[%s1443_s11 + $0x48] sm:$0xff] %v348_v9 }
  0x20   : > { %v352_v11 = vld [vmem:[%s1438_s10 + $0x160] sm:$0xff]  ;;  %351 = vst [vmem:[%s1443_s11 + $0x50] sm:$0xff] %v350_v10 }
  0x21   : > { %353 = vst [vmem:[%s1443_s11 + $0x58] sm:$0xff] %v352_v11  ;;  %v354_v12 = vld [vmem:[%s1438_s10 + $0x180] sm:$0xff] }
  0x22   : > { %v356_v13 = vld [vmem:[%s1438_s10 + $0x1a0] sm:$0xff]  ;;  %355 = vst [vmem:[%s1443_s11 + $0x60] sm:$0xff] %v354_v12 }
  0x23   : > { %v358_v14 = vld [vmem:[%s1438_s10 + $0x1c0] sm:$0xff]  ;;  %357 = vst [vmem:[%s1443_s11 + $0x68] sm:$0xff] %v356_v13 }
  0x24   : > { %359 = vst [vmem:[%s1443_s11 + $0x70] sm:$0xff] %v358_v14  ;;  %v360_v15 = vld [vmem:[%s1438_s10 + $0x1e0] sm:$0xff] }
  0x25   : > { %v362_v16 = vld [vmem:[%s1438_s10 + $0x200] sm:$0xff]  ;;  %361 = vst [vmem:[%s1443_s11 + $0x78] sm:$0xff] %v360_v15 }
  0x26   : > { %v364_v17 = vld [vmem:[%s1438_s10 + $0x220] sm:$0xff]  ;;  %363 = vst [vmem:[%s1443_s11 + $0x80] sm:$0xff] %v362_v16 }
  0x27   : > { %365 = vst [vmem:[%s1443_s11 + $0x88] sm:$0xff] %v364_v17  ;;  %v366_v18 = vld [vmem:[%s1438_s10 + $0x240] sm:$0xff] }
  0x28   : > { %v368_v19 = vld [vmem:[%s1438_s10 + $0x260] sm:$0xff]  ;;  %367 = vst [vmem:[%s1443_s11 + $0x90] sm:$0xff] %v366_v18 }
  0x29   : > { %v370_v20 = vld [vmem:[%s1438_s10 + $0x280] sm:$0xff]  ;;  %369 = vst [vmem:[%s1443_s11 + $0x98] sm:$0xff] %v368_v19 }
  0x2a   : > { %371 = vst [vmem:[%s1443_s11 + $0xa0] sm:$0xff] %v370_v20  ;;  %v372_v21 = vld [vmem:[%s1438_s10 + $0x2a0] sm:$0xff] }
  0x2b   : > { %v374_v22 = vld [vmem:[%s1438_s10 + $0x2c0] sm:$0xff]  ;;  %373 = vst [vmem:[%s1443_s11 + $0xa8] sm:$0xff] %v372_v21 }
  0x2c   : > { %v376_v23 = vld [vmem:[%s1438_s10 + $0x2e0] sm:$0xff]  ;;  %375 = vst [vmem:[%s1443_s11 + $0xb0] sm:$0xff] %v374_v22 }
  0x2d   : > { %377 = vst [vmem:[%s1443_s11 + $0xb8] sm:$0xff] %v376_v23  ;;  %v378_v24 = vld [vmem:[%s1438_s10 + $0x300] sm:$0xff] }
  0x2e   : > { %v380_v25 = vld [vmem:[%s1438_s10 + $0x320] sm:$0xff]  ;;  %379 = vst [vmem:[%s1443_s11 + $0xc0] sm:$0xff] %v378_v24 }
  0x2f   : > { %v382_v26 = vld [vmem:[%s1438_s10 + $0x340] sm:$0xff]  ;;  %381 = vst [vmem:[%s1443_s11 + $0xc8] sm:$0xff] %v380_v25 }
  0x30   : > { %383 = vst [vmem:[%s1443_s11 + $0xd0] sm:$0xff] %v382_v26  ;;  %v384_v27 = vld [vmem:[%s1438_s10 + $0x360] sm:$0xff] }
  0x31   : > { %v386_v28 = vld [vmem:[%s1438_s10 + $0x380] sm:$0xff]  ;;  %385 = vst [vmem:[%s1443_s11 + $0xd8] sm:$0xff] %v384_v27 }
  0x32   : > { %v388_v29 = vld [vmem:[%s1438_s10 + $0x3a0] sm:$0xff]  ;;  %387 = vst [vmem:[%s1443_s11 + $0xe0] sm:$0xff] %v386_v28 }
  0x33   : > { %389 = vst [vmem:[%s1443_s11 + $0xe8] sm:$0xff] %v388_v29  ;;  %v390_v30 = vld [vmem:[%s1438_s10 + $0x3c0] sm:$0xff] }
  0x34   : > { %v392_v31 = vld [vmem:[%s1438_s10 + $0x3e0] sm:$0xff]  ;;  %391 = vst [vmem:[%s1443_s11 + $0xf0] sm:$0xff] %v390_v30 }
  0x35   : > { %393 = vst [vmem:[%s1443_s11 + $0xf8] sm:$0xff] %v392_v31 }
  0x36 PF: > { %415 = sbr.rel (!%p1416_p3) target bundleno = 61 (0x3d), region = 70  ;;  %s417_s12 = sand.u32 (%p1416_p3), 1, %s1340_s19  }
  0x37   : > { %s1182_s13 = sshll.u32 (%p1416_p3), %s1348_s21, 3  ;;  %s1219_s14 = smul.u32 (%p1416_p3), 24, %s417_s12 }
  0x38   : > { %s425_s17 = scalar_lea.vmem (%p1416_p3), %s1605_s4, %s1182_s13 }
  0x39   : > { %v457_v32 = vld [vmem:[%s425_s17] sm:$0xff] (%p1416_p3)  ;;  %s419_s24 = scalar_lea.vmem (%p1416_p3), [#allocation4], %s1219_s14 }
  0x3a   : > { %v459_v33 = vld [vmem:[%s425_s17 + $0x20] sm:$0xff] (%p1416_p3)  ;;  %458 = vst [vmem:[%s419_s24] sm:$0xff] (%p1416_p3), %v457_v32 }
  0x3b   : > { %v461_v34 = vld [vmem:[%s425_s17 + $0x40] sm:$0xff] (%p1416_p3)  ;;  %460 = vst [vmem:[%s419_s24 + $0x8] sm:$0xff] (%p1416_p3), %v459_v33 }
  0x3c   : > { %462 = vst [vmem:[%s419_s24 + $0x10] sm:$0xff] (%p1416_p3), %v461_v34 }
  0x3d PF: > { %p1134_p8 = scmp.ge.s32.totalorder %s1352_s22, 1  ;;  %p467_p9 = scmp.lt.s32.totalorder %s1352_s22, 5 }
  0x3f   : > { %p468_p10 = pnand %p1134_p8, %p467_p9 }
  0x40   : > { %s474_s25 = sand.u32 (!%p468_p10), 1, %s1336_s18   ;;  %v1311_v35 = vld [vmem:[%s1601_s0 + $0x4] ss:$8 sps:$4 sm:$0xff] (!%p468_p10)   ;;  %v1524_v36 = vld [vmem:[%s1601_s0 + $0x10] sm:$0xff] (!%p468_p10)  ;;  %v1309_v6 = vld [vmem:[%s1601_s0] ss:$8 sps:$4 sm:$0xff] (!%p468_p10)   ;;  %v859_v8 = vlaneseq (!%p468_p10) }
  0x41   : > { %471 = sbr.rel (%p468_p10) target bundleno = 366 (0x16e), region = 108  ;;  %s1135_s26 = sshll.u32 (!%p468_p10), %s474_s25, 8  ;;  %v1141_v37 = vcombine.high (!%p468_p10), %v1524_v36, %v1524_v36  ;;  %817 = vmatprep.mubr.bf16.mxu0 (!%p468_p10), %v1311_v35  ;;  %v1140_v7 = vcombine.low (!%p468_p10), %v1524_v36, %v1524_v36 }
  0x42   : > { %s1528_s8 = scalar_lea.vmem (!%p468_p10), [#allocation3], %s1135_s26  ;;  %s1136_s11 = sshll.u32 (!%p468_p10), %s1344_s20, 1  ;;  %v860_v9 = vshrl.u32 (!%p468_p10), %v859_v8, 7 }
  0x43   : > { %v1261_v38 = vld [vmem:[%s1528_s8 + $0x4] ss:$8 sps:$4 sm:$0xff] (!%p468_p10)   ;;  %v1263_v39 = vld [vmem:[%s1528_s8] ss:$8 sps:$4 sm:$0xff] (!%p468_p10)   ;;  %827 = vmatprep.mubr.bf16.mxu1 (!%p468_p10), %v1141_v37  ;;  %v1264_v40 = vld [vmem:[%s1528_s8 + $0x14] ss:$8 sps:$4 sm:$0xff] (!%p468_p10)  }
  0x44   : > { %785 = vmatprep.subr.bf16.mxu0 (!%p468_p10), %v1261_v38  ;;  %1187 = vmatprep.subr.bf16.mxu1 (!%p468_p10), %v1261_v38  ;;  %v1266_v41 = vld [vmem:[%s1528_s8 + $0x10] ss:$8 sps:$4 sm:$0xff] (!%p468_p10)   ;;  %v1267_v42 = vld [vmem:[%s1528_s8 + $0x24] ss:$8 sps:$4 sm:$0xff] (!%p468_p10)   ;;  %v1269_v43 = vld [vmem:[%s1528_s8 + $0x20] ss:$8 sps:$4 sm:$0xff] (!%p468_p10)  }
  0x45   : > { %786 = vmatpush1.bf16.msra.mxu0 (!%p468_p10), %v1263_v39  ;;  %1203 = vmatpush1.bf16.msra.mxu1 (!%p468_p10), %v1263_v39  ;;  %v1270_v44 = vld [vmem:[%s1528_s8 + $0x34] ss:$8 sps:$4 sm:$0xff] (!%p468_p10)   ;;  %v1272_v45 = vld [vmem:[%s1528_s8 + $0x30] ss:$8 sps:$4 sm:$0xff] (!%p468_p10)   ;;  %v1273_v46 = vld [vmem:[%s1528_s8 + $0x44] ss:$8 sps:$4 sm:$0xff] (!%p468_p10)  }
  0x46   : > { %787 = vmatprep.subr.bf16.mxu0 (!%p468_p10), %v1264_v40  ;;  %1188 = vmatprep.subr.bf16.mxu1 (!%p468_p10), %v1264_v40  ;;  %v1275_v47 = vld [vmem:[%s1528_s8 + $0x40] ss:$8 sps:$4 sm:$0xff] (!%p468_p10)   ;;  %v1276_v48 = vld [vmem:[%s1528_s8 + $0x54] ss:$8 sps:$4 sm:$0xff] (!%p468_p10)   ;;  %v1278_v49 = vld [vmem:[%s1528_s8 + $0x50] ss:$8 sps:$4 sm:$0xff] (!%p468_p10)  }
  0x47   : > { %v1279_v50 = vld [vmem:[%s1528_s8 + $0x64] ss:$8 sps:$4 sm:$0xff] (!%p468_p10)   ;;  %v1281_v51 = vld [vmem:[%s1528_s8 + $0x60] ss:$8 sps:$4 sm:$0xff] (!%p468_p10)   ;;  %v1282_v52 = vld [vmem:[%s1528_s8 + $0x74] ss:$8 sps:$4 sm:$0xff] (!%p468_p10)  }
  0x48   : > { %v1284_v53 = vld [vmem:[%s1528_s8 + $0x70] ss:$8 sps:$4 sm:$0xff]   ;;  %v1285_v54 = vld [vmem:[%s1528_s8 + $0x84] ss:$8 sps:$4 sm:$0xff]   ;;  %v1287_v55 = vld [vmem:[%s1528_s8 + $0x80] ss:$8 sps:$4 sm:$0xff]  }
  0x49   : > { %788 = vmatpush1.bf16.msra.mxu0 %v1266_v41  ;;  %1204 = vmatpush1.bf16.msra.mxu1 %v1266_v41  ;;  %v1288_v56 = vld [vmem:[%s1528_s8 + $0x94] ss:$8 sps:$4 sm:$0xff]   ;;  %v1290_v57 = vld [vmem:[%s1528_s8 + $0x90] ss:$8 sps:$4 sm:$0xff]   ;;  %v1291_v58 = vld [vmem:[%s1528_s8 + $0xa4] ss:$8 sps:$4 sm:$0xff]  }
  0x4a   : > { %789 = vmatprep.subr.bf16.mxu0 %v1267_v42  ;;  %1189 = vmatprep.subr.bf16.mxu1 %v1267_v42  ;;  %v1293_v59 = vld [vmem:[%s1528_s8 + $0xa0] ss:$8 sps:$4 sm:$0xff]   ;;  %v1294_v60 = vld [vmem:[%s1528_s8 + $0xb4] ss:$8 sps:$4 sm:$0xff]   ;;  %v1296_v61 = vld [vmem:[%s1528_s8 + $0xb0] ss:$8 sps:$4 sm:$0xff]  }
  0x4b   : > { %v1297_v62 = vld [vmem:[%s1528_s8 + $0xc4] ss:$8 sps:$4 sm:$0xff]   ;;  %v1299_v63 = vld [vmem:[%s1528_s8 + $0xc0] ss:$8 sps:$4 sm:$0xff]   ;;  %v1300_v0 = vld [vmem:[%s1528_s8 + $0xd4] ss:$8 sps:$4 sm:$0xff]  }
  0x4c   : > { %v1302_v1 = vld [vmem:[%s1528_s8 + $0xd0] ss:$8 sps:$4 sm:$0xff]   ;;  %v1303_v2 = vld [vmem:[%s1528_s8 + $0xe4] ss:$8 sps:$4 sm:$0xff]   ;;  %v1305_v3 = vld [vmem:[%s1528_s8 + $0xe0] ss:$8 sps:$4 sm:$0xff]  }
  0x4d   : > { %790 = vmatpush1.bf16.msra.mxu0 %v1269_v43  ;;  %1205 = vmatpush1.bf16.msra.mxu1 %v1269_v43  ;;  %v1306_v4 = vld [vmem:[%s1528_s8 + $0xf4] ss:$8 sps:$4 sm:$0xff]   ;;  %v1308_v5 = vld [vmem:[%s1528_s8 + $0xf0] ss:$8 sps:$4 sm:$0xff]   ;;  %p544_p11 = scmp.lt.s32.totalorder %s1136_s11, 7  ;;  %s1570_s12 = smul.u32 24, %s474_s25 }
  0x4e   : > { %791 = vmatprep.subr.bf16.mxu0 %v1270_v44  ;;  %1190 = vmatprep.subr.bf16.mxu1 %v1270_v44  ;;  %v861_v10 = vsub.s32 0, %v860_v9  ;;  %v865_v12 = vsub.s32 1, %v860_v9  ;;  %s1186_s25 = sshll.u32 (%p1423_p6), %s1344_s20, 3 }
  0x4f   : > { %s1616_s11 = smov (!%p544_p11, %s1136_s11), 7  ;;  %s483_s26 = scalar_lea.vmem [#allocation4], %s1570_s12 }
  0x50   : > { %s546_s15 = scalar_lea.vmem %s1603_s2, %s1616_s11  ;;  %s551_s24 = scalar_lea.vmem %s1604_s3, %s1616_s11  ;;  %v893_v15 = vld [vmem:[%s483_s26] sm:$0xff]  ;;  %v895_v16 = vld [vmem:[%s483_s26 + $0x10] sm:$0xff]  ;;  %v894_v22 = vld [vmem:[%s483_s26 + $0x8] sm:$0xff] }
  0x51   : > { %792 = vmatpush1.bf16.msra.mxu0 %v1272_v45  ;;  %1206 = vmatpush1.bf16.msra.mxu1 %v1272_v45  ;;  %v857_v11 = vld [vmem:[%s546_s15] sm:$0x3]  ;;  %v896_v24 = vunpack.c.l.bf16 %v893_v15  ;;  %v900_v26 = vunpack.c.l.bf16 %v895_v16  ;;  %v897_v30 = vunpack.c.h.bf16 %v893_v15  ;;  %v901_v32 = vunpack.c.h.bf16 %v895_v16  ;;  %s528_s18 = scalar_lea.vmem [#allocation5], %s1570_s12  ;;  %s949_s6 = scalar_lea.vmem (%p1423_p6), %s1606_s5, %s1186_s25 }
  0x52   : > { %793 = vmatprep.subr.bf16.mxu0 %v1273_v46  ;;  %1191 = vmatprep.subr.bf16.mxu1 %v1273_v46  ;;  %v875_v13 = vld [vmem:[%s551_s24] sm:$0x3]  ;;  %v862_v14 = vrot.slane %v857_v11, %v861_v10  ;;  %v866_v17 = vrot.slane %v857_v11, %v865_v12  ;;  %v898_v38 = vunpack.c.l.bf16 %v894_v22  ;;  %v899_v44 = vunpack.c.h.bf16 %v894_v22 }
  0x53   : > { %v880_v18 = vrot.slane %v875_v13, %v861_v10  ;;  %v884_v21 = vrot.slane %v875_v13, %v865_v12 }
  0x55   : > { %794 = vmatpush1.bf16.msra.mxu0 %v1275_v47  ;;  %1207 = vmatpush1.bf16.msra.mxu1 %v1275_v47 }
  0x56   : > { %795 = vmatprep.subr.bf16.mxu0 %v1276_v48  ;;  %1192 = vmatprep.subr.bf16.mxu1 %v1276_v48 }
  0x59   : > { %796 = vmatpush1.bf16.msra.mxu0 %v1278_v49  ;;  %1208 = vmatpush1.bf16.msra.mxu1 %v1278_v49 }
  0x5a   : > { %797 = vmatprep.subr.bf16.mxu0 %v1279_v50  ;;  %1193 = vmatprep.subr.bf16.mxu1 %v1279_v50 }
  0x5d   : > { %798 = vmatpush1.bf16.msra.mxu0 %v1281_v51  ;;  %1209 = vmatpush1.bf16.msra.mxu1 %v1281_v51 }
  0x5e   : > { %799 = vmatprep.subr.bf16.mxu0 %v1282_v52  ;;  %1194 = vmatprep.subr.bf16.mxu1 %v1282_v52 }
  0x61   : > { %800 = vmatpush1.bf16.msra.mxu0 %v1284_v53  ;;  %1210 = vmatpush1.bf16.msra.mxu1 %v1284_v53 }
  0x62   : > { %801 = vmatprep.subr.bf16.mxu0 %v1285_v54  ;;  %1195 = vmatprep.subr.bf16.mxu1 %v1285_v54 }
  0x65   : > { %802 = vmatpush1.bf16.msra.mxu0 %v1287_v55  ;;  %1211 = vmatpush1.bf16.msra.mxu1 %v1287_v55 }
  0x66   : > { %803 = vmatprep.subr.bf16.mxu0 %v1288_v56  ;;  %1196 = vmatprep.subr.bf16.mxu1 %v1288_v56 }
  0x69   : > { %804 = vmatpush1.bf16.msra.mxu0 %v1290_v57  ;;  %1212 = vmatpush1.bf16.msra.mxu1 %v1290_v57 }
  0x6a   : > { %805 = vmatprep.subr.bf16.mxu0 %v1291_v58  ;;  %1197 = vmatprep.subr.bf16.mxu1 %v1291_v58 }
  0x6d   : > { %806 = vmatpush1.bf16.msra.mxu0 %v1293_v59  ;;  %1213 = vmatpush1.bf16.msra.mxu1 %v1293_v59 }
  0x6e   : > { %807 = vmatprep.subr.bf16.mxu0 %v1294_v60  ;;  %1198 = vmatprep.subr.bf16.mxu1 %v1294_v60 }
  0x71   : > { %808 = vmatpush1.bf16.msra.mxu0 %v1296_v61  ;;  %1214 = vmatpush1.bf16.msra.mxu1 %v1296_v61 }
  0x72   : > { %809 = vmatprep.subr.bf16.mxu0 %v1297_v62  ;;  %1199 = vmatprep.subr.bf16.mxu1 %v1297_v62 }
  0x75   : > { %810 = vmatpush1.bf16.msra.mxu0 %v1299_v63  ;;  %1215 = vmatpush1.bf16.msra.mxu1 %v1299_v63 }
  0x76   : > { %811 = vmatprep.subr.bf16.mxu0 %v1300_v0  ;;  %1200 = vmatprep.subr.bf16.mxu1 %v1300_v0 }
  0x79   : > { %812 = vmatpush1.bf16.msra.mxu0 %v1302_v1  ;;  %1216 = vmatpush1.bf16.msra.mxu1 %v1302_v1 }
  0x7a   : > { %813 = vmatprep.subr.bf16.mxu0 %v1303_v2  ;;  %1201 = vmatprep.subr.bf16.mxu1 %v1303_v2 }
  0x7d   : > { %814 = vmatpush1.bf16.msra.mxu0 %v1305_v3  ;;  %1217 = vmatpush1.bf16.msra.mxu1 %v1305_v3 }
  0x7e   : > { %815 = vmatprep.subr.bf16.mxu0 %v1306_v4  ;;  %1202 = vmatprep.subr.bf16.mxu1 %v1306_v4 }
  0x81   : > { %816 = vmatpush1.bf16.msra.mxu0 %v1308_v5  ;;  %1218 = vmatpush1.bf16.msra.mxu1 %v1308_v5 }
  0x84   : > { %818 = vmatmul.mubr.bf16.vlgmr.msra.gmra.mrb[0].mxu0 %v1309_v6  ;;  %828 = vmatmul.mubr.bf16.vlgmr.msra.gmra.mrb[0].mxu1 %v1140_v7 }
 0x157   : > { %v819_v19 = vpop.f32.mrb[0].mxu0  ;;  %v829_v20 = vpop.f32.mrb[0].mxu1 }
 0x158   : > { %v869_v23 = vmul.f32 %v862_v14, %v819_v19  ;;  %v873_v25 = vmul.f32 %v862_v14, %v829_v20  ;;  %v821_v27 = vpop.f32.mrb[1].mxu0  ;;  %v831_v28 = vpop.f32.mrb[1].mxu1 }
 0x159   : > { %v870_v29 = vmul.f32 %v866_v17, %v821_v27  ;;  %v874_v31 = vmul.f32 %v866_v17, %v831_v28  ;;  %v823_v33 = vpop.f32.mrb[2].mxu0  ;;  %v833_v34 = vpop.f32.mrb[2].mxu1 }
 0x15a   : > { %v887_v35 = vadd.f32 %v880_v18, %v869_v23  ;;  %v891_v36 = vadd.f32 %v880_v18, %v873_v25  ;;  %v871_v37 = vmul.f32 %v862_v14, %v823_v33  ;;  %v825_v39 = vpop.f32.mrb[3].mxu0  ;;  %v834_v40 = vpop.f32.mrb[3].mxu1 }
 0x15b   : > { %v888_v41 = vadd.f32 %v884_v21, %v870_v29  ;;  %v892_v42 = vadd.f32 %v884_v21, %v874_v31  ;;  %v872_v43 = vmul.f32 %v866_v17, %v825_v39 }
 0x15c   : > { %v902_v45 = vadd.f32 %v896_v24, %v887_v35  ;;  %v906_v46 = vadd.f32 %v900_v26, %v891_v36  ;;  %v889_v47 = vadd.f32 %v880_v18, %v871_v37 }
 0x15d   : > { %v903_v48 = vadd.f32 %v897_v30, %v888_v41  ;;  %v907_v49 = vadd.f32 %v901_v32, %v892_v42  ;;  %v890_v50 = vadd.f32 %v884_v21, %v872_v43 }
 0x15e   : > { %v908_v51 = vmax.f32 %v902_v45, 0.0  ;;  %v912_v52 = vmax.f32 %v906_v46, 0.0  ;;  %v904_v53 = vadd.f32 %v898_v38, %v889_v47 }
 0x15f   : > { %v909_v54 = vmax.f32 %v903_v48, 0.0  ;;  %v913_v55 = vmax.f32 %v907_v49, 0.0  ;;  %v905_v56 = vadd.f32 %v899_v44, %v890_v50  ;;  %943 = sbr.rel (!%p1423_p6) target bundleno = 366 (0x16e), region = 128 }
 0x160   : > { %v910_v57 = vmax.f32 %v904_v53, 0.0 }
 0x161   : > { %v1183_v58 = vpack.c.bf16 %v909_v54, %v908_v51  ;;  %v1185_v59 = vpack.c.bf16 %v913_v55, %v912_v52  ;;  %v911_v60 = vmax.f32 %v905_v56, 0.0 }
 0x163   : > { %934 = vst [vmem:[%s528_s18] sm:$0xff] %v1183_v58  ;;  %936 = vst [vmem:[%s528_s18 + $0x10] sm:$0xff] %v1185_v59  ;;  %v1184_v61 = vpack.c.bf16 %v911_v60, %v910_v57 }
 0x165   : > { %935 = vst [vmem:[%s528_s18 + $0x8] sm:$0xff] %v1184_v61 }
 0x16a   : > { %v981_v62 = vld [vmem:[%s528_s18] sm:$0xff]  ;;  %v985_v0 = vld [vmem:[%s528_s18 + $0x10] sm:$0xff] }
 0x16b   : > { %982 = vst [vmem:[%s949_s6] sm:$0xff] %v981_v62  ;;  %986 = vst [vmem:[%s949_s6 + $0x40] sm:$0xff] %v985_v0 }
 0x16c   : > { %v983_v63 = vld [vmem:[%s528_s18 + $0x8] sm:$0xff] }
 0x16d   : > { %984 = vst [vmem:[%s949_s6 + $0x20] sm:$0xff] %v983_v63 }
 0x16e PF: > { %s15_s22 = sadd.s32 1, %s1352_s22   ;;  %s1609_s18 = smov %s1340_s19 }
 0x16f   : > { %p12_p12 = scmp.ge.s32.totalorder %s15_s22, 6   ;;  %s1610_s19 = smov %s1428_s29 }
 0x170   : > { %s1611_s20 = smov %s1348_s21  ;;  %s1612_s21 = smov %s1614_s23 }
 0x171   :  { %14 = sbr.rel (!%p12_p12) target bundleno = 3 (0x3), region = 214 }

// kernel: deeplab_v2_forward.33
= control target key start
LH: loop header
LB: loop body
LE: loop exit
PB: predicated region body
PF: predicated region fallthrough
CT: control target
= control target key end

     0   :  { %s1299_s15 = smov 0   ;;  %s1301_s16 = smov 0   ;;  %s1440_s0 = inlined_call_operand.vmem [shape: bf16[24,2304], index: 0, kind: input, shape index: {}]   ;;  %s1441_s1 = inlined_call_operand.vmem [shape: bf16[2304,256], index: 1, kind: input, shape index: {}]   ;;  %s1442_s2 = inlined_call_operand.vmem [shape: f32[1,256], index: 2, kind: input, shape index: {}]   ;;  %s1443_s3 = inlined_call_operand.vmem [shape: f32[1,256], index: 3, kind: input, shape index: {}]   ;;  %s1444_s4 = inlined_call_operand.vmem [shape: bf16[24,256], index: 4, kind: output, shape index: {}]  }
   0x1   :  { %s1303_s17 = smov 0   ;;  %s1305_s18 = smov 0  }
   0x2   :  { %s1307_s19 = smov 0  }
   0x3 LB: > { %s26_s20 = sadd.s32 1, %s1266_s18  ;;  %p49_p1 = scmp.ne.s32.totalorder %s1258_s16, %s1254_s15  ;;  %s1270_s19 = sphi %s1307_s19, %s14_s19   ;;  %s1266_s18 = sphi %s1305_s18, %s1448_s18   ;;  %s1262_s17 = sphi %s1303_s17, %s1447_s17   ;;  %s1258_s16 = sphi %s1301_s16, %s1446_s16   ;;  %s1254_s15 = sphi %s1299_s15, %s1445_s15  }
   0x4   : > { %p27_p0 = scmp.ge.s32.totalorder %s26_s20, 6  ;;  %p50_p2 = scmp.eq.s32.totalorder %s1270_s19, 0 }
   0x5   : > { %s42_s22 = sadd.s32 1, %s1258_s16  ;;  %p1026_p5 = scmp.ge.s32.totalorder %s1270_s19, 6 }
   0x6   : > { %s1450_s20 = smov (%p27_p0, %s26_s20), 0  ;;  %p51_p3 = por %p50_p2, %p49_p1 }
   0x7   : > { %s38_s21 = ssub.s32 %s1266_s18, %s1450_s20  ;;  %199 = sbr.rel (%p1026_p5) target bundleno = 22 (0x16), region = 24 }
   0x8   : > { %p40_p4 = scmp.eq.s32.totalorder %s38_s21, 0 }
   0xa   : > { %s1334_s23 = scalar_select %p40_p4, %s1258_s16, %s42_s22  }
   0xe   : > { %202 = sbr.rel (!%p51_p3) target bundleno = 22 (0x16), region = 28  ;;  %s204_s24 = sand.u32 (%p51_p3), 1, %s1258_s16  }
   0xf   : > { %s1100_s25 = smul.u32 (%p51_p3), 12, %s1266_s18 }
  0x10   : > { %s1109_s26 = smul.u32 (%p51_p3), 36, %s204_s24 }
  0x11   : > { %s212_s29 = scalar_lea.vmem (%p51_p3), %s1440_s0, %s1100_s25 }
  0x12   : > { %v227_v0 = vld [vmem:[%s212_s29] sm:$0xff] (%p51_p3)  ;;  %v229_v1 = vld [vmem:[%s212_s29 + $0x48] sm:$0xff] (%p51_p3)  ;;  %v231_v2 = vld [vmem:[%s212_s29 + $0x90] sm:$0xff] (%p51_p3)  ;;  %s206_s30 = scalar_lea.vmem (%p51_p3), [#allocation3], %s1109_s26 }
  0x13   : > { %228 = vst [vmem:[%s206_s30] sm:$0xff] (%p51_p3), %v227_v0  ;;  %230 = vst [vmem:[%s206_s30 + $0xc] sm:$0xff] (%p51_p3), %v229_v1  ;;  %v1028_v3 = vld [vmem:[%s212_s29 + $0x8] sm:$0xf] (%p51_p3)  ;;  %v1030_v4 = vld [vmem:[%s212_s29 + $0x50] sm:$0xf] (%p51_p3) }
  0x14   : > { %232 = vst [vmem:[%s206_s30 + $0x18] sm:$0xff] (%p51_p3), %v231_v2  ;;  %v1032_v5 = vld [vmem:[%s212_s29 + $0x98] sm:$0xf] (%p51_p3)  ;;  %1029 = vst [vmem:[%s206_s30 + $0x8] sm:$0xf] (%p51_p3), %v1028_v3 }
  0x15   : > { %1031 = vst [vmem:[%s206_s30 + $0x14] sm:$0xf] %v1030_v4  ;;  %1033 = vst [vmem:[%s206_s30 + $0x20] sm:$0xf] %v1032_v5 }
  0x16 PF: > { %p1034_p6 = scmp.ge.s32.totalorder %s1270_s19, 1  ;;  %p265_p7 = scmp.lt.s32.totalorder %s1270_s19, 7 }
  0x18   : > { %p266_p8 = pnand %p1034_p6, %p265_p7 }
  0x19   : > { %s272_s5 = sand.u32 (!%p266_p8), 1, %s1254_s15   ;;  %s322_s6 = smul.u32 (!%p266_p8), 48, %s1262_s17 }
  0x1a   : > { %269 = sbr.rel (%p266_p8) target bundleno = 347 (0x15b), region = 58  ;;  %p1037_p10 = scmp.ne.s32.totalorder (!%p266_p8), %s1262_s17, 0 }
  0x1b   : > { %s1110_s7 = smul.u32 (!%p266_p8), 36, %s272_s5  ;;  %p324_p9 = scmp.lt.s32.totalorder (!%p266_p8), %s322_s6, 287 }
  0x1d   : > { %s1351_s12 = scalar_lea.vmem (!%p266_p8), [#allocation3], %s1110_s7 }
  0x21   : > { %s1452_s6 = smov (!%p324_p9, %s322_s6), 287  ;;  %360 = sbr.rel (%p1037_p10) target bundleno = 40 (0x28), region = 66 }
  0x22   : > { %s1101_s8 = sshll.u32 %s1452_s6, 3  ;;  %v1272_v6 = vmov (!%p1037_p10), 0.0  }
  0x23   : > { %s1349_s11 = scalar_lea.vmem %s1441_s1, %s1101_s8  ;;  %361 = vst [vmem:[#allocation2] sm:$0xff] (!%p1037_p10), %v1272_v6  ;;  %362 = vst [vmem:[#allocation2 + $0x8] sm:$0xff] (!%p1037_p10), %v1272_v6 }
  0x24   : > { %363 = vst [vmem:[#allocation2 + $0x10] sm:$0xff] (!%p1037_p10), %v1272_v6  ;;  %364 = vst [vmem:[#allocation2 + $0x18] sm:$0xff] (!%p1037_p10), %v1272_v6 }
  0x25   : > { %365 = vst [vmem:[#allocation2 + $0x20] sm:$0xff] (!%p1037_p10), %v1272_v6  ;;  %366 = vst [vmem:[#allocation2 + $0x28] sm:$0xff] (!%p1037_p10), %v1272_v6 }
  0x28 PF: > { %v1153_v7 = vld [vmem:[%s1349_s11 + $0x4] ss:$8 sps:$4 sm:$0xff]   ;;  %v1155_v8 = vld [vmem:[%s1349_s11] ss:$8 sps:$4 sm:$0xff]   ;;  %v1273_v9 = vmov 0   ;;  %p1092_p11 = scmp.ne.s32.totalorder %s1262_s17, 5 }
  0x29   : > { %777 = vmatprep.mubr.bf16.mxu0 %v1273_v9  ;;  %694 = vmatprep.subr.bf16.mxu1 %v1153_v7  ;;  %v1156_v10 = vld [vmem:[%s1349_s11 + $0x14] ss:$8 sps:$4 sm:$0xff]   ;;  %v1158_v11 = vld [vmem:[%s1349_s11 + $0x10] ss:$8 sps:$4 sm:$0xff]   ;;  %v1159_v12 = vld [vmem:[%s1349_s11 + $0x24] ss:$8 sps:$4 sm:$0xff]  }
  0x2a   : > { %695 = vmatpush1.bf16.msra.mxu1 %v1155_v8  ;;  %v1161_v13 = vld [vmem:[%s1349_s11 + $0x20] ss:$8 sps:$4 sm:$0xff]   ;;  %v1162_v14 = vld [vmem:[%s1349_s11 + $0x34] ss:$8 sps:$4 sm:$0xff]   ;;  %v1164_v15 = vld [vmem:[%s1349_s11 + $0x30] ss:$8 sps:$4 sm:$0xff]  }
  0x2b   : > { %696 = vmatprep.subr.bf16.mxu1 %v1156_v10  ;;  %v1177_v16 = vld [vmem:[%s1349_s11 + $0x104] ss:$8 sps:$4 sm:$0xff]   ;;  %v1179_v17 = vld [vmem:[%s1349_s11 + $0x100] ss:$8 sps:$4 sm:$0xff]   ;;  %v1183_v19 = vld [vmem:[%s1349_s11 + $0x114] ss:$8 sps:$4 sm:$0xff]  }
  0x2c   : > { %v1165_v18 = vld [vmem:[%s1349_s11 + $0x44] ss:$8 sps:$4 sm:$0xff]   ;;  %745 = vmatprep.subr.bf16.mxu0 %v1177_v16  ;;  %v1185_v20 = vld [vmem:[%s1349_s11 + $0x110] ss:$8 sps:$4 sm:$0xff]   ;;  %v1167_v21 = vld [vmem:[%s1349_s11 + $0x40] ss:$8 sps:$4 sm:$0xff]  }
  0x2d   : > { %746 = vmatpush1.bf16.msra.mxu0 %v1179_v17  ;;  %v1168_v22 = vld [vmem:[%s1349_s11 + $0x54] ss:$8 sps:$4 sm:$0xff]   ;;  %v1189_v23 = vld [vmem:[%s1349_s11 + $0x124] ss:$8 sps:$4 sm:$0xff]   ;;  %v1191_v24 = vld [vmem:[%s1349_s11 + $0x120] ss:$8 sps:$4 sm:$0xff]  }
  0x2e   : > { %697 = vmatpush1.bf16.msra.mxu1 %v1158_v11  ;;  %747 = vmatprep.subr.bf16.mxu0 %v1183_v19  ;;  %v1170_v25 = vld [vmem:[%s1349_s11 + $0x50] ss:$8 sps:$4 sm:$0xff]   ;;  %v1195_v26 = vld [vmem:[%s1349_s11 + $0x134] ss:$8 sps:$4 sm:$0xff]   ;;  %v1171_v27 = vld [vmem:[%s1349_s11 + $0x64] ss:$8 sps:$4 sm:$0xff]  }
  0x2f   : > { %698 = vmatprep.subr.bf16.mxu1 %v1159_v12  ;;  %v1197_v28 = vld [vmem:[%s1349_s11 + $0x130] ss:$8 sps:$4 sm:$0xff]   ;;  %v1173_v29 = vld [vmem:[%s1349_s11 + $0x60] ss:$8 sps:$4 sm:$0xff]   ;;  %v1201_v30 = vld [vmem:[%s1349_s11 + $0x144] ss:$8 sps:$4 sm:$0xff]  }
  0x30   : > { %v1174_v31 = vld [vmem:[%s1349_s11 + $0x74] ss:$8 sps:$4 sm:$0xff]   ;;  %v1203_v32 = vld [vmem:[%s1349_s11 + $0x140] ss:$8 sps:$4 sm:$0xff]   ;;  %v1176_v33 = vld [vmem:[%s1349_s11 + $0x70] ss:$8 sps:$4 sm:$0xff]  }
  0x31   : > { %748 = vmatpush1.bf16.msra.mxu0 %v1185_v20  ;;  %v1207_v34 = vld [vmem:[%s1349_s11 + $0x154] ss:$8 sps:$4 sm:$0xff]   ;;  %v1180_v35 = vld [vmem:[%s1349_s11 + $0x84] ss:$8 sps:$4 sm:$0xff]   ;;  %v1209_v36 = vld [vmem:[%s1349_s11 + $0x150] ss:$8 sps:$4 sm:$0xff]  }
  0x32   : > { %699 = vmatpush1.bf16.msra.mxu1 %v1161_v13  ;;  %749 = vmatprep.subr.bf16.mxu0 %v1189_v23  ;;  %v1182_v37 = vld [vmem:[%s1349_s11 + $0x80] ss:$8 sps:$4 sm:$0xff]   ;;  %v1213_v38 = vld [vmem:[%s1349_s11 + $0x164] ss:$8 sps:$4 sm:$0xff]   ;;  %v1186_v39 = vld [vmem:[%s1349_s11 + $0x94] ss:$8 sps:$4 sm:$0xff]  }
  0x33   : > { %700 = vmatprep.subr.bf16.mxu1 %v1162_v14  ;;  %v1215_v40 = vld [vmem:[%s1349_s11 + $0x160] ss:$8 sps:$4 sm:$0xff]   ;;  %v1188_v42 = vld [vmem:[%s1349_s11 + $0x90] ss:$8 sps:$4 sm:$0xff]   ;;  %v1219_v43 = vld [vmem:[%s1349_s11 + $0x174] ss:$8 sps:$4 sm:$0xff]  }
  0x34   : > { %v1228_v41 = vld [vmem:[%s1351_s12 + $0x4] ss:$12 sps:$4 sm:$0xff]   ;;  %v1225_v48 = vld [vmem:[%s1351_s12 + $0x8] ss:$12 sps:$4 sm:$0xff]   ;;  %v1229_v53 = vld [vmem:[%s1351_s12 + $0x20] ss:$0 sps:$4 sm:$0xff]  }
  0x35   : > { %750 = vmatpush1.bf16.msra.mxu0 %v1191_v24  ;;  %v1192_v44 = vld [vmem:[%s1349_s11 + $0xa4] ss:$8 sps:$4 sm:$0xff]   ;;  %726 = vmatprep.mubr.bf16.mxu1 %v1228_v41  ;;  %v1221_v45 = vld [vmem:[%s1349_s11 + $0x170] ss:$8 sps:$4 sm:$0xff]   ;;  %v1194_v46 = vld [vmem:[%s1349_s11 + $0xa0] ss:$8 sps:$4 sm:$0xff]  }
  0x36   : > { %701 = vmatpush1.bf16.msra.mxu1 %v1164_v15  ;;  %751 = vmatprep.subr.bf16.mxu0 %v1195_v26  ;;  %v1198_v47 = vld [vmem:[%s1349_s11 + $0xb4] ss:$8 sps:$4 sm:$0xff]   ;;  %v1200_v49 = vld [vmem:[%s1349_s11 + $0xb0] ss:$8 sps:$4 sm:$0xff]   ;;  %v1204_v50 = vld [vmem:[%s1349_s11 + $0xc4] ss:$8 sps:$4 sm:$0xff]  }
  0x37   : > { %702 = vmatprep.subr.bf16.mxu1 %v1165_v18  ;;  %v1206_v51 = vld [vmem:[%s1349_s11 + $0xc0] ss:$8 sps:$4 sm:$0xff]   ;;  %v1210_v52 = vld [vmem:[%s1349_s11 + $0xd4] ss:$8 sps:$4 sm:$0xff]   ;;  %v1212_v54 = vld [vmem:[%s1349_s11 + $0xd0] ss:$8 sps:$4 sm:$0xff]  }
  0x38   : > { %v1216_v55 = vld [vmem:[%s1349_s11 + $0xe4] ss:$8 sps:$4 sm:$0xff]   ;;  %v1218_v56 = vld [vmem:[%s1349_s11 + $0xe0] ss:$8 sps:$4 sm:$0xff]   ;;  %v1222_v57 = vld [vmem:[%s1349_s11 + $0xf4] ss:$8 sps:$4 sm:$0xff]  }
  0x39   : > { %752 = vmatpush1.bf16.msra.mxu0 %v1197_v28  ;;  %v1224_v58 = vld [vmem:[%s1349_s11 + $0xf0] ss:$8 sps:$4 sm:$0xff]   ;;  %v367_v7 = vld [vmem:[#allocation2] sm:$0xff]  ;;  %v368_v10 = vld [vmem:[#allocation2 + $0x8] sm:$0xff] }
  0x3a   : > { %703 = vmatpush1.bf16.msra.mxu1 %v1167_v21  ;;  %753 = vmatprep.subr.bf16.mxu0 %v1201_v30  ;;  %v377_v59 = vld [vmem:[%s1351_s12 + $0x18] sm:$0xff]  ;;  %v1226_v60 = vld [vmem:[%s1351_s12] ss:$12 sps:$4 sm:$0xff]  }
  0x3b   : > { %704 = vmatprep.subr.bf16.mxu1 %v1168_v22  ;;  %v1042_v61 = vcombine.high %v377_v59, %v377_v59  ;;  %v1041_v62 = vcombine.low %v377_v59, %v377_v59  ;;  %v369_v13 = vld [vmem:[#allocation2 + $0x10] sm:$0xff]  ;;  %v370_v17 = vld [vmem:[#allocation2 + $0x18] sm:$0xff]  ;;  %v371_v23 = vld [vmem:[#allocation2 + $0x20] sm:$0xff] }
  0x3c   : > { %v372_v26 = vld [vmem:[#allocation2 + $0x28] sm:$0xff] }
  0x3d   : > { %754 = vmatpush1.bf16.msra.mxu0 %v1203_v32 }
  0x3e   : > { %705 = vmatpush1.bf16.msra.mxu1 %v1170_v25  ;;  %755 = vmatprep.subr.bf16.mxu0 %v1207_v34 }
  0x3f   : > { %706 = vmatprep.subr.bf16.mxu1 %v1171_v27 }
  0x41   : > { %756 = vmatpush1.bf16.msra.mxu0 %v1209_v36  ;;  %v836_v36 = vld [vmem:[%s1443_s3] sm:$0x3] (!%p1092_p11) }
  0x42   : > { %707 = vmatpush1.bf16.msra.mxu1 %v1173_v29  ;;  %757 = vmatprep.subr.bf16.mxu0 %v1213_v38 }
  0x43   : > { %708 = vmatprep.subr.bf16.mxu1 %v1174_v31 }
  0x45   : > { %758 = vmatpush1.bf16.msra.mxu0 %v1215_v40 }
  0x46   : > { %709 = vmatpush1.bf16.msra.mxu1 %v1176_v33  ;;  %759 = vmatprep.subr.bf16.mxu0 %v1219_v43  ;;  %v820_v33 = vlaneseq (!%p1092_p11) }
  0x47   : > { %710 = vmatprep.subr.bf16.mxu1 %v1180_v35  ;;  %v818_v35 = vld [vmem:[%s1442_s2] sm:$0x3] (!%p1092_p11) }
  0x48   : > { %v821_v34 = vshrl.u32 (!%p1092_p11), %v820_v33, 7 }
  0x49   : > { %760 = vmatpush1.bf16.msra.mxu0 %v1221_v45 }
  0x4a   : > { %711 = vmatpush1.bf16.msra.mxu1 %v1182_v37  ;;  %v822_v38 = vsub.s32 (!%p1092_p11), 0, %v821_v34 }
  0x4b   : > { %712 = vmatprep.subr.bf16.mxu1 %v1186_v39  ;;  %v826_v39 = vsub.s32 (!%p1092_p11), 1, %v821_v34 }
  0x4c   : > { %778 = vmatmul.mubr.bf16.vlgmr.msra.gmra.mrb[0].mxu0 %v1225_v48  ;;  %v823_v43 = vrot.slane (!%p1092_p11), %v818_v35, %v822_v38  ;;  %v841_v45 = vrot.slane (!%p1092_p11), %v836_v36, %v822_v38 }
  0x4d   : > { %787 = vmatprep.mubr.bf16.mxu0 %v1273_v9 }
  0x4e   : > { %713 = vmatpush1.bf16.msra.mxu1 %v1188_v42 }
  0x4f   : > { %714 = vmatprep.subr.bf16.mxu1 %v1192_v44  ;;  %v827_v44 = vrot.slane (!%p1092_p11), %v818_v35, %v826_v39 }
  0x52   : > { %715 = vmatpush1.bf16.msra.mxu1 %v1194_v46  ;;  %v845_v46 = vrot.slane (!%p1092_p11), %v836_v36, %v826_v39 }
  0x53   : > { %716 = vmatprep.subr.bf16.mxu1 %v1198_v47 }
  0x54   : > { %788 = vmatmul.mubr.bf16.gmra.mrb[4].mxu0 %v1229_v53 }
  0x56   : > { %717 = vmatpush1.bf16.msra.mxu1 %v1200_v49 }
  0x57   : > { %718 = vmatprep.subr.bf16.mxu1 %v1204_v50 }
  0x5a   : > { %719 = vmatpush1.bf16.msra.mxu1 %v1206_v51 }
  0x5b   : > { %720 = vmatprep.subr.bf16.mxu1 %v1210_v52 }
  0x5e   : > { %721 = vmatpush1.bf16.msra.mxu1 %v1212_v54 }
  0x5f   : > { %722 = vmatprep.subr.bf16.mxu1 %v1216_v55 }
  0x62   : > { %723 = vmatpush1.bf16.msra.mxu1 %v1218_v56 }
  0x63   : > { %724 = vmatprep.subr.bf16.mxu1 %v1222_v57 }
  0x66   : > { %725 = vmatpush1.bf16.msra.mxu1 %v1224_v58 }
  0x69   : > { %727 = vmatmul.mubr.bf16.vlgmr.msra.gmra.mrb[0].mxu1 %v1226_v60 }
  0x6a   : > { %736 = vmatprep.mubr.bf16.mxu1 %v1042_v61 }
  0x71   : > { %737 = vmatmul.mubr.bf16.gmra.mrb[4].mxu1 %v1041_v62 }
 0x11f   : > { %v779_v63 = vpop.f32.mrb[0].mxu0 }
 0x120   : > { %v781_v0 = vpop.f32.mrb[1].mxu0 }
 0x121   : > { %v783_v1 = vpop.f32.mrb[2].mxu0 }
 0x122   : > { %v785_v2 = vpop.f32.mrb[3].mxu0 }
 0x127   : > { %v789_v3 = vpop.f32.mrb[4].mxu0 }
 0x128   : > { %v791_v4 = vpop.f32.mrb[5].mxu0 }
 0x129   : > { %v793_v5 = vpop.f32.mrb[6].mxu0 }
 0x12a   : > { %v794_v6 = vpop.f32.mrb[7].mxu0 }
 0x13c   : > { %v728_v8 = vpop.f32.mrb[0].mxu1 }
 0x13d   : > { %v780_v9 = vadd.f32 %v779_v63, %v728_v8  ;;  %v730_v11 = vpop.f32.mrb[1].mxu1 }
 0x13e   : > { %v782_v12 = vadd.f32 %v781_v0, %v730_v11  ;;  %v732_v14 = vpop.f32.mrb[2].mxu1 }
 0x13f   : > { %v796_v15 = vadd.f32 %v780_v9, %v367_v7  ;;  %v784_v16 = vadd.f32 %v783_v1, %v732_v14  ;;  %v734_v18 = vpop.f32.mrb[3].mxu1 }
 0x140   : > { %v797_v19 = vadd.f32 %v782_v12, %v368_v10  ;;  %v786_v20 = vadd.f32 %v785_v2, %v734_v18 }
 0x141   : > { %802 = vst [vmem:[#allocation2] sm:$0xff] %v796_v15  ;;  %v798_v21 = vadd.f32 %v784_v16, %v369_v13 }
 0x142   : > { %803 = vst [vmem:[#allocation2 + $0x8] sm:$0xff] %v797_v19  ;;  %v799_v22 = vadd.f32 %v786_v20, %v370_v17 }
 0x143   : > { %804 = vst [vmem:[#allocation2 + $0x10] sm:$0xff] %v798_v21 }
 0x144   : > { %805 = vst [vmem:[#allocation2 + $0x18] sm:$0xff] %v799_v22  ;;  %v738_v24 = vpop.f32.mrb[4].mxu1  ;;  %811 = sbr.rel (%p1092_p11) target bundleno = 347 (0x15b), region = 70 }
 0x145   : > { %v790_v25 = vadd.f32 %v789_v3, %v738_v24  ;;  %v740_v27 = vpop.f32.mrb[5].mxu1 }
 0x146   : > { %v792_v28 = vadd.f32 %v791_v4, %v740_v27  ;;  %v742_v29 = vpop.f32.mrb[6].mxu1 }
 0x147   : > { %v800_v30 = vadd.f32 %v790_v25, %v371_v23  ;;  %v743_v31 = vpop.f32.mrb[7].mxu1 }
 0x148   : > { %v801_v32 = vadd.f32 %v792_v28, %v372_v26  ;;  %v812_v37 = vld [vmem:[#allocation2] sm:$0xff] (!%p1092_p11) }
 0x149   : > { %806 = vst [vmem:[#allocation2 + $0x20] sm:$0xff] %v800_v30  ;;  %v813_v40 = vld [vmem:[#allocation2 + $0x8] sm:$0xff] (!%p1092_p11)  ;;  %v830_v49 = vmul.f32 (!%p1092_p11), %v823_v43, %v812_v37 }
 0x14a   : > { %807 = vst [vmem:[#allocation2 + $0x28] sm:$0xff] %v801_v32  ;;  %v814_v41 = vld [vmem:[#allocation2 + $0x10] sm:$0xff] (!%p1092_p11)  ;;  %v831_v50 = vmul.f32 (!%p1092_p11), %v827_v44, %v813_v40 }
 0x14b   : > { %v815_v42 = vld [vmem:[#allocation2 + $0x18] sm:$0xff]  ;;  %v832_v51 = vmul.f32 %v823_v43, %v814_v41  ;;  %v848_v55 = vadd.f32 %v841_v45, %v830_v49 }
 0x14c   : > { %v833_v52 = vmul.f32 %v827_v44, %v815_v42  ;;  %v849_v56 = vadd.f32 %v845_v46, %v831_v50 }
 0x14d   : > { %v850_v57 = vadd.f32 %v841_v45, %v832_v51  ;;  %v854_v61 = vmax.f32 %v848_v55, 0.0 }
 0x14e   : > { %v851_v58 = vadd.f32 %v845_v46, %v833_v52  ;;  %v855_v62 = vmax.f32 %v849_v56, 0.0 }
 0x14f   : > { %v856_v63 = vmax.f32 %v850_v57, 0.0 }
 0x150   : > { %v816_v47 = vld [vmem:[#allocation2 + $0x20] sm:$0xff]  ;;  %v857_v0 = vmax.f32 %v851_v58, 0.0  ;;  %v1102_v3 = vpack.c.bf16 %v855_v62, %v854_v61 }
 0x151   : > { %v817_v48 = vld [vmem:[#allocation2 + $0x28] sm:$0xff]  ;;  %v834_v53 = vmul.f32 %v823_v43, %v816_v47 }
 0x152   : > { %v835_v54 = vmul.f32 %v827_v44, %v817_v48  ;;  %v1103_v4 = vpack.c.bf16 %v857_v0, %v856_v63  ;;  %880 = vst [vmem:[%s1444_s4] sm:$0xff] %v1102_v3 }
 0x153   : > { %v852_v59 = vadd.f32 %v841_v45, %v834_v53 }
 0x154   : > { %v853_v60 = vadd.f32 %v845_v46, %v835_v54  ;;  %881 = vst [vmem:[%s1444_s4 + $0x8] sm:$0xff] %v1103_v4 }
 0x155   : > { %v858_v1 = vmax.f32 %v852_v59, 0.0 }
 0x156   : > { %v859_v2 = vmax.f32 %v853_v60, 0.0 }
 0x158   : > { %v1104_v5 = vpack.c.bf16 %v859_v2, %v858_v1 }
 0x15a   : > { %882 = vst [vmem:[%s1444_s4 + $0x10] sm:$0xff] %v1104_v5 }
 0x15b PF: > { %s14_s19 = sadd.s32 1, %s1270_s19   ;;  %s1445_s15 = smov %s1258_s16 }
 0x15c   : > { %p11_p12 = scmp.ge.s32.totalorder %s14_s19, 8   ;;  %s1446_s16 = smov %s1334_s23 }
 0x15d   : > { %s1447_s17 = smov %s1266_s18  ;;  %s1448_s18 = smov %s1450_s20 }
 0x15e   :  { %13 = sbr.rel (!%p11_p12) target bundleno = 3 (0x3), region = 120 }

// kernel: deeplab_v2_forward.36
= control target key start
LH: loop header
LB: loop body
LE: loop exit
PB: predicated region body
PF: predicated region fallthrough
CT: control target
= control target key end

     0   :  { %s2215_s0 = inlined_call_operand.vmem [shape: bf16[24,1024], index: 0, kind: input, shape index: {}]   ;;  %s2216_s1 = inlined_call_operand.vmem [shape: bf16[1024,512], index: 1, kind: input, shape index: {}]   ;;  %s2217_s2 = inlined_call_operand.vmem [shape: f32[1,512], index: 2, kind: input, shape index: {}]   ;;  %s2218_s3 = inlined_call_operand.vmem [shape: f32[1,512], index: 3, kind: input, shape index: {}]   ;;  %s2219_s4 = inlined_call_operand.vmem [shape: bf16[24,512], index: 4, kind: output, shape index: {}]  }
   0x1   :  { %2222 = sst [smem:[#allocation8_spill]] %s2215_s0 }
   0x2   :  { %2223 = sst [smem:[#allocation9_spill]] %s2216_s1 }
   0x3   :  { %s1820_s15 = smov 0   ;;  %s1822_s16 = smov 0  }
   0x4   :  { %s1824_s17 = smov 0   ;;  %s1826_s18 = smov 0  }
   0x5   :  { %s1828_s19 = smov 0   ;;  %s1830_s20 = smov 0  }
   0x6   :  { %s1832_s21 = smov 0   ;;  %s1834_s22 = smov 0  }
   0x7   :  { %s1836_s23 = smov 0   ;;  %s1838_s24 = smov 0  }
   0x8   :  { %s1840_s25 = smov 0  }
   0x9 LB: > { %s1402_s26 = sadd.s32 4294967295, %s1792_s25   ;;  %s26_s27 = sadd.s32 1, %s1784_s23  ;;  %s1792_s25 = sphi %s1840_s25, %s14_s25   ;;  %s1788_s24 = sphi %s1838_s24, %s2242_s24   ;;  %s1784_s23 = sphi %s1836_s23, %s2241_s23   ;;  %s1780_s22 = sphi %s1834_s22, %s2240_s22   ;;  %s1776_s21 = sphi %s1832_s21, %s2239_s21   ;;  %s1772_s20 = sphi %s1830_s20, %s2238_s20   ;;  %s1768_s19 = sphi %s1828_s19, %s2237_s19   ;;  %s1764_s18 = sphi %s1826_s18, %s2236_s18   ;;  %s1760_s17 = sphi %s1824_s17, %s2235_s17   ;;  %s1756_s16 = sphi %s1822_s16, %s2234_s16   ;;  %s1752_s15 = sphi %s1820_s15, %s2233_s15  }
   0xa   : > { %p27_p0 = scmp.ge.s32.totalorder %s26_s27, 2  ;;  %s29_s28 = sadd.s32 1, %s1788_s24 }
   0xb   : > { %s42_s29 = sadd.s32 1, %s1772_s20  ;;  %p49_p1 = scmp.ne.s32.totalorder %s1772_s20, %s1768_s19 }
   0xc   : > { %s2244_s27 = smov (%p27_p0, %s26_s27), 0  ;;  %s2246_s28 = smov (!%p27_p0, %s29_s28), %s1788_s24 }
   0xd   : > { %2224 = sst [smem:[#allocation6_spill]] %s2244_s27  ;;  %s38_s30 = ssub.s32 %s1784_s23, %s2244_s27 }
   0xe   : > { %p50_p2 = scmp.eq.s32.totalorder %s1792_s25, 0  ;;  %p31_p3 = scmp.ge.s32.totalorder %s2246_s28, 2 }
   0xf   : > { %p40_p4 = scmp.eq.s32.totalorder %s38_s30, 0  ;;  %s70_s6 = sadd.s32 1, %s1764_s18 }
  0x10   : > { %p1887_p5 = por %p50_p2, %p49_p1  ;;  %s2248_s28 = smov (%p31_p3, %s2246_s28), 0 }
  0x11   : > { %2226 = sst [smem:[#allocation7_spill]] %s2248_s28  ;;  %s66_s8 = ssub.s32 %s1788_s24, %s2248_s28 }
  0x12   : > { %s1895_s7 = scalar_select %p40_p4, %s1772_s20, %s42_s29  }
  0x13   : > { %p77_p6 = scmp.ne.s32.totalorder %s1764_s18, %s1760_s17  ;;  %s67_s9 = sor.u32 %s66_s8, %s38_s30 }
  0x14   : > { %p148_p7 = scmp.eq.s32.totalorder %s66_s8, 0  ;;  %p68_p8 = scmp.eq.s32.totalorder %s67_s9, 0 }
  0x15   : > { %p1901_p9 = por %p77_p6, %p50_p2  ;;  %s150_s11 = sadd.s32 1, %s1756_s16 }
  0x16   : > { %p160_p10 = scmp.ne.s32.totalorder %s1756_s16, %s1752_s15  ;;  %p161_p11 = scmp.eq.s32.totalorder %s1402_s26, 3 }
  0x17   : > { %s1909_s12 = scalar_select %p68_p8, %s1764_s18, %s70_s6  }
  0x18   : > { %s1912_s13 = scalar_select %p148_p7, %s1756_s16, %s150_s11  }
  0x19   : > { %p1914_p12 = por %p161_p11, %p160_p10  ;;  %p1405_p13 = scmp.ge.s32.totalorder %s1792_s25, 4 }
  0x1b   : > { %183 = sbr.rel (%p1405_p13) target bundleno = 89 (0x59), region = 16 }
  0x22   : > { %186 = sbr.rel (!%p1887_p5) target bundleno = 47 (0x2f), region = 20  ;;  %s188_s29 = sand.u32 (%p1887_p5), 1, %s1772_s20  }
  0x23   : > { %s1498_s30 = sshll.u32 (%p1887_p5), %s1784_s23, 4  ;;  %s1508_s8 = smul.u32 (%p1887_p5), 48, %s188_s29 }
  0x24   : > { %s2229_s0 = sld [smem:[#allocation8_spill]] (%p1887_p5) }
  0x25   : > { %s190_s26 = scalar_lea.vmem (%p1887_p5), [#allocation3], %s1508_s8 }
  0x2a   : > { %s196_s11 = scalar_lea.vmem %s2229_s0, %s1498_s30 }
  0x2b   : > { %v209_v0 = vld [vmem:[%s196_s11] sm:$0xff]  ;;  %v211_v1 = vld [vmem:[%s196_s11 + $0x8] sm:$0xff] }
  0x2c   : > { %v213_v2 = vld [vmem:[%s196_s11 + $0x20] sm:$0xff]  ;;  %v215_v3 = vld [vmem:[%s196_s11 + $0x28] sm:$0xff]  ;;  %210 = vst [vmem:[%s190_s26] sm:$0xff] %v209_v0  ;;  %212 = vst [vmem:[%s190_s26 + $0x8] sm:$0xff] %v211_v1 }
  0x2d   : > { %v217_v4 = vld [vmem:[%s196_s11 + $0x40] sm:$0xff]  ;;  %v219_v5 = vld [vmem:[%s196_s11 + $0x48] sm:$0xff]  ;;  %214 = vst [vmem:[%s190_s26 + $0x10] sm:$0xff] %v213_v2  ;;  %216 = vst [vmem:[%s190_s26 + $0x18] sm:$0xff] %v215_v3 }
  0x2e   : > { %218 = vst [vmem:[%s190_s26 + $0x20] sm:$0xff] %v217_v4  ;;  %220 = vst [vmem:[%s190_s26 + $0x28] sm:$0xff] %v219_v5 }
  0x2f PF: > { %226 = sbr.rel (!%p1901_p9) target bundleno = 89 (0x59), region = 43  ;;  %s228_s5 = sand.u32 (%p1901_p9), 1, %s1764_s18  }
  0x30   : > { %s1410_s29 = sshll.u32 (%p1901_p9), %s1788_s24, 1  ;;  %s1408_s30 = sshll.u32 (%p1901_p9), %s228_s5, 9 }
  0x31   : > { %s1499_s6 = sshll.u32 (%p1901_p9), %s1784_s23, 8  ;;  %s2230_s1 = sld [smem:[#allocation9_spill]] (%p1901_p9) }
  0x32   : > { %s234_s9 = sadd.s32 (%p1901_p9), %s1499_s6, %s1410_s29  ;;  %s1939_s10 = scalar_lea.vmem (%p1901_p9), [#allocation4], %s1408_s30 }
  0x33   : > { %s1412_s11 = sshll.u32 (%p1901_p9), %s234_s9, 2 }
  0x37   : > { %s1934_s28 = scalar_lea.vmem %s2230_s1, %s1412_s11 }
  0x38   : > { %v390_v6 = vld [vmem:[%s1934_s28] sm:$0xff]  ;;  %v392_v7 = vld [vmem:[%s1934_s28 + $0x10] sm:$0xff] }
  0x39   : > { %v394_v8 = vld [vmem:[%s1934_s28 + $0x20] sm:$0xff]  ;;  %391 = vst [vmem:[%s1939_s10] sm:$0xff] %v390_v6  ;;  %393 = vst [vmem:[%s1939_s10 + $0x8] sm:$0xff] %v392_v7  ;;  %v396_v9 = vld [vmem:[%s1934_s28 + $0x30] sm:$0xff] }
  0x3a   : > { %395 = vst [vmem:[%s1939_s10 + $0x10] sm:$0xff] %v394_v8  ;;  %v398_v10 = vld [vmem:[%s1934_s28 + $0x40] sm:$0xff]  ;;  %v400_v11 = vld [vmem:[%s1934_s28 + $0x50] sm:$0xff]  ;;  %397 = vst [vmem:[%s1939_s10 + $0x18] sm:$0xff] %v396_v9 }
  0x3b   : > { %399 = vst [vmem:[%s1939_s10 + $0x20] sm:$0xff] %v398_v10  ;;  %401 = vst [vmem:[%s1939_s10 + $0x28] sm:$0xff] %v400_v11  ;;  %v402_v12 = vld [vmem:[%s1934_s28 + $0x60] sm:$0xff]  ;;  %v404_v13 = vld [vmem:[%s1934_s28 + $0x70] sm:$0xff] }
  0x3c   : > { %v406_v14 = vld [vmem:[%s1934_s28 + $0x80] sm:$0xff]  ;;  %403 = vst [vmem:[%s1939_s10 + $0x30] sm:$0xff] %v402_v12  ;;  %405 = vst [vmem:[%s1939_s10 + $0x38] sm:$0xff] %v404_v13  ;;  %v408_v15 = vld [vmem:[%s1934_s28 + $0x90] sm:$0xff] }
  0x3d   : > { %407 = vst [vmem:[%s1939_s10 + $0x40] sm:$0xff] %v406_v14  ;;  %v410_v16 = vld [vmem:[%s1934_s28 + $0xa0] sm:$0xff]  ;;  %v412_v17 = vld [vmem:[%s1934_s28 + $0xb0] sm:$0xff]  ;;  %409 = vst [vmem:[%s1939_s10 + $0x48] sm:$0xff] %v408_v15 }
  0x3e   : > { %411 = vst [vmem:[%s1939_s10 + $0x50] sm:$0xff] %v410_v16  ;;  %413 = vst [vmem:[%s1939_s10 + $0x58] sm:$0xff] %v412_v17  ;;  %v414_v18 = vld [vmem:[%s1934_s28 + $0xc0] sm:$0xff]  ;;  %v416_v19 = vld [vmem:[%s1934_s28 + $0xd0] sm:$0xff] }
  0x3f   : > { %v418_v20 = vld [vmem:[%s1934_s28 + $0xe0] sm:$0xff]  ;;  %415 = vst [vmem:[%s1939_s10 + $0x60] sm:$0xff] %v414_v18  ;;  %417 = vst [vmem:[%s1939_s10 + $0x68] sm:$0xff] %v416_v19  ;;  %v420_v21 = vld [vmem:[%s1934_s28 + $0xf0] sm:$0xff] }
  0x40   : > { %419 = vst [vmem:[%s1939_s10 + $0x70] sm:$0xff] %v418_v20  ;;  %v422_v22 = vld [vmem:[%s1934_s28 + $0x100] sm:$0xff]  ;;  %v424_v23 = vld [vmem:[%s1934_s28 + $0x110] sm:$0xff]  ;;  %421 = vst [vmem:[%s1939_s10 + $0x78] sm:$0xff] %v420_v21 }
  0x41   : > { %423 = vst [vmem:[%s1939_s10 + $0x80] sm:$0xff] %v422_v22  ;;  %425 = vst [vmem:[%s1939_s10 + $0x88] sm:$0xff] %v424_v23  ;;  %v426_v24 = vld [vmem:[%s1934_s28 + $0x120] sm:$0xff]  ;;  %v428_v25 = vld [vmem:[%s1934_s28 + $0x130] sm:$0xff] }
  0x42   : > { %v430_v26 = vld [vmem:[%s1934_s28 + $0x140] sm:$0xff]  ;;  %427 = vst [vmem:[%s1939_s10 + $0x90] sm:$0xff] %v426_v24  ;;  %429 = vst [vmem:[%s1939_s10 + $0x98] sm:$0xff] %v428_v25  ;;  %v432_v27 = vld [vmem:[%s1934_s28 + $0x150] sm:$0xff] }
  0x43   : > { %431 = vst [vmem:[%s1939_s10 + $0xa0] sm:$0xff] %v430_v26  ;;  %v434_v28 = vld [vmem:[%s1934_s28 + $0x160] sm:$0xff]  ;;  %v436_v29 = vld [vmem:[%s1934_s28 + $0x170] sm:$0xff]  ;;  %433 = vst [vmem:[%s1939_s10 + $0xa8] sm:$0xff] %v432_v27 }
  0x44   : > { %435 = vst [vmem:[%s1939_s10 + $0xb0] sm:$0xff] %v434_v28  ;;  %437 = vst [vmem:[%s1939_s10 + $0xb8] sm:$0xff] %v436_v29  ;;  %v438_v30 = vld [vmem:[%s1934_s28 + $0x180] sm:$0xff]  ;;  %v440_v31 = vld [vmem:[%s1934_s28 + $0x190] sm:$0xff] }
  0x45   : > { %v442_v32 = vld [vmem:[%s1934_s28 + $0x1a0] sm:$0xff]  ;;  %439 = vst [vmem:[%s1939_s10 + $0xc0] sm:$0xff] %v438_v30  ;;  %441 = vst [vmem:[%s1939_s10 + $0xc8] sm:$0xff] %v440_v31  ;;  %v444_v33 = vld [vmem:[%s1934_s28 + $0x1b0] sm:$0xff] }
  0x46   : > { %443 = vst [vmem:[%s1939_s10 + $0xd0] sm:$0xff] %v442_v32  ;;  %v446_v34 = vld [vmem:[%s1934_s28 + $0x1c0] sm:$0xff]  ;;  %v448_v35 = vld [vmem:[%s1934_s28 + $0x1d0] sm:$0xff]  ;;  %445 = vst [vmem:[%s1939_s10 + $0xd8] sm:$0xff] %v444_v33 }
  0x47   : > { %447 = vst [vmem:[%s1939_s10 + $0xe0] sm:$0xff] %v446_v34  ;;  %449 = vst [vmem:[%s1939_s10 + $0xe8] sm:$0xff] %v448_v35  ;;  %v450_v36 = vld [vmem:[%s1934_s28 + $0x1e0] sm:$0xff]  ;;  %v452_v37 = vld [vmem:[%s1934_s28 + $0x1f0] sm:$0xff] }
  0x48   : > { %v454_v38 = vld [vmem:[%s1934_s28 + $0x200] sm:$0xff]  ;;  %451 = vst [vmem:[%s1939_s10 + $0xf0] sm:$0xff] %v450_v36  ;;  %453 = vst [vmem:[%s1939_s10 + $0xf8] sm:$0xff] %v452_v37  ;;  %v456_v39 = vld [vmem:[%s1934_s28 + $0x210] sm:$0xff] }
  0x49   : > { %455 = vst [vmem:[%s1939_s10 + $0x100] sm:$0xff] %v454_v38  ;;  %v458_v40 = vld [vmem:[%s1934_s28 + $0x220] sm:$0xff]  ;;  %v460_v41 = vld [vmem:[%s1934_s28 + $0x230] sm:$0xff]  ;;  %457 = vst [vmem:[%s1939_s10 + $0x108] sm:$0xff] %v456_v39 }
  0x4a   : > { %459 = vst [vmem:[%s1939_s10 + $0x110] sm:$0xff] %v458_v40  ;;  %461 = vst [vmem:[%s1939_s10 + $0x118] sm:$0xff] %v460_v41  ;;  %v462_v42 = vld [vmem:[%s1934_s28 + $0x240] sm:$0xff]  ;;  %v464_v43 = vld [vmem:[%s1934_s28 + $0x250] sm:$0xff] }
  0x4b   : > { %v466_v44 = vld [vmem:[%s1934_s28 + $0x260] sm:$0xff]  ;;  %463 = vst [vmem:[%s1939_s10 + $0x120] sm:$0xff] %v462_v42  ;;  %465 = vst [vmem:[%s1939_s10 + $0x128] sm:$0xff] %v464_v43  ;;  %v468_v45 = vld [vmem:[%s1934_s28 + $0x270] sm:$0xff] }
  0x4c   : > { %467 = vst [vmem:[%s1939_s10 + $0x130] sm:$0xff] %v466_v44  ;;  %v470_v46 = vld [vmem:[%s1934_s28 + $0x280] sm:$0xff]  ;;  %v472_v47 = vld [vmem:[%s1934_s28 + $0x290] sm:$0xff]  ;;  %469 = vst [vmem:[%s1939_s10 + $0x138] sm:$0xff] %v468_v45 }
  0x4d   : > { %471 = vst [vmem:[%s1939_s10 + $0x140] sm:$0xff] %v470_v46  ;;  %473 = vst [vmem:[%s1939_s10 + $0x148] sm:$0xff] %v472_v47  ;;  %v474_v48 = vld [vmem:[%s1934_s28 + $0x2a0] sm:$0xff]  ;;  %v476_v49 = vld [vmem:[%s1934_s28 + $0x2b0] sm:$0xff] }
  0x4e   : > { %v478_v50 = vld [vmem:[%s1934_s28 + $0x2c0] sm:$0xff]  ;;  %475 = vst [vmem:[%s1939_s10 + $0x150] sm:$0xff] %v474_v48  ;;  %477 = vst [vmem:[%s1939_s10 + $0x158] sm:$0xff] %v476_v49  ;;  %v480_v51 = vld [vmem:[%s1934_s28 + $0x2d0] sm:$0xff] }
  0x4f   : > { %479 = vst [vmem:[%s1939_s10 + $0x160] sm:$0xff] %v478_v50  ;;  %v482_v52 = vld [vmem:[%s1934_s28 + $0x2e0] sm:$0xff]  ;;  %v484_v53 = vld [vmem:[%s1934_s28 + $0x2f0] sm:$0xff]  ;;  %481 = vst [vmem:[%s1939_s10 + $0x168] sm:$0xff] %v480_v51 }
  0x50   : > { %483 = vst [vmem:[%s1939_s10 + $0x170] sm:$0xff] %v482_v52  ;;  %485 = vst [vmem:[%s1939_s10 + $0x178] sm:$0xff] %v484_v53  ;;  %v486_v54 = vld [vmem:[%s1934_s28 + $0x300] sm:$0xff]  ;;  %v488_v55 = vld [vmem:[%s1934_s28 + $0x310] sm:$0xff] }
  0x51   : > { %v490_v56 = vld [vmem:[%s1934_s28 + $0x320] sm:$0xff]  ;;  %487 = vst [vmem:[%s1939_s10 + $0x180] sm:$0xff] %v486_v54  ;;  %489 = vst [vmem:[%s1939_s10 + $0x188] sm:$0xff] %v488_v55  ;;  %v492_v57 = vld [vmem:[%s1934_s28 + $0x330] sm:$0xff] }
  0x52   : > { %491 = vst [vmem:[%s1939_s10 + $0x190] sm:$0xff] %v490_v56  ;;  %v494_v58 = vld [vmem:[%s1934_s28 + $0x340] sm:$0xff]  ;;  %v496_v59 = vld [vmem:[%s1934_s28 + $0x350] sm:$0xff]  ;;  %493 = vst [vmem:[%s1939_s10 + $0x198] sm:$0xff] %v492_v57 }
  0x53   : > { %495 = vst [vmem:[%s1939_s10 + $0x1a0] sm:$0xff] %v494_v58  ;;  %497 = vst [vmem:[%s1939_s10 + $0x1a8] sm:$0xff] %v496_v59  ;;  %v498_v60 = vld [vmem:[%s1934_s28 + $0x360] sm:$0xff]  ;;  %v500_v61 = vld [vmem:[%s1934_s28 + $0x370] sm:$0xff] }
  0x54   : > { %v502_v62 = vld [vmem:[%s1934_s28 + $0x380] sm:$0xff]  ;;  %499 = vst [vmem:[%s1939_s10 + $0x1b0] sm:$0xff] %v498_v60  ;;  %501 = vst [vmem:[%s1939_s10 + $0x1b8] sm:$0xff] %v500_v61  ;;  %v504_v63 = vld [vmem:[%s1934_s28 + $0x390] sm:$0xff] }
  0x55   : > { %503 = vst [vmem:[%s1939_s10 + $0x1c0] sm:$0xff] %v502_v62  ;;  %v506_v0 = vld [vmem:[%s1934_s28 + $0x3a0] sm:$0xff]  ;;  %v508_v1 = vld [vmem:[%s1934_s28 + $0x3b0] sm:$0xff]  ;;  %505 = vst [vmem:[%s1939_s10 + $0x1c8] sm:$0xff] %v504_v63 }
  0x56   : > { %507 = vst [vmem:[%s1939_s10 + $0x1d0] sm:$0xff] %v506_v0  ;;  %509 = vst [vmem:[%s1939_s10 + $0x1d8] sm:$0xff] %v508_v1  ;;  %v510_v2 = vld [vmem:[%s1934_s28 + $0x3c0] sm:$0xff]  ;;  %v512_v3 = vld [vmem:[%s1934_s28 + $0x3d0] sm:$0xff] }
  0x57   : > { %v514_v4 = vld [vmem:[%s1934_s28 + $0x3e0] sm:$0xff]  ;;  %511 = vst [vmem:[%s1939_s10 + $0x1e0] sm:$0xff] %v510_v2  ;;  %513 = vst [vmem:[%s1939_s10 + $0x1e8] sm:$0xff] %v512_v3  ;;  %v516_v5 = vld [vmem:[%s1934_s28 + $0x3f0] sm:$0xff] }
  0x58   : > { %515 = vst [vmem:[%s1939_s10 + $0x1f0] sm:$0xff] %v514_v4  ;;  %517 = vst [vmem:[%s1939_s10 + $0x1f8] sm:$0xff] %v516_v5 }
  0x59 PF: > { %p1413_p0 = scmp.ge.s32.totalorder %s1792_s25, 1  ;;  %p538_p1 = scmp.lt.s32.totalorder %s1792_s25, 5 }
  0x5b   : > { %p539_p2 = pnand %p1413_p0, %p538_p1 }
  0x5c   : > { %s545_s0 = sand.u32 (!%p539_p2), 1, %s1768_s19   ;;  %s552_s26 = sand.u32 (!%p539_p2), 1, %s1760_s17  }
  0x5d   : > { %542 = sbr.rel (%p539_p2) target bundleno = 423 (0x1a7), region = 89  ;;  %s1414_s29 = sshll.u32 (!%p539_p2), %s552_s26, 9 }
  0x5e   : > { %s1509_s5 = smul.u32 (!%p539_p2), 48, %s545_s0  ;;  %s585_s30 = sand.u32 (!%p539_p2), 1, %s1752_s15  }
  0x5f   : > { %s1510_s6 = smul.u32 (!%p539_p2), 24, %s585_s30  ;;  %s1415_s28 = sshll.u32 (!%p539_p2), %s1780_s22, 1 }
  0x60   : > { %p593_p3 = scmp.lt.s32.totalorder (!%p539_p2), %s1415_s28, 3  ;;  %s2082_s19 = scalar_lea.vmem (!%p539_p2), [#allocation3], %s1509_s5 }
  0x61   : > { %s2084_s17 = scalar_lea.vmem (!%p539_p2), [#allocation4], %s1414_s29  ;;  %s2086_s15 = scalar_lea.vmem (!%p539_p2), [#allocation5], %s1510_s6 }
  0x62   : > { %p1417_p4 = scmp.ne.s32.totalorder (!%p539_p2), %s1776_s21, 0 }
  0x64   : > { %s2250_s28 = smov (!%p593_p3, %s1415_s28), 3  ;;  %607 = sbr.rel (%p1417_p4) target bundleno = 107 (0x6b), region = 101 }
  0x65   : > { %s595_s8 = scalar_lea.vmem %s2217_s2, %s2250_s28  ;;  %s600_s27 = scalar_lea.vmem %s2218_s3, %s2250_s28  ;;  %v1794_v6 = vmov (!%p1417_p4), 0.0  }
  0x66   : > { %608 = vst [vmem:[#allocation2] sm:$0xff] (!%p1417_p4), %v1794_v6  ;;  %609 = vst [vmem:[#allocation2 + $0x8] sm:$0xff] (!%p1417_p4), %v1794_v6 }
  0x67   : > { %610 = vst [vmem:[#allocation2 + $0x10] sm:$0xff] (!%p1417_p4), %v1794_v6  ;;  %611 = vst [vmem:[#allocation2 + $0x18] sm:$0xff] (!%p1417_p4), %v1794_v6 }
  0x68   : > { %612 = vst [vmem:[#allocation2 + $0x20] sm:$0xff] (!%p1417_p4), %v1794_v6  ;;  %613 = vst [vmem:[#allocation2 + $0x28] sm:$0xff] (!%p1417_p4), %v1794_v6 }
  0x6b PF: > { %v1600_v7 = vld [vmem:[%s2084_s17 + $0x4] ss:$8 sps:$4 sm:$0xff]   ;;  %v1604_v9 = vld [vmem:[%s2084_s17] ss:$8 sps:$4 sm:$0xff]   ;;  %v1606_v11 = vld [vmem:[%s2084_s17 + $0x14] ss:$8 sps:$4 sm:$0xff]  }
  0x6c   : > { %v1602_v8 = vld [vmem:[%s2084_s17 + $0x104] ss:$8 sps:$4 sm:$0xff]   ;;  %1044 = vmatprep.subr.bf16.mxu1 %v1600_v7  ;;  %v1605_v10 = vld [vmem:[%s2084_s17 + $0x100] ss:$8 sps:$4 sm:$0xff]   ;;  %v1608_v12 = vld [vmem:[%s2084_s17 + $0x114] ss:$8 sps:$4 sm:$0xff]  }
  0x6d   : > { %1095 = vmatprep.subr.bf16.mxu0 %v1602_v8  ;;  %1045 = vmatpush1.bf16.msra.mxu1 %v1604_v9  ;;  %v1610_v13 = vld [vmem:[%s2084_s17 + $0x10] ss:$8 sps:$4 sm:$0xff]   ;;  %v1612_v15 = vld [vmem:[%s2084_s17 + $0x24] ss:$8 sps:$4 sm:$0xff]   ;;  %v1616_v17 = vld [vmem:[%s2084_s17 + $0x20] ss:$8 sps:$4 sm:$0xff]  }
  0x6e   : > { %1096 = vmatpush1.bf16.msra.mxu0 %v1605_v10  ;;  %1046 = vmatprep.subr.bf16.mxu1 %v1606_v11  ;;  %v1611_v14 = vld [vmem:[%s2084_s17 + $0x110] ss:$8 sps:$4 sm:$0xff]   ;;  %v1614_v16 = vld [vmem:[%s2084_s17 + $0x124] ss:$8 sps:$4 sm:$0xff]   ;;  %v1617_v18 = vld [vmem:[%s2084_s17 + $0x120] ss:$8 sps:$4 sm:$0xff]  }
  0x6f   : > { %1097 = vmatprep.subr.bf16.mxu0 %v1608_v12  ;;  %v1618_v19 = vld [vmem:[%s2084_s17 + $0x34] ss:$8 sps:$4 sm:$0xff]   ;;  %v1622_v21 = vld [vmem:[%s2084_s17 + $0x30] ss:$8 sps:$4 sm:$0xff]   ;;  %v1624_v23 = vld [vmem:[%s2084_s17 + $0x44] ss:$8 sps:$4 sm:$0xff]  }
  0x70   : > { %v1620_v20 = vld [vmem:[%s2084_s17 + $0x134] ss:$8 sps:$4 sm:$0xff]   ;;  %v1623_v22 = vld [vmem:[%s2084_s17 + $0x130] ss:$8 sps:$4 sm:$0xff]   ;;  %v1626_v24 = vld [vmem:[%s2084_s17 + $0x144] ss:$8 sps:$4 sm:$0xff]  }
  0x71   : > { %1047 = vmatpush1.bf16.msra.mxu1 %v1610_v13  ;;  %v1628_v25 = vld [vmem:[%s2084_s17 + $0x40] ss:$8 sps:$4 sm:$0xff]   ;;  %v1630_v27 = vld [vmem:[%s2084_s17 + $0x54] ss:$8 sps:$4 sm:$0xff]   ;;  %v1634_v29 = vld [vmem:[%s2084_s17 + $0x50] ss:$8 sps:$4 sm:$0xff]  }
  0x72   : > { %1098 = vmatpush1.bf16.msra.mxu0 %v1611_v14  ;;  %1048 = vmatprep.subr.bf16.mxu1 %v1612_v15  ;;  %v1629_v26 = vld [vmem:[%s2084_s17 + $0x140] ss:$8 sps:$4 sm:$0xff]   ;;  %v1632_v28 = vld [vmem:[%s2084_s17 + $0x154] ss:$8 sps:$4 sm:$0xff]   ;;  %v1635_v30 = vld [vmem:[%s2084_s17 + $0x150] ss:$8 sps:$4 sm:$0xff]  }
  0x73   : > { %1099 = vmatprep.subr.bf16.mxu0 %v1614_v16  ;;  %v1636_v31 = vld [vmem:[%s2084_s17 + $0x64] ss:$8 sps:$4 sm:$0xff]   ;;  %v1640_v33 = vld [vmem:[%s2084_s17 + $0x60] ss:$8 sps:$4 sm:$0xff]   ;;  %v1642_v35 = vld [vmem:[%s2084_s17 + $0x74] ss:$8 sps:$4 sm:$0xff]  }
  0x74   : > { %v1638_v32 = vld [vmem:[%s2084_s17 + $0x164] ss:$8 sps:$4 sm:$0xff]   ;;  %v1641_v34 = vld [vmem:[%s2084_s17 + $0x160] ss:$8 sps:$4 sm:$0xff]   ;;  %v1644_v36 = vld [vmem:[%s2084_s17 + $0x174] ss:$8 sps:$4 sm:$0xff]  }
  0x75   : > { %1049 = vmatpush1.bf16.msra.mxu1 %v1616_v17  ;;  %v1646_v37 = vld [vmem:[%s2084_s17 + $0x70] ss:$8 sps:$4 sm:$0xff]   ;;  %v1648_v39 = vld [vmem:[%s2084_s17 + $0x84] ss:$8 sps:$4 sm:$0xff]   ;;  %v1652_v41 = vld [vmem:[%s2084_s17 + $0x80] ss:$8 sps:$4 sm:$0xff]  }
  0x76   : > { %1100 = vmatpush1.bf16.msra.mxu0 %v1617_v18  ;;  %1050 = vmatprep.subr.bf16.mxu1 %v1618_v19  ;;  %v1647_v38 = vld [vmem:[%s2084_s17 + $0x170] ss:$8 sps:$4 sm:$0xff]   ;;  %v1650_v40 = vld [vmem:[%s2084_s17 + $0x184] ss:$8 sps:$4 sm:$0xff]   ;;  %v1653_v42 = vld [vmem:[%s2084_s17 + $0x180] ss:$8 sps:$4 sm:$0xff]  }
  0x77   : > { %1101 = vmatprep.subr.bf16.mxu0 %v1620_v20  ;;  %v1654_v43 = vld [vmem:[%s2084_s17 + $0x94] ss:$8 sps:$4 sm:$0xff]   ;;  %v1658_v45 = vld [vmem:[%s2084_s17 + $0x90] ss:$8 sps:$4 sm:$0xff]   ;;  %v1660_v47 = vld [vmem:[%s2084_s17 + $0xa4] ss:$8 sps:$4 sm:$0xff]  }
  0x78   : > { %v1656_v44 = vld [vmem:[%s2084_s17 + $0x194] ss:$8 sps:$4 sm:$0xff]   ;;  %v1659_v46 = vld [vmem:[%s2084_s17 + $0x190] ss:$8 sps:$4 sm:$0xff]   ;;  %v1662_v48 = vld [vmem:[%s2084_s17 + $0x1a4] ss:$8 sps:$4 sm:$0xff]  }
  0x79   : > { %1051 = vmatpush1.bf16.msra.mxu1 %v1622_v21  ;;  %v1664_v49 = vld [vmem:[%s2084_s17 + $0xa0] ss:$8 sps:$4 sm:$0xff]   ;;  %v1666_v51 = vld [vmem:[%s2084_s17 + $0xb4] ss:$8 sps:$4 sm:$0xff]   ;;  %v1670_v53 = vld [vmem:[%s2084_s17 + $0xb0] ss:$8 sps:$4 sm:$0xff]  }
  0x7a   : > { %1102 = vmatpush1.bf16.msra.mxu0 %v1623_v22  ;;  %1052 = vmatprep.subr.bf16.mxu1 %v1624_v23  ;;  %v1665_v50 = vld [vmem:[%s2084_s17 + $0x1a0] ss:$8 sps:$4 sm:$0xff]   ;;  %v1668_v52 = vld [vmem:[%s2084_s17 + $0x1b4] ss:$8 sps:$4 sm:$0xff]   ;;  %v1671_v55 = vld [vmem:[%s2084_s17 + $0x1b0] ss:$8 sps:$4 sm:$0xff]  }
  0x7b   : > { %1103 = vmatprep.subr.bf16.mxu0 %v1626_v24  ;;  %v1698_v54 = vld [vmem:[%s2082_s19 + $0x4] ss:$16 sps:$4 sm:$0xff]   ;;  %v1701_v58 = vld [vmem:[%s2082_s19 + $0xc] ss:$16 sps:$4 sm:$0xff]   ;;  %v1676_v59 = vld [vmem:[%s2084_s17 + $0xc0] ss:$8 sps:$4 sm:$0xff]  }
  0x7c   : > { %v1672_v56 = vld [vmem:[%s2084_s17 + $0xc4] ss:$8 sps:$4 sm:$0xff]   ;;  %1076 = vmatprep.mubr.bf16.mxu1 %v1698_v54  ;;  %1127 = vmatprep.mubr.bf16.mxu0 %v1701_v58  ;;  %v1677_v60 = vld [vmem:[%s2084_s17 + $0x1c0] ss:$8 sps:$4 sm:$0xff]   ;;  %v1678_v61 = vld [vmem:[%s2084_s17 + $0xd4] ss:$8 sps:$4 sm:$0xff]  }
  0x7d   : > { %1053 = vmatpush1.bf16.msra.mxu1 %v1628_v25  ;;  %v1674_v57 = vld [vmem:[%s2084_s17 + $0x1c4] ss:$8 sps:$4 sm:$0xff]   ;;  %v1680_v62 = vld [vmem:[%s2084_s17 + $0x1d4] ss:$8 sps:$4 sm:$0xff]   ;;  %v1682_v63 = vld [vmem:[%s2084_s17 + $0xd0] ss:$8 sps:$4 sm:$0xff]  }
  0x7e   : > { %1104 = vmatpush1.bf16.msra.mxu0 %v1629_v26  ;;  %1054 = vmatprep.subr.bf16.mxu1 %v1630_v27  ;;  %v1683_v0 = vld [vmem:[%s2084_s17 + $0x1d0] ss:$8 sps:$4 sm:$0xff]   ;;  %v1684_v1 = vld [vmem:[%s2084_s17 + $0xe4] ss:$8 sps:$4 sm:$0xff]   ;;  %v1688_v3 = vld [vmem:[%s2084_s17 + $0xe0] ss:$8 sps:$4 sm:$0xff]  }
  0x7f   : > { %1105 = vmatprep.subr.bf16.mxu0 %v1632_v28  ;;  %v1686_v2 = vld [vmem:[%s2084_s17 + $0x1e4] ss:$8 sps:$4 sm:$0xff]   ;;  %v1689_v4 = vld [vmem:[%s2084_s17 + $0x1e0] ss:$8 sps:$4 sm:$0xff]   ;;  %v1690_v5 = vld [vmem:[%s2084_s17 + $0xf4] ss:$8 sps:$4 sm:$0xff]  }
  0x80   : > { %v1692_v6 = vld [vmem:[%s2084_s17 + $0x1f4] ss:$8 sps:$4 sm:$0xff]   ;;  %v1694_v7 = vld [vmem:[%s2084_s17 + $0xf0] ss:$8 sps:$4 sm:$0xff]   ;;  %v616_v26 = vld [vmem:[#allocation2 + $0x10] sm:$0xff]  ;;  %p1490_p5 = scmp.ne.s32.totalorder %s1776_s21, 1 }
  0x81   : > { %1055 = vmatpush1.bf16.msra.mxu1 %v1634_v29  ;;  %v1695_v8 = vld [vmem:[%s2084_s17 + $0x1f0] ss:$8 sps:$4 sm:$0xff]  }
  0x82   : > { %1106 = vmatpush1.bf16.msra.mxu0 %v1635_v30  ;;  %1056 = vmatprep.subr.bf16.mxu1 %v1636_v31  ;;  %v624_v9 = vld [vmem:[%s2082_s19 + $0x20] sm:$0xff]  ;;  %v625_v10 = vld [vmem:[%s2082_s19 + $0x28] sm:$0xff] }
  0x83   : > { %1107 = vmatprep.subr.bf16.mxu0 %v1638_v32  ;;  %v1696_v11 = vld [vmem:[%s2082_s19] ss:$16 sps:$4 sm:$0xff]   ;;  %v1699_v12 = vld [vmem:[%s2082_s19 + $0x8] ss:$16 sps:$4 sm:$0xff]   ;;  %v1423_v13 = vcombine.high %v624_v9, %v624_v9  ;;  %v1425_v14 = vcombine.high %v625_v10, %v625_v10  ;;  %v1422_v15 = vcombine.low %v624_v9, %v624_v9  ;;  %v1424_v16 = vcombine.low %v625_v10, %v625_v10 }
  0x84   : > { %v614_v18 = vld [vmem:[#allocation2] sm:$0xff]  ;;  %v615_v22 = vld [vmem:[#allocation2 + $0x8] sm:$0xff]  ;;  %v617_v31 = vld [vmem:[#allocation2 + $0x18] sm:$0xff] }
  0x85   : > { %1057 = vmatpush1.bf16.msra.mxu1 %v1640_v33  ;;  %v1186_v54 = vld [vmem:[%s600_s27] sm:$0x3] (!%p1490_p5) }
  0x86   : > { %1108 = vmatpush1.bf16.msra.mxu0 %v1641_v34  ;;  %1058 = vmatprep.subr.bf16.mxu1 %v1642_v35 }
  0x87   : > { %1109 = vmatprep.subr.bf16.mxu0 %v1644_v36 }
  0x89   : > { %1059 = vmatpush1.bf16.msra.mxu1 %v1646_v37 }
  0x8a   : > { %1110 = vmatpush1.bf16.msra.mxu0 %v1647_v38  ;;  %1060 = vmatprep.subr.bf16.mxu1 %v1648_v39  ;;  %v618_v38 = vld [vmem:[#allocation2 + $0x20] sm:$0xff] }
  0x8b   : > { %1111 = vmatprep.subr.bf16.mxu0 %v1650_v40 }
  0x8d   : > { %1061 = vmatpush1.bf16.msra.mxu1 %v1652_v41 }
  0x8e   : > { %1112 = vmatpush1.bf16.msra.mxu0 %v1653_v42  ;;  %1062 = vmatprep.subr.bf16.mxu1 %v1654_v43  ;;  %v619_v42 = vld [vmem:[#allocation2 + $0x28] sm:$0xff] }
  0x8f   : > { %1113 = vmatprep.subr.bf16.mxu0 %v1656_v44 }
  0x91   : > { %1063 = vmatpush1.bf16.msra.mxu1 %v1658_v45 }
  0x92   : > { %1114 = vmatpush1.bf16.msra.mxu0 %v1659_v46  ;;  %1064 = vmatprep.subr.bf16.mxu1 %v1660_v47 }
  0x93   : > { %1115 = vmatprep.subr.bf16.mxu0 %v1662_v48 }
  0x95   : > { %1065 = vmatpush1.bf16.msra.mxu1 %v1664_v49 }
  0x96   : > { %1116 = vmatpush1.bf16.msra.mxu0 %v1665_v50  ;;  %1066 = vmatprep.subr.bf16.mxu1 %v1666_v51  ;;  %v1170_v51 = vlaneseq (!%p1490_p5) }
  0x97   : > { %1117 = vmatprep.subr.bf16.mxu0 %v1668_v52 }
  0x98   : > { %v1171_v52 = vshrl.u32 (!%p1490_p5), %v1170_v51, 7 }
  0x99   : > { %1067 = vmatpush1.bf16.msra.mxu1 %v1670_v53  ;;  %v1168_v53 = vld [vmem:[%s595_s8] sm:$0x3] (!%p1490_p5) }
  0x9a   : > { %1118 = vmatpush1.bf16.msra.mxu0 %v1671_v55  ;;  %1068 = vmatprep.subr.bf16.mxu1 %v1672_v56  ;;  %v1172_v56 = vsub.s32 (!%p1490_p5), 0, %v1171_v52 }
  0x9b   : > { %1119 = vmatprep.subr.bf16.mxu0 %v1674_v57  ;;  %v1176_v57 = vsub.s32 (!%p1490_p5), 1, %v1171_v52 }
  0x9d   : > { %1069 = vmatpush1.bf16.msra.mxu1 %v1676_v59 }
  0x9e   : > { %1120 = vmatpush1.bf16.msra.mxu0 %v1677_v60  ;;  %1070 = vmatprep.subr.bf16.mxu1 %v1678_v61  ;;  %v1173_v61 = vrot.slane (!%p1490_p5), %v1168_v53, %v1172_v56 }
  0x9f   : > { %1121 = vmatprep.subr.bf16.mxu0 %v1680_v62  ;;  %v1177_v62 = vrot.slane (!%p1490_p5), %v1168_v53, %v1176_v57 }
  0xa1   : > { %1071 = vmatpush1.bf16.msra.mxu1 %v1682_v63  ;;  %v1191_v63 = vrot.slane (!%p1490_p5), %v1186_v54, %v1172_v56 }
  0xa2   : > { %1122 = vmatpush1.bf16.msra.mxu0 %v1683_v0  ;;  %1072 = vmatprep.subr.bf16.mxu1 %v1684_v1  ;;  %v1195_v0 = vrot.slane (!%p1490_p5), %v1186_v54, %v1176_v57 }
  0xa3   : > { %1123 = vmatprep.subr.bf16.mxu0 %v1686_v2 }
  0xa5   : > { %1073 = vmatpush1.bf16.msra.mxu1 %v1688_v3 }
  0xa6   : > { %1124 = vmatpush1.bf16.msra.mxu0 %v1689_v4  ;;  %1074 = vmatprep.subr.bf16.mxu1 %v1690_v5 }
  0xa7   : > { %1125 = vmatprep.subr.bf16.mxu0 %v1692_v6 }
  0xa9   : > { %1075 = vmatpush1.bf16.msra.mxu1 %v1694_v7 }
  0xaa   : > { %1126 = vmatpush1.bf16.msra.mxu0 %v1695_v8 }
  0xac   : > { %1077 = vmatmul.mubr.bf16.vlgmr.msra.gmra.mrb[0].mxu1 %v1696_v11 }
  0xad   : > { %1128 = vmatmul.mubr.bf16.vlgmr.msra.gmra.mrb[0].mxu0 %v1699_v12  ;;  %1086 = vmatprep.mubr.bf16.mxu1 %v1423_v13 }
  0xae   : > { %1137 = vmatprep.mubr.bf16.mxu0 %v1425_v14 }
  0xb4   : > { %1087 = vmatmul.mubr.bf16.gmra.mrb[4].mxu1 %v1422_v15 }
  0xb5   : > { %1138 = vmatmul.mubr.bf16.gmra.mrb[4].mxu0 %v1424_v16 }
 0x17f   : > { %v1078_v17 = vpop.f32.mrb[0].mxu1 }
 0x180   : > { %v1129_v19 = vpop.f32.mrb[0].mxu0  ;;  %v1080_v21 = vpop.f32.mrb[1].mxu1 }
 0x181   : > { %v1130_v20 = vadd.f32 %v1129_v19, %v1078_v17  ;;  %v1131_v23 = vpop.f32.mrb[1].mxu0  ;;  %v1082_v25 = vpop.f32.mrb[2].mxu1 }
 0x182   : > { %v1132_v24 = vadd.f32 %v1131_v23, %v1080_v21  ;;  %v1133_v27 = vpop.f32.mrb[2].mxu0  ;;  %v1084_v30 = vpop.f32.mrb[3].mxu1 }
 0x183   : > { %v1146_v28 = vadd.f32 %v1130_v20, %v614_v18  ;;  %v1134_v29 = vadd.f32 %v1133_v27, %v1082_v25  ;;  %v1135_v32 = vpop.f32.mrb[3].mxu0 }
 0x184   : > { %v1147_v33 = vadd.f32 %v1132_v24, %v615_v22  ;;  %v1136_v34 = vadd.f32 %v1135_v32, %v1084_v30 }
 0x185   : > { %1152 = vst [vmem:[#allocation2] sm:$0xff] %v1146_v28  ;;  %v1148_v35 = vadd.f32 %v1134_v29, %v616_v26 }
 0x186   : > { %1153 = vst [vmem:[#allocation2 + $0x8] sm:$0xff] %v1147_v33  ;;  %v1149_v36 = vadd.f32 %v1136_v34, %v617_v31 }
 0x187   : > { %1154 = vst [vmem:[#allocation2 + $0x10] sm:$0xff] %v1148_v35  ;;  %v1088_v37 = vpop.f32.mrb[4].mxu1 }
 0x188   : > { %1155 = vst [vmem:[#allocation2 + $0x18] sm:$0xff] %v1149_v36  ;;  %v1139_v39 = vpop.f32.mrb[4].mxu0  ;;  %v1090_v41 = vpop.f32.mrb[5].mxu1  ;;  %1161 = sbr.rel (%p1490_p5) target bundleno = 415 (0x19f), region = 105 }
 0x189   : > { %v1140_v40 = vadd.f32 %v1139_v39, %v1088_v37  ;;  %v1141_v43 = vpop.f32.mrb[5].mxu0  ;;  %v1092_v45 = vpop.f32.mrb[6].mxu1 }
 0x18a   : > { %v1142_v44 = vadd.f32 %v1141_v43, %v1090_v41  ;;  %v1143_v46 = vpop.f32.mrb[6].mxu0  ;;  %v1093_v48 = vpop.f32.mrb[7].mxu1 }
 0x18b   : > { %v1150_v47 = vadd.f32 %v1140_v40, %v618_v38  ;;  %v1144_v49 = vpop.f32.mrb[7].mxu0 }
 0x18c   : > { %v1151_v50 = vadd.f32 %v1142_v44, %v619_v42  ;;  %v1162_v55 = vld [vmem:[#allocation2] sm:$0xff] (!%p1490_p5) }
 0x18d   : > { %1156 = vst [vmem:[#allocation2 + $0x20] sm:$0xff] %v1150_v47  ;;  %v1163_v58 = vld [vmem:[#allocation2 + $0x8] sm:$0xff] (!%p1490_p5)  ;;  %v1180_v3 = vmul.f32 (!%p1490_p5), %v1173_v61, %v1162_v55 }
 0x18e   : > { %1157 = vst [vmem:[#allocation2 + $0x28] sm:$0xff] %v1151_v50  ;;  %v1164_v59 = vld [vmem:[#allocation2 + $0x10] sm:$0xff] (!%p1490_p5)  ;;  %v1181_v4 = vmul.f32 (!%p1490_p5), %v1177_v62, %v1163_v58 }
 0x18f   : > { %v1165_v60 = vld [vmem:[#allocation2 + $0x18] sm:$0xff]  ;;  %v1182_v5 = vmul.f32 %v1173_v61, %v1164_v59  ;;  %v1198_v9 = vadd.f32 %v1191_v63, %v1180_v3 }
 0x190   : > { %v1183_v6 = vmul.f32 %v1177_v62, %v1165_v60  ;;  %v1199_v10 = vadd.f32 %v1195_v0, %v1181_v4 }
 0x191   : > { %v1200_v11 = vadd.f32 %v1191_v63, %v1182_v5  ;;  %v1204_v15 = vmax.f32 %v1198_v9, 0.0 }
 0x192   : > { %v1201_v12 = vadd.f32 %v1195_v0, %v1183_v6  ;;  %v1205_v16 = vmax.f32 %v1199_v10, 0.0 }
 0x193   : > { %v1206_v17 = vmax.f32 %v1200_v11, 0.0 }
 0x194   : > { %v1166_v1 = vld [vmem:[#allocation2 + $0x20] sm:$0xff]  ;;  %v1207_v18 = vmax.f32 %v1201_v12, 0.0  ;;  %v1500_v21 = vpack.c.bf16 %v1205_v16, %v1204_v15 }
 0x195   : > { %v1167_v2 = vld [vmem:[#allocation2 + $0x28] sm:$0xff]  ;;  %v1184_v7 = vmul.f32 %v1173_v61, %v1166_v1 }
 0x196   : > { %v1185_v8 = vmul.f32 %v1177_v62, %v1167_v2  ;;  %v1501_v22 = vpack.c.bf16 %v1207_v18, %v1206_v17  ;;  %1230 = vst [vmem:[%s2086_s15] sm:$0xff] %v1500_v21 }
 0x197   : > { %v1202_v13 = vadd.f32 %v1191_v63, %v1184_v7 }
 0x198   : > { %v1203_v14 = vadd.f32 %v1195_v0, %v1185_v8  ;;  %1231 = vst [vmem:[%s2086_s15 + $0x8] sm:$0xff] %v1501_v22 }
 0x199   : > { %v1208_v19 = vmax.f32 %v1202_v13, 0.0 }
 0x19a   : > { %v1209_v20 = vmax.f32 %v1203_v14, 0.0 }
 0x19c   : > { %v1502_v23 = vpack.c.bf16 %v1209_v20, %v1208_v19 }
 0x19e   : > { %1232 = vst [vmem:[%s2086_s15 + $0x10] sm:$0xff] %v1502_v23 }
 0x19f PF: > { %1239 = sbr.rel (!%p1914_p12) target bundleno = 423 (0x1a7), region = 109  ;;  %s1503_s21 = sshll.u32 (%p1914_p12), %s1780_s22, 3  ;;  %v1277_v24 = vld [vmem:[%s2086_s15] sm:$0xff] (%p1914_p12)  ;;  %v1279_v25 = vld [vmem:[%s2086_s15 + $0x8] sm:$0xff] (%p1914_p12) }
 0x1a0   : > { %s1245_s30 = scalar_lea.vmem (%p1914_p12), %s2219_s4, %s1503_s21 }
 0x1a1   : > { %1278 = vst [vmem:[%s1245_s30] sm:$0xff] (%p1914_p12), %v1277_v24  ;;  %1280 = vst [vmem:[%s1245_s30 + $0x10] sm:$0xff] (%p1914_p12), %v1279_v25 }
 0x1a5   : > { %v1281_v26 = vld [vmem:[%s2086_s15 + $0x10] sm:$0xff] (%p1914_p12) }
 0x1a6   : > { %1282 = vst [vmem:[%s1245_s30 + $0x20] sm:$0xff] %v1281_v26 }
 0x1a7 PF: > { %s14_s25 = sadd.s32 1, %s1792_s25   ;;  %s2231_s14 = sld [smem:[#allocation6_spill]] }
 0x1a8   : > { %p11_p6 = scmp.ge.s32.totalorder %s14_s25, 6   ;;  %s2232_s6 = sld [smem:[#allocation7_spill]] }
 0x1a9   : > { %s2233_s15 = smov %s1756_s16  ;;  %s2234_s16 = smov %s1912_s13 }
 0x1aa   : > { %s2235_s17 = smov %s1764_s18  ;;  %s2236_s18 = smov %s1909_s12 }
 0x1ab   : > { %s2237_s19 = smov %s1772_s20  ;;  %s2238_s20 = smov %s1895_s7 }
 0x1ac   : > { %s2239_s21 = smov %s1784_s23  ;;  %s2240_s22 = smov %s1788_s24 }
 0x1ad   : > { %s2241_s23 = smov %s2231_s14  ;;  %13 = sbr.rel (!%p11_p6) target bundleno = 9 (0x9), region = 192 }
 0x1ae   : > { %s2242_s24 = smov %s2232_s6 }

// kernel: deeplab_v2_forward.31
= control target key start
LH: loop header
LB: loop body
LE: loop exit
PB: predicated region body
PF: predicated region fallthrough
CT: control target
= control target key end

     0   :  { %s1690_s15 = smov 0   ;;  %s1692_s16 = smov 0   ;;  %s1989_s0 = inlined_call_operand.vmem [shape: bf16[24,512], index: 0, kind: input, shape index: {}]   ;;  %s1990_s1 = inlined_call_operand.vmem [shape: bf16[512,1024], index: 1, kind: input, shape index: {}]   ;;  %s1991_s2 = inlined_call_operand.vmem [shape: f32[1,1024], index: 2, kind: input, shape index: {}]   ;;  %s1992_s3 = inlined_call_operand.vmem [shape: f32[1,1024], index: 3, kind: input, shape index: {}]   ;;  %s1993_s4 = inlined_call_operand.vmem [shape: bf16[24,1024], index: 4, kind: output, shape index: {}]  }
   0x1   :  { %s1694_s17 = smov 0   ;;  %s1696_s18 = smov 0  }
   0x2   :  { %s1698_s19 = smov 0  }
   0x3 LB: > { %s29_s20 = sadd.s32 1, %s1659_s18  ;;  %s1376_s21 = sadd.s32 4294967295, %s1663_s19   ;;  %s1663_s19 = sphi %s1698_s19, %s14_s19   ;;  %s1659_s18 = sphi %s1696_s18, %s1998_s18   ;;  %s1655_s17 = sphi %s1694_s17, %s1997_s17   ;;  %s1651_s16 = sphi %s1692_s16, %s1996_s16   ;;  %s1647_s15 = sphi %s1690_s15, %s1995_s15  }
   0x4   : > { %p31_p0 = scmp.ge.s32.totalorder %s29_s20, 4  ;;  %p77_p1 = scmp.ne.s32.totalorder %s1651_s16, %s1647_s15 }
   0x5   : > { %p78_p2 = scmp.eq.s32.totalorder %s1663_s19, 0  ;;  %p161_p4 = scmp.eq.s32.totalorder %s1376_s21, 3 }
   0x6   : > { %s2000_s20 = smov (%p31_p0, %s29_s20), 0  ;;  %s70_s23 = sadd.s32 1, %s1651_s16 }
   0x7   : > { %p79_p3 = por %p78_p2, %p77_p1  ;;  %s66_s22 = ssub.s32 %s1659_s18, %s2000_s20 }
   0x8   : > { %p68_p5 = scmp.eq.s32.totalorder %s66_s22, 0  ;;  %p1725_p6 = por %p161_p4, %p77_p1 }
   0x9   : > { %p1380_p7 = scmp.ge.s32.totalorder %s1663_s19, 4 }
   0xa   : > { %s1730_s25 = scalar_select %p68_p5, %s1651_s16, %s70_s23  }
   0xb   : > { %198 = sbr.rel (%p1380_p7) target bundleno = 86 (0x56), region = 20 }
  0x12   : > { %201 = sbr.rel (!%p79_p3) target bundleno = 86 (0x56), region = 24  ;;  %s203_s26 = sand.u32 (%p79_p3), 1, %s1651_s16  }
  0x13   : > { %s1467_s27 = sshll.u32 (%p79_p3), %s1659_s18, 3  ;;  %s1381_s28 = sshll.u32 (%p79_p3), %s203_s26, 9 }
  0x14   : > { %s1738_s5 = scalar_lea.vmem (%p79_p3), %s1990_s1, %s1467_s27  ;;  %s1743_s6 = scalar_lea.vmem (%p79_p3), [#allocation3], %s1381_s28 }
  0x15   : > { %v365_v0 = vld [vmem:[%s1738_s5] sm:$0xff] (%p79_p3) }
  0x16   : > { %v367_v1 = vld [vmem:[%s1738_s5 + $0x20] sm:$0xff] (%p79_p3)  ;;  %366 = vst [vmem:[%s1743_s6] sm:$0xff] (%p79_p3), %v365_v0 }
  0x17   : > { %v369_v2 = vld [vmem:[%s1738_s5 + $0x40] sm:$0xff] (%p79_p3)  ;;  %368 = vst [vmem:[%s1743_s6 + $0x8] sm:$0xff] (%p79_p3), %v367_v1 }
  0x18   : > { %370 = vst [vmem:[%s1743_s6 + $0x10] sm:$0xff] (%p79_p3), %v369_v2  ;;  %v371_v3 = vld [vmem:[%s1738_s5 + $0x60] sm:$0xff] (%p79_p3) }
  0x19   : > { %v373_v4 = vld [vmem:[%s1738_s5 + $0x80] sm:$0xff]  ;;  %372 = vst [vmem:[%s1743_s6 + $0x18] sm:$0xff] %v371_v3 }
  0x1a   : > { %v375_v5 = vld [vmem:[%s1738_s5 + $0xa0] sm:$0xff]  ;;  %374 = vst [vmem:[%s1743_s6 + $0x20] sm:$0xff] %v373_v4 }
  0x1b   : > { %376 = vst [vmem:[%s1743_s6 + $0x28] sm:$0xff] %v375_v5  ;;  %v377_v6 = vld [vmem:[%s1738_s5 + $0xc0] sm:$0xff] }
  0x1c   : > { %v379_v7 = vld [vmem:[%s1738_s5 + $0xe0] sm:$0xff]  ;;  %378 = vst [vmem:[%s1743_s6 + $0x30] sm:$0xff] %v377_v6 }
  0x1d   : > { %v381_v8 = vld [vmem:[%s1738_s5 + $0x100] sm:$0xff]  ;;  %380 = vst [vmem:[%s1743_s6 + $0x38] sm:$0xff] %v379_v7 }
  0x1e   : > { %382 = vst [vmem:[%s1743_s6 + $0x40] sm:$0xff] %v381_v8  ;;  %v383_v9 = vld [vmem:[%s1738_s5 + $0x120] sm:$0xff] }
  0x1f   : > { %v385_v10 = vld [vmem:[%s1738_s5 + $0x140] sm:$0xff]  ;;  %384 = vst [vmem:[%s1743_s6 + $0x48] sm:$0xff] %v383_v9 }
  0x20   : > { %v387_v11 = vld [vmem:[%s1738_s5 + $0x160] sm:$0xff]  ;;  %386 = vst [vmem:[%s1743_s6 + $0x50] sm:$0xff] %v385_v10 }
  0x21   : > { %388 = vst [vmem:[%s1743_s6 + $0x58] sm:$0xff] %v387_v11  ;;  %v389_v12 = vld [vmem:[%s1738_s5 + $0x180] sm:$0xff] }
  0x22   : > { %v391_v13 = vld [vmem:[%s1738_s5 + $0x1a0] sm:$0xff]  ;;  %390 = vst [vmem:[%s1743_s6 + $0x60] sm:$0xff] %v389_v12 }
  0x23   : > { %v393_v14 = vld [vmem:[%s1738_s5 + $0x1c0] sm:$0xff]  ;;  %392 = vst [vmem:[%s1743_s6 + $0x68] sm:$0xff] %v391_v13 }
  0x24   : > { %394 = vst [vmem:[%s1743_s6 + $0x70] sm:$0xff] %v393_v14  ;;  %v395_v15 = vld [vmem:[%s1738_s5 + $0x1e0] sm:$0xff] }
  0x25   : > { %v397_v16 = vld [vmem:[%s1738_s5 + $0x200] sm:$0xff]  ;;  %396 = vst [vmem:[%s1743_s6 + $0x78] sm:$0xff] %v395_v15 }
  0x26   : > { %v399_v17 = vld [vmem:[%s1738_s5 + $0x220] sm:$0xff]  ;;  %398 = vst [vmem:[%s1743_s6 + $0x80] sm:$0xff] %v397_v16 }
  0x27   : > { %400 = vst [vmem:[%s1743_s6 + $0x88] sm:$0xff] %v399_v17  ;;  %v401_v18 = vld [vmem:[%s1738_s5 + $0x240] sm:$0xff] }
  0x28   : > { %v403_v19 = vld [vmem:[%s1738_s5 + $0x260] sm:$0xff]  ;;  %402 = vst [vmem:[%s1743_s6 + $0x90] sm:$0xff] %v401_v18 }
  0x29   : > { %v405_v20 = vld [vmem:[%s1738_s5 + $0x280] sm:$0xff]  ;;  %404 = vst [vmem:[%s1743_s6 + $0x98] sm:$0xff] %v403_v19 }
  0x2a   : > { %406 = vst [vmem:[%s1743_s6 + $0xa0] sm:$0xff] %v405_v20  ;;  %v407_v21 = vld [vmem:[%s1738_s5 + $0x2a0] sm:$0xff] }
  0x2b   : > { %v409_v22 = vld [vmem:[%s1738_s5 + $0x2c0] sm:$0xff]  ;;  %408 = vst [vmem:[%s1743_s6 + $0xa8] sm:$0xff] %v407_v21 }
  0x2c   : > { %v411_v23 = vld [vmem:[%s1738_s5 + $0x2e0] sm:$0xff]  ;;  %410 = vst [vmem:[%s1743_s6 + $0xb0] sm:$0xff] %v409_v22 }
  0x2d   : > { %412 = vst [vmem:[%s1743_s6 + $0xb8] sm:$0xff] %v411_v23  ;;  %v413_v24 = vld [vmem:[%s1738_s5 + $0x300] sm:$0xff] }
  0x2e   : > { %v415_v25 = vld [vmem:[%s1738_s5 + $0x320] sm:$0xff]  ;;  %414 = vst [vmem:[%s1743_s6 + $0xc0] sm:$0xff] %v413_v24 }
  0x2f   : > { %v417_v26 = vld [vmem:[%s1738_s5 + $0x340] sm:$0xff]  ;;  %416 = vst [vmem:[%s1743_s6 + $0xc8] sm:$0xff] %v415_v25 }
  0x30   : > { %418 = vst [vmem:[%s1743_s6 + $0xd0] sm:$0xff] %v417_v26  ;;  %v419_v27 = vld [vmem:[%s1738_s5 + $0x360] sm:$0xff] }
  0x31   : > { %v421_v28 = vld [vmem:[%s1738_s5 + $0x380] sm:$0xff]  ;;  %420 = vst [vmem:[%s1743_s6 + $0xd8] sm:$0xff] %v419_v27 }
  0x32   : > { %v423_v29 = vld [vmem:[%s1738_s5 + $0x3a0] sm:$0xff]  ;;  %422 = vst [vmem:[%s1743_s6 + $0xe0] sm:$0xff] %v421_v28 }
  0x33   : > { %424 = vst [vmem:[%s1743_s6 + $0xe8] sm:$0xff] %v423_v29  ;;  %v425_v30 = vld [vmem:[%s1738_s5 + $0x3c0] sm:$0xff] }
  0x34   : > { %v427_v31 = vld [vmem:[%s1738_s5 + $0x3e0] sm:$0xff]  ;;  %426 = vst [vmem:[%s1743_s6 + $0xf0] sm:$0xff] %v425_v30 }
  0x35   : > { %v429_v32 = vld [vmem:[%s1738_s5 + $0x400] sm:$0xff]  ;;  %428 = vst [vmem:[%s1743_s6 + $0xf8] sm:$0xff] %v427_v31 }
  0x36   : > { %430 = vst [vmem:[%s1743_s6 + $0x100] sm:$0xff] %v429_v32  ;;  %v431_v33 = vld [vmem:[%s1738_s5 + $0x420] sm:$0xff] }
  0x37   : > { %v433_v34 = vld [vmem:[%s1738_s5 + $0x440] sm:$0xff]  ;;  %432 = vst [vmem:[%s1743_s6 + $0x108] sm:$0xff] %v431_v33 }
  0x38   : > { %v435_v35 = vld [vmem:[%s1738_s5 + $0x460] sm:$0xff]  ;;  %434 = vst [vmem:[%s1743_s6 + $0x110] sm:$0xff] %v433_v34 }
  0x39   : > { %436 = vst [vmem:[%s1743_s6 + $0x118] sm:$0xff] %v435_v35  ;;  %v437_v36 = vld [vmem:[%s1738_s5 + $0x480] sm:$0xff] }
  0x3a   : > { %v439_v37 = vld [vmem:[%s1738_s5 + $0x4a0] sm:$0xff]  ;;  %438 = vst [vmem:[%s1743_s6 + $0x120] sm:$0xff] %v437_v36 }
  0x3b   : > { %v441_v38 = vld [vmem:[%s1738_s5 + $0x4c0] sm:$0xff]  ;;  %440 = vst [vmem:[%s1743_s6 + $0x128] sm:$0xff] %v439_v37 }
  0x3c   : > { %442 = vst [vmem:[%s1743_s6 + $0x130] sm:$0xff] %v441_v38  ;;  %v443_v39 = vld [vmem:[%s1738_s5 + $0x4e0] sm:$0xff] }
  0x3d   : > { %v445_v40 = vld [vmem:[%s1738_s5 + $0x500] sm:$0xff]  ;;  %444 = vst [vmem:[%s1743_s6 + $0x138] sm:$0xff] %v443_v39 }
  0x3e   : > { %v447_v41 = vld [vmem:[%s1738_s5 + $0x520] sm:$0xff]  ;;  %446 = vst [vmem:[%s1743_s6 + $0x140] sm:$0xff] %v445_v40 }
  0x3f   : > { %448 = vst [vmem:[%s1743_s6 + $0x148] sm:$0xff] %v447_v41  ;;  %v449_v42 = vld [vmem:[%s1738_s5 + $0x540] sm:$0xff] }
  0x40   : > { %v451_v43 = vld [vmem:[%s1738_s5 + $0x560] sm:$0xff]  ;;  %450 = vst [vmem:[%s1743_s6 + $0x150] sm:$0xff] %v449_v42 }
  0x41   : > { %v453_v44 = vld [vmem:[%s1738_s5 + $0x580] sm:$0xff]  ;;  %452 = vst [vmem:[%s1743_s6 + $0x158] sm:$0xff] %v451_v43 }
  0x42   : > { %454 = vst [vmem:[%s1743_s6 + $0x160] sm:$0xff] %v453_v44  ;;  %v455_v45 = vld [vmem:[%s1738_s5 + $0x5a0] sm:$0xff] }
  0x43   : > { %v457_v46 = vld [vmem:[%s1738_s5 + $0x5c0] sm:$0xff]  ;;  %456 = vst [vmem:[%s1743_s6 + $0x168] sm:$0xff] %v455_v45 }
  0x44   : > { %v459_v47 = vld [vmem:[%s1738_s5 + $0x5e0] sm:$0xff]  ;;  %458 = vst [vmem:[%s1743_s6 + $0x170] sm:$0xff] %v457_v46 }
  0x45   : > { %460 = vst [vmem:[%s1743_s6 + $0x178] sm:$0xff] %v459_v47  ;;  %v461_v48 = vld [vmem:[%s1738_s5 + $0x600] sm:$0xff] }
  0x46   : > { %v463_v49 = vld [vmem:[%s1738_s5 + $0x620] sm:$0xff]  ;;  %462 = vst [vmem:[%s1743_s6 + $0x180] sm:$0xff] %v461_v48 }
  0x47   : > { %v465_v50 = vld [vmem:[%s1738_s5 + $0x640] sm:$0xff]  ;;  %464 = vst [vmem:[%s1743_s6 + $0x188] sm:$0xff] %v463_v49 }
  0x48   : > { %466 = vst [vmem:[%s1743_s6 + $0x190] sm:$0xff] %v465_v50  ;;  %v467_v51 = vld [vmem:[%s1738_s5 + $0x660] sm:$0xff] }
  0x49   : > { %v469_v52 = vld [vmem:[%s1738_s5 + $0x680] sm:$0xff]  ;;  %468 = vst [vmem:[%s1743_s6 + $0x198] sm:$0xff] %v467_v51 }
  0x4a   : > { %v471_v53 = vld [vmem:[%s1738_s5 + $0x6a0] sm:$0xff]  ;;  %470 = vst [vmem:[%s1743_s6 + $0x1a0] sm:$0xff] %v469_v52 }
  0x4b   : > { %472 = vst [vmem:[%s1743_s6 + $0x1a8] sm:$0xff] %v471_v53  ;;  %v473_v54 = vld [vmem:[%s1738_s5 + $0x6c0] sm:$0xff] }
  0x4c   : > { %v475_v55 = vld [vmem:[%s1738_s5 + $0x6e0] sm:$0xff]  ;;  %474 = vst [vmem:[%s1743_s6 + $0x1b0] sm:$0xff] %v473_v54 }
  0x4d   : > { %v477_v56 = vld [vmem:[%s1738_s5 + $0x700] sm:$0xff]  ;;  %476 = vst [vmem:[%s1743_s6 + $0x1b8] sm:$0xff] %v475_v55 }
  0x4e   : > { %478 = vst [vmem:[%s1743_s6 + $0x1c0] sm:$0xff] %v477_v56  ;;  %v479_v57 = vld [vmem:[%s1738_s5 + $0x720] sm:$0xff] }
  0x4f   : > { %v481_v58 = vld [vmem:[%s1738_s5 + $0x740] sm:$0xff]  ;;  %480 = vst [vmem:[%s1743_s6 + $0x1c8] sm:$0xff] %v479_v57 }
  0x50   : > { %v483_v59 = vld [vmem:[%s1738_s5 + $0x760] sm:$0xff]  ;;  %482 = vst [vmem:[%s1743_s6 + $0x1d0] sm:$0xff] %v481_v58 }
  0x51   : > { %484 = vst [vmem:[%s1743_s6 + $0x1d8] sm:$0xff] %v483_v59  ;;  %v485_v60 = vld [vmem:[%s1738_s5 + $0x780] sm:$0xff] }
  0x52   : > { %v487_v61 = vld [vmem:[%s1738_s5 + $0x7a0] sm:$0xff]  ;;  %486 = vst [vmem:[%s1743_s6 + $0x1e0] sm:$0xff] %v485_v60 }
  0x53   : > { %v489_v62 = vld [vmem:[%s1738_s5 + $0x7c0] sm:$0xff]  ;;  %488 = vst [vmem:[%s1743_s6 + $0x1e8] sm:$0xff] %v487_v61 }
  0x54   : > { %490 = vst [vmem:[%s1743_s6 + $0x1f0] sm:$0xff] %v489_v62  ;;  %v491_v63 = vld [vmem:[%s1738_s5 + $0x7e0] sm:$0xff] }
  0x55   : > { %492 = vst [vmem:[%s1743_s6 + $0x1f8] sm:$0xff] %v491_v63 }
  0x56 PF: > { %p1384_p8 = scmp.ge.s32.totalorder %s1663_s19, 1  ;;  %p513_p9 = scmp.lt.s32.totalorder %s1663_s19, 5 }
  0x58   : > { %p514_p10 = pnand %p1384_p8, %p513_p9 }
  0x59   : > { %s520_s7 = sand.u32 (!%p514_p10), 1, %s1647_s15   ;;  %v1617_v0 = vld [vmem:[%s1989_s0 + $0x4] ss:$16 sps:$4 sm:$0xff] (!%p514_p10)   ;;  %v1620_v1 = vld [vmem:[%s1989_s0 + $0xc] ss:$16 sps:$4 sm:$0xff] (!%p514_p10)   ;;  %s1386_s30 = sshll.u32 (!%p514_p10), %s1655_s17, 1 }
  0x5a   : > { %517 = sbr.rel (%p514_p10) target bundleno = 396 (0x18c), region = 70  ;;  %s1385_s8 = sshll.u32 (!%p514_p10), %s520_s7, 9  ;;  %1060 = vmatprep.mubr.bf16.mxu1 (!%p514_p10), %v1617_v0  ;;  %1111 = vmatprep.mubr.bf16.mxu0 (!%p514_p10), %v1620_v1 }
  0x5b   : > { %s1881_s13 = scalar_lea.vmem (!%p514_p10), [#allocation3], %s1385_s8  ;;  %p577_p11 = scmp.lt.s32.totalorder (!%p514_p10), %s1386_s30, 7 }
  0x5c   : > { %v1519_v2 = vld [vmem:[%s1881_s13 + $0x4] ss:$8 sps:$4 sm:$0xff] (!%p514_p10)   ;;  %v1523_v4 = vld [vmem:[%s1881_s13] ss:$8 sps:$4 sm:$0xff] (!%p514_p10)   ;;  %v1525_v6 = vld [vmem:[%s1881_s13 + $0x14] ss:$8 sps:$4 sm:$0xff] (!%p514_p10)  }
  0x5d   : > { %v1521_v3 = vld [vmem:[%s1881_s13 + $0x104] ss:$8 sps:$4 sm:$0xff] (!%p514_p10)   ;;  %1028 = vmatprep.subr.bf16.mxu1 (!%p514_p10), %v1519_v2  ;;  %v1524_v5 = vld [vmem:[%s1881_s13 + $0x100] ss:$8 sps:$4 sm:$0xff] (!%p514_p10)   ;;  %v1527_v7 = vld [vmem:[%s1881_s13 + $0x114] ss:$8 sps:$4 sm:$0xff] (!%p514_p10)  }
  0x5e   : > { %1079 = vmatprep.subr.bf16.mxu0 (!%p514_p10), %v1521_v3  ;;  %1029 = vmatpush1.bf16.msra.mxu1 (!%p514_p10), %v1523_v4  ;;  %v1529_v8 = vld [vmem:[%s1881_s13 + $0x10] ss:$8 sps:$4 sm:$0xff] (!%p514_p10)   ;;  %v1531_v10 = vld [vmem:[%s1881_s13 + $0x24] ss:$8 sps:$4 sm:$0xff] (!%p514_p10)   ;;  %v1535_v12 = vld [vmem:[%s1881_s13 + $0x20] ss:$8 sps:$4 sm:$0xff] (!%p514_p10)  }
  0x5f   : > { %1080 = vmatpush1.bf16.msra.mxu0 (!%p514_p10), %v1524_v5  ;;  %1030 = vmatprep.subr.bf16.mxu1 (!%p514_p10), %v1525_v6  ;;  %v1530_v9 = vld [vmem:[%s1881_s13 + $0x110] ss:$8 sps:$4 sm:$0xff] (!%p514_p10)   ;;  %v1533_v11 = vld [vmem:[%s1881_s13 + $0x124] ss:$8 sps:$4 sm:$0xff] (!%p514_p10)   ;;  %v1536_v13 = vld [vmem:[%s1881_s13 + $0x120] ss:$8 sps:$4 sm:$0xff] (!%p514_p10)  }
  0x60   : > { %1081 = vmatprep.subr.bf16.mxu0 (!%p514_p10), %v1527_v7  ;;  %v1537_v14 = vld [vmem:[%s1881_s13 + $0x34] ss:$8 sps:$4 sm:$0xff] (!%p514_p10)   ;;  %v1541_v16 = vld [vmem:[%s1881_s13 + $0x30] ss:$8 sps:$4 sm:$0xff] (!%p514_p10)   ;;  %v1543_v18 = vld [vmem:[%s1881_s13 + $0x44] ss:$8 sps:$4 sm:$0xff] (!%p514_p10)  }
  0x61   : > { %v1539_v15 = vld [vmem:[%s1881_s13 + $0x134] ss:$8 sps:$4 sm:$0xff]   ;;  %v1542_v17 = vld [vmem:[%s1881_s13 + $0x130] ss:$8 sps:$4 sm:$0xff]   ;;  %v1545_v19 = vld [vmem:[%s1881_s13 + $0x144] ss:$8 sps:$4 sm:$0xff]  }
  0x62   : > { %1031 = vmatpush1.bf16.msra.mxu1 %v1529_v8  ;;  %v1547_v20 = vld [vmem:[%s1881_s13 + $0x40] ss:$8 sps:$4 sm:$0xff]   ;;  %v1549_v22 = vld [vmem:[%s1881_s13 + $0x54] ss:$8 sps:$4 sm:$0xff]   ;;  %v1553_v24 = vld [vmem:[%s1881_s13 + $0x50] ss:$8 sps:$4 sm:$0xff]  }
  0x63   : > { %1082 = vmatpush1.bf16.msra.mxu0 %v1530_v9  ;;  %1032 = vmatprep.subr.bf16.mxu1 %v1531_v10  ;;  %v1548_v21 = vld [vmem:[%s1881_s13 + $0x140] ss:$8 sps:$4 sm:$0xff]   ;;  %v1551_v23 = vld [vmem:[%s1881_s13 + $0x154] ss:$8 sps:$4 sm:$0xff]   ;;  %v1554_v25 = vld [vmem:[%s1881_s13 + $0x150] ss:$8 sps:$4 sm:$0xff]   ;;  %v1153_v10 = vlaneseq }
  0x64   : > { %1083 = vmatprep.subr.bf16.mxu0 %v1533_v11  ;;  %v1555_v26 = vld [vmem:[%s1881_s13 + $0x64] ss:$8 sps:$4 sm:$0xff]   ;;  %v1559_v28 = vld [vmem:[%s1881_s13 + $0x60] ss:$8 sps:$4 sm:$0xff]   ;;  %v1561_v30 = vld [vmem:[%s1881_s13 + $0x74] ss:$8 sps:$4 sm:$0xff]  }
  0x65   : > { %v1557_v27 = vld [vmem:[%s1881_s13 + $0x164] ss:$8 sps:$4 sm:$0xff]   ;;  %v1560_v29 = vld [vmem:[%s1881_s13 + $0x160] ss:$8 sps:$4 sm:$0xff]   ;;  %v1563_v31 = vld [vmem:[%s1881_s13 + $0x174] ss:$8 sps:$4 sm:$0xff]  }
  0x66   : > { %1033 = vmatpush1.bf16.msra.mxu1 %v1535_v12  ;;  %v1565_v32 = vld [vmem:[%s1881_s13 + $0x70] ss:$8 sps:$4 sm:$0xff]   ;;  %v1567_v34 = vld [vmem:[%s1881_s13 + $0x84] ss:$8 sps:$4 sm:$0xff]   ;;  %v1571_v36 = vld [vmem:[%s1881_s13 + $0x80] ss:$8 sps:$4 sm:$0xff]  }
  0x67   : > { %1084 = vmatpush1.bf16.msra.mxu0 %v1536_v13  ;;  %1034 = vmatprep.subr.bf16.mxu1 %v1537_v14  ;;  %v1566_v33 = vld [vmem:[%s1881_s13 + $0x170] ss:$8 sps:$4 sm:$0xff]   ;;  %v1569_v35 = vld [vmem:[%s1881_s13 + $0x184] ss:$8 sps:$4 sm:$0xff]   ;;  %v1572_v37 = vld [vmem:[%s1881_s13 + $0x180] ss:$8 sps:$4 sm:$0xff]  }
  0x68   : > { %1085 = vmatprep.subr.bf16.mxu0 %v1539_v15  ;;  %v1573_v38 = vld [vmem:[%s1881_s13 + $0x94] ss:$8 sps:$4 sm:$0xff]   ;;  %v1577_v40 = vld [vmem:[%s1881_s13 + $0x90] ss:$8 sps:$4 sm:$0xff]   ;;  %v1579_v42 = vld [vmem:[%s1881_s13 + $0xa4] ss:$8 sps:$4 sm:$0xff]  }
  0x69   : > { %v1575_v39 = vld [vmem:[%s1881_s13 + $0x194] ss:$8 sps:$4 sm:$0xff]   ;;  %v1578_v41 = vld [vmem:[%s1881_s13 + $0x190] ss:$8 sps:$4 sm:$0xff]   ;;  %v1581_v43 = vld [vmem:[%s1881_s13 + $0x1a4] ss:$8 sps:$4 sm:$0xff]  }
  0x6a   : > { %1035 = vmatpush1.bf16.msra.mxu1 %v1541_v16  ;;  %v1583_v44 = vld [vmem:[%s1881_s13 + $0xa0] ss:$8 sps:$4 sm:$0xff]   ;;  %v1585_v46 = vld [vmem:[%s1881_s13 + $0xb4] ss:$8 sps:$4 sm:$0xff]   ;;  %v1589_v48 = vld [vmem:[%s1881_s13 + $0xb0] ss:$8 sps:$4 sm:$0xff]  }
  0x6b   : > { %1086 = vmatpush1.bf16.msra.mxu0 %v1542_v17  ;;  %1036 = vmatprep.subr.bf16.mxu1 %v1543_v18  ;;  %v1584_v45 = vld [vmem:[%s1881_s13 + $0x1a0] ss:$8 sps:$4 sm:$0xff]   ;;  %v1587_v47 = vld [vmem:[%s1881_s13 + $0x1b4] ss:$8 sps:$4 sm:$0xff]   ;;  %v1590_v49 = vld [vmem:[%s1881_s13 + $0x1b0] ss:$8 sps:$4 sm:$0xff]  }
  0x6c   : > { %1087 = vmatprep.subr.bf16.mxu0 %v1545_v19  ;;  %v1591_v50 = vld [vmem:[%s1881_s13 + $0xc4] ss:$8 sps:$4 sm:$0xff]   ;;  %v1595_v52 = vld [vmem:[%s1881_s13 + $0xc0] ss:$8 sps:$4 sm:$0xff]   ;;  %v1597_v54 = vld [vmem:[%s1881_s13 + $0xd4] ss:$8 sps:$4 sm:$0xff]  }
  0x6d   : > { %v1593_v51 = vld [vmem:[%s1881_s13 + $0x1c4] ss:$8 sps:$4 sm:$0xff]   ;;  %v1596_v53 = vld [vmem:[%s1881_s13 + $0x1c0] ss:$8 sps:$4 sm:$0xff]   ;;  %v1599_v55 = vld [vmem:[%s1881_s13 + $0x1d4] ss:$8 sps:$4 sm:$0xff]  }
  0x6e   : > { %1037 = vmatpush1.bf16.msra.mxu1 %v1547_v20  ;;  %v1601_v56 = vld [vmem:[%s1881_s13 + $0xd0] ss:$8 sps:$4 sm:$0xff]   ;;  %v1603_v58 = vld [vmem:[%s1881_s13 + $0xe4] ss:$8 sps:$4 sm:$0xff]   ;;  %v1607_v60 = vld [vmem:[%s1881_s13 + $0xe0] ss:$8 sps:$4 sm:$0xff]  }
  0x6f   : > { %1088 = vmatpush1.bf16.msra.mxu0 %v1548_v21  ;;  %1038 = vmatprep.subr.bf16.mxu1 %v1549_v22  ;;  %v1602_v57 = vld [vmem:[%s1881_s13 + $0x1d0] ss:$8 sps:$4 sm:$0xff]   ;;  %v1605_v59 = vld [vmem:[%s1881_s13 + $0x1e4] ss:$8 sps:$4 sm:$0xff]   ;;  %v1608_v61 = vld [vmem:[%s1881_s13 + $0x1e0] ss:$8 sps:$4 sm:$0xff]  }
  0x70   : > { %1089 = vmatprep.subr.bf16.mxu0 %v1551_v23  ;;  %v1609_v62 = vld [vmem:[%s1881_s13 + $0xf4] ss:$8 sps:$4 sm:$0xff]   ;;  %v1613_v0 = vld [vmem:[%s1881_s13 + $0xf0] ss:$8 sps:$4 sm:$0xff]   ;;  %v608_v2 = vld [vmem:[%s1989_s0 + $0x20] sm:$0xff]  ;;  %s2002_s30 = smov (!%p577_p11, %s1386_s30), 7 }
  0x71   : > { %v1611_v63 = vld [vmem:[%s1881_s13 + $0x1f4] ss:$8 sps:$4 sm:$0xff]   ;;  %v1614_v1 = vld [vmem:[%s1881_s13 + $0x1f0] ss:$8 sps:$4 sm:$0xff]   ;;  %v609_v3 = vld [vmem:[%s1989_s0 + $0x28] sm:$0xff]  ;;  %v1393_v6 = vcombine.high %v608_v2, %v608_v2  ;;  %v1392_v8 = vcombine.low %v608_v2, %v608_v2  ;;  %v1154_v11 = vshrl.u32 %v1153_v10, 7  ;;  %s579_s8 = scalar_lea.vmem %s1991_s2, %s2002_s30  ;;  %s584_s11 = scalar_lea.vmem %s1992_s3, %s2002_s30 }
  0x72   : > { %1039 = vmatpush1.bf16.msra.mxu1 %v1553_v24  ;;  %v1615_v4 = vld [vmem:[%s1989_s0] ss:$16 sps:$4 sm:$0xff]   ;;  %v1618_v5 = vld [vmem:[%s1989_s0 + $0x8] ss:$16 sps:$4 sm:$0xff]   ;;  %v1395_v7 = vcombine.high %v609_v3, %v609_v3  ;;  %v1394_v9 = vcombine.low %v609_v3, %v609_v3  ;;  %s1478_s12 = smul.u32 24, %s520_s7  ;;  %s1471_s15 = sshll.u32 (%p1725_p6), %s1655_s17, 3 }
  0x73   : > { %1090 = vmatpush1.bf16.msra.mxu0 %v1554_v25  ;;  %1040 = vmatprep.subr.bf16.mxu1 %v1555_v26  ;;  %v1155_v12 = vsub.s32 0, %v1154_v11  ;;  %v1151_v13 = vld [vmem:[%s579_s8] sm:$0x3]  ;;  %v1159_v14 = vsub.s32 1, %v1154_v11  ;;  %s1222_s21 = scalar_lea.vmem (%p1725_p6), %s1993_s4, %s1471_s15 }
  0x74   : > { %1091 = vmatprep.subr.bf16.mxu0 %v1557_v27  ;;  %v1169_v15 = vld [vmem:[%s584_s11] sm:$0x3]  ;;  %s561_s13 = scalar_lea.vmem [#allocation4], %s1478_s12 }
  0x75   : > { %v1156_v16 = vrot.slane %v1151_v13, %v1155_v12  ;;  %v1160_v19 = vrot.slane %v1151_v13, %v1159_v14  ;;  %v1174_v21 = vrot.slane %v1169_v15, %v1155_v12  ;;  %v1178_v25 = vrot.slane %v1169_v15, %v1159_v14 }
  0x76   : > { %1041 = vmatpush1.bf16.msra.mxu1 %v1559_v28 }
  0x77   : > { %1092 = vmatpush1.bf16.msra.mxu0 %v1560_v29  ;;  %1042 = vmatprep.subr.bf16.mxu1 %v1561_v30 }
  0x78   : > { %1093 = vmatprep.subr.bf16.mxu0 %v1563_v31 }
  0x7a   : > { %1043 = vmatpush1.bf16.msra.mxu1 %v1565_v32 }
  0x7b   : > { %1094 = vmatpush1.bf16.msra.mxu0 %v1566_v33  ;;  %1044 = vmatprep.subr.bf16.mxu1 %v1567_v34 }
  0x7c   : > { %1095 = vmatprep.subr.bf16.mxu0 %v1569_v35 }
  0x7e   : > { %1045 = vmatpush1.bf16.msra.mxu1 %v1571_v36 }
  0x7f   : > { %1096 = vmatpush1.bf16.msra.mxu0 %v1572_v37  ;;  %1046 = vmatprep.subr.bf16.mxu1 %v1573_v38 }
  0x80   : > { %1097 = vmatprep.subr.bf16.mxu0 %v1575_v39 }
  0x82   : > { %1047 = vmatpush1.bf16.msra.mxu1 %v1577_v40 }
  0x83   : > { %1098 = vmatpush1.bf16.msra.mxu0 %v1578_v41  ;;  %1048 = vmatprep.subr.bf16.mxu1 %v1579_v42 }
  0x84   : > { %1099 = vmatprep.subr.bf16.mxu0 %v1581_v43 }
  0x86   : > { %1049 = vmatpush1.bf16.msra.mxu1 %v1583_v44 }
  0x87   : > { %1100 = vmatpush1.bf16.msra.mxu0 %v1584_v45  ;;  %1050 = vmatprep.subr.bf16.mxu1 %v1585_v46 }
  0x88   : > { %1101 = vmatprep.subr.bf16.mxu0 %v1587_v47 }
  0x8a   : > { %1051 = vmatpush1.bf16.msra.mxu1 %v1589_v48 }
  0x8b   : > { %1102 = vmatpush1.bf16.msra.mxu0 %v1590_v49  ;;  %1052 = vmatprep.subr.bf16.mxu1 %v1591_v50 }
  0x8c   : > { %1103 = vmatprep.subr.bf16.mxu0 %v1593_v51 }
  0x8e   : > { %1053 = vmatpush1.bf16.msra.mxu1 %v1595_v52 }
  0x8f   : > { %1104 = vmatpush1.bf16.msra.mxu0 %v1596_v53  ;;  %1054 = vmatprep.subr.bf16.mxu1 %v1597_v54 }
  0x90   : > { %1105 = vmatprep.subr.bf16.mxu0 %v1599_v55 }
  0x92   : > { %1055 = vmatpush1.bf16.msra.mxu1 %v1601_v56 }
  0x93   : > { %1106 = vmatpush1.bf16.msra.mxu0 %v1602_v57  ;;  %1056 = vmatprep.subr.bf16.mxu1 %v1603_v58 }
  0x94   : > { %1107 = vmatprep.subr.bf16.mxu0 %v1605_v59 }
  0x96   : > { %1057 = vmatpush1.bf16.msra.mxu1 %v1607_v60 }
  0x97   : > { %1108 = vmatpush1.bf16.msra.mxu0 %v1608_v61  ;;  %1058 = vmatprep.subr.bf16.mxu1 %v1609_v62 }
  0x98   : > { %1109 = vmatprep.subr.bf16.mxu0 %v1611_v63 }
  0x9a   : > { %1059 = vmatpush1.bf16.msra.mxu1 %v1613_v0 }
  0x9b   : > { %1110 = vmatpush1.bf16.msra.mxu0 %v1614_v1 }
  0x9d   : > { %1061 = vmatmul.mubr.bf16.vlgmr.msra.gmra.mrb[0].mxu1 %v1615_v4 }
  0x9e   : > { %1112 = vmatmul.mubr.bf16.vlgmr.msra.gmra.mrb[0].mxu0 %v1618_v5  ;;  %1070 = vmatprep.mubr.bf16.mxu1 %v1393_v6 }
  0x9f   : > { %1121 = vmatprep.mubr.bf16.mxu0 %v1395_v7 }
  0xa5   : > { %1071 = vmatmul.mubr.bf16.gmra.mrb[4].mxu1 %v1392_v8 }
  0xa6   : > { %1122 = vmatmul.mubr.bf16.gmra.mrb[4].mxu0 %v1394_v9 }
 0x170   : > { %v1062_v17 = vpop.f32.mrb[0].mxu1 }
 0x171   : > { %v1113_v18 = vpop.f32.mrb[0].mxu0  ;;  %v1064_v22 = vpop.f32.mrb[1].mxu1 }
 0x172   : > { %v1114_v20 = vadd.f32 %v1113_v18, %v1062_v17  ;;  %v1115_v23 = vpop.f32.mrb[1].mxu0  ;;  %v1066_v26 = vpop.f32.mrb[2].mxu1 }
 0x173   : > { %v1116_v24 = vadd.f32 %v1115_v23, %v1064_v22  ;;  %v1117_v27 = vpop.f32.mrb[2].mxu0  ;;  %v1068_v30 = vpop.f32.mrb[3].mxu1 }
 0x174   : > { %v1163_v28 = vmul.f32 %v1156_v16, %v1114_v20  ;;  %v1118_v29 = vadd.f32 %v1117_v27, %v1066_v26  ;;  %v1119_v31 = vpop.f32.mrb[3].mxu0 }
 0x175   : > { %v1164_v32 = vmul.f32 %v1160_v19, %v1116_v24  ;;  %v1120_v33 = vadd.f32 %v1119_v31, %v1068_v30 }
 0x176   : > { %v1181_v34 = vadd.f32 %v1174_v21, %v1163_v28  ;;  %v1165_v35 = vmul.f32 %v1156_v16, %v1118_v29 }
 0x177   : > { %v1182_v36 = vadd.f32 %v1178_v25, %v1164_v32  ;;  %v1166_v37 = vmul.f32 %v1160_v19, %v1120_v33 }
 0x178   : > { %v1183_v38 = vadd.f32 %v1174_v21, %v1165_v35  ;;  %v1072_v41 = vpop.f32.mrb[4].mxu1 }
 0x179   : > { %v1468_v39 = vpack.c.bf16 %v1182_v36, %v1181_v34  ;;  %v1184_v40 = vadd.f32 %v1178_v25, %v1166_v37  ;;  %v1123_v42 = vpop.f32.mrb[4].mxu0  ;;  %v1074_v44 = vpop.f32.mrb[5].mxu1 }
 0x17a   : > { %v1124_v43 = vadd.f32 %v1123_v42, %v1072_v41  ;;  %v1125_v45 = vpop.f32.mrb[5].mxu0  ;;  %v1076_v48 = vpop.f32.mrb[6].mxu1 }
 0x17b   : > { %1207 = vst [vmem:[%s561_s13] sm:$0xff] %v1468_v39  ;;  %v1469_v46 = vpack.c.bf16 %v1184_v40, %v1183_v38  ;;  %v1126_v47 = vadd.f32 %v1125_v45, %v1074_v44  ;;  %v1127_v49 = vpop.f32.mrb[6].mxu0  ;;  %v1077_v51 = vpop.f32.mrb[7].mxu1 }
 0x17c   : > { %v1167_v50 = vmul.f32 %v1156_v16, %v1124_v43  ;;  %v1128_v52 = vpop.f32.mrb[7].mxu0 }
 0x17d   : > { %1208 = vst [vmem:[%s561_s13 + $0x8] sm:$0xff] %v1469_v46  ;;  %v1168_v53 = vmul.f32 %v1160_v19, %v1126_v47  ;;  %1216 = sbr.rel (!%p1725_p6) target bundleno = 396 (0x18c), region = 86 }
 0x17e   : > { %v1185_v54 = vadd.f32 %v1174_v21, %v1167_v50 }
 0x17f   : > { %v1186_v55 = vadd.f32 %v1178_v25, %v1168_v53 }
 0x181   : > { %v1470_v56 = vpack.c.bf16 %v1186_v55, %v1185_v54 }
 0x182   : > { %v1254_v57 = vld [vmem:[%s561_s13] sm:$0xff] (%p1725_p6) }
 0x183   : > { %1209 = vst [vmem:[%s561_s13 + $0x10] sm:$0xff] %v1470_v56  ;;  %1255 = vst [vmem:[%s1222_s21] sm:$0xff] (%p1725_p6), %v1254_v57 }
 0x184   : > { %v1256_v58 = vld [vmem:[%s561_s13 + $0x8] sm:$0xff] }
 0x185   : > { %1257 = vst [vmem:[%s1222_s21 + $0x20] sm:$0xff] %v1256_v58 }
 0x18a   : > { %v1258_v59 = vld [vmem:[%s561_s13 + $0x10] sm:$0xff] }
 0x18b   : > { %1259 = vst [vmem:[%s1222_s21 + $0x40] sm:$0xff] %v1258_v59 }
 0x18c PF: > { %s14_s19 = sadd.s32 1, %s1663_s19   ;;  %s1995_s15 = smov %s1651_s16 }
 0x18d   : > { %p11_p12 = scmp.ge.s32.totalorder %s14_s19, 6   ;;  %s1996_s16 = smov %s1730_s25 }
 0x18e   : > { %s1997_s17 = smov %s1659_s18  ;;  %s1998_s18 = smov %s2000_s20 }
 0x18f   :  { %13 = sbr.rel (!%p11_p12) target bundleno = 3 (0x3), region = 164 }

// kernel: deeplab_v2_forward.37
= control target key start
LH: loop header
LB: loop body
LE: loop exit
PB: predicated region body
PF: predicated region fallthrough
CT: control target
= control target key end

     0   :  { %s2215_s0 = inlined_call_operand.vmem [shape: bf16[24,4608], index: 0, kind: input, shape index: {}]   ;;  %s2216_s1 = inlined_call_operand.vmem [shape: bf16[4608,512], index: 1, kind: input, shape index: {}]   ;;  %s2217_s2 = inlined_call_operand.vmem [shape: f32[1,512], index: 2, kind: input, shape index: {}]   ;;  %s2218_s3 = inlined_call_operand.vmem [shape: f32[1,512], index: 3, kind: input, shape index: {}]   ;;  %s2219_s4 = inlined_call_operand.vmem [shape: bf16[24,512], index: 4, kind: output, shape index: {}]  }
   0x1   :  { %2222 = sst [smem:[#allocation8_spill]] %s2215_s0 }
   0x2   :  { %2223 = sst [smem:[#allocation9_spill]] %s2216_s1 }
   0x3   :  { %s1820_s15 = smov 0   ;;  %s1822_s16 = smov 0  }
   0x4   :  { %s1824_s17 = smov 0   ;;  %s1826_s18 = smov 0  }
   0x5   :  { %s1828_s19 = smov 0   ;;  %s1830_s20 = smov 0  }
   0x6   :  { %s1832_s21 = smov 0   ;;  %s1834_s22 = smov 0  }
   0x7   :  { %s1836_s23 = smov 0   ;;  %s1838_s24 = smov 0  }
   0x8   :  { %s1840_s25 = smov 0  }
   0x9 LB: > { %s1402_s26 = sadd.s32 4294967295, %s1792_s25   ;;  %s26_s27 = sadd.s32 1, %s1784_s23  ;;  %s1792_s25 = sphi %s1840_s25, %s14_s25   ;;  %s1788_s24 = sphi %s1838_s24, %s2242_s24   ;;  %s1784_s23 = sphi %s1836_s23, %s2241_s23   ;;  %s1780_s22 = sphi %s1834_s22, %s2240_s22   ;;  %s1776_s21 = sphi %s1832_s21, %s2239_s21   ;;  %s1772_s20 = sphi %s1830_s20, %s2238_s20   ;;  %s1768_s19 = sphi %s1828_s19, %s2237_s19   ;;  %s1764_s18 = sphi %s1826_s18, %s2236_s18   ;;  %s1760_s17 = sphi %s1824_s17, %s2235_s17   ;;  %s1756_s16 = sphi %s1822_s16, %s2234_s16   ;;  %s1752_s15 = sphi %s1820_s15, %s2233_s15  }
   0xa   : > { %p27_p0 = scmp.ge.s32.totalorder %s26_s27, 9  ;;  %s29_s28 = sadd.s32 1, %s1788_s24 }
   0xb   : > { %s42_s29 = sadd.s32 1, %s1772_s20  ;;  %p49_p1 = scmp.ne.s32.totalorder %s1772_s20, %s1768_s19 }
   0xc   : > { %s2244_s27 = smov (%p27_p0, %s26_s27), 0  ;;  %s2246_s28 = smov (!%p27_p0, %s29_s28), %s1788_s24 }
   0xd   : > { %2224 = sst [smem:[#allocation6_spill]] %s2244_s27  ;;  %s38_s30 = ssub.s32 %s1784_s23, %s2244_s27 }
   0xe   : > { %p50_p2 = scmp.eq.s32.totalorder %s1792_s25, 0  ;;  %p31_p3 = scmp.ge.s32.totalorder %s2246_s28, 2 }
   0xf   : > { %p40_p4 = scmp.eq.s32.totalorder %s38_s30, 0  ;;  %s70_s6 = sadd.s32 1, %s1764_s18 }
  0x10   : > { %p1887_p5 = por %p50_p2, %p49_p1  ;;  %s2248_s28 = smov (%p31_p3, %s2246_s28), 0 }
  0x11   : > { %2226 = sst [smem:[#allocation7_spill]] %s2248_s28  ;;  %s66_s8 = ssub.s32 %s1788_s24, %s2248_s28 }
  0x12   : > { %s1895_s7 = scalar_select %p40_p4, %s1772_s20, %s42_s29  }
  0x13   : > { %p77_p6 = scmp.ne.s32.totalorder %s1764_s18, %s1760_s17  ;;  %s67_s9 = sor.u32 %s66_s8, %s38_s30 }
  0x14   : > { %p148_p7 = scmp.eq.s32.totalorder %s66_s8, 0  ;;  %p68_p8 = scmp.eq.s32.totalorder %s67_s9, 0 }
  0x15   : > { %p1901_p9 = por %p77_p6, %p50_p2  ;;  %s150_s11 = sadd.s32 1, %s1756_s16 }
  0x16   : > { %p160_p10 = scmp.ne.s32.totalorder %s1756_s16, %s1752_s15  ;;  %p161_p11 = scmp.eq.s32.totalorder %s1402_s26, 17 }
  0x17   : > { %s1909_s12 = scalar_select %p68_p8, %s1764_s18, %s70_s6  }
  0x18   : > { %s1912_s13 = scalar_select %p148_p7, %s1756_s16, %s150_s11  }
  0x19   : > { %p1914_p12 = por %p161_p11, %p160_p10  ;;  %p1405_p13 = scmp.ge.s32.totalorder %s1792_s25, 18 }
  0x1b   : > { %183 = sbr.rel (%p1405_p13) target bundleno = 90 (0x5a), region = 16 }
  0x22   : > { %186 = sbr.rel (!%p1887_p5) target bundleno = 48 (0x30), region = 20  ;;  %s188_s29 = sand.u32 (%p1887_p5), 1, %s1772_s20  }
  0x23   : > { %s1498_s30 = sshll.u32 (%p1887_p5), %s1784_s23, 4  ;;  %s1508_s8 = smul.u32 (%p1887_p5), 48, %s188_s29 }
  0x24   : > { %s2229_s0 = sld [smem:[#allocation8_spill]] (%p1887_p5) }
  0x25   : > { %s190_s26 = scalar_lea.vmem (%p1887_p5), [#allocation3], %s1508_s8 }
  0x2a   : > { %s196_s11 = scalar_lea.vmem %s2229_s0, %s1498_s30 }
  0x2b   : > { %v209_v0 = vld [vmem:[%s196_s11] sm:$0xff]  ;;  %v211_v1 = vld [vmem:[%s196_s11 + $0x8] sm:$0xff]  ;;  %v213_v2 = vld [vmem:[%s196_s11 + $0x90] sm:$0xff] }
  0x2c   : > { %v215_v3 = vld [vmem:[%s196_s11 + $0x98] sm:$0xff]  ;;  %v217_v4 = vld [vmem:[%s196_s11 + $0x120] sm:$0xff]  ;;  %v219_v5 = vld [vmem:[%s196_s11 + $0x128] sm:$0xff]  ;;  %210 = vst [vmem:[%s190_s26] sm:$0xff] %v209_v0 }
  0x2d   : > { %212 = vst [vmem:[%s190_s26 + $0x8] sm:$0xff] %v211_v1  ;;  %214 = vst [vmem:[%s190_s26 + $0x10] sm:$0xff] %v213_v2 }
  0x2e   : > { %216 = vst [vmem:[%s190_s26 + $0x18] sm:$0xff] %v215_v3  ;;  %218 = vst [vmem:[%s190_s26 + $0x20] sm:$0xff] %v217_v4 }
  0x2f   : > { %220 = vst [vmem:[%s190_s26 + $0x28] sm:$0xff] %v219_v5 }
  0x30 PF: > { %226 = sbr.rel (!%p1901_p9) target bundleno = 90 (0x5a), region = 43  ;;  %s228_s5 = sand.u32 (%p1901_p9), 1, %s1764_s18  }
  0x31   : > { %s1410_s29 = sshll.u32 (%p1901_p9), %s1788_s24, 1  ;;  %s1408_s30 = sshll.u32 (%p1901_p9), %s228_s5, 9 }
  0x32   : > { %s1499_s6 = sshll.u32 (%p1901_p9), %s1784_s23, 8  ;;  %s2230_s1 = sld [smem:[#allocation9_spill]] (%p1901_p9) }
  0x33   : > { %s234_s9 = sadd.s32 (%p1901_p9), %s1499_s6, %s1410_s29  ;;  %s1939_s10 = scalar_lea.vmem (%p1901_p9), [#allocation4], %s1408_s30 }
  0x34   : > { %s1412_s11 = sshll.u32 (%p1901_p9), %s234_s9, 2 }
  0x38   : > { %s1934_s28 = scalar_lea.vmem %s2230_s1, %s1412_s11 }
  0x39   : > { %v390_v6 = vld [vmem:[%s1934_s28] sm:$0xff]  ;;  %v392_v7 = vld [vmem:[%s1934_s28 + $0x10] sm:$0xff] }
  0x3a   : > { %v394_v8 = vld [vmem:[%s1934_s28 + $0x20] sm:$0xff]  ;;  %391 = vst [vmem:[%s1939_s10] sm:$0xff] %v390_v6  ;;  %393 = vst [vmem:[%s1939_s10 + $0x8] sm:$0xff] %v392_v7  ;;  %v396_v9 = vld [vmem:[%s1934_s28 + $0x30] sm:$0xff] }
  0x3b   : > { %395 = vst [vmem:[%s1939_s10 + $0x10] sm:$0xff] %v394_v8  ;;  %v398_v10 = vld [vmem:[%s1934_s28 + $0x40] sm:$0xff]  ;;  %v400_v11 = vld [vmem:[%s1934_s28 + $0x50] sm:$0xff]  ;;  %397 = vst [vmem:[%s1939_s10 + $0x18] sm:$0xff] %v396_v9 }
  0x3c   : > { %399 = vst [vmem:[%s1939_s10 + $0x20] sm:$0xff] %v398_v10  ;;  %401 = vst [vmem:[%s1939_s10 + $0x28] sm:$0xff] %v400_v11  ;;  %v402_v12 = vld [vmem:[%s1934_s28 + $0x60] sm:$0xff]  ;;  %v404_v13 = vld [vmem:[%s1934_s28 + $0x70] sm:$0xff] }
  0x3d   : > { %v406_v14 = vld [vmem:[%s1934_s28 + $0x80] sm:$0xff]  ;;  %403 = vst [vmem:[%s1939_s10 + $0x30] sm:$0xff] %v402_v12  ;;  %405 = vst [vmem:[%s1939_s10 + $0x38] sm:$0xff] %v404_v13  ;;  %v408_v15 = vld [vmem:[%s1934_s28 + $0x90] sm:$0xff] }
  0x3e   : > { %407 = vst [vmem:[%s1939_s10 + $0x40] sm:$0xff] %v406_v14  ;;  %v410_v16 = vld [vmem:[%s1934_s28 + $0xa0] sm:$0xff]  ;;  %v412_v17 = vld [vmem:[%s1934_s28 + $0xb0] sm:$0xff]  ;;  %409 = vst [vmem:[%s1939_s10 + $0x48] sm:$0xff] %v408_v15 }
  0x3f   : > { %411 = vst [vmem:[%s1939_s10 + $0x50] sm:$0xff] %v410_v16  ;;  %413 = vst [vmem:[%s1939_s10 + $0x58] sm:$0xff] %v412_v17  ;;  %v414_v18 = vld [vmem:[%s1934_s28 + $0xc0] sm:$0xff]  ;;  %v416_v19 = vld [vmem:[%s1934_s28 + $0xd0] sm:$0xff] }
  0x40   : > { %v418_v20 = vld [vmem:[%s1934_s28 + $0xe0] sm:$0xff]  ;;  %415 = vst [vmem:[%s1939_s10 + $0x60] sm:$0xff] %v414_v18  ;;  %417 = vst [vmem:[%s1939_s10 + $0x68] sm:$0xff] %v416_v19  ;;  %v420_v21 = vld [vmem:[%s1934_s28 + $0xf0] sm:$0xff] }
  0x41   : > { %419 = vst [vmem:[%s1939_s10 + $0x70] sm:$0xff] %v418_v20  ;;  %v422_v22 = vld [vmem:[%s1934_s28 + $0x100] sm:$0xff]  ;;  %v424_v23 = vld [vmem:[%s1934_s28 + $0x110] sm:$0xff]  ;;  %421 = vst [vmem:[%s1939_s10 + $0x78] sm:$0xff] %v420_v21 }
  0x42   : > { %423 = vst [vmem:[%s1939_s10 + $0x80] sm:$0xff] %v422_v22  ;;  %425 = vst [vmem:[%s1939_s10 + $0x88] sm:$0xff] %v424_v23  ;;  %v426_v24 = vld [vmem:[%s1934_s28 + $0x120] sm:$0xff]  ;;  %v428_v25 = vld [vmem:[%s1934_s28 + $0x130] sm:$0xff] }
  0x43   : > { %v430_v26 = vld [vmem:[%s1934_s28 + $0x140] sm:$0xff]  ;;  %427 = vst [vmem:[%s1939_s10 + $0x90] sm:$0xff] %v426_v24  ;;  %429 = vst [vmem:[%s1939_s10 + $0x98] sm:$0xff] %v428_v25  ;;  %v432_v27 = vld [vmem:[%s1934_s28 + $0x150] sm:$0xff] }
  0x44   : > { %431 = vst [vmem:[%s1939_s10 + $0xa0] sm:$0xff] %v430_v26  ;;  %v434_v28 = vld [vmem:[%s1934_s28 + $0x160] sm:$0xff]  ;;  %v436_v29 = vld [vmem:[%s1934_s28 + $0x170] sm:$0xff]  ;;  %433 = vst [vmem:[%s1939_s10 + $0xa8] sm:$0xff] %v432_v27 }
  0x45   : > { %435 = vst [vmem:[%s1939_s10 + $0xb0] sm:$0xff] %v434_v28  ;;  %437 = vst [vmem:[%s1939_s10 + $0xb8] sm:$0xff] %v436_v29  ;;  %v438_v30 = vld [vmem:[%s1934_s28 + $0x180] sm:$0xff]  ;;  %v440_v31 = vld [vmem:[%s1934_s28 + $0x190] sm:$0xff] }
  0x46   : > { %v442_v32 = vld [vmem:[%s1934_s28 + $0x1a0] sm:$0xff]  ;;  %439 = vst [vmem:[%s1939_s10 + $0xc0] sm:$0xff] %v438_v30  ;;  %441 = vst [vmem:[%s1939_s10 + $0xc8] sm:$0xff] %v440_v31  ;;  %v444_v33 = vld [vmem:[%s1934_s28 + $0x1b0] sm:$0xff] }
  0x47   : > { %443 = vst [vmem:[%s1939_s10 + $0xd0] sm:$0xff] %v442_v32  ;;  %v446_v34 = vld [vmem:[%s1934_s28 + $0x1c0] sm:$0xff]  ;;  %v448_v35 = vld [vmem:[%s1934_s28 + $0x1d0] sm:$0xff]  ;;  %445 = vst [vmem:[%s1939_s10 + $0xd8] sm:$0xff] %v444_v33 }
  0x48   : > { %447 = vst [vmem:[%s1939_s10 + $0xe0] sm:$0xff] %v446_v34  ;;  %449 = vst [vmem:[%s1939_s10 + $0xe8] sm:$0xff] %v448_v35  ;;  %v450_v36 = vld [vmem:[%s1934_s28 + $0x1e0] sm:$0xff]  ;;  %v452_v37 = vld [vmem:[%s1934_s28 + $0x1f0] sm:$0xff] }
  0x49   : > { %v454_v38 = vld [vmem:[%s1934_s28 + $0x200] sm:$0xff]  ;;  %451 = vst [vmem:[%s1939_s10 + $0xf0] sm:$0xff] %v450_v36  ;;  %453 = vst [vmem:[%s1939_s10 + $0xf8] sm:$0xff] %v452_v37  ;;  %v456_v39 = vld [vmem:[%s1934_s28 + $0x210] sm:$0xff] }
  0x4a   : > { %455 = vst [vmem:[%s1939_s10 + $0x100] sm:$0xff] %v454_v38  ;;  %v458_v40 = vld [vmem:[%s1934_s28 + $0x220] sm:$0xff]  ;;  %v460_v41 = vld [vmem:[%s1934_s28 + $0x230] sm:$0xff]  ;;  %457 = vst [vmem:[%s1939_s10 + $0x108] sm:$0xff] %v456_v39 }
  0x4b   : > { %459 = vst [vmem:[%s1939_s10 + $0x110] sm:$0xff] %v458_v40  ;;  %461 = vst [vmem:[%s1939_s10 + $0x118] sm:$0xff] %v460_v41  ;;  %v462_v42 = vld [vmem:[%s1934_s28 + $0x240] sm:$0xff]  ;;  %v464_v43 = vld [vmem:[%s1934_s28 + $0x250] sm:$0xff] }
  0x4c   : > { %v466_v44 = vld [vmem:[%s1934_s28 + $0x260] sm:$0xff]  ;;  %463 = vst [vmem:[%s1939_s10 + $0x120] sm:$0xff] %v462_v42  ;;  %465 = vst [vmem:[%s1939_s10 + $0x128] sm:$0xff] %v464_v43  ;;  %v468_v45 = vld [vmem:[%s1934_s28 + $0x270] sm:$0xff] }
  0x4d   : > { %467 = vst [vmem:[%s1939_s10 + $0x130] sm:$0xff] %v466_v44  ;;  %v470_v46 = vld [vmem:[%s1934_s28 + $0x280] sm:$0xff]  ;;  %v472_v47 = vld [vmem:[%s1934_s28 + $0x290] sm:$0xff]  ;;  %469 = vst [vmem:[%s1939_s10 + $0x138] sm:$0xff] %v468_v45 }
  0x4e   : > { %471 = vst [vmem:[%s1939_s10 + $0x140] sm:$0xff] %v470_v46  ;;  %473 = vst [vmem:[%s1939_s10 + $0x148] sm:$0xff] %v472_v47  ;;  %v474_v48 = vld [vmem:[%s1934_s28 + $0x2a0] sm:$0xff]  ;;  %v476_v49 = vld [vmem:[%s1934_s28 + $0x2b0] sm:$0xff] }
  0x4f   : > { %v478_v50 = vld [vmem:[%s1934_s28 + $0x2c0] sm:$0xff]  ;;  %475 = vst [vmem:[%s1939_s10 + $0x150] sm:$0xff] %v474_v48  ;;  %477 = vst [vmem:[%s1939_s10 + $0x158] sm:$0xff] %v476_v49  ;;  %v480_v51 = vld [vmem:[%s1934_s28 + $0x2d0] sm:$0xff] }
  0x50   : > { %479 = vst [vmem:[%s1939_s10 + $0x160] sm:$0xff] %v478_v50  ;;  %v482_v52 = vld [vmem:[%s1934_s28 + $0x2e0] sm:$0xff]  ;;  %v484_v53 = vld [vmem:[%s1934_s28 + $0x2f0] sm:$0xff]  ;;  %481 = vst [vmem:[%s1939_s10 + $0x168] sm:$0xff] %v480_v51 }
  0x51   : > { %483 = vst [vmem:[%s1939_s10 + $0x170] sm:$0xff] %v482_v52  ;;  %485 = vst [vmem:[%s1939_s10 + $0x178] sm:$0xff] %v484_v53  ;;  %v486_v54 = vld [vmem:[%s1934_s28 + $0x300] sm:$0xff]  ;;  %v488_v55 = vld [vmem:[%s1934_s28 + $0x310] sm:$0xff] }
  0x52   : > { %v490_v56 = vld [vmem:[%s1934_s28 + $0x320] sm:$0xff]  ;;  %487 = vst [vmem:[%s1939_s10 + $0x180] sm:$0xff] %v486_v54  ;;  %489 = vst [vmem:[%s1939_s10 + $0x188] sm:$0xff] %v488_v55  ;;  %v492_v57 = vld [vmem:[%s1934_s28 + $0x330] sm:$0xff] }
  0x53   : > { %491 = vst [vmem:[%s1939_s10 + $0x190] sm:$0xff] %v490_v56  ;;  %v494_v58 = vld [vmem:[%s1934_s28 + $0x340] sm:$0xff]  ;;  %v496_v59 = vld [vmem:[%s1934_s28 + $0x350] sm:$0xff]  ;;  %493 = vst [vmem:[%s1939_s10 + $0x198] sm:$0xff] %v492_v57 }
  0x54   : > { %495 = vst [vmem:[%s1939_s10 + $0x1a0] sm:$0xff] %v494_v58  ;;  %497 = vst [vmem:[%s1939_s10 + $0x1a8] sm:$0xff] %v496_v59  ;;  %v498_v60 = vld [vmem:[%s1934_s28 + $0x360] sm:$0xff]  ;;  %v500_v61 = vld [vmem:[%s1934_s28 + $0x370] sm:$0xff] }
  0x55   : > { %v502_v62 = vld [vmem:[%s1934_s28 + $0x380] sm:$0xff]  ;;  %499 = vst [vmem:[%s1939_s10 + $0x1b0] sm:$0xff] %v498_v60  ;;  %501 = vst [vmem:[%s1939_s10 + $0x1b8] sm:$0xff] %v500_v61  ;;  %v504_v63 = vld [vmem:[%s1934_s28 + $0x390] sm:$0xff] }
  0x56   : > { %503 = vst [vmem:[%s1939_s10 + $0x1c0] sm:$0xff] %v502_v62  ;;  %v506_v0 = vld [vmem:[%s1934_s28 + $0x3a0] sm:$0xff]  ;;  %v508_v1 = vld [vmem:[%s1934_s28 + $0x3b0] sm:$0xff]  ;;  %505 = vst [vmem:[%s1939_s10 + $0x1c8] sm:$0xff] %v504_v63 }
  0x57   : > { %507 = vst [vmem:[%s1939_s10 + $0x1d0] sm:$0xff] %v506_v0  ;;  %509 = vst [vmem:[%s1939_s10 + $0x1d8] sm:$0xff] %v508_v1  ;;  %v510_v2 = vld [vmem:[%s1934_s28 + $0x3c0] sm:$0xff]  ;;  %v512_v3 = vld [vmem:[%s1934_s28 + $0x3d0] sm:$0xff] }
  0x58   : > { %v514_v4 = vld [vmem:[%s1934_s28 + $0x3e0] sm:$0xff]  ;;  %511 = vst [vmem:[%s1939_s10 + $0x1e0] sm:$0xff] %v510_v2  ;;  %513 = vst [vmem:[%s1939_s10 + $0x1e8] sm:$0xff] %v512_v3  ;;  %v516_v5 = vld [vmem:[%s1934_s28 + $0x3f0] sm:$0xff] }
  0x59   : > { %515 = vst [vmem:[%s1939_s10 + $0x1f0] sm:$0xff] %v514_v4  ;;  %517 = vst [vmem:[%s1939_s10 + $0x1f8] sm:$0xff] %v516_v5 }
  0x5a PF: > { %p1413_p0 = scmp.ge.s32.totalorder %s1792_s25, 1  ;;  %p538_p1 = scmp.lt.s32.totalorder %s1792_s25, 19 }
  0x5c   : > { %p539_p2 = pnand %p1413_p0, %p538_p1 }
  0x5d   : > { %s545_s0 = sand.u32 (!%p539_p2), 1, %s1768_s19   ;;  %s552_s26 = sand.u32 (!%p539_p2), 1, %s1760_s17  }
  0x5e   : > { %542 = sbr.rel (%p539_p2) target bundleno = 424 (0x1a8), region = 89  ;;  %s1414_s29 = sshll.u32 (!%p539_p2), %s552_s26, 9 }
  0x5f   : > { %s1509_s5 = smul.u32 (!%p539_p2), 48, %s545_s0  ;;  %s585_s30 = sand.u32 (!%p539_p2), 1, %s1752_s15  }
  0x60   : > { %s1510_s6 = smul.u32 (!%p539_p2), 24, %s585_s30  ;;  %s1415_s28 = sshll.u32 (!%p539_p2), %s1780_s22, 1 }
  0x61   : > { %p593_p3 = scmp.lt.s32.totalorder (!%p539_p2), %s1415_s28, 3  ;;  %s2082_s19 = scalar_lea.vmem (!%p539_p2), [#allocation3], %s1509_s5 }
  0x62   : > { %s2084_s17 = scalar_lea.vmem (!%p539_p2), [#allocation4], %s1414_s29  ;;  %s2086_s15 = scalar_lea.vmem (!%p539_p2), [#allocation5], %s1510_s6 }
  0x63   : > { %p1417_p4 = scmp.ne.s32.totalorder (!%p539_p2), %s1776_s21, 0 }
  0x65   : > { %s2250_s28 = smov (!%p593_p3, %s1415_s28), 3  ;;  %607 = sbr.rel (%p1417_p4) target bundleno = 108 (0x6c), region = 101 }
  0x66   : > { %s595_s8 = scalar_lea.vmem %s2217_s2, %s2250_s28  ;;  %s600_s27 = scalar_lea.vmem %s2218_s3, %s2250_s28  ;;  %v1794_v6 = vmov (!%p1417_p4), 0.0  }
  0x67   : > { %608 = vst [vmem:[#allocation2] sm:$0xff] (!%p1417_p4), %v1794_v6  ;;  %609 = vst [vmem:[#allocation2 + $0x8] sm:$0xff] (!%p1417_p4), %v1794_v6 }
  0x68   : > { %610 = vst [vmem:[#allocation2 + $0x10] sm:$0xff] (!%p1417_p4), %v1794_v6  ;;  %611 = vst [vmem:[#allocation2 + $0x18] sm:$0xff] (!%p1417_p4), %v1794_v6 }
  0x69   : > { %612 = vst [vmem:[#allocation2 + $0x20] sm:$0xff] (!%p1417_p4), %v1794_v6  ;;  %613 = vst [vmem:[#allocation2 + $0x28] sm:$0xff] (!%p1417_p4), %v1794_v6 }
  0x6c PF: > { %v1600_v7 = vld [vmem:[%s2084_s17 + $0x4] ss:$8 sps:$4 sm:$0xff]   ;;  %v1604_v9 = vld [vmem:[%s2084_s17] ss:$8 sps:$4 sm:$0xff]   ;;  %v1606_v11 = vld [vmem:[%s2084_s17 + $0x14] ss:$8 sps:$4 sm:$0xff]  }
  0x6d   : > { %v1602_v8 = vld [vmem:[%s2084_s17 + $0x104] ss:$8 sps:$4 sm:$0xff]   ;;  %1044 = vmatprep.subr.bf16.mxu1 %v1600_v7  ;;  %v1605_v10 = vld [vmem:[%s2084_s17 + $0x100] ss:$8 sps:$4 sm:$0xff]   ;;  %v1608_v12 = vld [vmem:[%s2084_s17 + $0x114] ss:$8 sps:$4 sm:$0xff]  }
  0x6e   : > { %1095 = vmatprep.subr.bf16.mxu0 %v1602_v8  ;;  %1045 = vmatpush1.bf16.msra.mxu1 %v1604_v9  ;;  %v1610_v13 = vld [vmem:[%s2084_s17 + $0x10] ss:$8 sps:$4 sm:$0xff]   ;;  %v1612_v15 = vld [vmem:[%s2084_s17 + $0x24] ss:$8 sps:$4 sm:$0xff]   ;;  %v1616_v17 = vld [vmem:[%s2084_s17 + $0x20] ss:$8 sps:$4 sm:$0xff]  }
  0x6f   : > { %1096 = vmatpush1.bf16.msra.mxu0 %v1605_v10  ;;  %1046 = vmatprep.subr.bf16.mxu1 %v1606_v11  ;;  %v1611_v14 = vld [vmem:[%s2084_s17 + $0x110] ss:$8 sps:$4 sm:$0xff]   ;;  %v1614_v16 = vld [vmem:[%s2084_s17 + $0x124] ss:$8 sps:$4 sm:$0xff]   ;;  %v1617_v18 = vld [vmem:[%s2084_s17 + $0x120] ss:$8 sps:$4 sm:$0xff]  }
  0x70   : > { %1097 = vmatprep.subr.bf16.mxu0 %v1608_v12  ;;  %v1618_v19 = vld [vmem:[%s2084_s17 + $0x34] ss:$8 sps:$4 sm:$0xff]   ;;  %v1622_v21 = vld [vmem:[%s2084_s17 + $0x30] ss:$8 sps:$4 sm:$0xff]   ;;  %v1624_v23 = vld [vmem:[%s2084_s17 + $0x44] ss:$8 sps:$4 sm:$0xff]  }
  0x71   : > { %v1620_v20 = vld [vmem:[%s2084_s17 + $0x134] ss:$8 sps:$4 sm:$0xff]   ;;  %v1623_v22 = vld [vmem:[%s2084_s17 + $0x130] ss:$8 sps:$4 sm:$0xff]   ;;  %v1626_v24 = vld [vmem:[%s2084_s17 + $0x144] ss:$8 sps:$4 sm:$0xff]  }
  0x72   : > { %1047 = vmatpush1.bf16.msra.mxu1 %v1610_v13  ;;  %v1628_v25 = vld [vmem:[%s2084_s17 + $0x40] ss:$8 sps:$4 sm:$0xff]   ;;  %v1630_v27 = vld [vmem:[%s2084_s17 + $0x54] ss:$8 sps:$4 sm:$0xff]   ;;  %v1634_v29 = vld [vmem:[%s2084_s17 + $0x50] ss:$8 sps:$4 sm:$0xff]  }
  0x73   : > { %1098 = vmatpush1.bf16.msra.mxu0 %v1611_v14  ;;  %1048 = vmatprep.subr.bf16.mxu1 %v1612_v15  ;;  %v1629_v26 = vld [vmem:[%s2084_s17 + $0x140] ss:$8 sps:$4 sm:$0xff]   ;;  %v1632_v28 = vld [vmem:[%s2084_s17 + $0x154] ss:$8 sps:$4 sm:$0xff]   ;;  %v1635_v30 = vld [vmem:[%s2084_s17 + $0x150] ss:$8 sps:$4 sm:$0xff]  }
  0x74   : > { %1099 = vmatprep.subr.bf16.mxu0 %v1614_v16  ;;  %v1636_v31 = vld [vmem:[%s2084_s17 + $0x64] ss:$8 sps:$4 sm:$0xff]   ;;  %v1640_v33 = vld [vmem:[%s2084_s17 + $0x60] ss:$8 sps:$4 sm:$0xff]   ;;  %v1642_v35 = vld [vmem:[%s2084_s17 + $0x74] ss:$8 sps:$4 sm:$0xff]  }
  0x75   : > { %v1638_v32 = vld [vmem:[%s2084_s17 + $0x164] ss:$8 sps:$4 sm:$0xff]   ;;  %v1641_v34 = vld [vmem:[%s2084_s17 + $0x160] ss:$8 sps:$4 sm:$0xff]   ;;  %v1644_v36 = vld [vmem:[%s2084_s17 + $0x174] ss:$8 sps:$4 sm:$0xff]  }
  0x76   : > { %1049 = vmatpush1.bf16.msra.mxu1 %v1616_v17  ;;  %v1646_v37 = vld [vmem:[%s2084_s17 + $0x70] ss:$8 sps:$4 sm:$0xff]   ;;  %v1648_v39 = vld [vmem:[%s2084_s17 + $0x84] ss:$8 sps:$4 sm:$0xff]   ;;  %v1652_v41 = vld [vmem:[%s2084_s17 + $0x80] ss:$8 sps:$4 sm:$0xff]  }
  0x77   : > { %1100 = vmatpush1.bf16.msra.mxu0 %v1617_v18  ;;  %1050 = vmatprep.subr.bf16.mxu1 %v1618_v19  ;;  %v1647_v38 = vld [vmem:[%s2084_s17 + $0x170] ss:$8 sps:$4 sm:$0xff]   ;;  %v1650_v40 = vld [vmem:[%s2084_s17 + $0x184] ss:$8 sps:$4 sm:$0xff]   ;;  %v1653_v42 = vld [vmem:[%s2084_s17 + $0x180] ss:$8 sps:$4 sm:$0xff]  }
  0x78   : > { %1101 = vmatprep.subr.bf16.mxu0 %v1620_v20  ;;  %v1654_v43 = vld [vmem:[%s2084_s17 + $0x94] ss:$8 sps:$4 sm:$0xff]   ;;  %v1658_v45 = vld [vmem:[%s2084_s17 + $0x90] ss:$8 sps:$4 sm:$0xff]   ;;  %v1660_v47 = vld [vmem:[%s2084_s17 + $0xa4] ss:$8 sps:$4 sm:$0xff]  }
  0x79   : > { %v1656_v44 = vld [vmem:[%s2084_s17 + $0x194] ss:$8 sps:$4 sm:$0xff]   ;;  %v1659_v46 = vld [vmem:[%s2084_s17 + $0x190] ss:$8 sps:$4 sm:$0xff]   ;;  %v1662_v48 = vld [vmem:[%s2084_s17 + $0x1a4] ss:$8 sps:$4 sm:$0xff]  }
  0x7a   : > { %1051 = vmatpush1.bf16.msra.mxu1 %v1622_v21  ;;  %v1664_v49 = vld [vmem:[%s2084_s17 + $0xa0] ss:$8 sps:$4 sm:$0xff]   ;;  %v1666_v51 = vld [vmem:[%s2084_s17 + $0xb4] ss:$8 sps:$4 sm:$0xff]   ;;  %v1670_v53 = vld [vmem:[%s2084_s17 + $0xb0] ss:$8 sps:$4 sm:$0xff]  }
  0x7b   : > { %1102 = vmatpush1.bf16.msra.mxu0 %v1623_v22  ;;  %1052 = vmatprep.subr.bf16.mxu1 %v1624_v23  ;;  %v1665_v50 = vld [vmem:[%s2084_s17 + $0x1a0] ss:$8 sps:$4 sm:$0xff]   ;;  %v1668_v52 = vld [vmem:[%s2084_s17 + $0x1b4] ss:$8 sps:$4 sm:$0xff]   ;;  %v1671_v55 = vld [vmem:[%s2084_s17 + $0x1b0] ss:$8 sps:$4 sm:$0xff]  }
  0x7c   : > { %1103 = vmatprep.subr.bf16.mxu0 %v1626_v24  ;;  %v1698_v54 = vld [vmem:[%s2082_s19 + $0x4] ss:$16 sps:$4 sm:$0xff]   ;;  %v1701_v58 = vld [vmem:[%s2082_s19 + $0xc] ss:$16 sps:$4 sm:$0xff]   ;;  %v1676_v59 = vld [vmem:[%s2084_s17 + $0xc0] ss:$8 sps:$4 sm:$0xff]  }
  0x7d   : > { %v1672_v56 = vld [vmem:[%s2084_s17 + $0xc4] ss:$8 sps:$4 sm:$0xff]   ;;  %1076 = vmatprep.mubr.bf16.mxu1 %v1698_v54  ;;  %1127 = vmatprep.mubr.bf16.mxu0 %v1701_v58  ;;  %v1677_v60 = vld [vmem:[%s2084_s17 + $0x1c0] ss:$8 sps:$4 sm:$0xff]   ;;  %v1678_v61 = vld [vmem:[%s2084_s17 + $0xd4] ss:$8 sps:$4 sm:$0xff]  }
  0x7e   : > { %1053 = vmatpush1.bf16.msra.mxu1 %v1628_v25  ;;  %v1674_v57 = vld [vmem:[%s2084_s17 + $0x1c4] ss:$8 sps:$4 sm:$0xff]   ;;  %v1680_v62 = vld [vmem:[%s2084_s17 + $0x1d4] ss:$8 sps:$4 sm:$0xff]   ;;  %v1682_v63 = vld [vmem:[%s2084_s17 + $0xd0] ss:$8 sps:$4 sm:$0xff]  }
  0x7f   : > { %1104 = vmatpush1.bf16.msra.mxu0 %v1629_v26  ;;  %1054 = vmatprep.subr.bf16.mxu1 %v1630_v27  ;;  %v1683_v0 = vld [vmem:[%s2084_s17 + $0x1d0] ss:$8 sps:$4 sm:$0xff]   ;;  %v1684_v1 = vld [vmem:[%s2084_s17 + $0xe4] ss:$8 sps:$4 sm:$0xff]   ;;  %v1688_v3 = vld [vmem:[%s2084_s17 + $0xe0] ss:$8 sps:$4 sm:$0xff]  }
  0x80   : > { %1105 = vmatprep.subr.bf16.mxu0 %v1632_v28  ;;  %v1686_v2 = vld [vmem:[%s2084_s17 + $0x1e4] ss:$8 sps:$4 sm:$0xff]   ;;  %v1689_v4 = vld [vmem:[%s2084_s17 + $0x1e0] ss:$8 sps:$4 sm:$0xff]   ;;  %v1690_v5 = vld [vmem:[%s2084_s17 + $0xf4] ss:$8 sps:$4 sm:$0xff]  }
  0x81   : > { %v1692_v6 = vld [vmem:[%s2084_s17 + $0x1f4] ss:$8 sps:$4 sm:$0xff]   ;;  %v1694_v7 = vld [vmem:[%s2084_s17 + $0xf0] ss:$8 sps:$4 sm:$0xff]   ;;  %v616_v26 = vld [vmem:[#allocation2 + $0x10] sm:$0xff]  ;;  %p1490_p5 = scmp.ne.s32.totalorder %s1776_s21, 8 }
  0x82   : > { %1055 = vmatpush1.bf16.msra.mxu1 %v1634_v29  ;;  %v1695_v8 = vld [vmem:[%s2084_s17 + $0x1f0] ss:$8 sps:$4 sm:$0xff]  }
  0x83   : > { %1106 = vmatpush1.bf16.msra.mxu0 %v1635_v30  ;;  %1056 = vmatprep.subr.bf16.mxu1 %v1636_v31  ;;  %v624_v9 = vld [vmem:[%s2082_s19 + $0x20] sm:$0xff]  ;;  %v625_v10 = vld [vmem:[%s2082_s19 + $0x28] sm:$0xff] }
  0x84   : > { %1107 = vmatprep.subr.bf16.mxu0 %v1638_v32  ;;  %v1696_v11 = vld [vmem:[%s2082_s19] ss:$16 sps:$4 sm:$0xff]   ;;  %v1699_v12 = vld [vmem:[%s2082_s19 + $0x8] ss:$16 sps:$4 sm:$0xff]   ;;  %v1423_v13 = vcombine.high %v624_v9, %v624_v9  ;;  %v1425_v14 = vcombine.high %v625_v10, %v625_v10  ;;  %v1422_v15 = vcombine.low %v624_v9, %v624_v9  ;;  %v1424_v16 = vcombine.low %v625_v10, %v625_v10 }
  0x85   : > { %v614_v18 = vld [vmem:[#allocation2] sm:$0xff]  ;;  %v615_v22 = vld [vmem:[#allocation2 + $0x8] sm:$0xff]  ;;  %v617_v31 = vld [vmem:[#allocation2 + $0x18] sm:$0xff] }
  0x86   : > { %1057 = vmatpush1.bf16.msra.mxu1 %v1640_v33  ;;  %v1186_v54 = vld [vmem:[%s600_s27] sm:$0x3] (!%p1490_p5) }
  0x87   : > { %1108 = vmatpush1.bf16.msra.mxu0 %v1641_v34  ;;  %1058 = vmatprep.subr.bf16.mxu1 %v1642_v35 }
  0x88   : > { %1109 = vmatprep.subr.bf16.mxu0 %v1644_v36 }
  0x8a   : > { %1059 = vmatpush1.bf16.msra.mxu1 %v1646_v37 }
  0x8b   : > { %1110 = vmatpush1.bf16.msra.mxu0 %v1647_v38  ;;  %1060 = vmatprep.subr.bf16.mxu1 %v1648_v39  ;;  %v618_v38 = vld [vmem:[#allocation2 + $0x20] sm:$0xff] }
  0x8c   : > { %1111 = vmatprep.subr.bf16.mxu0 %v1650_v40 }
  0x8e   : > { %1061 = vmatpush1.bf16.msra.mxu1 %v1652_v41 }
  0x8f   : > { %1112 = vmatpush1.bf16.msra.mxu0 %v1653_v42  ;;  %1062 = vmatprep.subr.bf16.mxu1 %v1654_v43  ;;  %v619_v42 = vld [vmem:[#allocation2 + $0x28] sm:$0xff] }
  0x90   : > { %1113 = vmatprep.subr.bf16.mxu0 %v1656_v44 }
  0x92   : > { %1063 = vmatpush1.bf16.msra.mxu1 %v1658_v45 }
  0x93   : > { %1114 = vmatpush1.bf16.msra.mxu0 %v1659_v46  ;;  %1064 = vmatprep.subr.bf16.mxu1 %v1660_v47 }
  0x94   : > { %1115 = vmatprep.subr.bf16.mxu0 %v1662_v48 }
  0x96   : > { %1065 = vmatpush1.bf16.msra.mxu1 %v1664_v49 }
  0x97   : > { %1116 = vmatpush1.bf16.msra.mxu0 %v1665_v50  ;;  %1066 = vmatprep.subr.bf16.mxu1 %v1666_v51  ;;  %v1170_v51 = vlaneseq (!%p1490_p5) }
  0x98   : > { %1117 = vmatprep.subr.bf16.mxu0 %v1668_v52 }
  0x99   : > { %v1171_v52 = vshrl.u32 (!%p1490_p5), %v1170_v51, 7 }
  0x9a   : > { %1067 = vmatpush1.bf16.msra.mxu1 %v1670_v53  ;;  %v1168_v53 = vld [vmem:[%s595_s8] sm:$0x3] (!%p1490_p5) }
  0x9b   : > { %1118 = vmatpush1.bf16.msra.mxu0 %v1671_v55  ;;  %1068 = vmatprep.subr.bf16.mxu1 %v1672_v56  ;;  %v1172_v56 = vsub.s32 (!%p1490_p5), 0, %v1171_v52 }
  0x9c   : > { %1119 = vmatprep.subr.bf16.mxu0 %v1674_v57  ;;  %v1176_v57 = vsub.s32 (!%p1490_p5), 1, %v1171_v52 }
  0x9e   : > { %1069 = vmatpush1.bf16.msra.mxu1 %v1676_v59 }
  0x9f   : > { %1120 = vmatpush1.bf16.msra.mxu0 %v1677_v60  ;;  %1070 = vmatprep.subr.bf16.mxu1 %v1678_v61  ;;  %v1173_v61 = vrot.slane (!%p1490_p5), %v1168_v53, %v1172_v56 }
  0xa0   : > { %1121 = vmatprep.subr.bf16.mxu0 %v1680_v62  ;;  %v1177_v62 = vrot.slane (!%p1490_p5), %v1168_v53, %v1176_v57 }
  0xa2   : > { %1071 = vmatpush1.bf16.msra.mxu1 %v1682_v63  ;;  %v1191_v63 = vrot.slane (!%p1490_p5), %v1186_v54, %v1172_v56 }
  0xa3   : > { %1122 = vmatpush1.bf16.msra.mxu0 %v1683_v0  ;;  %1072 = vmatprep.subr.bf16.mxu1 %v1684_v1  ;;  %v1195_v0 = vrot.slane (!%p1490_p5), %v1186_v54, %v1176_v57 }
  0xa4   : > { %1123 = vmatprep.subr.bf16.mxu0 %v1686_v2 }
  0xa6   : > { %1073 = vmatpush1.bf16.msra.mxu1 %v1688_v3 }
  0xa7   : > { %1124 = vmatpush1.bf16.msra.mxu0 %v1689_v4  ;;  %1074 = vmatprep.subr.bf16.mxu1 %v1690_v5 }
  0xa8   : > { %1125 = vmatprep.subr.bf16.mxu0 %v1692_v6 }
  0xaa   : > { %1075 = vmatpush1.bf16.msra.mxu1 %v1694_v7 }
  0xab   : > { %1126 = vmatpush1.bf16.msra.mxu0 %v1695_v8 }
  0xad   : > { %1077 = vmatmul.mubr.bf16.vlgmr.msra.gmra.mrb[0].mxu1 %v1696_v11 }
  0xae   : > { %1128 = vmatmul.mubr.bf16.vlgmr.msra.gmra.mrb[0].mxu0 %v1699_v12  ;;  %1086 = vmatprep.mubr.bf16.mxu1 %v1423_v13 }
  0xaf   : > { %1137 = vmatprep.mubr.bf16.mxu0 %v1425_v14 }
  0xb5   : > { %1087 = vmatmul.mubr.bf16.gmra.mrb[4].mxu1 %v1422_v15 }
  0xb6   : > { %1138 = vmatmul.mubr.bf16.gmra.mrb[4].mxu0 %v1424_v16 }
 0x180   : > { %v1078_v17 = vpop.f32.mrb[0].mxu1 }
 0x181   : > { %v1129_v19 = vpop.f32.mrb[0].mxu0  ;;  %v1080_v21 = vpop.f32.mrb[1].mxu1 }
 0x182   : > { %v1130_v20 = vadd.f32 %v1129_v19, %v1078_v17  ;;  %v1131_v23 = vpop.f32.mrb[1].mxu0  ;;  %v1082_v25 = vpop.f32.mrb[2].mxu1 }
 0x183   : > { %v1132_v24 = vadd.f32 %v1131_v23, %v1080_v21  ;;  %v1133_v27 = vpop.f32.mrb[2].mxu0  ;;  %v1084_v30 = vpop.f32.mrb[3].mxu1 }
 0x184   : > { %v1146_v28 = vadd.f32 %v1130_v20, %v614_v18  ;;  %v1134_v29 = vadd.f32 %v1133_v27, %v1082_v25  ;;  %v1135_v32 = vpop.f32.mrb[3].mxu0 }
 0x185   : > { %v1147_v33 = vadd.f32 %v1132_v24, %v615_v22  ;;  %v1136_v34 = vadd.f32 %v1135_v32, %v1084_v30 }
 0x186   : > { %1152 = vst [vmem:[#allocation2] sm:$0xff] %v1146_v28  ;;  %v1148_v35 = vadd.f32 %v1134_v29, %v616_v26 }
 0x187   : > { %1153 = vst [vmem:[#allocation2 + $0x8] sm:$0xff] %v1147_v33  ;;  %v1149_v36 = vadd.f32 %v1136_v34, %v617_v31 }
 0x188   : > { %1154 = vst [vmem:[#allocation2 + $0x10] sm:$0xff] %v1148_v35  ;;  %v1088_v37 = vpop.f32.mrb[4].mxu1 }
 0x189   : > { %1155 = vst [vmem:[#allocation2 + $0x18] sm:$0xff] %v1149_v36  ;;  %v1139_v39 = vpop.f32.mrb[4].mxu0  ;;  %v1090_v41 = vpop.f32.mrb[5].mxu1  ;;  %1161 = sbr.rel (%p1490_p5) target bundleno = 416 (0x1a0), region = 105 }
 0x18a   : > { %v1140_v40 = vadd.f32 %v1139_v39, %v1088_v37  ;;  %v1141_v43 = vpop.f32.mrb[5].mxu0  ;;  %v1092_v45 = vpop.f32.mrb[6].mxu1 }
 0x18b   : > { %v1142_v44 = vadd.f32 %v1141_v43, %v1090_v41  ;;  %v1143_v46 = vpop.f32.mrb[6].mxu0  ;;  %v1093_v48 = vpop.f32.mrb[7].mxu1 }
 0x18c   : > { %v1150_v47 = vadd.f32 %v1140_v40, %v618_v38  ;;  %v1144_v49 = vpop.f32.mrb[7].mxu0 }
 0x18d   : > { %v1151_v50 = vadd.f32 %v1142_v44, %v619_v42  ;;  %v1162_v55 = vld [vmem:[#allocation2] sm:$0xff] (!%p1490_p5) }
 0x18e   : > { %1156 = vst [vmem:[#allocation2 + $0x20] sm:$0xff] %v1150_v47  ;;  %v1163_v58 = vld [vmem:[#allocation2 + $0x8] sm:$0xff] (!%p1490_p5)  ;;  %v1180_v3 = vmul.f32 (!%p1490_p5), %v1173_v61, %v1162_v55 }
 0x18f   : > { %1157 = vst [vmem:[#allocation2 + $0x28] sm:$0xff] %v1151_v50  ;;  %v1164_v59 = vld [vmem:[#allocation2 + $0x10] sm:$0xff] (!%p1490_p5)  ;;  %v1181_v4 = vmul.f32 (!%p1490_p5), %v1177_v62, %v1163_v58 }
 0x190   : > { %v1165_v60 = vld [vmem:[#allocation2 + $0x18] sm:$0xff]  ;;  %v1182_v5 = vmul.f32 %v1173_v61, %v1164_v59  ;;  %v1198_v9 = vadd.f32 %v1191_v63, %v1180_v3 }
 0x191   : > { %v1183_v6 = vmul.f32 %v1177_v62, %v1165_v60  ;;  %v1199_v10 = vadd.f32 %v1195_v0, %v1181_v4 }
 0x192   : > { %v1200_v11 = vadd.f32 %v1191_v63, %v1182_v5  ;;  %v1204_v15 = vmax.f32 %v1198_v9, 0.0 }
 0x193   : > { %v1201_v12 = vadd.f32 %v1195_v0, %v1183_v6  ;;  %v1205_v16 = vmax.f32 %v1199_v10, 0.0 }
 0x194   : > { %v1206_v17 = vmax.f32 %v1200_v11, 0.0 }
 0x195   : > { %v1166_v1 = vld [vmem:[#allocation2 + $0x20] sm:$0xff]  ;;  %v1207_v18 = vmax.f32 %v1201_v12, 0.0  ;;  %v1500_v21 = vpack.c.bf16 %v1205_v16, %v1204_v15 }
 0x196   : > { %v1167_v2 = vld [vmem:[#allocation2 + $0x28] sm:$0xff]  ;;  %v1184_v7 = vmul.f32 %v1173_v61, %v1166_v1 }
 0x197   : > { %v1185_v8 = vmul.f32 %v1177_v62, %v1167_v2  ;;  %v1501_v22 = vpack.c.bf16 %v1207_v18, %v1206_v17  ;;  %1230 = vst [vmem:[%s2086_s15] sm:$0xff] %v1500_v21 }
 0x198   : > { %v1202_v13 = vadd.f32 %v1191_v63, %v1184_v7 }
 0x199   : > { %v1203_v14 = vadd.f32 %v1195_v0, %v1185_v8  ;;  %1231 = vst [vmem:[%s2086_s15 + $0x8] sm:$0xff] %v1501_v22 }
 0x19a   : > { %v1208_v19 = vmax.f32 %v1202_v13, 0.0 }
 0x19b   : > { %v1209_v20 = vmax.f32 %v1203_v14, 0.0 }
 0x19d   : > { %v1502_v23 = vpack.c.bf16 %v1209_v20, %v1208_v19 }
 0x19f   : > { %1232 = vst [vmem:[%s2086_s15 + $0x10] sm:$0xff] %v1502_v23 }
 0x1a0 PF: > { %1239 = sbr.rel (!%p1914_p12) target bundleno = 424 (0x1a8), region = 109  ;;  %s1503_s21 = sshll.u32 (%p1914_p12), %s1780_s22, 3  ;;  %v1277_v24 = vld [vmem:[%s2086_s15] sm:$0xff] (%p1914_p12)  ;;  %v1279_v25 = vld [vmem:[%s2086_s15 + $0x8] sm:$0xff] (%p1914_p12) }
 0x1a1   : > { %s1245_s30 = scalar_lea.vmem (%p1914_p12), %s2219_s4, %s1503_s21 }
 0x1a2   : > { %1278 = vst [vmem:[%s1245_s30] sm:$0xff] (%p1914_p12), %v1277_v24  ;;  %1280 = vst [vmem:[%s1245_s30 + $0x10] sm:$0xff] (%p1914_p12), %v1279_v25 }
 0x1a6   : > { %v1281_v26 = vld [vmem:[%s2086_s15 + $0x10] sm:$0xff] (%p1914_p12) }
 0x1a7   : > { %1282 = vst [vmem:[%s1245_s30 + $0x20] sm:$0xff] %v1281_v26 }
 0x1a8 PF: > { %s14_s25 = sadd.s32 1, %s1792_s25   ;;  %s2231_s14 = sld [smem:[#allocation6_spill]] }
 0x1a9   : > { %p11_p6 = scmp.ge.s32.totalorder %s14_s25, 20   ;;  %s2232_s6 = sld [smem:[#allocation7_spill]] }
 0x1aa   : > { %s2233_s15 = smov %s1756_s16  ;;  %s2234_s16 = smov %s1912_s13 }
 0x1ab   : > { %s2235_s17 = smov %s1764_s18  ;;  %s2236_s18 = smov %s1909_s12 }
 0x1ac   : > { %s2237_s19 = smov %s1772_s20  ;;  %s2238_s20 = smov %s1895_s7 }
 0x1ad   : > { %s2239_s21 = smov %s1784_s23  ;;  %s2240_s22 = smov %s1788_s24 }
 0x1ae   : > { %s2241_s23 = smov %s2231_s14  ;;  %13 = sbr.rel (!%p11_p6) target bundleno = 9 (0x9), region = 192 }
 0x1af   : > { %s2242_s24 = smov %s2232_s6 }

// kernel: deeplab_v2_forward.38
= control target key start
LH: loop header
LB: loop body
LE: loop exit
PB: predicated region body
PF: predicated region fallthrough
CT: control target
= control target key end

     0   :  { %s1838_s18 = smov 0   ;;  %s1840_s19 = smov 0   ;;  %s2159_s0 = inlined_call_operand.vmem [shape: bf16[24,512], index: 0, kind: input, shape index: {}]   ;;  %s2160_s1 = inlined_call_operand.vmem [shape: bf16[512,2048], index: 1, kind: input, shape index: {}]   ;;  %s2161_s2 = inlined_call_operand.vmem [shape: f32[1,2048], index: 2, kind: input, shape index: {}]   ;;  %s2162_s3 = inlined_call_operand.vmem [shape: f32[1,2048], index: 3, kind: input, shape index: {}]   ;;  %s2163_s4 = inlined_call_operand.vmem [shape: bf16[24,2048], index: 4, kind: input, shape index: {}]   ;;  %s2164_s5 = inlined_call_operand.vmem [shape: bf16[24,2048], index: 5, kind: output, shape index: {}]  }
   0x1   :  { %s1842_s20 = smov 0   ;;  %s1844_s21 = smov 0  }
   0x2   :  { %s1846_s22 = smov 0  }
   0x3 LB: > { %s30_s23 = sadd.s32 1, %s1802_s21  ;;  %s1515_s24 = sadd.s32 4294967295, %s1806_s22   ;;  %s1806_s22 = sphi %s1846_s22, %s15_s22   ;;  %s1802_s21 = sphi %s1844_s21, %s2170_s21   ;;  %s1798_s20 = sphi %s1842_s20, %s2169_s20   ;;  %s1794_s19 = sphi %s1840_s19, %s2168_s19   ;;  %s1790_s18 = sphi %s1838_s18, %s2167_s18  }
   0x4   : > { %p32_p0 = scmp.ge.s32.totalorder %s30_s23, 8  ;;  %p78_p1 = scmp.ne.s32.totalorder %s1794_s19, %s1790_s18 }
   0x5   : > { %p79_p2 = scmp.eq.s32.totalorder %s1806_s22, 0  ;;  %p190_p4 = scmp.eq.s32.totalorder %s1515_s24, 7 }
   0x6   : > { %s2172_s23 = smov (%p32_p0, %s30_s23), 0  ;;  %s71_s27 = sadd.s32 1, %s1794_s19 }
   0x7   : > { %p1870_p3 = por %p79_p2, %p78_p1  ;;  %s67_s26 = ssub.s32 %s1802_s21, %s2172_s23 }
   0x8   : > { %p69_p5 = scmp.eq.s32.totalorder %s67_s26, 0  ;;  %p1877_p6 = por %p190_p4, %p78_p1 }
   0x9   : > { %p1519_p7 = scmp.ge.s32.totalorder %s1806_s22, 8 }
   0xa   : > { %s1882_s29 = scalar_select %p69_p5, %s1794_s19, %s71_s27  }
   0xb   : > { %227 = sbr.rel (%p1519_p7) target bundleno = 93 (0x5d), region = 20 }
  0x12   : > { %230 = sbr.rel (!%p1870_p3) target bundleno = 86 (0x56), region = 24  ;;  %s232_s30 = sand.u32 (%p1870_p3), 1, %s1794_s19  }
  0x13   : > { %s1608_s6 = sshll.u32 (%p1870_p3), %s1802_s21, 3  ;;  %s1520_s7 = sshll.u32 (%p1870_p3), %s232_s30, 9 }
  0x14   : > { %s1892_s10 = scalar_lea.vmem (%p1870_p3), %s2160_s1, %s1608_s6  ;;  %s1897_s11 = scalar_lea.vmem (%p1870_p3), [#allocation3], %s1520_s7 }
  0x15   : > { %v394_v0 = vld [vmem:[%s1892_s10] sm:$0xff] (%p1870_p3) }
  0x16   : > { %v396_v1 = vld [vmem:[%s1892_s10 + $0x40] sm:$0xff] (%p1870_p3)  ;;  %395 = vst [vmem:[%s1897_s11] sm:$0xff] (%p1870_p3), %v394_v0 }
  0x17   : > { %v398_v2 = vld [vmem:[%s1892_s10 + $0x80] sm:$0xff] (%p1870_p3)  ;;  %397 = vst [vmem:[%s1897_s11 + $0x8] sm:$0xff] (%p1870_p3), %v396_v1 }
  0x18   : > { %399 = vst [vmem:[%s1897_s11 + $0x10] sm:$0xff] (%p1870_p3), %v398_v2  ;;  %v400_v3 = vld [vmem:[%s1892_s10 + $0xc0] sm:$0xff] (%p1870_p3) }
  0x19   : > { %v402_v4 = vld [vmem:[%s1892_s10 + $0x100] sm:$0xff]  ;;  %401 = vst [vmem:[%s1897_s11 + $0x18] sm:$0xff] %v400_v3 }
  0x1a   : > { %v404_v5 = vld [vmem:[%s1892_s10 + $0x140] sm:$0xff]  ;;  %403 = vst [vmem:[%s1897_s11 + $0x20] sm:$0xff] %v402_v4 }
  0x1b   : > { %405 = vst [vmem:[%s1897_s11 + $0x28] sm:$0xff] %v404_v5  ;;  %v406_v6 = vld [vmem:[%s1892_s10 + $0x180] sm:$0xff] }
  0x1c   : > { %v408_v7 = vld [vmem:[%s1892_s10 + $0x1c0] sm:$0xff]  ;;  %407 = vst [vmem:[%s1897_s11 + $0x30] sm:$0xff] %v406_v6 }
  0x1d   : > { %v410_v8 = vld [vmem:[%s1892_s10 + $0x200] sm:$0xff]  ;;  %409 = vst [vmem:[%s1897_s11 + $0x38] sm:$0xff] %v408_v7 }
  0x1e   : > { %411 = vst [vmem:[%s1897_s11 + $0x40] sm:$0xff] %v410_v8  ;;  %v412_v9 = vld [vmem:[%s1892_s10 + $0x240] sm:$0xff] }
  0x1f   : > { %v414_v10 = vld [vmem:[%s1892_s10 + $0x280] sm:$0xff]  ;;  %413 = vst [vmem:[%s1897_s11 + $0x48] sm:$0xff] %v412_v9 }
  0x20   : > { %v416_v11 = vld [vmem:[%s1892_s10 + $0x2c0] sm:$0xff]  ;;  %415 = vst [vmem:[%s1897_s11 + $0x50] sm:$0xff] %v414_v10 }
  0x21   : > { %417 = vst [vmem:[%s1897_s11 + $0x58] sm:$0xff] %v416_v11  ;;  %v418_v12 = vld [vmem:[%s1892_s10 + $0x300] sm:$0xff] }
  0x22   : > { %v420_v13 = vld [vmem:[%s1892_s10 + $0x340] sm:$0xff]  ;;  %419 = vst [vmem:[%s1897_s11 + $0x60] sm:$0xff] %v418_v12 }
  0x23   : > { %v422_v14 = vld [vmem:[%s1892_s10 + $0x380] sm:$0xff]  ;;  %421 = vst [vmem:[%s1897_s11 + $0x68] sm:$0xff] %v420_v13 }
  0x24   : > { %423 = vst [vmem:[%s1897_s11 + $0x70] sm:$0xff] %v422_v14  ;;  %v424_v15 = vld [vmem:[%s1892_s10 + $0x3c0] sm:$0xff] }
  0x25   : > { %v426_v16 = vld [vmem:[%s1892_s10 + $0x400] sm:$0xff]  ;;  %425 = vst [vmem:[%s1897_s11 + $0x78] sm:$0xff] %v424_v15 }
  0x26   : > { %v428_v17 = vld [vmem:[%s1892_s10 + $0x440] sm:$0xff]  ;;  %427 = vst [vmem:[%s1897_s11 + $0x80] sm:$0xff] %v426_v16 }
  0x27   : > { %429 = vst [vmem:[%s1897_s11 + $0x88] sm:$0xff] %v428_v17  ;;  %v430_v18 = vld [vmem:[%s1892_s10 + $0x480] sm:$0xff] }
  0x28   : > { %v432_v19 = vld [vmem:[%s1892_s10 + $0x4c0] sm:$0xff]  ;;  %431 = vst [vmem:[%s1897_s11 + $0x90] sm:$0xff] %v430_v18 }
  0x29   : > { %v434_v20 = vld [vmem:[%s1892_s10 + $0x500] sm:$0xff]  ;;  %433 = vst [vmem:[%s1897_s11 + $0x98] sm:$0xff] %v432_v19 }
  0x2a   : > { %435 = vst [vmem:[%s1897_s11 + $0xa0] sm:$0xff] %v434_v20  ;;  %v436_v21 = vld [vmem:[%s1892_s10 + $0x540] sm:$0xff] }
  0x2b   : > { %v438_v22 = vld [vmem:[%s1892_s10 + $0x580] sm:$0xff]  ;;  %437 = vst [vmem:[%s1897_s11 + $0xa8] sm:$0xff] %v436_v21 }
  0x2c   : > { %v440_v23 = vld [vmem:[%s1892_s10 + $0x5c0] sm:$0xff]  ;;  %439 = vst [vmem:[%s1897_s11 + $0xb0] sm:$0xff] %v438_v22 }
  0x2d   : > { %441 = vst [vmem:[%s1897_s11 + $0xb8] sm:$0xff] %v440_v23  ;;  %v442_v24 = vld [vmem:[%s1892_s10 + $0x600] sm:$0xff] }
  0x2e   : > { %v444_v25 = vld [vmem:[%s1892_s10 + $0x640] sm:$0xff]  ;;  %443 = vst [vmem:[%s1897_s11 + $0xc0] sm:$0xff] %v442_v24 }
  0x2f   : > { %v446_v26 = vld [vmem:[%s1892_s10 + $0x680] sm:$0xff]  ;;  %445 = vst [vmem:[%s1897_s11 + $0xc8] sm:$0xff] %v444_v25 }
  0x30   : > { %447 = vst [vmem:[%s1897_s11 + $0xd0] sm:$0xff] %v446_v26  ;;  %v448_v27 = vld [vmem:[%s1892_s10 + $0x6c0] sm:$0xff] }
  0x31   : > { %v450_v28 = vld [vmem:[%s1892_s10 + $0x700] sm:$0xff]  ;;  %449 = vst [vmem:[%s1897_s11 + $0xd8] sm:$0xff] %v448_v27 }
  0x32   : > { %v452_v29 = vld [vmem:[%s1892_s10 + $0x740] sm:$0xff]  ;;  %451 = vst [vmem:[%s1897_s11 + $0xe0] sm:$0xff] %v450_v28 }
  0x33   : > { %453 = vst [vmem:[%s1897_s11 + $0xe8] sm:$0xff] %v452_v29  ;;  %v454_v30 = vld [vmem:[%s1892_s10 + $0x780] sm:$0xff] }
  0x34   : > { %v456_v31 = vld [vmem:[%s1892_s10 + $0x7c0] sm:$0xff]  ;;  %455 = vst [vmem:[%s1897_s11 + $0xf0] sm:$0xff] %v454_v30 }
  0x35   : > { %v458_v32 = vld [vmem:[%s1892_s10 + $0x800] sm:$0xff]  ;;  %457 = vst [vmem:[%s1897_s11 + $0xf8] sm:$0xff] %v456_v31 }
  0x36   : > { %459 = vst [vmem:[%s1897_s11 + $0x100] sm:$0xff] %v458_v32  ;;  %v460_v33 = vld [vmem:[%s1892_s10 + $0x840] sm:$0xff] }
  0x37   : > { %v462_v34 = vld [vmem:[%s1892_s10 + $0x880] sm:$0xff]  ;;  %461 = vst [vmem:[%s1897_s11 + $0x108] sm:$0xff] %v460_v33 }
  0x38   : > { %v464_v35 = vld [vmem:[%s1892_s10 + $0x8c0] sm:$0xff]  ;;  %463 = vst [vmem:[%s1897_s11 + $0x110] sm:$0xff] %v462_v34 }
  0x39   : > { %465 = vst [vmem:[%s1897_s11 + $0x118] sm:$0xff] %v464_v35  ;;  %v466_v36 = vld [vmem:[%s1892_s10 + $0x900] sm:$0xff] }
  0x3a   : > { %v468_v37 = vld [vmem:[%s1892_s10 + $0x940] sm:$0xff]  ;;  %467 = vst [vmem:[%s1897_s11 + $0x120] sm:$0xff] %v466_v36 }
  0x3b   : > { %v470_v38 = vld [vmem:[%s1892_s10 + $0x980] sm:$0xff]  ;;  %469 = vst [vmem:[%s1897_s11 + $0x128] sm:$0xff] %v468_v37 }
  0x3c   : > { %471 = vst [vmem:[%s1897_s11 + $0x130] sm:$0xff] %v470_v38  ;;  %v472_v39 = vld [vmem:[%s1892_s10 + $0x9c0] sm:$0xff] }
  0x3d   : > { %v474_v40 = vld [vmem:[%s1892_s10 + $0xa00] sm:$0xff]  ;;  %473 = vst [vmem:[%s1897_s11 + $0x138] sm:$0xff] %v472_v39 }
  0x3e   : > { %v476_v41 = vld [vmem:[%s1892_s10 + $0xa40] sm:$0xff]  ;;  %475 = vst [vmem:[%s1897_s11 + $0x140] sm:$0xff] %v474_v40 }
  0x3f   : > { %477 = vst [vmem:[%s1897_s11 + $0x148] sm:$0xff] %v476_v41  ;;  %v478_v42 = vld [vmem:[%s1892_s10 + $0xa80] sm:$0xff] }
  0x40   : > { %v480_v43 = vld [vmem:[%s1892_s10 + $0xac0] sm:$0xff]  ;;  %479 = vst [vmem:[%s1897_s11 + $0x150] sm:$0xff] %v478_v42 }
  0x41   : > { %v482_v44 = vld [vmem:[%s1892_s10 + $0xb00] sm:$0xff]  ;;  %481 = vst [vmem:[%s1897_s11 + $0x158] sm:$0xff] %v480_v43 }
  0x42   : > { %483 = vst [vmem:[%s1897_s11 + $0x160] sm:$0xff] %v482_v44  ;;  %v484_v45 = vld [vmem:[%s1892_s10 + $0xb40] sm:$0xff] }
  0x43   : > { %v486_v46 = vld [vmem:[%s1892_s10 + $0xb80] sm:$0xff]  ;;  %485 = vst [vmem:[%s1897_s11 + $0x168] sm:$0xff] %v484_v45 }
  0x44   : > { %v488_v47 = vld [vmem:[%s1892_s10 + $0xbc0] sm:$0xff]  ;;  %487 = vst [vmem:[%s1897_s11 + $0x170] sm:$0xff] %v486_v46 }
  0x45   : > { %489 = vst [vmem:[%s1897_s11 + $0x178] sm:$0xff] %v488_v47  ;;  %v490_v48 = vld [vmem:[%s1892_s10 + $0xc00] sm:$0xff] }
  0x46   : > { %v492_v49 = vld [vmem:[%s1892_s10 + $0xc40] sm:$0xff]  ;;  %491 = vst [vmem:[%s1897_s11 + $0x180] sm:$0xff] %v490_v48 }
  0x47   : > { %v494_v50 = vld [vmem:[%s1892_s10 + $0xc80] sm:$0xff]  ;;  %493 = vst [vmem:[%s1897_s11 + $0x188] sm:$0xff] %v492_v49 }
  0x48   : > { %495 = vst [vmem:[%s1897_s11 + $0x190] sm:$0xff] %v494_v50  ;;  %v496_v51 = vld [vmem:[%s1892_s10 + $0xcc0] sm:$0xff] }
  0x49   : > { %v498_v52 = vld [vmem:[%s1892_s10 + $0xd00] sm:$0xff]  ;;  %497 = vst [vmem:[%s1897_s11 + $0x198] sm:$0xff] %v496_v51 }
  0x4a   : > { %v500_v53 = vld [vmem:[%s1892_s10 + $0xd40] sm:$0xff]  ;;  %499 = vst [vmem:[%s1897_s11 + $0x1a0] sm:$0xff] %v498_v52 }
  0x4b   : > { %501 = vst [vmem:[%s1897_s11 + $0x1a8] sm:$0xff] %v500_v53  ;;  %v502_v54 = vld [vmem:[%s1892_s10 + $0xd80] sm:$0xff] }
  0x4c   : > { %v504_v55 = vld [vmem:[%s1892_s10 + $0xdc0] sm:$0xff]  ;;  %503 = vst [vmem:[%s1897_s11 + $0x1b0] sm:$0xff] %v502_v54 }
  0x4d   : > { %v506_v56 = vld [vmem:[%s1892_s10 + $0xe00] sm:$0xff]  ;;  %505 = vst [vmem:[%s1897_s11 + $0x1b8] sm:$0xff] %v504_v55 }
  0x4e   : > { %507 = vst [vmem:[%s1897_s11 + $0x1c0] sm:$0xff] %v506_v56  ;;  %v508_v57 = vld [vmem:[%s1892_s10 + $0xe40] sm:$0xff] }
  0x4f   : > { %v510_v58 = vld [vmem:[%s1892_s10 + $0xe80] sm:$0xff]  ;;  %509 = vst [vmem:[%s1897_s11 + $0x1c8] sm:$0xff] %v508_v57 }
  0x50   : > { %v512_v59 = vld [vmem:[%s1892_s10 + $0xec0] sm:$0xff]  ;;  %511 = vst [vmem:[%s1897_s11 + $0x1d0] sm:$0xff] %v510_v58 }
  0x51   : > { %513 = vst [vmem:[%s1897_s11 + $0x1d8] sm:$0xff] %v512_v59  ;;  %v514_v60 = vld [vmem:[%s1892_s10 + $0xf00] sm:$0xff] }
  0x52   : > { %v516_v61 = vld [vmem:[%s1892_s10 + $0xf40] sm:$0xff]  ;;  %515 = vst [vmem:[%s1897_s11 + $0x1e0] sm:$0xff] %v514_v60 }
  0x53   : > { %v518_v62 = vld [vmem:[%s1892_s10 + $0xf80] sm:$0xff]  ;;  %517 = vst [vmem:[%s1897_s11 + $0x1e8] sm:$0xff] %v516_v61 }
  0x54   : > { %519 = vst [vmem:[%s1897_s11 + $0x1f0] sm:$0xff] %v518_v62  ;;  %v520_v63 = vld [vmem:[%s1892_s10 + $0xfc0] sm:$0xff] }
  0x55   : > { %521 = vst [vmem:[%s1897_s11 + $0x1f8] sm:$0xff] %v520_v63 }
  0x56 PF: > { %543 = sbr.rel (!%p1870_p3) target bundleno = 93 (0x5d), region = 70  ;;  %s545_s12 = sand.u32 (%p1870_p3), 1, %s1794_s19  }
  0x57   : > { %s1609_s13 = sshll.u32 (%p1870_p3), %s1802_s21, 3  ;;  %s1620_s14 = smul.u32 (%p1870_p3), 24, %s545_s12 }
  0x58   : > { %s553_s17 = scalar_lea.vmem (%p1870_p3), %s2163_s4, %s1609_s13 }
  0x59   : > { %v585_v0 = vld [vmem:[%s553_s17] sm:$0xff] (%p1870_p3)  ;;  %s547_s24 = scalar_lea.vmem (%p1870_p3), [#allocation4], %s1620_s14 }
  0x5a   : > { %v587_v1 = vld [vmem:[%s553_s17 + $0x40] sm:$0xff] (%p1870_p3)  ;;  %586 = vst [vmem:[%s547_s24] sm:$0xff] (%p1870_p3), %v585_v0 }
  0x5b   : > { %v589_v2 = vld [vmem:[%s553_s17 + $0x80] sm:$0xff] (%p1870_p3)  ;;  %588 = vst [vmem:[%s547_s24 + $0x8] sm:$0xff] (%p1870_p3), %v587_v1 }
  0x5c   : > { %590 = vst [vmem:[%s547_s24 + $0x10] sm:$0xff] (%p1870_p3), %v589_v2 }
  0x5d PF: > { %p1525_p8 = scmp.ge.s32.totalorder %s1806_s22, 1  ;;  %p595_p9 = scmp.lt.s32.totalorder %s1806_s22, 9 }
  0x5f   : > { %p596_p10 = pnand %p1525_p8, %p595_p9 }
  0x60   : > { %s602_s25 = sand.u32 (!%p596_p10), 1, %s1790_s18   ;;  %v1760_v3 = vld [vmem:[%s2159_s0 + $0x4] ss:$16 sps:$4 sm:$0xff] (!%p596_p10)   ;;  %v1763_v4 = vld [vmem:[%s2159_s0 + $0xc] ss:$16 sps:$4 sm:$0xff] (!%p596_p10)   ;;  %s1527_s17 = sshll.u32 (!%p596_p10), %s1798_s20, 1 }
  0x61   : > { %599 = sbr.rel (%p596_p10) target bundleno = 407 (0x197), region = 108  ;;  %s1526_s26 = sshll.u32 (!%p596_p10), %s602_s25, 9  ;;  %1157 = vmatprep.mubr.bf16.mxu1 (!%p596_p10), %v1760_v3  ;;  %1208 = vmatprep.mubr.bf16.mxu0 (!%p596_p10), %v1763_v4 }
  0x62   : > { %s2042_s8 = scalar_lea.vmem (!%p596_p10), [#allocation3], %s1526_s26  ;;  %p672_p11 = scmp.lt.s32.totalorder (!%p596_p10), %s1527_s17, 15 }
  0x63   : > { %v1662_v5 = vld [vmem:[%s2042_s8 + $0x4] ss:$8 sps:$4 sm:$0xff] (!%p596_p10)   ;;  %v1666_v7 = vld [vmem:[%s2042_s8] ss:$8 sps:$4 sm:$0xff] (!%p596_p10)   ;;  %v1668_v9 = vld [vmem:[%s2042_s8 + $0x14] ss:$8 sps:$4 sm:$0xff] (!%p596_p10)  }
  0x64   : > { %v1664_v6 = vld [vmem:[%s2042_s8 + $0x104] ss:$8 sps:$4 sm:$0xff] (!%p596_p10)   ;;  %1125 = vmatprep.subr.bf16.mxu1 (!%p596_p10), %v1662_v5  ;;  %v1667_v8 = vld [vmem:[%s2042_s8 + $0x100] ss:$8 sps:$4 sm:$0xff] (!%p596_p10)   ;;  %v1670_v10 = vld [vmem:[%s2042_s8 + $0x114] ss:$8 sps:$4 sm:$0xff] (!%p596_p10)  }
  0x65   : > { %1176 = vmatprep.subr.bf16.mxu0 (!%p596_p10), %v1664_v6  ;;  %1126 = vmatpush1.bf16.msra.mxu1 (!%p596_p10), %v1666_v7  ;;  %v1672_v11 = vld [vmem:[%s2042_s8 + $0x10] ss:$8 sps:$4 sm:$0xff] (!%p596_p10)   ;;  %v1674_v13 = vld [vmem:[%s2042_s8 + $0x24] ss:$8 sps:$4 sm:$0xff] (!%p596_p10)   ;;  %v1678_v15 = vld [vmem:[%s2042_s8 + $0x20] ss:$8 sps:$4 sm:$0xff] (!%p596_p10)  }
  0x66   : > { %1177 = vmatpush1.bf16.msra.mxu0 (!%p596_p10), %v1667_v8  ;;  %1127 = vmatprep.subr.bf16.mxu1 (!%p596_p10), %v1668_v9  ;;  %v1673_v12 = vld [vmem:[%s2042_s8 + $0x110] ss:$8 sps:$4 sm:$0xff] (!%p596_p10)   ;;  %v1676_v14 = vld [vmem:[%s2042_s8 + $0x124] ss:$8 sps:$4 sm:$0xff] (!%p596_p10)   ;;  %v1679_v16 = vld [vmem:[%s2042_s8 + $0x120] ss:$8 sps:$4 sm:$0xff] (!%p596_p10)  }
  0x67   : > { %1178 = vmatprep.subr.bf16.mxu0 (!%p596_p10), %v1670_v10  ;;  %v1680_v17 = vld [vmem:[%s2042_s8 + $0x34] ss:$8 sps:$4 sm:$0xff] (!%p596_p10)   ;;  %v1684_v19 = vld [vmem:[%s2042_s8 + $0x30] ss:$8 sps:$4 sm:$0xff] (!%p596_p10)   ;;  %v1686_v21 = vld [vmem:[%s2042_s8 + $0x44] ss:$8 sps:$4 sm:$0xff] (!%p596_p10)  }
  0x68   : > { %v1682_v18 = vld [vmem:[%s2042_s8 + $0x134] ss:$8 sps:$4 sm:$0xff]   ;;  %v1685_v20 = vld [vmem:[%s2042_s8 + $0x130] ss:$8 sps:$4 sm:$0xff]   ;;  %v1688_v22 = vld [vmem:[%s2042_s8 + $0x144] ss:$8 sps:$4 sm:$0xff]  }
  0x69   : > { %1128 = vmatpush1.bf16.msra.mxu1 %v1672_v11  ;;  %v1690_v23 = vld [vmem:[%s2042_s8 + $0x40] ss:$8 sps:$4 sm:$0xff]   ;;  %v1692_v25 = vld [vmem:[%s2042_s8 + $0x54] ss:$8 sps:$4 sm:$0xff]   ;;  %v1696_v27 = vld [vmem:[%s2042_s8 + $0x50] ss:$8 sps:$4 sm:$0xff]  }
  0x6a   : > { %1179 = vmatpush1.bf16.msra.mxu0 %v1673_v12  ;;  %1129 = vmatprep.subr.bf16.mxu1 %v1674_v13  ;;  %v1691_v24 = vld [vmem:[%s2042_s8 + $0x140] ss:$8 sps:$4 sm:$0xff]   ;;  %v1694_v26 = vld [vmem:[%s2042_s8 + $0x154] ss:$8 sps:$4 sm:$0xff]   ;;  %v1697_v28 = vld [vmem:[%s2042_s8 + $0x150] ss:$8 sps:$4 sm:$0xff]   ;;  %v1250_v13 = vlaneseq }
  0x6b   : > { %1180 = vmatprep.subr.bf16.mxu0 %v1676_v14  ;;  %v1698_v29 = vld [vmem:[%s2042_s8 + $0x64] ss:$8 sps:$4 sm:$0xff]   ;;  %v1702_v31 = vld [vmem:[%s2042_s8 + $0x60] ss:$8 sps:$4 sm:$0xff]   ;;  %v1704_v33 = vld [vmem:[%s2042_s8 + $0x74] ss:$8 sps:$4 sm:$0xff]  }
  0x6c   : > { %v1700_v30 = vld [vmem:[%s2042_s8 + $0x164] ss:$8 sps:$4 sm:$0xff]   ;;  %v1703_v32 = vld [vmem:[%s2042_s8 + $0x160] ss:$8 sps:$4 sm:$0xff]   ;;  %v1706_v34 = vld [vmem:[%s2042_s8 + $0x174] ss:$8 sps:$4 sm:$0xff]  }
  0x6d   : > { %1130 = vmatpush1.bf16.msra.mxu1 %v1678_v15  ;;  %v1708_v35 = vld [vmem:[%s2042_s8 + $0x70] ss:$8 sps:$4 sm:$0xff]   ;;  %v1710_v37 = vld [vmem:[%s2042_s8 + $0x84] ss:$8 sps:$4 sm:$0xff]   ;;  %v1714_v39 = vld [vmem:[%s2042_s8 + $0x80] ss:$8 sps:$4 sm:$0xff]  }
  0x6e   : > { %1181 = vmatpush1.bf16.msra.mxu0 %v1679_v16  ;;  %1131 = vmatprep.subr.bf16.mxu1 %v1680_v17  ;;  %v1709_v36 = vld [vmem:[%s2042_s8 + $0x170] ss:$8 sps:$4 sm:$0xff]   ;;  %v1712_v38 = vld [vmem:[%s2042_s8 + $0x184] ss:$8 sps:$4 sm:$0xff]   ;;  %v1715_v40 = vld [vmem:[%s2042_s8 + $0x180] ss:$8 sps:$4 sm:$0xff]  }
  0x6f   : > { %1182 = vmatprep.subr.bf16.mxu0 %v1682_v18  ;;  %v1716_v41 = vld [vmem:[%s2042_s8 + $0x94] ss:$8 sps:$4 sm:$0xff]   ;;  %v1720_v43 = vld [vmem:[%s2042_s8 + $0x90] ss:$8 sps:$4 sm:$0xff]   ;;  %v1722_v45 = vld [vmem:[%s2042_s8 + $0xa4] ss:$8 sps:$4 sm:$0xff]  }
  0x70   : > { %v1718_v42 = vld [vmem:[%s2042_s8 + $0x194] ss:$8 sps:$4 sm:$0xff]   ;;  %v1721_v44 = vld [vmem:[%s2042_s8 + $0x190] ss:$8 sps:$4 sm:$0xff]   ;;  %v1724_v46 = vld [vmem:[%s2042_s8 + $0x1a4] ss:$8 sps:$4 sm:$0xff]  }
  0x71   : > { %1132 = vmatpush1.bf16.msra.mxu1 %v1684_v19  ;;  %v1726_v47 = vld [vmem:[%s2042_s8 + $0xa0] ss:$8 sps:$4 sm:$0xff]   ;;  %v1728_v49 = vld [vmem:[%s2042_s8 + $0xb4] ss:$8 sps:$4 sm:$0xff]   ;;  %v1732_v51 = vld [vmem:[%s2042_s8 + $0xb0] ss:$8 sps:$4 sm:$0xff]  }
  0x72   : > { %1183 = vmatpush1.bf16.msra.mxu0 %v1685_v20  ;;  %1133 = vmatprep.subr.bf16.mxu1 %v1686_v21  ;;  %v1727_v48 = vld [vmem:[%s2042_s8 + $0x1a0] ss:$8 sps:$4 sm:$0xff]   ;;  %v1730_v50 = vld [vmem:[%s2042_s8 + $0x1b4] ss:$8 sps:$4 sm:$0xff]   ;;  %v1733_v52 = vld [vmem:[%s2042_s8 + $0x1b0] ss:$8 sps:$4 sm:$0xff]  }
  0x73   : > { %1184 = vmatprep.subr.bf16.mxu0 %v1688_v22  ;;  %v1734_v53 = vld [vmem:[%s2042_s8 + $0xc4] ss:$8 sps:$4 sm:$0xff]   ;;  %v1738_v55 = vld [vmem:[%s2042_s8 + $0xc0] ss:$8 sps:$4 sm:$0xff]   ;;  %v1740_v57 = vld [vmem:[%s2042_s8 + $0xd4] ss:$8 sps:$4 sm:$0xff]  }
  0x74   : > { %v1736_v54 = vld [vmem:[%s2042_s8 + $0x1c4] ss:$8 sps:$4 sm:$0xff]   ;;  %v1739_v56 = vld [vmem:[%s2042_s8 + $0x1c0] ss:$8 sps:$4 sm:$0xff]   ;;  %v1742_v58 = vld [vmem:[%s2042_s8 + $0x1d4] ss:$8 sps:$4 sm:$0xff]  }
  0x75   : > { %1134 = vmatpush1.bf16.msra.mxu1 %v1690_v23  ;;  %v1744_v59 = vld [vmem:[%s2042_s8 + $0xd0] ss:$8 sps:$4 sm:$0xff]   ;;  %v1746_v61 = vld [vmem:[%s2042_s8 + $0xe4] ss:$8 sps:$4 sm:$0xff]   ;;  %v1750_v63 = vld [vmem:[%s2042_s8 + $0xe0] ss:$8 sps:$4 sm:$0xff]  }
  0x76   : > { %1185 = vmatpush1.bf16.msra.mxu0 %v1691_v24  ;;  %1135 = vmatprep.subr.bf16.mxu1 %v1692_v25  ;;  %v1745_v60 = vld [vmem:[%s2042_s8 + $0x1d0] ss:$8 sps:$4 sm:$0xff]   ;;  %v1748_v62 = vld [vmem:[%s2042_s8 + $0x1e4] ss:$8 sps:$4 sm:$0xff]   ;;  %v1751_v0 = vld [vmem:[%s2042_s8 + $0x1e0] ss:$8 sps:$4 sm:$0xff]  }
  0x77   : > { %1186 = vmatprep.subr.bf16.mxu0 %v1694_v26  ;;  %v1752_v1 = vld [vmem:[%s2042_s8 + $0xf4] ss:$8 sps:$4 sm:$0xff]   ;;  %v1756_v3 = vld [vmem:[%s2042_s8 + $0xf0] ss:$8 sps:$4 sm:$0xff]   ;;  %v705_v5 = vld [vmem:[%s2159_s0 + $0x20] sm:$0xff]  ;;  %s2174_s17 = smov (!%p672_p11, %s1527_s17), 15 }
  0x78   : > { %v1754_v2 = vld [vmem:[%s2042_s8 + $0x1f4] ss:$8 sps:$4 sm:$0xff]   ;;  %v1757_v4 = vld [vmem:[%s2042_s8 + $0x1f0] ss:$8 sps:$4 sm:$0xff]   ;;  %v706_v6 = vld [vmem:[%s2159_s0 + $0x28] sm:$0xff]  ;;  %v1534_v9 = vcombine.high %v705_v5, %v705_v5  ;;  %v1533_v11 = vcombine.low %v705_v5, %v705_v5  ;;  %v1251_v14 = vshrl.u32 %v1250_v13, 7  ;;  %s674_s30 = scalar_lea.vmem %s2161_s2, %s2174_s17  ;;  %s679_s8 = scalar_lea.vmem %s2162_s3, %s2174_s17 }
  0x79   : > { %1136 = vmatpush1.bf16.msra.mxu1 %v1696_v27  ;;  %v1758_v7 = vld [vmem:[%s2159_s0] ss:$16 sps:$4 sm:$0xff]   ;;  %v1761_v8 = vld [vmem:[%s2159_s0 + $0x8] ss:$16 sps:$4 sm:$0xff]   ;;  %v1536_v10 = vcombine.high %v706_v6, %v706_v6  ;;  %v1535_v12 = vcombine.low %v706_v6, %v706_v6  ;;  %s2123_s24 = smul.u32 24, %s602_s25  ;;  %s1613_s25 = sshll.u32 (%p1877_p6), %s1798_s20, 3 }
  0x7a   : > { %1187 = vmatpush1.bf16.msra.mxu0 %v1697_v28  ;;  %1137 = vmatprep.subr.bf16.mxu1 %v1698_v29  ;;  %v1252_v15 = vsub.s32 0, %v1251_v14  ;;  %v1248_v16 = vld [vmem:[%s674_s30] sm:$0x3]  ;;  %v1256_v17 = vsub.s32 1, %v1251_v14  ;;  %s1340_s12 = scalar_lea.vmem (%p1877_p6), %s2164_s5, %s1613_s25 }
  0x7b   : > { %1188 = vmatprep.subr.bf16.mxu0 %v1700_v30  ;;  %v1266_v18 = vld [vmem:[%s679_s8] sm:$0x3]  ;;  %s2132_s9 = scalar_lea.vmem [#allocation4], %s2123_s24  ;;  %s656_s18 = scalar_lea.vmem [#allocation5], %s2123_s24 }
  0x7c   : > { %v1253_v19 = vrot.slane %v1248_v16, %v1252_v15  ;;  %v1284_v22 = vld [vmem:[%s2132_s9] sm:$0xff]  ;;  %v1257_v23 = vrot.slane %v1248_v16, %v1256_v17  ;;  %v1271_v25 = vrot.slane %v1266_v18, %v1252_v15  ;;  %v1275_v29 = vrot.slane %v1266_v18, %v1256_v17 }
  0x7d   : > { %1138 = vmatpush1.bf16.msra.mxu1 %v1702_v31 }
  0x7e   : > { %1189 = vmatpush1.bf16.msra.mxu0 %v1703_v32  ;;  %1139 = vmatprep.subr.bf16.mxu1 %v1704_v33  ;;  %v1285_v32 = vld [vmem:[%s2132_s9 + $0x8] sm:$0xff] }
  0x7f   : > { %1190 = vmatprep.subr.bf16.mxu0 %v1706_v34  ;;  %v1287_v34 = vunpack.c.l.bf16 %v1284_v22 }
  0x81   : > { %1140 = vmatpush1.bf16.msra.mxu1 %v1708_v35 }
  0x82   : > { %1191 = vmatpush1.bf16.msra.mxu0 %v1709_v36  ;;  %1141 = vmatprep.subr.bf16.mxu1 %v1710_v37 }
  0x83   : > { %1192 = vmatprep.subr.bf16.mxu0 %v1712_v38 }
  0x85   : > { %1142 = vmatpush1.bf16.msra.mxu1 %v1714_v39  ;;  %v1288_v39 = vunpack.c.h.bf16 %v1284_v22 }
  0x86   : > { %1193 = vmatpush1.bf16.msra.mxu0 %v1715_v40  ;;  %1143 = vmatprep.subr.bf16.mxu1 %v1716_v41 }
  0x87   : > { %1194 = vmatprep.subr.bf16.mxu0 %v1718_v42 }
  0x89   : > { %1144 = vmatpush1.bf16.msra.mxu1 %v1720_v43  ;;  %v1289_v43 = vunpack.c.l.bf16 %v1285_v32 }
  0x8a   : > { %1195 = vmatpush1.bf16.msra.mxu0 %v1721_v44  ;;  %1145 = vmatprep.subr.bf16.mxu1 %v1722_v45 }
  0x8b   : > { %1196 = vmatprep.subr.bf16.mxu0 %v1724_v46  ;;  %v1290_v46 = vunpack.c.h.bf16 %v1285_v32 }
  0x8d   : > { %1146 = vmatpush1.bf16.msra.mxu1 %v1726_v47 }
  0x8e   : > { %1197 = vmatpush1.bf16.msra.mxu0 %v1727_v48  ;;  %1147 = vmatprep.subr.bf16.mxu1 %v1728_v49 }
  0x8f   : > { %1198 = vmatprep.subr.bf16.mxu0 %v1730_v50 }
  0x91   : > { %1148 = vmatpush1.bf16.msra.mxu1 %v1732_v51 }
  0x92   : > { %1199 = vmatpush1.bf16.msra.mxu0 %v1733_v52  ;;  %1149 = vmatprep.subr.bf16.mxu1 %v1734_v53  ;;  %v1286_v53 = vld [vmem:[%s2132_s9 + $0x10] sm:$0xff] }
  0x93   : > { %1200 = vmatprep.subr.bf16.mxu0 %v1736_v54 }
  0x95   : > { %1150 = vmatpush1.bf16.msra.mxu1 %v1738_v55 }
  0x96   : > { %1201 = vmatpush1.bf16.msra.mxu0 %v1739_v56  ;;  %1151 = vmatprep.subr.bf16.mxu1 %v1740_v57 }
  0x97   : > { %1202 = vmatprep.subr.bf16.mxu0 %v1742_v58 }
  0x99   : > { %1152 = vmatpush1.bf16.msra.mxu1 %v1744_v59 }
  0x9a   : > { %1203 = vmatpush1.bf16.msra.mxu0 %v1745_v60  ;;  %1153 = vmatprep.subr.bf16.mxu1 %v1746_v61 }
  0x9b   : > { %1204 = vmatprep.subr.bf16.mxu0 %v1748_v62 }
  0x9d   : > { %1154 = vmatpush1.bf16.msra.mxu1 %v1750_v63 }
  0x9e   : > { %1205 = vmatpush1.bf16.msra.mxu0 %v1751_v0  ;;  %1155 = vmatprep.subr.bf16.mxu1 %v1752_v1 }
  0x9f   : > { %1206 = vmatprep.subr.bf16.mxu0 %v1754_v2  ;;  %v1291_v2 = vunpack.c.l.bf16 %v1286_v53 }
  0xa1   : > { %1156 = vmatpush1.bf16.msra.mxu1 %v1756_v3 }
  0xa2   : > { %1207 = vmatpush1.bf16.msra.mxu0 %v1757_v4 }
  0xa4   : > { %1158 = vmatmul.mubr.bf16.vlgmr.msra.gmra.mrb[0].mxu1 %v1758_v7 }
  0xa5   : > { %1209 = vmatmul.mubr.bf16.vlgmr.msra.gmra.mrb[0].mxu0 %v1761_v8  ;;  %1167 = vmatprep.mubr.bf16.mxu1 %v1534_v9  ;;  %v1292_v8 = vunpack.c.h.bf16 %v1286_v53 }
  0xa6   : > { %1218 = vmatprep.mubr.bf16.mxu0 %v1536_v10 }
  0xac   : > { %1168 = vmatmul.mubr.bf16.gmra.mrb[4].mxu1 %v1533_v11 }
  0xad   : > { %1219 = vmatmul.mubr.bf16.gmra.mrb[4].mxu0 %v1535_v12 }
 0x177   : > { %v1159_v20 = vpop.f32.mrb[0].mxu1 }
 0x178   : > { %v1210_v21 = vpop.f32.mrb[0].mxu0  ;;  %v1161_v26 = vpop.f32.mrb[1].mxu1 }
 0x179   : > { %v1211_v24 = vadd.f32 %v1210_v21, %v1159_v20  ;;  %v1212_v27 = vpop.f32.mrb[1].mxu0  ;;  %v1163_v30 = vpop.f32.mrb[2].mxu1 }
 0x17a   : > { %v1213_v28 = vadd.f32 %v1212_v27, %v1161_v26  ;;  %v1214_v31 = vpop.f32.mrb[2].mxu0  ;;  %v1165_v36 = vpop.f32.mrb[3].mxu1 }
 0x17b   : > { %v1260_v33 = vmul.f32 %v1253_v19, %v1211_v24  ;;  %v1215_v35 = vadd.f32 %v1214_v31, %v1163_v30  ;;  %v1216_v37 = vpop.f32.mrb[3].mxu0 }
 0x17c   : > { %v1261_v38 = vmul.f32 %v1257_v23, %v1213_v28  ;;  %v1217_v40 = vadd.f32 %v1216_v37, %v1165_v36 }
 0x17d   : > { %v1278_v41 = vadd.f32 %v1271_v25, %v1260_v33  ;;  %v1262_v42 = vmul.f32 %v1253_v19, %v1215_v35 }
 0x17e   : > { %v1279_v44 = vadd.f32 %v1275_v29, %v1261_v38  ;;  %v1263_v45 = vmul.f32 %v1257_v23, %v1217_v40 }
 0x17f   : > { %v1293_v47 = vadd.f32 %v1287_v34, %v1278_v41  ;;  %v1280_v48 = vadd.f32 %v1271_v25, %v1262_v42  ;;  %v1169_v51 = vpop.f32.mrb[4].mxu1 }
 0x180   : > { %v1294_v49 = vadd.f32 %v1288_v39, %v1279_v44  ;;  %v1281_v50 = vadd.f32 %v1275_v29, %v1263_v45  ;;  %v1220_v52 = vpop.f32.mrb[4].mxu0  ;;  %v1171_v57 = vpop.f32.mrb[5].mxu1 }
 0x181   : > { %v1299_v54 = vmax.f32 %v1293_v47, 0.0  ;;  %v1295_v55 = vadd.f32 %v1289_v43, %v1280_v48  ;;  %v1221_v56 = vadd.f32 %v1220_v52, %v1169_v51  ;;  %v1222_v58 = vpop.f32.mrb[5].mxu0  ;;  %v1173_v62 = vpop.f32.mrb[6].mxu1 }
 0x182   : > { %v1300_v59 = vmax.f32 %v1294_v49, 0.0  ;;  %v1296_v60 = vadd.f32 %v1290_v46, %v1281_v50  ;;  %v1223_v61 = vadd.f32 %v1222_v58, %v1171_v57  ;;  %v1224_v63 = vpop.f32.mrb[6].mxu0  ;;  %v1174_v3 = vpop.f32.mrb[7].mxu1 }
 0x183   : > { %v1301_v0 = vmax.f32 %v1295_v55, 0.0  ;;  %v1264_v1 = vmul.f32 %v1253_v19, %v1221_v56  ;;  %v1225_v4 = vpop.f32.mrb[7].mxu0 }
 0x184   : > { %v1610_v5 = vpack.c.bf16 %v1300_v59, %v1299_v54  ;;  %v1302_v6 = vmax.f32 %v1296_v60, 0.0  ;;  %v1265_v7 = vmul.f32 %v1257_v23, %v1223_v61 }
 0x185   : > { %v1282_v9 = vadd.f32 %v1271_v25, %v1264_v1 }
 0x186   : > { %1325 = vst [vmem:[%s656_s18] sm:$0xff] %v1610_v5  ;;  %v1611_v10 = vpack.c.bf16 %v1302_v6, %v1301_v0  ;;  %v1283_v11 = vadd.f32 %v1275_v29, %v1265_v7 }
 0x187   : > { %v1297_v12 = vadd.f32 %v1291_v2, %v1282_v9 }
 0x188   : > { %1326 = vst [vmem:[%s656_s18 + $0x8] sm:$0xff] %v1611_v10  ;;  %v1298_v13 = vadd.f32 %v1292_v8, %v1283_v11  ;;  %1334 = sbr.rel (!%p1877_p6) target bundleno = 407 (0x197), region = 128 }
 0x189   : > { %v1303_v14 = vmax.f32 %v1297_v12, 0.0 }
 0x18a   : > { %v1304_v15 = vmax.f32 %v1298_v13, 0.0 }
 0x18c   : > { %v1612_v16 = vpack.c.bf16 %v1304_v15, %v1303_v14 }
 0x18d   : > { %v1372_v17 = vld [vmem:[%s656_s18] sm:$0xff] (%p1877_p6) }
 0x18e   : > { %1327 = vst [vmem:[%s656_s18 + $0x10] sm:$0xff] %v1612_v16  ;;  %1373 = vst [vmem:[%s1340_s12] sm:$0xff] (%p1877_p6), %v1372_v17 }
 0x18f   : > { %v1374_v18 = vld [vmem:[%s656_s18 + $0x8] sm:$0xff] }
 0x190   : > { %1375 = vst [vmem:[%s1340_s12 + $0x40] sm:$0xff] %v1374_v18 }
 0x195   : > { %v1376_v19 = vld [vmem:[%s656_s18 + $0x10] sm:$0xff] }
 0x196   : > { %1377 = vst [vmem:[%s1340_s12 + $0x80] sm:$0xff] %v1376_v19 }
 0x197 PF: > { %s15_s22 = sadd.s32 1, %s1806_s22   ;;  %s2167_s18 = smov %s1794_s19 }
 0x198   : > { %p12_p12 = scmp.ge.s32.totalorder %s15_s22, 10   ;;  %s2168_s19 = smov %s1882_s29 }
 0x199   : > { %s2169_s20 = smov %s1802_s21  ;;  %s2170_s21 = smov %s2172_s23 }
 0x19a   :  { %14 = sbr.rel (!%p12_p12) target bundleno = 3 (0x3), region = 214 }

// kernel: deeplab_v2_forward.35
= control target key start
LH: loop header
LB: loop body
LE: loop exit
PB: predicated region body
PF: predicated region fallthrough
CT: control target
= control target key end

     0   :  { %s2209_s0 = inlined_call_operand.vmem [shape: bf16[24,1024], index: 0, kind: input, shape index: {}]   ;;  %s2210_s1 = inlined_call_operand.vmem [shape: bf16[1024,2048], index: 1, kind: input, shape index: {}]   ;;  %s2211_s2 = inlined_call_operand.vmem [shape: f32[1,2048], index: 2, kind: input, shape index: {}]   ;;  %s2212_s3 = inlined_call_operand.vmem [shape: f32[1,2048], index: 3, kind: input, shape index: {}]   ;;  %s2213_s4 = inlined_call_operand.vmem [shape: bf16[24,2048], index: 4, kind: output, shape index: {}]  }
   0x1   :  { %2216 = sst [smem:[#allocation8_spill]] %s2209_s0 }
   0x2   :  { %2217 = sst [smem:[#allocation9_spill]] %s2210_s1 }
   0x3   :  { %s1814_s15 = smov 0   ;;  %s1816_s16 = smov 0  }
   0x4   :  { %s1818_s17 = smov 0   ;;  %s1820_s18 = smov 0  }
   0x5   :  { %s1822_s19 = smov 0   ;;  %s1824_s20 = smov 0  }
   0x6   :  { %s1826_s21 = smov 0   ;;  %s1828_s22 = smov 0  }
   0x7   :  { %s1830_s23 = smov 0   ;;  %s1832_s24 = smov 0  }
   0x8   :  { %s1834_s25 = smov 0  }
   0x9 LB: > { %s1396_s26 = sadd.s32 4294967295, %s1786_s25   ;;  %s26_s27 = sadd.s32 1, %s1778_s23  ;;  %s1786_s25 = sphi %s1834_s25, %s14_s25   ;;  %s1782_s24 = sphi %s1832_s24, %s2236_s24   ;;  %s1778_s23 = sphi %s1830_s23, %s2235_s23   ;;  %s1774_s22 = sphi %s1828_s22, %s2234_s22   ;;  %s1770_s21 = sphi %s1826_s21, %s2233_s21   ;;  %s1766_s20 = sphi %s1824_s20, %s2232_s20   ;;  %s1762_s19 = sphi %s1822_s19, %s2231_s19   ;;  %s1758_s18 = sphi %s1820_s18, %s2230_s18   ;;  %s1754_s17 = sphi %s1818_s17, %s2229_s17   ;;  %s1750_s16 = sphi %s1816_s16, %s2228_s16   ;;  %s1746_s15 = sphi %s1814_s15, %s2227_s15  }
   0xa   : > { %p27_p0 = scmp.ge.s32.totalorder %s26_s27, 2  ;;  %s29_s28 = sadd.s32 1, %s1782_s24 }
   0xb   : > { %s42_s29 = sadd.s32 1, %s1766_s20  ;;  %p49_p1 = scmp.ne.s32.totalorder %s1766_s20, %s1762_s19 }
   0xc   : > { %s2238_s27 = smov (%p27_p0, %s26_s27), 0  ;;  %s2240_s28 = smov (!%p27_p0, %s29_s28), %s1782_s24 }
   0xd   : > { %2218 = sst [smem:[#allocation6_spill]] %s2238_s27  ;;  %s38_s30 = ssub.s32 %s1778_s23, %s2238_s27 }
   0xe   : > { %p50_p2 = scmp.eq.s32.totalorder %s1786_s25, 0  ;;  %p31_p3 = scmp.ge.s32.totalorder %s2240_s28, 8 }
   0xf   : > { %p40_p4 = scmp.eq.s32.totalorder %s38_s30, 0  ;;  %s70_s6 = sadd.s32 1, %s1758_s18 }
  0x10   : > { %p1881_p5 = por %p50_p2, %p49_p1  ;;  %s2242_s28 = smov (%p31_p3, %s2240_s28), 0 }
  0x11   : > { %2220 = sst [smem:[#allocation7_spill]] %s2242_s28  ;;  %s66_s8 = ssub.s32 %s1782_s24, %s2242_s28 }
  0x12   : > { %s1889_s7 = scalar_select %p40_p4, %s1766_s20, %s42_s29  }
  0x13   : > { %p77_p6 = scmp.ne.s32.totalorder %s1758_s18, %s1754_s17  ;;  %s67_s9 = sor.u32 %s66_s8, %s38_s30 }
  0x14   : > { %p148_p7 = scmp.eq.s32.totalorder %s66_s8, 0  ;;  %p68_p8 = scmp.eq.s32.totalorder %s67_s9, 0 }
  0x15   : > { %p1895_p9 = por %p77_p6, %p50_p2  ;;  %s150_s11 = sadd.s32 1, %s1750_s16 }
  0x16   : > { %p160_p10 = scmp.ne.s32.totalorder %s1750_s16, %s1746_s15  ;;  %p161_p11 = scmp.eq.s32.totalorder %s1396_s26, 15 }
  0x17   : > { %s1903_s12 = scalar_select %p68_p8, %s1758_s18, %s70_s6  }
  0x18   : > { %s1906_s13 = scalar_select %p148_p7, %s1750_s16, %s150_s11  }
  0x19   : > { %p1908_p12 = por %p161_p11, %p160_p10  ;;  %p1399_p13 = scmp.ge.s32.totalorder %s1786_s25, 16 }
  0x1b   : > { %183 = sbr.rel (%p1399_p13) target bundleno = 121 (0x79), region = 16 }
  0x22   : > { %186 = sbr.rel (!%p1881_p5) target bundleno = 47 (0x2f), region = 20  ;;  %s188_s29 = sand.u32 (%p1881_p5), 1, %s1766_s20  }
  0x23   : > { %s1492_s30 = sshll.u32 (%p1881_p5), %s1778_s23, 4  ;;  %s1502_s8 = smul.u32 (%p1881_p5), 48, %s188_s29 }
  0x24   : > { %s2223_s0 = sld [smem:[#allocation8_spill]] (%p1881_p5) }
  0x25   : > { %s190_s26 = scalar_lea.vmem (%p1881_p5), [#allocation3], %s1502_s8 }
  0x2a   : > { %s196_s11 = scalar_lea.vmem %s2223_s0, %s1492_s30 }
  0x2b   : > { %v209_v0 = vld [vmem:[%s196_s11] sm:$0xff]  ;;  %v211_v1 = vld [vmem:[%s196_s11 + $0x8] sm:$0xff] }
  0x2c   : > { %v213_v2 = vld [vmem:[%s196_s11 + $0x20] sm:$0xff]  ;;  %v215_v3 = vld [vmem:[%s196_s11 + $0x28] sm:$0xff]  ;;  %210 = vst [vmem:[%s190_s26] sm:$0xff] %v209_v0  ;;  %212 = vst [vmem:[%s190_s26 + $0x8] sm:$0xff] %v211_v1 }
  0x2d   : > { %v217_v4 = vld [vmem:[%s196_s11 + $0x40] sm:$0xff]  ;;  %v219_v5 = vld [vmem:[%s196_s11 + $0x48] sm:$0xff]  ;;  %214 = vst [vmem:[%s190_s26 + $0x10] sm:$0xff] %v213_v2  ;;  %216 = vst [vmem:[%s190_s26 + $0x18] sm:$0xff] %v215_v3 }
  0x2e   : > { %218 = vst [vmem:[%s190_s26 + $0x20] sm:$0xff] %v217_v4  ;;  %220 = vst [vmem:[%s190_s26 + $0x28] sm:$0xff] %v219_v5 }
  0x2f PF: > { %226 = sbr.rel (!%p1895_p9) target bundleno = 121 (0x79), region = 43  ;;  %s228_s5 = sand.u32 (%p1895_p9), 1, %s1758_s18  }
  0x30   : > { %s1404_s29 = sshll.u32 (%p1895_p9), %s1782_s24, 1  ;;  %s1402_s30 = sshll.u32 (%p1895_p9), %s228_s5, 9 }
  0x31   : > { %s1493_s6 = sshll.u32 (%p1895_p9), %s1778_s23, 10  ;;  %s2224_s1 = sld [smem:[#allocation9_spill]] (%p1895_p9) }
  0x32   : > { %s234_s9 = sadd.s32 (%p1895_p9), %s1493_s6, %s1404_s29  ;;  %s1933_s10 = scalar_lea.vmem (%p1895_p9), [#allocation4], %s1402_s30 }
  0x33   : > { %s1406_s11 = sshll.u32 (%p1895_p9), %s234_s9, 2 }
  0x37   : > { %s1928_s28 = scalar_lea.vmem %s2224_s1, %s1406_s11 }
  0x38   : > { %v390_v6 = vld [vmem:[%s1928_s28] sm:$0xff] }
  0x39   : > { %v392_v7 = vld [vmem:[%s1928_s28 + $0x40] sm:$0xff]  ;;  %391 = vst [vmem:[%s1933_s10] sm:$0xff] %v390_v6 }
  0x3a   : > { %v394_v8 = vld [vmem:[%s1928_s28 + $0x80] sm:$0xff]  ;;  %393 = vst [vmem:[%s1933_s10 + $0x8] sm:$0xff] %v392_v7 }
  0x3b   : > { %395 = vst [vmem:[%s1933_s10 + $0x10] sm:$0xff] %v394_v8  ;;  %v396_v9 = vld [vmem:[%s1928_s28 + $0xc0] sm:$0xff] }
  0x3c   : > { %v398_v10 = vld [vmem:[%s1928_s28 + $0x100] sm:$0xff]  ;;  %397 = vst [vmem:[%s1933_s10 + $0x18] sm:$0xff] %v396_v9 }
  0x3d   : > { %v400_v11 = vld [vmem:[%s1928_s28 + $0x140] sm:$0xff]  ;;  %399 = vst [vmem:[%s1933_s10 + $0x20] sm:$0xff] %v398_v10 }
  0x3e   : > { %401 = vst [vmem:[%s1933_s10 + $0x28] sm:$0xff] %v400_v11  ;;  %v402_v12 = vld [vmem:[%s1928_s28 + $0x180] sm:$0xff] }
  0x3f   : > { %v404_v13 = vld [vmem:[%s1928_s28 + $0x1c0] sm:$0xff]  ;;  %403 = vst [vmem:[%s1933_s10 + $0x30] sm:$0xff] %v402_v12 }
  0x40   : > { %v406_v14 = vld [vmem:[%s1928_s28 + $0x200] sm:$0xff]  ;;  %405 = vst [vmem:[%s1933_s10 + $0x38] sm:$0xff] %v404_v13 }
  0x41   : > { %407 = vst [vmem:[%s1933_s10 + $0x40] sm:$0xff] %v406_v14  ;;  %v408_v15 = vld [vmem:[%s1928_s28 + $0x240] sm:$0xff] }
  0x42   : > { %v410_v16 = vld [vmem:[%s1928_s28 + $0x280] sm:$0xff]  ;;  %409 = vst [vmem:[%s1933_s10 + $0x48] sm:$0xff] %v408_v15 }
  0x43   : > { %v412_v17 = vld [vmem:[%s1928_s28 + $0x2c0] sm:$0xff]  ;;  %411 = vst [vmem:[%s1933_s10 + $0x50] sm:$0xff] %v410_v16 }
  0x44   : > { %413 = vst [vmem:[%s1933_s10 + $0x58] sm:$0xff] %v412_v17  ;;  %v414_v18 = vld [vmem:[%s1928_s28 + $0x300] sm:$0xff] }
  0x45   : > { %v416_v19 = vld [vmem:[%s1928_s28 + $0x340] sm:$0xff]  ;;  %415 = vst [vmem:[%s1933_s10 + $0x60] sm:$0xff] %v414_v18 }
  0x46   : > { %v418_v20 = vld [vmem:[%s1928_s28 + $0x380] sm:$0xff]  ;;  %417 = vst [vmem:[%s1933_s10 + $0x68] sm:$0xff] %v416_v19 }
  0x47   : > { %419 = vst [vmem:[%s1933_s10 + $0x70] sm:$0xff] %v418_v20  ;;  %v420_v21 = vld [vmem:[%s1928_s28 + $0x3c0] sm:$0xff] }
  0x48   : > { %v422_v22 = vld [vmem:[%s1928_s28 + $0x400] sm:$0xff]  ;;  %421 = vst [vmem:[%s1933_s10 + $0x78] sm:$0xff] %v420_v21 }
  0x49   : > { %v424_v23 = vld [vmem:[%s1928_s28 + $0x440] sm:$0xff]  ;;  %423 = vst [vmem:[%s1933_s10 + $0x80] sm:$0xff] %v422_v22 }
  0x4a   : > { %425 = vst [vmem:[%s1933_s10 + $0x88] sm:$0xff] %v424_v23  ;;  %v426_v24 = vld [vmem:[%s1928_s28 + $0x480] sm:$0xff] }
  0x4b   : > { %v428_v25 = vld [vmem:[%s1928_s28 + $0x4c0] sm:$0xff]  ;;  %427 = vst [vmem:[%s1933_s10 + $0x90] sm:$0xff] %v426_v24 }
  0x4c   : > { %v430_v26 = vld [vmem:[%s1928_s28 + $0x500] sm:$0xff]  ;;  %429 = vst [vmem:[%s1933_s10 + $0x98] sm:$0xff] %v428_v25 }
  0x4d   : > { %431 = vst [vmem:[%s1933_s10 + $0xa0] sm:$0xff] %v430_v26  ;;  %v432_v27 = vld [vmem:[%s1928_s28 + $0x540] sm:$0xff] }
  0x4e   : > { %v434_v28 = vld [vmem:[%s1928_s28 + $0x580] sm:$0xff]  ;;  %433 = vst [vmem:[%s1933_s10 + $0xa8] sm:$0xff] %v432_v27 }
  0x4f   : > { %v436_v29 = vld [vmem:[%s1928_s28 + $0x5c0] sm:$0xff]  ;;  %435 = vst [vmem:[%s1933_s10 + $0xb0] sm:$0xff] %v434_v28 }
  0x50   : > { %437 = vst [vmem:[%s1933_s10 + $0xb8] sm:$0xff] %v436_v29  ;;  %v438_v30 = vld [vmem:[%s1928_s28 + $0x600] sm:$0xff] }
  0x51   : > { %v440_v31 = vld [vmem:[%s1928_s28 + $0x640] sm:$0xff]  ;;  %439 = vst [vmem:[%s1933_s10 + $0xc0] sm:$0xff] %v438_v30 }
  0x52   : > { %v442_v32 = vld [vmem:[%s1928_s28 + $0x680] sm:$0xff]  ;;  %441 = vst [vmem:[%s1933_s10 + $0xc8] sm:$0xff] %v440_v31 }
  0x53   : > { %443 = vst [vmem:[%s1933_s10 + $0xd0] sm:$0xff] %v442_v32  ;;  %v444_v33 = vld [vmem:[%s1928_s28 + $0x6c0] sm:$0xff] }
  0x54   : > { %v446_v34 = vld [vmem:[%s1928_s28 + $0x700] sm:$0xff]  ;;  %445 = vst [vmem:[%s1933_s10 + $0xd8] sm:$0xff] %v444_v33 }
  0x55   : > { %v448_v35 = vld [vmem:[%s1928_s28 + $0x740] sm:$0xff]  ;;  %447 = vst [vmem:[%s1933_s10 + $0xe0] sm:$0xff] %v446_v34 }
  0x56   : > { %449 = vst [vmem:[%s1933_s10 + $0xe8] sm:$0xff] %v448_v35  ;;  %v450_v36 = vld [vmem:[%s1928_s28 + $0x780] sm:$0xff] }
  0x57   : > { %v452_v37 = vld [vmem:[%s1928_s28 + $0x7c0] sm:$0xff]  ;;  %451 = vst [vmem:[%s1933_s10 + $0xf0] sm:$0xff] %v450_v36 }
  0x58   : > { %v454_v38 = vld [vmem:[%s1928_s28 + $0x800] sm:$0xff]  ;;  %453 = vst [vmem:[%s1933_s10 + $0xf8] sm:$0xff] %v452_v37 }
  0x59   : > { %455 = vst [vmem:[%s1933_s10 + $0x100] sm:$0xff] %v454_v38  ;;  %v456_v39 = vld [vmem:[%s1928_s28 + $0x840] sm:$0xff] }
  0x5a   : > { %v458_v40 = vld [vmem:[%s1928_s28 + $0x880] sm:$0xff]  ;;  %457 = vst [vmem:[%s1933_s10 + $0x108] sm:$0xff] %v456_v39 }
  0x5b   : > { %v460_v41 = vld [vmem:[%s1928_s28 + $0x8c0] sm:$0xff]  ;;  %459 = vst [vmem:[%s1933_s10 + $0x110] sm:$0xff] %v458_v40 }
  0x5c   : > { %461 = vst [vmem:[%s1933_s10 + $0x118] sm:$0xff] %v460_v41  ;;  %v462_v42 = vld [vmem:[%s1928_s28 + $0x900] sm:$0xff] }
  0x5d   : > { %v464_v43 = vld [vmem:[%s1928_s28 + $0x940] sm:$0xff]  ;;  %463 = vst [vmem:[%s1933_s10 + $0x120] sm:$0xff] %v462_v42 }
  0x5e   : > { %v466_v44 = vld [vmem:[%s1928_s28 + $0x980] sm:$0xff]  ;;  %465 = vst [vmem:[%s1933_s10 + $0x128] sm:$0xff] %v464_v43 }
  0x5f   : > { %467 = vst [vmem:[%s1933_s10 + $0x130] sm:$0xff] %v466_v44  ;;  %v468_v45 = vld [vmem:[%s1928_s28 + $0x9c0] sm:$0xff] }
  0x60   : > { %v470_v46 = vld [vmem:[%s1928_s28 + $0xa00] sm:$0xff]  ;;  %469 = vst [vmem:[%s1933_s10 + $0x138] sm:$0xff] %v468_v45 }
  0x61   : > { %v472_v47 = vld [vmem:[%s1928_s28 + $0xa40] sm:$0xff]  ;;  %471 = vst [vmem:[%s1933_s10 + $0x140] sm:$0xff] %v470_v46 }
  0x62   : > { %473 = vst [vmem:[%s1933_s10 + $0x148] sm:$0xff] %v472_v47  ;;  %v474_v48 = vld [vmem:[%s1928_s28 + $0xa80] sm:$0xff] }
  0x63   : > { %v476_v49 = vld [vmem:[%s1928_s28 + $0xac0] sm:$0xff]  ;;  %475 = vst [vmem:[%s1933_s10 + $0x150] sm:$0xff] %v474_v48 }
  0x64   : > { %v478_v50 = vld [vmem:[%s1928_s28 + $0xb00] sm:$0xff]  ;;  %477 = vst [vmem:[%s1933_s10 + $0x158] sm:$0xff] %v476_v49 }
  0x65   : > { %479 = vst [vmem:[%s1933_s10 + $0x160] sm:$0xff] %v478_v50  ;;  %v480_v51 = vld [vmem:[%s1928_s28 + $0xb40] sm:$0xff] }
  0x66   : > { %v482_v52 = vld [vmem:[%s1928_s28 + $0xb80] sm:$0xff]  ;;  %481 = vst [vmem:[%s1933_s10 + $0x168] sm:$0xff] %v480_v51 }
  0x67   : > { %v484_v53 = vld [vmem:[%s1928_s28 + $0xbc0] sm:$0xff]  ;;  %483 = vst [vmem:[%s1933_s10 + $0x170] sm:$0xff] %v482_v52 }
  0x68   : > { %485 = vst [vmem:[%s1933_s10 + $0x178] sm:$0xff] %v484_v53  ;;  %v486_v54 = vld [vmem:[%s1928_s28 + $0xc00] sm:$0xff] }
  0x69   : > { %v488_v55 = vld [vmem:[%s1928_s28 + $0xc40] sm:$0xff]  ;;  %487 = vst [vmem:[%s1933_s10 + $0x180] sm:$0xff] %v486_v54 }
  0x6a   : > { %v490_v56 = vld [vmem:[%s1928_s28 + $0xc80] sm:$0xff]  ;;  %489 = vst [vmem:[%s1933_s10 + $0x188] sm:$0xff] %v488_v55 }
  0x6b   : > { %491 = vst [vmem:[%s1933_s10 + $0x190] sm:$0xff] %v490_v56  ;;  %v492_v57 = vld [vmem:[%s1928_s28 + $0xcc0] sm:$0xff] }
  0x6c   : > { %v494_v58 = vld [vmem:[%s1928_s28 + $0xd00] sm:$0xff]  ;;  %493 = vst [vmem:[%s1933_s10 + $0x198] sm:$0xff] %v492_v57 }
  0x6d   : > { %v496_v59 = vld [vmem:[%s1928_s28 + $0xd40] sm:$0xff]  ;;  %495 = vst [vmem:[%s1933_s10 + $0x1a0] sm:$0xff] %v494_v58 }
  0x6e   : > { %497 = vst [vmem:[%s1933_s10 + $0x1a8] sm:$0xff] %v496_v59  ;;  %v498_v60 = vld [vmem:[%s1928_s28 + $0xd80] sm:$0xff] }
  0x6f   : > { %v500_v61 = vld [vmem:[%s1928_s28 + $0xdc0] sm:$0xff]  ;;  %499 = vst [vmem:[%s1933_s10 + $0x1b0] sm:$0xff] %v498_v60 }
  0x70   : > { %v502_v62 = vld [vmem:[%s1928_s28 + $0xe00] sm:$0xff]  ;;  %501 = vst [vmem:[%s1933_s10 + $0x1b8] sm:$0xff] %v500_v61 }
  0x71   : > { %503 = vst [vmem:[%s1933_s10 + $0x1c0] sm:$0xff] %v502_v62  ;;  %v504_v63 = vld [vmem:[%s1928_s28 + $0xe40] sm:$0xff] }
  0x72   : > { %v506_v0 = vld [vmem:[%s1928_s28 + $0xe80] sm:$0xff]  ;;  %505 = vst [vmem:[%s1933_s10 + $0x1c8] sm:$0xff] %v504_v63 }
  0x73   : > { %v508_v1 = vld [vmem:[%s1928_s28 + $0xec0] sm:$0xff]  ;;  %507 = vst [vmem:[%s1933_s10 + $0x1d0] sm:$0xff] %v506_v0 }
  0x74   : > { %509 = vst [vmem:[%s1933_s10 + $0x1d8] sm:$0xff] %v508_v1  ;;  %v510_v2 = vld [vmem:[%s1928_s28 + $0xf00] sm:$0xff] }
  0x75   : > { %v512_v3 = vld [vmem:[%s1928_s28 + $0xf40] sm:$0xff]  ;;  %511 = vst [vmem:[%s1933_s10 + $0x1e0] sm:$0xff] %v510_v2 }
  0x76   : > { %v514_v4 = vld [vmem:[%s1928_s28 + $0xf80] sm:$0xff]  ;;  %513 = vst [vmem:[%s1933_s10 + $0x1e8] sm:$0xff] %v512_v3 }
  0x77   : > { %515 = vst [vmem:[%s1933_s10 + $0x1f0] sm:$0xff] %v514_v4  ;;  %v516_v5 = vld [vmem:[%s1928_s28 + $0xfc0] sm:$0xff] }
  0x78   : > { %517 = vst [vmem:[%s1933_s10 + $0x1f8] sm:$0xff] %v516_v5 }
  0x79 PF: > { %p1407_p0 = scmp.ge.s32.totalorder %s1786_s25, 1  ;;  %p538_p1 = scmp.lt.s32.totalorder %s1786_s25, 17 }
  0x7b   : > { %p539_p2 = pnand %p1407_p0, %p538_p1 }
  0x7c   : > { %s545_s0 = sand.u32 (!%p539_p2), 1, %s1762_s19   ;;  %s552_s26 = sand.u32 (!%p539_p2), 1, %s1754_s17  }
  0x7d   : > { %542 = sbr.rel (%p539_p2) target bundleno = 453 (0x1c5), region = 89  ;;  %s1408_s29 = sshll.u32 (!%p539_p2), %s552_s26, 9 }
  0x7e   : > { %s1503_s5 = smul.u32 (!%p539_p2), 48, %s545_s0  ;;  %s585_s30 = sand.u32 (!%p539_p2), 1, %s1746_s15  }
  0x7f   : > { %s1504_s6 = smul.u32 (!%p539_p2), 24, %s585_s30  ;;  %s1409_s28 = sshll.u32 (!%p539_p2), %s1774_s22, 1 }
  0x80   : > { %p593_p3 = scmp.lt.s32.totalorder (!%p539_p2), %s1409_s28, 15  ;;  %s2076_s19 = scalar_lea.vmem (!%p539_p2), [#allocation3], %s1503_s5 }
  0x81   : > { %s2078_s17 = scalar_lea.vmem (!%p539_p2), [#allocation4], %s1408_s29  ;;  %s2080_s15 = scalar_lea.vmem (!%p539_p2), [#allocation5], %s1504_s6 }
  0x82   : > { %p1411_p4 = scmp.ne.s32.totalorder (!%p539_p2), %s1770_s21, 0 }
  0x84   : > { %s2244_s28 = smov (!%p593_p3, %s1409_s28), 15  ;;  %607 = sbr.rel (%p1411_p4) target bundleno = 139 (0x8b), region = 101 }
  0x85   : > { %s595_s8 = scalar_lea.vmem %s2211_s2, %s2244_s28  ;;  %s600_s27 = scalar_lea.vmem %s2212_s3, %s2244_s28  ;;  %v1788_v6 = vmov (!%p1411_p4), 0.0  }
  0x86   : > { %608 = vst [vmem:[#allocation2] sm:$0xff] (!%p1411_p4), %v1788_v6  ;;  %609 = vst [vmem:[#allocation2 + $0x8] sm:$0xff] (!%p1411_p4), %v1788_v6 }
  0x87   : > { %610 = vst [vmem:[#allocation2 + $0x10] sm:$0xff] (!%p1411_p4), %v1788_v6  ;;  %611 = vst [vmem:[#allocation2 + $0x18] sm:$0xff] (!%p1411_p4), %v1788_v6 }
  0x88   : > { %612 = vst [vmem:[#allocation2 + $0x20] sm:$0xff] (!%p1411_p4), %v1788_v6  ;;  %613 = vst [vmem:[#allocation2 + $0x28] sm:$0xff] (!%p1411_p4), %v1788_v6 }
  0x8b PF: > { %v1594_v7 = vld [vmem:[%s2078_s17 + $0x4] ss:$8 sps:$4 sm:$0xff]   ;;  %v1598_v9 = vld [vmem:[%s2078_s17] ss:$8 sps:$4 sm:$0xff]   ;;  %v1600_v11 = vld [vmem:[%s2078_s17 + $0x14] ss:$8 sps:$4 sm:$0xff]  }
  0x8c   : > { %v1596_v8 = vld [vmem:[%s2078_s17 + $0x104] ss:$8 sps:$4 sm:$0xff]   ;;  %1044 = vmatprep.subr.bf16.mxu1 %v1594_v7  ;;  %v1599_v10 = vld [vmem:[%s2078_s17 + $0x100] ss:$8 sps:$4 sm:$0xff]   ;;  %v1602_v12 = vld [vmem:[%s2078_s17 + $0x114] ss:$8 sps:$4 sm:$0xff]  }
  0x8d   : > { %1095 = vmatprep.subr.bf16.mxu0 %v1596_v8  ;;  %1045 = vmatpush1.bf16.msra.mxu1 %v1598_v9  ;;  %v1604_v13 = vld [vmem:[%s2078_s17 + $0x10] ss:$8 sps:$4 sm:$0xff]   ;;  %v1606_v15 = vld [vmem:[%s2078_s17 + $0x24] ss:$8 sps:$4 sm:$0xff]   ;;  %v1610_v17 = vld [vmem:[%s2078_s17 + $0x20] ss:$8 sps:$4 sm:$0xff]  }
  0x8e   : > { %1096 = vmatpush1.bf16.msra.mxu0 %v1599_v10  ;;  %1046 = vmatprep.subr.bf16.mxu1 %v1600_v11  ;;  %v1605_v14 = vld [vmem:[%s2078_s17 + $0x110] ss:$8 sps:$4 sm:$0xff]   ;;  %v1608_v16 = vld [vmem:[%s2078_s17 + $0x124] ss:$8 sps:$4 sm:$0xff]   ;;  %v1611_v18 = vld [vmem:[%s2078_s17 + $0x120] ss:$8 sps:$4 sm:$0xff]  }
  0x8f   : > { %1097 = vmatprep.subr.bf16.mxu0 %v1602_v12  ;;  %v1612_v19 = vld [vmem:[%s2078_s17 + $0x34] ss:$8 sps:$4 sm:$0xff]   ;;  %v1616_v21 = vld [vmem:[%s2078_s17 + $0x30] ss:$8 sps:$4 sm:$0xff]   ;;  %v1618_v23 = vld [vmem:[%s2078_s17 + $0x44] ss:$8 sps:$4 sm:$0xff]  }
  0x90   : > { %v1614_v20 = vld [vmem:[%s2078_s17 + $0x134] ss:$8 sps:$4 sm:$0xff]   ;;  %v1617_v22 = vld [vmem:[%s2078_s17 + $0x130] ss:$8 sps:$4 sm:$0xff]   ;;  %v1620_v24 = vld [vmem:[%s2078_s17 + $0x144] ss:$8 sps:$4 sm:$0xff]  }
  0x91   : > { %1047 = vmatpush1.bf16.msra.mxu1 %v1604_v13  ;;  %v1622_v25 = vld [vmem:[%s2078_s17 + $0x40] ss:$8 sps:$4 sm:$0xff]   ;;  %v1624_v27 = vld [vmem:[%s2078_s17 + $0x54] ss:$8 sps:$4 sm:$0xff]   ;;  %v1628_v29 = vld [vmem:[%s2078_s17 + $0x50] ss:$8 sps:$4 sm:$0xff]  }
  0x92   : > { %1098 = vmatpush1.bf16.msra.mxu0 %v1605_v14  ;;  %1048 = vmatprep.subr.bf16.mxu1 %v1606_v15  ;;  %v1623_v26 = vld [vmem:[%s2078_s17 + $0x140] ss:$8 sps:$4 sm:$0xff]   ;;  %v1626_v28 = vld [vmem:[%s2078_s17 + $0x154] ss:$8 sps:$4 sm:$0xff]   ;;  %v1629_v30 = vld [vmem:[%s2078_s17 + $0x150] ss:$8 sps:$4 sm:$0xff]  }
  0x93   : > { %1099 = vmatprep.subr.bf16.mxu0 %v1608_v16  ;;  %v1630_v31 = vld [vmem:[%s2078_s17 + $0x64] ss:$8 sps:$4 sm:$0xff]   ;;  %v1634_v33 = vld [vmem:[%s2078_s17 + $0x60] ss:$8 sps:$4 sm:$0xff]   ;;  %v1636_v35 = vld [vmem:[%s2078_s17 + $0x74] ss:$8 sps:$4 sm:$0xff]  }
  0x94   : > { %v1632_v32 = vld [vmem:[%s2078_s17 + $0x164] ss:$8 sps:$4 sm:$0xff]   ;;  %v1635_v34 = vld [vmem:[%s2078_s17 + $0x160] ss:$8 sps:$4 sm:$0xff]   ;;  %v1638_v36 = vld [vmem:[%s2078_s17 + $0x174] ss:$8 sps:$4 sm:$0xff]  }
  0x95   : > { %1049 = vmatpush1.bf16.msra.mxu1 %v1610_v17  ;;  %v1640_v37 = vld [vmem:[%s2078_s17 + $0x70] ss:$8 sps:$4 sm:$0xff]   ;;  %v1642_v39 = vld [vmem:[%s2078_s17 + $0x84] ss:$8 sps:$4 sm:$0xff]   ;;  %v1646_v41 = vld [vmem:[%s2078_s17 + $0x80] ss:$8 sps:$4 sm:$0xff]  }
  0x96   : > { %1100 = vmatpush1.bf16.msra.mxu0 %v1611_v18  ;;  %1050 = vmatprep.subr.bf16.mxu1 %v1612_v19  ;;  %v1641_v38 = vld [vmem:[%s2078_s17 + $0x170] ss:$8 sps:$4 sm:$0xff]   ;;  %v1644_v40 = vld [vmem:[%s2078_s17 + $0x184] ss:$8 sps:$4 sm:$0xff]   ;;  %v1647_v42 = vld [vmem:[%s2078_s17 + $0x180] ss:$8 sps:$4 sm:$0xff]  }
  0x97   : > { %1101 = vmatprep.subr.bf16.mxu0 %v1614_v20  ;;  %v1648_v43 = vld [vmem:[%s2078_s17 + $0x94] ss:$8 sps:$4 sm:$0xff]   ;;  %v1652_v45 = vld [vmem:[%s2078_s17 + $0x90] ss:$8 sps:$4 sm:$0xff]   ;;  %v1654_v47 = vld [vmem:[%s2078_s17 + $0xa4] ss:$8 sps:$4 sm:$0xff]  }
  0x98   : > { %v1650_v44 = vld [vmem:[%s2078_s17 + $0x194] ss:$8 sps:$4 sm:$0xff]   ;;  %v1653_v46 = vld [vmem:[%s2078_s17 + $0x190] ss:$8 sps:$4 sm:$0xff]   ;;  %v1656_v48 = vld [vmem:[%s2078_s17 + $0x1a4] ss:$8 sps:$4 sm:$0xff]  }
  0x99   : > { %1051 = vmatpush1.bf16.msra.mxu1 %v1616_v21  ;;  %v1658_v49 = vld [vmem:[%s2078_s17 + $0xa0] ss:$8 sps:$4 sm:$0xff]   ;;  %v1660_v51 = vld [vmem:[%s2078_s17 + $0xb4] ss:$8 sps:$4 sm:$0xff]   ;;  %v1664_v53 = vld [vmem:[%s2078_s17 + $0xb0] ss:$8 sps:$4 sm:$0xff]  }
  0x9a   : > { %1102 = vmatpush1.bf16.msra.mxu0 %v1617_v22  ;;  %1052 = vmatprep.subr.bf16.mxu1 %v1618_v23  ;;  %v1659_v50 = vld [vmem:[%s2078_s17 + $0x1a0] ss:$8 sps:$4 sm:$0xff]   ;;  %v1662_v52 = vld [vmem:[%s2078_s17 + $0x1b4] ss:$8 sps:$4 sm:$0xff]   ;;  %v1665_v55 = vld [vmem:[%s2078_s17 + $0x1b0] ss:$8 sps:$4 sm:$0xff]  }
  0x9b   : > { %1103 = vmatprep.subr.bf16.mxu0 %v1620_v24  ;;  %v1692_v54 = vld [vmem:[%s2076_s19 + $0x4] ss:$16 sps:$4 sm:$0xff]   ;;  %v1695_v58 = vld [vmem:[%s2076_s19 + $0xc] ss:$16 sps:$4 sm:$0xff]   ;;  %v1670_v59 = vld [vmem:[%s2078_s17 + $0xc0] ss:$8 sps:$4 sm:$0xff]  }
  0x9c   : > { %v1666_v56 = vld [vmem:[%s2078_s17 + $0xc4] ss:$8 sps:$4 sm:$0xff]   ;;  %1076 = vmatprep.mubr.bf16.mxu1 %v1692_v54  ;;  %1127 = vmatprep.mubr.bf16.mxu0 %v1695_v58  ;;  %v1671_v60 = vld [vmem:[%s2078_s17 + $0x1c0] ss:$8 sps:$4 sm:$0xff]   ;;  %v1672_v61 = vld [vmem:[%s2078_s17 + $0xd4] ss:$8 sps:$4 sm:$0xff]  }
  0x9d   : > { %1053 = vmatpush1.bf16.msra.mxu1 %v1622_v25  ;;  %v1668_v57 = vld [vmem:[%s2078_s17 + $0x1c4] ss:$8 sps:$4 sm:$0xff]   ;;  %v1674_v62 = vld [vmem:[%s2078_s17 + $0x1d4] ss:$8 sps:$4 sm:$0xff]   ;;  %v1676_v63 = vld [vmem:[%s2078_s17 + $0xd0] ss:$8 sps:$4 sm:$0xff]  }
  0x9e   : > { %1104 = vmatpush1.bf16.msra.mxu0 %v1623_v26  ;;  %1054 = vmatprep.subr.bf16.mxu1 %v1624_v27  ;;  %v1677_v0 = vld [vmem:[%s2078_s17 + $0x1d0] ss:$8 sps:$4 sm:$0xff]   ;;  %v1678_v1 = vld [vmem:[%s2078_s17 + $0xe4] ss:$8 sps:$4 sm:$0xff]   ;;  %v1682_v3 = vld [vmem:[%s2078_s17 + $0xe0] ss:$8 sps:$4 sm:$0xff]  }
  0x9f   : > { %1105 = vmatprep.subr.bf16.mxu0 %v1626_v28  ;;  %v1680_v2 = vld [vmem:[%s2078_s17 + $0x1e4] ss:$8 sps:$4 sm:$0xff]   ;;  %v1683_v4 = vld [vmem:[%s2078_s17 + $0x1e0] ss:$8 sps:$4 sm:$0xff]   ;;  %v1684_v5 = vld [vmem:[%s2078_s17 + $0xf4] ss:$8 sps:$4 sm:$0xff]  }
  0xa0   : > { %v1686_v6 = vld [vmem:[%s2078_s17 + $0x1f4] ss:$8 sps:$4 sm:$0xff]   ;;  %v1688_v7 = vld [vmem:[%s2078_s17 + $0xf0] ss:$8 sps:$4 sm:$0xff]   ;;  %v616_v26 = vld [vmem:[#allocation2 + $0x10] sm:$0xff]  ;;  %p1484_p5 = scmp.ne.s32.totalorder %s1770_s21, 1 }
  0xa1   : > { %1055 = vmatpush1.bf16.msra.mxu1 %v1628_v29  ;;  %v1689_v8 = vld [vmem:[%s2078_s17 + $0x1f0] ss:$8 sps:$4 sm:$0xff]  }
  0xa2   : > { %1106 = vmatpush1.bf16.msra.mxu0 %v1629_v30  ;;  %1056 = vmatprep.subr.bf16.mxu1 %v1630_v31  ;;  %v624_v9 = vld [vmem:[%s2076_s19 + $0x20] sm:$0xff]  ;;  %v625_v10 = vld [vmem:[%s2076_s19 + $0x28] sm:$0xff] }
  0xa3   : > { %1107 = vmatprep.subr.bf16.mxu0 %v1632_v32  ;;  %v1690_v11 = vld [vmem:[%s2076_s19] ss:$16 sps:$4 sm:$0xff]   ;;  %v1693_v12 = vld [vmem:[%s2076_s19 + $0x8] ss:$16 sps:$4 sm:$0xff]   ;;  %v1417_v13 = vcombine.high %v624_v9, %v624_v9  ;;  %v1419_v14 = vcombine.high %v625_v10, %v625_v10  ;;  %v1416_v15 = vcombine.low %v624_v9, %v624_v9  ;;  %v1418_v16 = vcombine.low %v625_v10, %v625_v10 }
  0xa4   : > { %v614_v18 = vld [vmem:[#allocation2] sm:$0xff]  ;;  %v615_v22 = vld [vmem:[#allocation2 + $0x8] sm:$0xff]  ;;  %v617_v31 = vld [vmem:[#allocation2 + $0x18] sm:$0xff] }
  0xa5   : > { %1057 = vmatpush1.bf16.msra.mxu1 %v1634_v33  ;;  %v1186_v54 = vld [vmem:[%s600_s27] sm:$0x3] (!%p1484_p5) }
  0xa6   : > { %1108 = vmatpush1.bf16.msra.mxu0 %v1635_v34  ;;  %1058 = vmatprep.subr.bf16.mxu1 %v1636_v35 }
  0xa7   : > { %1109 = vmatprep.subr.bf16.mxu0 %v1638_v36 }
  0xa9   : > { %1059 = vmatpush1.bf16.msra.mxu1 %v1640_v37 }
  0xaa   : > { %1110 = vmatpush1.bf16.msra.mxu0 %v1641_v38  ;;  %1060 = vmatprep.subr.bf16.mxu1 %v1642_v39  ;;  %v618_v38 = vld [vmem:[#allocation2 + $0x20] sm:$0xff] }
  0xab   : > { %1111 = vmatprep.subr.bf16.mxu0 %v1644_v40 }
  0xad   : > { %1061 = vmatpush1.bf16.msra.mxu1 %v1646_v41 }
  0xae   : > { %1112 = vmatpush1.bf16.msra.mxu0 %v1647_v42  ;;  %1062 = vmatprep.subr.bf16.mxu1 %v1648_v43  ;;  %v619_v42 = vld [vmem:[#allocation2 + $0x28] sm:$0xff] }
  0xaf   : > { %1113 = vmatprep.subr.bf16.mxu0 %v1650_v44 }
  0xb1   : > { %1063 = vmatpush1.bf16.msra.mxu1 %v1652_v45 }
  0xb2   : > { %1114 = vmatpush1.bf16.msra.mxu0 %v1653_v46  ;;  %1064 = vmatprep.subr.bf16.mxu1 %v1654_v47 }
  0xb3   : > { %1115 = vmatprep.subr.bf16.mxu0 %v1656_v48 }
  0xb5   : > { %1065 = vmatpush1.bf16.msra.mxu1 %v1658_v49 }
  0xb6   : > { %1116 = vmatpush1.bf16.msra.mxu0 %v1659_v50  ;;  %1066 = vmatprep.subr.bf16.mxu1 %v1660_v51  ;;  %v1170_v51 = vlaneseq (!%p1484_p5) }
  0xb7   : > { %1117 = vmatprep.subr.bf16.mxu0 %v1662_v52 }
  0xb8   : > { %v1171_v52 = vshrl.u32 (!%p1484_p5), %v1170_v51, 7 }
  0xb9   : > { %1067 = vmatpush1.bf16.msra.mxu1 %v1664_v53  ;;  %v1168_v53 = vld [vmem:[%s595_s8] sm:$0x3] (!%p1484_p5) }
  0xba   : > { %1118 = vmatpush1.bf16.msra.mxu0 %v1665_v55  ;;  %1068 = vmatprep.subr.bf16.mxu1 %v1666_v56  ;;  %v1172_v56 = vsub.s32 (!%p1484_p5), 0, %v1171_v52 }
  0xbb   : > { %1119 = vmatprep.subr.bf16.mxu0 %v1668_v57  ;;  %v1176_v57 = vsub.s32 (!%p1484_p5), 1, %v1171_v52 }
  0xbd   : > { %1069 = vmatpush1.bf16.msra.mxu1 %v1670_v59 }
  0xbe   : > { %1120 = vmatpush1.bf16.msra.mxu0 %v1671_v60  ;;  %1070 = vmatprep.subr.bf16.mxu1 %v1672_v61  ;;  %v1173_v61 = vrot.slane (!%p1484_p5), %v1168_v53, %v1172_v56 }
  0xbf   : > { %1121 = vmatprep.subr.bf16.mxu0 %v1674_v62  ;;  %v1177_v62 = vrot.slane (!%p1484_p5), %v1168_v53, %v1176_v57 }
  0xc1   : > { %1071 = vmatpush1.bf16.msra.mxu1 %v1676_v63  ;;  %v1191_v63 = vrot.slane (!%p1484_p5), %v1186_v54, %v1172_v56 }
  0xc2   : > { %1122 = vmatpush1.bf16.msra.mxu0 %v1677_v0  ;;  %1072 = vmatprep.subr.bf16.mxu1 %v1678_v1  ;;  %v1195_v0 = vrot.slane (!%p1484_p5), %v1186_v54, %v1176_v57 }
  0xc3   : > { %1123 = vmatprep.subr.bf16.mxu0 %v1680_v2 }
  0xc5   : > { %1073 = vmatpush1.bf16.msra.mxu1 %v1682_v3 }
  0xc6   : > { %1124 = vmatpush1.bf16.msra.mxu0 %v1683_v4  ;;  %1074 = vmatprep.subr.bf16.mxu1 %v1684_v5 }
  0xc7   : > { %1125 = vmatprep.subr.bf16.mxu0 %v1686_v6 }
  0xc9   : > { %1075 = vmatpush1.bf16.msra.mxu1 %v1688_v7 }
  0xca   : > { %1126 = vmatpush1.bf16.msra.mxu0 %v1689_v8 }
  0xcc   : > { %1077 = vmatmul.mubr.bf16.vlgmr.msra.gmra.mrb[0].mxu1 %v1690_v11 }
  0xcd   : > { %1128 = vmatmul.mubr.bf16.vlgmr.msra.gmra.mrb[0].mxu0 %v1693_v12  ;;  %1086 = vmatprep.mubr.bf16.mxu1 %v1417_v13 }
  0xce   : > { %1137 = vmatprep.mubr.bf16.mxu0 %v1419_v14 }
  0xd4   : > { %1087 = vmatmul.mubr.bf16.gmra.mrb[4].mxu1 %v1416_v15 }
  0xd5   : > { %1138 = vmatmul.mubr.bf16.gmra.mrb[4].mxu0 %v1418_v16 }
 0x19f   : > { %v1078_v17 = vpop.f32.mrb[0].mxu1 }
 0x1a0   : > { %v1129_v19 = vpop.f32.mrb[0].mxu0  ;;  %v1080_v21 = vpop.f32.mrb[1].mxu1 }
 0x1a1   : > { %v1130_v20 = vadd.f32 %v1129_v19, %v1078_v17  ;;  %v1131_v23 = vpop.f32.mrb[1].mxu0  ;;  %v1082_v25 = vpop.f32.mrb[2].mxu1 }
 0x1a2   : > { %v1132_v24 = vadd.f32 %v1131_v23, %v1080_v21  ;;  %v1133_v27 = vpop.f32.mrb[2].mxu0  ;;  %v1084_v30 = vpop.f32.mrb[3].mxu1 }
 0x1a3   : > { %v1146_v28 = vadd.f32 %v1130_v20, %v614_v18  ;;  %v1134_v29 = vadd.f32 %v1133_v27, %v1082_v25  ;;  %v1135_v32 = vpop.f32.mrb[3].mxu0 }
 0x1a4   : > { %v1147_v33 = vadd.f32 %v1132_v24, %v615_v22  ;;  %v1136_v34 = vadd.f32 %v1135_v32, %v1084_v30 }
 0x1a5   : > { %1152 = vst [vmem:[#allocation2] sm:$0xff] %v1146_v28  ;;  %v1148_v35 = vadd.f32 %v1134_v29, %v616_v26 }
 0x1a6   : > { %1153 = vst [vmem:[#allocation2 + $0x8] sm:$0xff] %v1147_v33  ;;  %v1149_v36 = vadd.f32 %v1136_v34, %v617_v31 }
 0x1a7   : > { %1154 = vst [vmem:[#allocation2 + $0x10] sm:$0xff] %v1148_v35  ;;  %v1088_v37 = vpop.f32.mrb[4].mxu1 }
 0x1a8   : > { %1155 = vst [vmem:[#allocation2 + $0x18] sm:$0xff] %v1149_v36  ;;  %v1139_v39 = vpop.f32.mrb[4].mxu0  ;;  %v1090_v41 = vpop.f32.mrb[5].mxu1  ;;  %1161 = sbr.rel (%p1484_p5) target bundleno = 445 (0x1bd), region = 105 }
 0x1a9   : > { %v1140_v40 = vadd.f32 %v1139_v39, %v1088_v37  ;;  %v1141_v43 = vpop.f32.mrb[5].mxu0  ;;  %v1092_v45 = vpop.f32.mrb[6].mxu1 }
 0x1aa   : > { %v1142_v44 = vadd.f32 %v1141_v43, %v1090_v41  ;;  %v1143_v46 = vpop.f32.mrb[6].mxu0  ;;  %v1093_v48 = vpop.f32.mrb[7].mxu1 }
 0x1ab   : > { %v1150_v47 = vadd.f32 %v1140_v40, %v618_v38  ;;  %v1144_v49 = vpop.f32.mrb[7].mxu0 }
 0x1ac   : > { %v1151_v50 = vadd.f32 %v1142_v44, %v619_v42  ;;  %v1162_v55 = vld [vmem:[#allocation2] sm:$0xff] (!%p1484_p5) }
 0x1ad   : > { %1156 = vst [vmem:[#allocation2 + $0x20] sm:$0xff] %v1150_v47  ;;  %v1163_v58 = vld [vmem:[#allocation2 + $0x8] sm:$0xff] (!%p1484_p5)  ;;  %v1180_v3 = vmul.f32 (!%p1484_p5), %v1173_v61, %v1162_v55 }
 0x1ae   : > { %1157 = vst [vmem:[#allocation2 + $0x28] sm:$0xff] %v1151_v50  ;;  %v1164_v59 = vld [vmem:[#allocation2 + $0x10] sm:$0xff] (!%p1484_p5)  ;;  %v1181_v4 = vmul.f32 (!%p1484_p5), %v1177_v62, %v1163_v58 }
 0x1af   : > { %v1165_v60 = vld [vmem:[#allocation2 + $0x18] sm:$0xff]  ;;  %v1182_v5 = vmul.f32 %v1173_v61, %v1164_v59  ;;  %v1198_v9 = vadd.f32 %v1191_v63, %v1180_v3 }
 0x1b0   : > { %v1183_v6 = vmul.f32 %v1177_v62, %v1165_v60  ;;  %v1199_v10 = vadd.f32 %v1195_v0, %v1181_v4 }
 0x1b1   : > { %v1200_v11 = vadd.f32 %v1191_v63, %v1182_v5 }
 0x1b2   : > { %v1201_v12 = vadd.f32 %v1195_v0, %v1183_v6  ;;  %v1494_v15 = vpack.c.bf16 %v1199_v10, %v1198_v9 }
 0x1b4   : > { %v1166_v1 = vld [vmem:[#allocation2 + $0x20] sm:$0xff]  ;;  %v1495_v16 = vpack.c.bf16 %v1201_v12, %v1200_v11  ;;  %1224 = vst [vmem:[%s2080_s15] sm:$0xff] %v1494_v15 }
 0x1b5   : > { %v1167_v2 = vld [vmem:[#allocation2 + $0x28] sm:$0xff]  ;;  %v1184_v7 = vmul.f32 %v1173_v61, %v1166_v1 }
 0x1b6   : > { %v1185_v8 = vmul.f32 %v1177_v62, %v1167_v2  ;;  %1225 = vst [vmem:[%s2080_s15 + $0x8] sm:$0xff] %v1495_v16 }
 0x1b7   : > { %v1202_v13 = vadd.f32 %v1191_v63, %v1184_v7 }
 0x1b8   : > { %v1203_v14 = vadd.f32 %v1195_v0, %v1185_v8 }
 0x1ba   : > { %v1496_v17 = vpack.c.bf16 %v1203_v14, %v1202_v13 }
 0x1bc   : > { %1226 = vst [vmem:[%s2080_s15 + $0x10] sm:$0xff] %v1496_v17 }
 0x1bd PF: > { %1233 = sbr.rel (!%p1908_p12) target bundleno = 453 (0x1c5), region = 109  ;;  %s1497_s21 = sshll.u32 (%p1908_p12), %s1774_s22, 3  ;;  %v1271_v18 = vld [vmem:[%s2080_s15] sm:$0xff] (%p1908_p12)  ;;  %v1273_v19 = vld [vmem:[%s2080_s15 + $0x8] sm:$0xff] (%p1908_p12) }
 0x1be   : > { %s1239_s30 = scalar_lea.vmem (%p1908_p12), %s2213_s4, %s1497_s21 }
 0x1bf   : > { %1272 = vst [vmem:[%s1239_s30] sm:$0xff] (%p1908_p12), %v1271_v18  ;;  %1274 = vst [vmem:[%s1239_s30 + $0x40] sm:$0xff] (%p1908_p12), %v1273_v19 }
 0x1c3   : > { %v1275_v20 = vld [vmem:[%s2080_s15 + $0x10] sm:$0xff] (%p1908_p12) }
 0x1c4   : > { %1276 = vst [vmem:[%s1239_s30 + $0x80] sm:$0xff] %v1275_v20 }
 0x1c5 PF: > { %s14_s25 = sadd.s32 1, %s1786_s25   ;;  %s2225_s14 = sld [smem:[#allocation6_spill]] }
 0x1c6   : > { %p11_p6 = scmp.ge.s32.totalorder %s14_s25, 18   ;;  %s2226_s6 = sld [smem:[#allocation7_spill]] }
 0x1c7   : > { %s2227_s15 = smov %s1750_s16  ;;  %s2228_s16 = smov %s1906_s13 }
 0x1c8   : > { %s2229_s17 = smov %s1758_s18  ;;  %s2230_s18 = smov %s1903_s12 }
 0x1c9   : > { %s2231_s19 = smov %s1766_s20  ;;  %s2232_s20 = smov %s1889_s7 }
 0x1ca   : > { %s2233_s21 = smov %s1778_s23  ;;  %s2234_s22 = smov %s1782_s24 }
 0x1cb   : > { %s2235_s23 = smov %s2225_s14  ;;  %13 = sbr.rel (!%p11_p6) target bundleno = 9 (0x9), region = 192 }
 0x1cc   : > { %s2236_s24 = smov %s2226_s6 }

// kernel: deeplab_v2_forward.39
= control target key start
LH: loop header
LB: loop body
LE: loop exit
PB: predicated region body
PF: predicated region fallthrough
CT: control target
= control target key end

     0   :  { %s1152_s15 = smov 0   ;;  %s1154_s16 = smov 0   ;;  %s1276_s0 = inlined_call_operand.vmem [shape: bf16[24,36864], index: 0, kind: input, shape index: {}]   ;;  %s1277_s1 = inlined_call_operand.vmem [shape: bf16[36864,128], index: 1, kind: input, shape index: {}]   ;;  %s1278_s2 = inlined_call_operand.vmem [shape: f32[1,128], index: 2, kind: input, shape index: {}]   ;;  %s1279_s3 = inlined_call_operand.vmem [shape: f32[1,128], index: 3, kind: input, shape index: {}]   ;;  %s1280_s4 = inlined_call_operand.vmem [shape: f32[24,128], index: 4, kind: output, shape index: {}]  }
   0x1   :  { %s1156_s17 = smov 0   ;;  %s1158_s18 = smov 0  }
   0x2   :  { %s1160_s19 = smov 0  }
   0x3 LB: > { %s26_s20 = sadd.s32 1, %s1120_s18  ;;  %p49_p1 = scmp.ne.s32.totalorder %s1112_s16, %s1108_s15  ;;  %s1124_s19 = sphi %s1160_s19, %s14_s19   ;;  %s1120_s18 = sphi %s1158_s18, %s1284_s18   ;;  %s1116_s17 = sphi %s1156_s17, %s1283_s17   ;;  %s1112_s16 = sphi %s1154_s16, %s1282_s16   ;;  %s1108_s15 = sphi %s1152_s15, %s1281_s15  }
   0x4   : > { %p27_p0 = scmp.ge.s32.totalorder %s26_s20, 72  ;;  %p50_p2 = scmp.eq.s32.totalorder %s1124_s19, 0 }
   0x5   : > { %s42_s22 = sadd.s32 1, %s1112_s16  ;;  %p890_p5 = scmp.ge.s32.totalorder %s1124_s19, 72 }
   0x6   : > { %s1286_s20 = smov (%p27_p0, %s26_s20), 0  ;;  %p51_p3 = por %p50_p2, %p49_p1 }
   0x7   : > { %s38_s21 = ssub.s32 %s1120_s18, %s1286_s20  ;;  %195 = sbr.rel (%p890_p5) target bundleno = 21 (0x15), region = 24 }
   0x8   : > { %p40_p4 = scmp.eq.s32.totalorder %s38_s21, 0 }
   0xa   : > { %s1187_s23 = scalar_select %p40_p4, %s1112_s16, %s42_s22  }
   0xe   : > { %198 = sbr.rel (!%p51_p3) target bundleno = 21 (0x15), region = 28  ;;  %s200_s24 = sand.u32 (%p51_p3), 1, %s1112_s16  }
   0xf   : > { %s944_s25 = sshll.u32 (%p51_p3), %s1120_s18, 4  ;;  %s1001_s26 = smul.u32 (%p51_p3), 48, %s200_s24 }
  0x10   : > { %s208_s29 = scalar_lea.vmem (%p51_p3), %s1276_s0, %s944_s25 }
  0x11   : > { %v221_v0 = vld [vmem:[%s208_s29] sm:$0xff] (%p51_p3)  ;;  %v223_v1 = vld [vmem:[%s208_s29 + $0x8] sm:$0xff] (%p51_p3)  ;;  %s202_s30 = scalar_lea.vmem (%p51_p3), [#allocation3], %s1001_s26 }
  0x12   : > { %v225_v2 = vld [vmem:[%s208_s29 + $0x480] sm:$0xff] (%p51_p3)  ;;  %v227_v3 = vld [vmem:[%s208_s29 + $0x488] sm:$0xff] (%p51_p3)  ;;  %222 = vst [vmem:[%s202_s30] sm:$0xff] (%p51_p3), %v221_v0  ;;  %224 = vst [vmem:[%s202_s30 + $0x8] sm:$0xff] (%p51_p3), %v223_v1 }
  0x13   : > { %v229_v4 = vld [vmem:[%s208_s29 + $0x900] sm:$0xff] (%p51_p3)  ;;  %v231_v5 = vld [vmem:[%s208_s29 + $0x908] sm:$0xff] (%p51_p3)  ;;  %226 = vst [vmem:[%s202_s30 + $0x10] sm:$0xff] (%p51_p3), %v225_v2  ;;  %228 = vst [vmem:[%s202_s30 + $0x18] sm:$0xff] (%p51_p3), %v227_v3 }
  0x14   : > { %230 = vst [vmem:[%s202_s30 + $0x20] sm:$0xff] (%p51_p3), %v229_v4  ;;  %232 = vst [vmem:[%s202_s30 + $0x28] sm:$0xff] (%p51_p3), %v231_v5 }
  0x15 PF: > { %p893_p6 = scmp.ge.s32.totalorder %s1124_s19, 1  ;;  %p249_p7 = scmp.lt.s32.totalorder %s1124_s19, 73 }
  0x17   : > { %p250_p8 = pnand %p893_p6, %p249_p7 }
  0x18   : > { %s256_s5 = sand.u32 (!%p250_p8), 1, %s1108_s15   ;;  %s894_s6 = sshll.u32 (!%p250_p8), %s1116_s17, 6 }
  0x19   : > { %253 = sbr.rel (%p250_p8) target bundleno = 314 (0x13a), region = 55  ;;  %p301_p9 = scmp.lt.s32.totalorder (!%p250_p8), %s894_s6, 4607 }
  0x1a   : > { %s1002_s7 = smul.u32 (!%p250_p8), 48, %s256_s5  ;;  %p896_p10 = scmp.ne.s32.totalorder (!%p250_p8), %s1116_s17, 0 }
  0x1c   : > { %s1204_s12 = scalar_lea.vmem (!%p250_p8), [#allocation3], %s1002_s7 }
  0x20   : > { %s1288_s6 = smov (!%p301_p9, %s894_s6), 4607  ;;  %328 = sbr.rel (%p896_p10) target bundleno = 39 (0x27), region = 63 }
  0x21   : > { %s895_s8 = sshll.u32 %s1288_s6, 2  ;;  %v1126_v6 = vmov (!%p896_p10), 0.0  }
  0x22   : > { %s1202_s11 = scalar_lea.vmem %s1277_s1, %s895_s8  ;;  %329 = vst [vmem:[#allocation2] sm:$0xff] (!%p896_p10), %v1126_v6  ;;  %330 = vst [vmem:[#allocation2 + $0x8] sm:$0xff] (!%p896_p10), %v1126_v6 }
  0x23   : > { %331 = vst [vmem:[#allocation2 + $0x10] sm:$0xff] (!%p896_p10), %v1126_v6 }
  0x27 PF: > { %v1044_v7 = vld [vmem:[%s1202_s11 + $0x40] sm:$0xff]   ;;  %v1048_v11 = vld [vmem:[%s1202_s11 + $0x48] sm:$0xff]   ;;  %v1052_v15 = vld [vmem:[%s1202_s11 + $0x50] sm:$0xff]   ;;  %p937_p11 = scmp.ne.s32.totalorder %s1116_s17, 71 }
  0x28   : > { %v1045_v8 = vld [vmem:[%s1202_s11 + $0xc0] sm:$0xff]   ;;  %945 = vmatprep.subr.bf16.mxu0 %v1044_v7  ;;  %v1049_v12 = vld [vmem:[%s1202_s11 + $0xc8] sm:$0xff]   ;;  %v1053_v16 = vld [vmem:[%s1202_s11 + $0xd0] sm:$0xff]  }
  0x29   : > { %v1046_v9 = vld [vmem:[%s1202_s11] sm:$0xff]   ;;  %973 = vmatprep.subr.bf16.mxu1 %v1045_v8  ;;  %v1050_v13 = vld [vmem:[%s1202_s11 + $0x8] sm:$0xff]   ;;  %v1054_v17 = vld [vmem:[%s1202_s11 + $0x10] sm:$0xff]  }
  0x2a   : > { %v1047_v10 = vld [vmem:[%s1202_s11 + $0x80] sm:$0xff]   ;;  %946 = vmatpush3.bf16.msra.mxu0 %v1046_v9  ;;  %v1051_v14 = vld [vmem:[%s1202_s11 + $0x88] sm:$0xff]   ;;  %v1055_v18 = vld [vmem:[%s1202_s11 + $0x90] sm:$0xff]  }
  0x2b   : > { %974 = vmatpush3.bf16.msra.mxu1 %v1047_v10  ;;  %947 = vmatprep.subr.bf16.mxu0 %v1048_v11  ;;  %v1056_v19 = vld [vmem:[%s1202_s11 + $0x58] sm:$0xff]   ;;  %v1060_v23 = vld [vmem:[%s1202_s11 + $0x60] sm:$0xff]   ;;  %v1064_v27 = vld [vmem:[%s1202_s11 + $0x68] sm:$0xff]  }
  0x2c   : > { %975 = vmatprep.subr.bf16.mxu1 %v1049_v12  ;;  %v1057_v20 = vld [vmem:[%s1202_s11 + $0xd8] sm:$0xff]   ;;  %v1061_v24 = vld [vmem:[%s1202_s11 + $0xe0] sm:$0xff]   ;;  %v1065_v28 = vld [vmem:[%s1202_s11 + $0xe8] sm:$0xff]  }
  0x2d   : > { %v1058_v21 = vld [vmem:[%s1202_s11 + $0x18] sm:$0xff]   ;;  %v1062_v25 = vld [vmem:[%s1202_s11 + $0x20] sm:$0xff]   ;;  %v1066_v29 = vld [vmem:[%s1202_s11 + $0x28] sm:$0xff]  }
  0x2e   : > { %948 = vmatpush3.bf16.msra.mxu0 %v1050_v13  ;;  %v1059_v22 = vld [vmem:[%s1202_s11 + $0x98] sm:$0xff]   ;;  %v1063_v26 = vld [vmem:[%s1202_s11 + $0xa0] sm:$0xff]   ;;  %v1067_v30 = vld [vmem:[%s1202_s11 + $0xa8] sm:$0xff]  }
  0x2f   : > { %976 = vmatpush3.bf16.msra.mxu1 %v1051_v14  ;;  %949 = vmatprep.subr.bf16.mxu0 %v1052_v15  ;;  %v1068_v31 = vld [vmem:[%s1202_s11 + $0x70] sm:$0xff]   ;;  %v1072_v35 = vld [vmem:[%s1202_s11 + $0x78] sm:$0xff]   ;;  %v332_v58 = vld [vmem:[#allocation2] sm:$0xff] }
  0x30   : > { %977 = vmatprep.subr.bf16.mxu1 %v1053_v16  ;;  %v1069_v32 = vld [vmem:[%s1202_s11 + $0xf0] sm:$0xff]   ;;  %v1073_v36 = vld [vmem:[%s1202_s11 + $0xf8] sm:$0xff]   ;;  %v333_v63 = vld [vmem:[#allocation2 + $0x8] sm:$0xff] }
  0x31   : > { %v1070_v33 = vld [vmem:[%s1202_s11 + $0x30] sm:$0xff]   ;;  %v1074_v37 = vld [vmem:[%s1202_s11 + $0x38] sm:$0xff]  }
  0x32   : > { %950 = vmatpush3.bf16.msra.mxu0 %v1054_v17  ;;  %v1071_v34 = vld [vmem:[%s1202_s11 + $0xb0] sm:$0xff]   ;;  %v1075_v38 = vld [vmem:[%s1202_s11 + $0xb8] sm:$0xff]   ;;  %v938_v17 = vld [vmem:[%s1278_s2] ss:$0 sm:$0xff] (!%p937_p11) }
  0x33   : > { %978 = vmatpush3.bf16.msra.mxu1 %v1055_v18  ;;  %951 = vmatprep.subr.bf16.mxu0 %v1056_v19  ;;  %v1076_v39 = vld [vmem:[%s1204_s12] ss:$16 sps:$4 sm:$0xff]   ;;  %v1078_v40 = vld [vmem:[%s1204_s12 + $0x4] ss:$16 sps:$4 sm:$0xff]   ;;  %v1079_v41 = vld [vmem:[%s1204_s12 + $0x8] ss:$16 sps:$4 sm:$0xff]  }
  0x34   : > { %979 = vmatprep.subr.bf16.mxu1 %v1057_v20  ;;  %v1081_v42 = vld [vmem:[%s1204_s12 + $0xc] ss:$16 sps:$4 sm:$0xff]   ;;  %v339_v43 = vld [vmem:[%s1204_s12 + $0x20] sm:$0xff]  ;;  %663 = vmatprep.mubr.bf16.mxu0 %v1078_v40  ;;  %v939_v18 = vld [vmem:[%s1279_s3] ss:$0 sm:$0xff] (!%p937_p11) }
  0x35   : > { %v902_v44 = vcombine.high %v339_v43, %v339_v43  ;;  %v340_v45 = vld [vmem:[%s1204_s12 + $0x28] sm:$0xff]  ;;  %711 = vmatprep.mubr.bf16.mxu1 %v1081_v42  ;;  %v901_v47 = vcombine.low %v339_v43, %v339_v43 }
  0x36   : > { %952 = vmatpush3.bf16.msra.mxu0 %v1058_v21  ;;  %v904_v46 = vcombine.high %v340_v45, %v340_v45  ;;  %v903_v48 = vcombine.low %v340_v45, %v340_v45  ;;  %v334_v12 = vld [vmem:[#allocation2 + $0x10] sm:$0xff] }
  0x37   : > { %980 = vmatpush3.bf16.msra.mxu1 %v1059_v22  ;;  %953 = vmatprep.subr.bf16.mxu0 %v1060_v23 }
  0x38   : > { %981 = vmatprep.subr.bf16.mxu1 %v1061_v24 }
  0x3a   : > { %954 = vmatpush3.bf16.msra.mxu0 %v1062_v25 }
  0x3b   : > { %982 = vmatpush3.bf16.msra.mxu1 %v1063_v26  ;;  %955 = vmatprep.subr.bf16.mxu0 %v1064_v27 }
  0x3c   : > { %983 = vmatprep.subr.bf16.mxu1 %v1065_v28 }
  0x3e   : > { %956 = vmatpush3.bf16.msra.mxu0 %v1066_v29 }
  0x3f   : > { %984 = vmatpush3.bf16.msra.mxu1 %v1067_v30  ;;  %957 = vmatprep.subr.bf16.mxu0 %v1068_v31 }
  0x40   : > { %985 = vmatprep.subr.bf16.mxu1 %v1069_v32 }
  0x42   : > { %958 = vmatpush3.bf16.msra.mxu0 %v1070_v33 }
  0x43   : > { %986 = vmatpush3.bf16.msra.mxu1 %v1071_v34  ;;  %959 = vmatprep.subr.bf16.mxu0 %v1072_v35 }
  0x44   : > { %987 = vmatprep.subr.bf16.mxu1 %v1073_v36 }
  0x46   : > { %960 = vmatpush3.bf16.msra.mxu0 %v1074_v37 }
  0x47   : > { %988 = vmatpush3.bf16.msra.mxu1 %v1075_v38 }
  0x49   : > { %664 = vmatmul.mubr.bf16.vlgmr.msra.gmra.mrb[0].mxu0 %v1076_v39 }
  0x4a   : > { %712 = vmatmul.mubr.bf16.vlgmr.msra.gmra.mrb[0].mxu1 %v1079_v41  ;;  %671 = vmatprep.mubr.bf16.mxu0 %v902_v44 }
  0x4b   : > { %719 = vmatprep.mubr.bf16.mxu1 %v904_v46 }
  0x51   : > { %672 = vmatmul.mubr.bf16.gmra.mrb[4].mxu0 %v901_v47 }
  0x52   : > { %720 = vmatmul.mubr.bf16.gmra.mrb[4].mxu1 %v903_v48 }
 0x11c   : > { %v961_v49 = vpop.f32.mrb[0].mxu0 }
 0x11d   : > { %v989_v50 = vpop.f32.mrb[0].mxu1  ;;  %v962_v51 = vpop.f32.mrb[1].mxu0 }
 0x11e   : > { %v963_v52 = vadd.f32 %v962_v51, %v961_v49  ;;  %v990_v53 = vpop.f32.mrb[1].mxu1  ;;  %v964_v54 = vpop.f32.mrb[2].mxu0 }
 0x11f   : > { %v991_v55 = vadd.f32 %v990_v53, %v989_v50  ;;  %v992_v56 = vpop.f32.mrb[2].mxu1  ;;  %v965_v57 = vpop.f32.mrb[3].mxu0 }
 0x120   : > { %v966_v59 = vadd.f32 %v965_v57, %v964_v54  ;;  %v993_v60 = vpop.f32.mrb[3].mxu1 }
 0x121   : > { %v714_v61 = vadd.f32 %v991_v55, %v963_v52  ;;  %v994_v62 = vadd.f32 %v993_v60, %v992_v56 }
 0x123   : > { %v727_v0 = vadd.f32 %v714_v61, %v332_v58  ;;  %v717_v1 = vadd.f32 %v994_v62, %v966_v59 }
 0x124   : > { %v967_v2 = vpop.f32.mrb[4].mxu0 }
 0x125   : > { %730 = vst [vmem:[#allocation2] sm:$0xff] %v727_v0  ;;  %v728_v3 = vadd.f32 %v717_v1, %v333_v63  ;;  %v995_v4 = vpop.f32.mrb[4].mxu1  ;;  %v968_v5 = vpop.f32.mrb[5].mxu0 }
 0x126   : > { %v969_v6 = vadd.f32 %v968_v5, %v967_v2  ;;  %v996_v7 = vpop.f32.mrb[5].mxu1  ;;  %v970_v8 = vpop.f32.mrb[6].mxu0 }
 0x127   : > { %731 = vst [vmem:[#allocation2 + $0x8] sm:$0xff] %v728_v3  ;;  %v997_v9 = vadd.f32 %v996_v7, %v995_v4  ;;  %v998_v10 = vpop.f32.mrb[6].mxu1  ;;  %v971_v11 = vpop.f32.mrb[7].mxu0  ;;  %736 = sbr.rel (%p937_p11) target bundleno = 314 (0x13a), region = 67 }
 0x128   : > { %v999_v13 = vpop.f32.mrb[7].mxu1 }
 0x129   : > { %v722_v14 = vadd.f32 %v997_v9, %v969_v6 }
 0x12b   : > { %v729_v15 = vadd.f32 %v722_v14, %v334_v12 }
 0x12c   : > { %v737_v16 = vld [vmem:[#allocation2] sm:$0xff] (!%p937_p11) }
 0x12d   : > { %732 = vst [vmem:[#allocation2 + $0x10] sm:$0xff] %v729_v15  ;;  %v747_v19 = vmul.f32 (!%p937_p11), %v938_v17, %v737_v16 }
 0x12e   : > { %v738_v20 = vld [vmem:[#allocation2 + $0x8] sm:$0xff] }
 0x12f   : > { %v748_v22 = vmul.f32 %v938_v17, %v738_v20  ;;  %v757_v24 = vadd.f32 %v939_v18, %v747_v19 }
 0x131   : > { %v758_v25 = vadd.f32 %v939_v18, %v748_v22  ;;  %760 = vst [vmem:[%s1280_s4] sm:$0xff] %v757_v24 }
 0x133   : > { %761 = vst [vmem:[%s1280_s4 + $0x8] sm:$0xff] %v758_v25 }
 0x134   : > { %v739_v21 = vld [vmem:[#allocation2 + $0x10] sm:$0xff] }
 0x135   : > { %v749_v23 = vmul.f32 %v938_v17, %v739_v21 }
 0x137   : > { %v759_v26 = vadd.f32 %v939_v18, %v749_v23 }
 0x139   : > { %762 = vst [vmem:[%s1280_s4 + $0x10] sm:$0xff] %v759_v26 }
 0x13a PF: > { %s14_s19 = sadd.s32 1, %s1124_s19   ;;  %s1281_s15 = smov %s1112_s16 }
 0x13b   : > { %p11_p12 = scmp.ge.s32.totalorder %s14_s19, 74   ;;  %s1282_s16 = smov %s1187_s23 }
 0x13c   : > { %s1283_s17 = smov %s1120_s18  ;;  %s1284_s18 = smov %s1286_s20 }
 0x13d   :  { %13 = sbr.rel (!%p11_p12) target bundleno = 3 (0x3), region = 111 }

// kernel: deeplab_v2_forward.40
= control target key start
LH: loop header
LB: loop body
LE: loop exit
PB: predicated region body
PF: predicated region fallthrough
CT: control target
= control target key end

     0   :  { %s287_s1 = inlined_call_operand.vmem [shape: f32[128,128], index: 1, kind: input, shape index: {}]   ;;  %s288_s0 = inlined_call_operand.vmem [shape: f32[16,128], index: 0, kind: input, shape index: {}]   ;;  %s289_s2 = inlined_call_operand.vmem [shape: f32[16,128], index: 2, kind: output, shape index: {}]  }
   0x1   :  { %v21_v0 = vld [vmem:[%s287_s1] sm:$0xff]  ;;  %v22_v1 = vld [vmem:[%s287_s1 + $0x8] sm:$0xff]  ;;  %v23_v2 = vld [vmem:[%s287_s1 + $0x10] sm:$0xff] }
   0x2   :  { %v180_v3 = vpack.c.bf16 %v22_v1, %v21_v0  ;;  %v24_v4 = vld [vmem:[%s287_s1 + $0x18] sm:$0xff]  ;;  %v25_v6 = vld [vmem:[%s287_s1 + $0x20] sm:$0xff]  ;;  %v26_v7 = vld [vmem:[%s287_s1 + $0x28] sm:$0xff] }
   0x3   :  { %v184_v5 = vpack.c.bf16 %v24_v4, %v23_v2  ;;  %v188_v8 = vpack.c.bf16 %v26_v7, %v25_v6  ;;  %v19_v9 = vld [vmem:[%s288_s0] sm:$0xff]  ;;  %v27_v10 = vld [vmem:[%s287_s1 + $0x30] sm:$0xff]  ;;  %v28_v11 = vld [vmem:[%s287_s1 + $0x38] sm:$0xff] }
   0x4   :  { %181 = vmatprep.subr.bf16.mxu0 %v180_v3  ;;  %177 = vmatprep.mubr.f32.mxu0 %v19_v9  ;;  %v192_v12 = vpack.c.bf16 %v28_v11, %v27_v10  ;;  %v29_v13 = vld [vmem:[%s287_s1 + $0x40] sm:$0xff]  ;;  %v30_v14 = vld [vmem:[%s287_s1 + $0x48] sm:$0xff]  ;;  %v31_v16 = vld [vmem:[%s287_s1 + $0x50] sm:$0xff] }
   0x5   :  { %183 = vmatpush3.bf16.msra.mxu0 %v180_v3  ;;  %v196_v15 = vpack.c.bf16 %v30_v14, %v29_v13  ;;  %v32_v17 = vld [vmem:[%s287_s1 + $0x58] sm:$0xff]  ;;  %v33_v19 = vld [vmem:[%s287_s1 + $0x60] sm:$0xff]  ;;  %v34_v20 = vld [vmem:[%s287_s1 + $0x68] sm:$0xff] }
   0x6   :  { %185 = vmatprep.subr.bf16.mxu0 %v184_v5  ;;  %v200_v18 = vpack.c.bf16 %v32_v17, %v31_v16  ;;  %v204_v21 = vpack.c.bf16 %v34_v20, %v33_v19  ;;  %v35_v22 = vld [vmem:[%s287_s1 + $0x70] sm:$0xff]  ;;  %v36_v23 = vld [vmem:[%s287_s1 + $0x78] sm:$0xff]  ;;  %v20_v25 = vld [vmem:[%s288_s0 + $0x8] sm:$0xff] }
   0x7   :  { %v208_v24 = vpack.c.bf16 %v36_v23, %v35_v22 }
   0x9   :  { %187 = vmatpush3.bf16.msra.mxu0 %v184_v5 }
   0xa   :  { %189 = vmatprep.subr.bf16.mxu0 %v188_v8 }
   0xd   :  { %191 = vmatpush3.bf16.msra.mxu0 %v188_v8 }
   0xe   :  { %193 = vmatprep.subr.bf16.mxu0 %v192_v12 }
  0x11   :  { %195 = vmatpush3.bf16.msra.mxu0 %v192_v12 }
  0x12   :  { %197 = vmatprep.subr.bf16.mxu0 %v196_v15 }
  0x15   :  { %199 = vmatpush3.bf16.msra.mxu0 %v196_v15 }
  0x16   :  { %201 = vmatprep.subr.bf16.mxu0 %v200_v18 }
  0x19   :  { %203 = vmatpush3.bf16.msra.mxu0 %v200_v18 }
  0x1a   :  { %205 = vmatprep.subr.bf16.mxu0 %v204_v21 }
  0x1d   :  { %207 = vmatpush3.bf16.msra.mxu0 %v204_v21 }
  0x1e   :  { %209 = vmatprep.subr.bf16.mxu0 %v208_v24 }
  0x21   :  { %211 = vmatpush3.bf16.msra.mxu0 %v208_v24 }
  0x24   :  { %178 = vmatmul.mubr.f32.vlgmr.msra.gmra.mrb[0].mxu0 %v20_v25 }
  0xf7   :  { %v179_v26 = vpop.f32.mrb[0].mxu0 }
  0xf8   :  { %122 = vst [vmem:[%s289_s2 + $0x8] sm:$0xff] %v179_v26  ;;  %v103_v27 = vpop.f32.mrb[1].mxu0 }
  0xf9   :  { %121 = vst [vmem:[%s289_s2] sm:$0xff] %v103_v27 }

</bundles_post_ra>
